<compile_context>
chip_gen: v7x
topology: tpu7x:2x2x1
jax: 0.10.0
libtpu: 0.0.40
codegen_flags: <defaults>
</compile_context>

<pallas_src>
import functools

import jax
import jax.numpy as jnp
import numpy as np
from jax.experimental import pallas as pl
from jax.experimental.pallas import tpu as pltpu


def cet_reduce_kernel(msg_ref, w_ref, b_ref, out_ref, *, temperature, deg):
    """One dst-node tile of CETLayer.reduce_func.

    msg_ref : [TN, deg*D] bf16  -- deg messages per dst node, concatenated (lane-dense)
    w_ref   : [D, Tp]     bf16  -- fc.weight.T, zero-padded to a lane multiple
    b_ref   : [1, Tp]     f32   -- fc.bias, zero-padded
    out_ref : [TN, Tp]    f32
    """
    w = w_ref[...]
    b = b_ref[...]
    d = w.shape[0]

    # Static unrolled loop over the deg messages: only 2-D lane-dense slices,
    # no 3-D reshapes (those forced relayout copies in the previous version).
    slices = [msg_ref[:, k * d:(k + 1) * d] for k in range(deg)]

    # agg = mailbox['msg'].mean(1)   (accumulate in f32)
    agg = slices[0].astype(jnp.float32)
    for k in range(1, deg):
        agg = agg + slices[k].astype(jnp.float32)
    agg = agg * (1.0 / deg)

    # predict_k = fc(relu(msg_k)) ; predict_agg = fc(relu(agg))   [TN, Tp] each
    preds = [
        jnp.dot(jnp.maximum(s, 0), w, preferred_element_type=jnp.float32) + b
        for s in slices
    ]
    preds.append(
        jnp.dot(jnp.maximum(agg, 0.0).astype(w.dtype), w,
                preferred_element_type=jnp.float32) + b)

    # softmax over the (deg+1) candidate axis, expressed as elementwise ops
    # over the 2-D tiles (equivalent to softmax(cat(predict1, predict2), dim=1)).
    logits = [temperature * p for p in preds]
    m = logits[0]
    for lg in logits[1:]:
        m = jnp.maximum(m, lg)
    exps = [jnp.exp(lg - m) for lg in logits]
    denom = exps[0]
    num = preds[0] * exps[0]
    for p, e in zip(preds[1:], exps[1:]):
        denom = denom + e
        num = num + p * e

    # (predict * weight).sum(1).sigmoid()  — divide via EUP reciprocal.
    out_ref[...] = jax.nn.sigmoid(num * pl.reciprocal(denom, approx=False))


def _round_up(x, m):
    return -(-x // m) * m


def cet_reduce(msg, fc_w_t, fc_b, temperature, *, tile_n=512):
    """msg: [N_dst, deg, D] f32; fc_w_t: [D, T]; fc_b: [T]  ->  [N_dst, T] f32."""
    n_dst, deg, d = msg.shape
    t = fc_w_t.shape[1]

    # Lane-dense output / weight: pad T up to a multiple of 128 lanes.
    t_pad = _round_up(max(t, 128), 128)
    # Row tile: multiple of 8 sublanes, no larger than the (rounded) problem.
    tile_n = _round_up(min(tile_n, _round_up(n_dst, 8)), 8)
    n_pad = _round_up(n_dst, tile_n)

    # [N_dst, deg*D] lane-dense bf16 mailbox (free reshape in HBM, halves DMA).
    msg2d = msg.reshape(n_dst, deg * d).astype(jnp.bfloat16)
    if n_pad != n_dst:
        msg2d = jnp.pad(msg2d, ((0, n_pad - n_dst), (0, 0)))
    w = jnp.pad(fc_w_t, ((0, 0), (0, t_pad - t))).astype(jnp.bfloat16)
    b = jnp.pad(fc_b.reshape(1, t), ((0, 0), (0, t_pad - t))).astype(jnp.float32)

    kernel = functools.partial(
        cet_reduce_kernel, temperature=float(temperature), deg=deg)

    out = pl.pallas_call(
        kernel,
        out_shape=jax.ShapeDtypeStruct((n_pad, t_pad), jnp.float32),
        grid_spec=pltpu.PrefetchScalarGridSpec(
            num_scalar_prefetch=0,
            grid=(n_pad // tile_n,),
            in_specs=[
                pl.BlockSpec((tile_n, deg * d), lambda i: (i, 0)),
                # fc weight / bias are grid-invariant: keep the whole arrays
                # resident in VMEM once (no per-step pipelining / double buffer).
                pl.BlockSpec(memory_space=pltpu.MemorySpace.VMEM),
                pl.BlockSpec(memory_space=pltpu.MemorySpace.VMEM),
            ],
            out_specs=pl.BlockSpec((tile_n, t_pad), lambda i: (i, 0)),
        ),
        compiler_params=pltpu.CompilerParams(
            dimension_semantics=("parallel",)),
        # NOTE: for real FB15kET sizes (D~100, T~3800) tile T on a second grid
        # axis and re-derive tile_n against VMEM (raise vmem_limit_bytes, halve
        # tile_n on v7x's 64 MiB VMEM).
    )(msg2d, w, b)
    return out[:n_dst, :t]


def cet_reference(msg, fc_w_t, fc_b, temperature):
    """Pure-JAX reference of CETLayer.reduce_func for verification."""
    relu_msg = jnp.maximum(msg, 0.0)
    predict1 = relu_msg @ fc_w_t + fc_b                       # [N, deg, T]
    agg = jnp.mean(msg, axis=1, keepdims=True)                # [N, 1, D]
    predict2 = jnp.maximum(agg, 0.0) @ fc_w_t + fc_b          # [N, 1, T]
    predict = jnp.concatenate([predict1, predict2], axis=1)   # [N, deg+1, T]
    weight = jax.nn.softmax(temperature * predict, axis=1)
    return jax.nn.sigmoid(jnp.sum(predict * weight, axis=1))


if __name__ == "__main__":
    # Small synthetic configuration consistent with CET.__init__ / forward.
    num_nodes = 256       # entity table rows
    num_rels = 6          # relation table rows (etype in [0, 2*num_rels))
    num_types = 40        # T (fc output dim) -- deliberately not a lane multiple
    hidden_dim = 32       # D (embedding_dim)
    temperature = 0.5
    num_src = 128         # src nodes of the block
    num_dst = 1000        # dst nodes (deliberately not a tile multiple)
    deg = 4               # fixed in-degree (DGL degree bucket)
    num_edges = num_dst * deg

    key = jax.random.PRNGKey(0)
    k_ent, k_rel, k_w, k_b, k_sid, k_esrc, k_ety = jax.random.split(key, 7)

    embedding_range = 10.0 / hidden_dim
    entity = jax.random.uniform(k_ent, (num_nodes, hidden_dim), jnp.float32,
                                -embedding_range, embedding_range)
    relation = jax.random.uniform(k_rel, (num_rels, hidden_dim), jnp.float32,
                                  -embedding_range, embedding_range)
    # nn.Linear(embedding_dim, num_types) init: U(-1/sqrt(D), 1/sqrt(D))
    bound = 1.0 / np.sqrt(hidden_dim)
    fc_weight = jax.random.uniform(k_w, (num_types, hidden_dim), jnp.float32,
                                   -bound, bound)
    fc_bias = jax.random.uniform(k_b, (num_types,), jnp.float32, -bound, bound)

    # Synthetic DGL block: src node ids, per-edge src position, per-edge etype.
    # Edges are grouped so that dst node n owns edges [n*deg, (n+1)*deg).
    src_ids = jax.random.randint(k_sid, (num_src,), 0, num_nodes)
    edge_src = jax.random.randint(k_esrc, (num_edges,), 0, num_src)
    etype = jax.random.randint(k_ety, (num_edges,), 0, 2 * num_rels)

    # --- plain-JAX glue (CET.forward graph/embedding gather + u_add_e) ---
    src = entity[src_ids]                                       # [num_src, D]
    rel = relation[etype % num_rels]                            # [E, D]
    rel = jnp.where((etype >= num_rels)[:, None], -rel, rel)    # inverse rels
    msg = (src[edge_src] + rel).reshape(num_dst, deg, hidden_dim)  # mailbox['msg']

    fc_w_t = fc_weight.T                                        # [D, T]

    # --- Pallas kernel (reduce_func hot path) ---
    out = cet_reduce(msg, fc_w_t, fc_bias, temperature, tile_n=512)
    out = jax.block_until_ready(out)
    assert out.shape == (num_dst, num_types)

    # Tight check against a reference fed the same bf16-quantized inputs.
    msg_q = msg.astype(jnp.bfloat16).astype(jnp.float32)
    w_q = fc_w_t.astype(jnp.bfloat16).astype(jnp.float32)
    ref_q = cet_reference(msg_q, w_q, fc_bias.reshape(1, -1), temperature)
    np.testing.assert_allclose(np.asarray(out), np.asarray(ref_q),
                               rtol=5e-3, atol=5e-3)

    # Looser check against the original full-f32 module numerics.
    ref = cet_reference(msg, fc_w_t, fc_bias.reshape(1, -1), temperature)
    np.testing.assert_allclose(np.asarray(out), np.asarray(ref),
                               rtol=2e-2, atol=2e-2)

    print("KERNEL_OK")
</pallas_src>

<mosaic_0001>
module attributes {stable_mosaic.version = 11 : i64} {
  func.func @cet_reduce_kernel(%arg0: i32, %arg1: memref<512x128xbf16, #tpu.memory_space<vmem>>, %arg2: memref<32x128xbf16, #tpu.memory_space<vmem>>, %arg3: memref<1x128xf32, #tpu.memory_space<vmem>>, %arg4: memref<512x128xf32, #tpu.memory_space<vmem>>) attributes {dimension_semantics = [#tpu.dimension_semantics<parallel>], iteration_bounds = array<i64: 2>, scalar_prefetch = 0 : i64, scratch_operands = 0 : i64, tpu.core_type = #tpu.core_type<tc>, window_params = [{transform_indices = @transform_0, window_bounds = array<i64: 512, 128>}, {pipeline_mode = #tpu.pipeline_mode<synchronous>, transform_indices = @transform_1, window_bounds = array<i64: 32, 128>}, {pipeline_mode = #tpu.pipeline_mode<synchronous>, transform_indices = @transform_2, window_bounds = array<i64: 1, 128>}, {transform_indices = @transform_3, window_bounds = array<i64: 512, 128>}]} {
    %c0 = arith.constant 0 : index
    %c0_0 = arith.constant 0 : index
    %0 = vector.load %arg2[%c0, %c0_0] : memref<32x128xbf16, #tpu.memory_space<vmem>>, vector<32x128xbf16>
    %c0_1 = arith.constant 0 : index
    %c0_2 = arith.constant 0 : index
    %1 = vector.load %arg3[%c0_1, %c0_2] : memref<1x128xf32, #tpu.memory_space<vmem>>, vector<1x128xf32>
    %c0_3 = arith.constant 0 : index
    %c0_4 = arith.constant 0 : index
    %2 = vector.load %arg1[%c0_3, %c0_4] : memref<512x128xbf16, #tpu.memory_space<vmem>>, vector<512x32xbf16>
    %c0_5 = arith.constant 0 : index
    %c32 = arith.constant 32 : index
    %3 = vector.load %arg1[%c0_5, %c32] : memref<512x128xbf16, #tpu.memory_space<vmem>>, vector<512x32xbf16>
    %c0_6 = arith.constant 0 : index
    %c64 = arith.constant 64 : index
    %4 = vector.load %arg1[%c0_6, %c64] : memref<512x128xbf16, #tpu.memory_space<vmem>>, vector<512x32xbf16>
    %c0_7 = arith.constant 0 : index
    %c96 = arith.constant 96 : index
    %5 = vector.load %arg1[%c0_7, %c96] : memref<512x128xbf16, #tpu.memory_space<vmem>>, vector<512x32xbf16>
    %6 = arith.extf %2 : vector<512x32xbf16> to vector<512x32xf32>
    %7 = arith.extf %3 : vector<512x32xbf16> to vector<512x32xf32>
    %8 = arith.addf %6, %7 : vector<512x32xf32>
    %9 = arith.extf %4 : vector<512x32xbf16> to vector<512x32xf32>
    %10 = arith.addf %8, %9 : vector<512x32xf32>
    %11 = arith.extf %5 : vector<512x32xbf16> to vector<512x32xf32>
    %12 = arith.addf %10, %11 : vector<512x32xf32>
    %cst = arith.constant 2.500000e-01 : f32
    %13 = vector.broadcast %cst : f32 to vector<512x32xf32>
    %14 = arith.mulf %12, %13 : vector<512x32xf32>
    %cst_8 = arith.constant 0.000000e+00 : bf16
    %15 = vector.broadcast %cst_8 : bf16 to vector<512x32xbf16>
    %16 = arith.maximumf %2, %15 : vector<512x32xbf16>
    %cst_9 = arith.constant dense<0.000000e+00> : vector<512x128xf32>
    %17 = tpu.matmul %16, %0, %cst_9 {dimension_numbers = #tpu.dot_dimension_numbers<[1], [0], [0], [1], [0, 0, 1, 1], [], []>} : vector<512x32xbf16>, vector<32x128xbf16>, vector<512x128xf32> -> vector<512x128xf32>
    %18 = vector.broadcast %1 : vector<1x128xf32> to vector<512x128xf32>
    %19 = arith.addf %17, %18 : vector<512x128xf32>
    %cst_10 = arith.constant 0.000000e+00 : bf16
    %20 = vector.broadcast %cst_10 : bf16 to vector<512x32xbf16>
    %21 = arith.maximumf %3, %20 : vector<512x32xbf16>
    %cst_11 = arith.constant dense<0.000000e+00> : vector<512x128xf32>
    %22 = tpu.matmul %21, %0, %cst_11 {dimension_numbers = #tpu.dot_dimension_numbers<[1], [0], [0], [1], [0, 0, 1, 1], [], []>} : vector<512x32xbf16>, vector<32x128xbf16>, vector<512x128xf32> -> vector<512x128xf32>
    %23 = vector.broadcast %1 : vector<1x128xf32> to vector<512x128xf32>
    %24 = arith.addf %22, %23 : vector<512x128xf32>
    %cst_12 = arith.constant 0.000000e+00 : bf16
    %25 = vector.broadcast %cst_12 : bf16 to vector<512x32xbf16>
    %26 = arith.maximumf %4, %25 : vector<512x32xbf16>
    %cst_13 = arith.constant dense<0.000000e+00> : vector<512x128xf32>
    %27 = tpu.matmul %26, %0, %cst_13 {dimension_numbers = #tpu.dot_dimension_numbers<[1], [0], [0], [1], [0, 0, 1, 1], [], []>} : vector<512x32xbf16>, vector<32x128xbf16>, vector<512x128xf32> -> vector<512x128xf32>
    %28 = vector.broadcast %1 : vector<1x128xf32> to vector<512x128xf32>
    %29 = arith.addf %27, %28 : vector<512x128xf32>
    %cst_14 = arith.constant 0.000000e+00 : bf16
    %30 = vector.broadcast %cst_14 : bf16 to vector<512x32xbf16>
    %31 = arith.maximumf %5, %30 : vector<512x32xbf16>
    %cst_15 = arith.constant dense<0.000000e+00> : vector<512x128xf32>
    %32 = tpu.matmul %31, %0, %cst_15 {dimension_numbers = #tpu.dot_dimension_numbers<[1], [0], [0], [1], [0, 0, 1, 1], [], []>} : vector<512x32xbf16>, vector<32x128xbf16>, vector<512x128xf32> -> vector<512x128xf32>
    %33 = vector.broadcast %1 : vector<1x128xf32> to vector<512x128xf32>
    %34 = arith.addf %32, %33 : vector<512x128xf32>
    %cst_16 = arith.constant 0.000000e+00 : f32
    %35 = vector.broadcast %cst_16 : f32 to vector<512x32xf32>
    %36 = arith.maximumf %14, %35 : vector<512x32xf32>
    %37 = arith.truncf %36 : vector<512x32xf32> to vector<512x32xbf16>
    %cst_17 = arith.constant dense<0.000000e+00> : vector<512x128xf32>
    %38 = tpu.matmul %37, %0, %cst_17 {dimension_numbers = #tpu.dot_dimension_numbers<[1], [0], [0], [1], [0, 0, 1, 1], [], []>} : vector<512x32xbf16>, vector<32x128xbf16>, vector<512x128xf32> -> vector<512x128xf32>
    %39 = vector.broadcast %1 : vector<1x128xf32> to vector<512x128xf32>
    %40 = arith.addf %38, %39 : vector<512x128xf32>
    %cst_18 = arith.constant 5.000000e-01 : f32
    %41 = vector.broadcast %cst_18 : f32 to vector<512x128xf32>
    %42 = arith.mulf %41, %19 : vector<512x128xf32>
    %cst_19 = arith.constant 5.000000e-01 : f32
    %43 = vector.broadcast %cst_19 : f32 to vector<512x128xf32>
    %44 = arith.mulf %43, %24 : vector<512x128xf32>
    %cst_20 = arith.constant 5.000000e-01 : f32
    %45 = vector.broadcast %cst_20 : f32 to vector<512x128xf32>
    %46 = arith.mulf %45, %29 : vector<512x128xf32>
    %cst_21 = arith.constant 5.000000e-01 : f32
    %47 = vector.broadcast %cst_21 : f32 to vector<512x128xf32>
    %48 = arith.mulf %47, %34 : vector<512x128xf32>
    %cst_22 = arith.constant 5.000000e-01 : f32
    %49 = vector.broadcast %cst_22 : f32 to vector<512x128xf32>
    %50 = arith.mulf %49, %40 : vector<512x128xf32>
    %51 = arith.maximumf %42, %44 : vector<512x128xf32>
    %52 = arith.maximumf %51, %46 : vector<512x128xf32>
    %53 = arith.maximumf %52, %48 : vector<512x128xf32>
    %54 = arith.maximumf %53, %50 : vector<512x128xf32>
    %55 = arith.subf %42, %54 : vector<512x128xf32>
    %56 = math.exp %55 : vector<512x128xf32>
    %57 = arith.subf %44, %54 : vector<512x128xf32>
    %58 = math.exp %57 : vector<512x128xf32>
    %59 = arith.subf %46, %54 : vector<512x128xf32>
    %60 = math.exp %59 : vector<512x128xf32>
    %61 = arith.subf %48, %54 : vector<512x128xf32>
    %62 = math.exp %61 : vector<512x128xf32>
    %63 = arith.subf %50, %54 : vector<512x128xf32>
    %64 = math.exp %63 : vector<512x128xf32>
    %65 = arith.mulf %19, %56 : vector<512x128xf32>
    %66 = arith.addf %56, %58 : vector<512x128xf32>
    %67 = arith.mulf %24, %58 : vector<512x128xf32>
    %68 = arith.addf %65, %67 : vector<512x128xf32>
    %69 = arith.addf %66, %60 : vector<512x128xf32>
    %70 = arith.mulf %29, %60 : vector<512x128xf32>
    %71 = arith.addf %68, %70 : vector<512x128xf32>
    %72 = arith.addf %69, %62 : vector<512x128xf32>
    %73 = arith.mulf %34, %62 : vector<512x128xf32>
    %74 = arith.addf %71, %73 : vector<512x128xf32>
    %75 = arith.addf %72, %64 : vector<512x128xf32>
    %76 = arith.mulf %40, %64 : vector<512x128xf32>
    %77 = arith.addf %74, %76 : vector<512x128xf32>
    %78 = tpu.reciprocal %75 : vector<512x128xf32> -> vector<512x128xf32>
    %79 = arith.mulf %77, %78 : vector<512x128xf32>
    %80 = arith.negf %79 : vector<512x128xf32>
    %81 = math.exp %80 : vector<512x128xf32>
    %cst_23 = arith.constant 1.000000e+00 : f32
    %82 = vector.broadcast %cst_23 : f32 to vector<512x128xf32>
    %83 = arith.addf %82, %81 : vector<512x128xf32>
    %84 = arith.divf %82, %83 : vector<512x128xf32>
    %c0_24 = arith.constant 0 : index
    %c0_25 = arith.constant 0 : index
    %85 = vector.load %arg4[%c0_24, %c0_25] : memref<512x128xf32, #tpu.memory_space<vmem>>, vector<512x128xf32>
    tpu.vector_store %arg4[%c0_24, %c0_25], %84 {strides = array<i32>} : memref<512x128xf32, #tpu.memory_space<vmem>>, vector<512x128xf32>,
    return
  }
  func.func @transform_0(%arg0: i32) -> (i32, i32) {
    %c0_i32 = arith.constant 0 : i32
    %c0_i32_0 = arith.constant 0 : i32
    return %arg0, %c0_i32 : i32, i32
  }
  func.func @transform_1(%arg0: i32) -> (i32, i32) {
    %c0_i32 = arith.constant 0 : i32
    %c0_i32_0 = arith.constant 0 : i32
    %c0_i32_1 = arith.constant 0 : i32
    return %c0_i32, %c0_i32_0 : i32, i32
  }
  func.func @transform_2(%arg0: i32) -> (i32, i32) {
    %c0_i32 = arith.constant 0 : i32
    %c0_i32_0 = arith.constant 0 : i32
    %c0_i32_1 = arith.constant 0 : i32
    return %c0_i32, %c0_i32_0 : i32, i32
  }
  func.func @transform_3(%arg0: i32) -> (i32, i32) {
    %c0_i32 = arith.constant 0 : i32
    %c0_i32_0 = arith.constant 0 : i32
    return %arg0, %c0_i32 : i32, i32
  }
}

</mosaic_0001>

<bundles_post_ra>
// kernel: tpu_custom_call.1
= control target key start
LH: loop header
LB: loop body
LE: loop exit
PB: predicated region body
PF: predicated region fallthrough
CT: control target
= control target key end

     0   :  { %8 = vsyncpa [#allocation3], 0  ;;  %s15172_s0 = inlined_call_operand.hbm [shape: bf16[1024,128], index: 0, kind: input, shape index: {}]   ;;  %s15173_s1 = inlined_call_operand.hbm [shape: bf16[32,128], index: 1, kind: input, shape index: {}]   ;;  %s15174_s2 = inlined_call_operand.vmem [shape: f32[1,128], index: 2, kind: input, shape index: {}]   ;;  %s15175_s3 = inlined_call_operand.hbm [shape: f32[1024,128], index: 3, kind: output, shape index: {}]  }
   0x1   :  { %10 = vsyncpa [#allocation3 + $0x1], 0 }
   0x2   :  { %11 = vsyncpa [#allocation6], 0 }
   0x3   :  { %12 = vsyncpa [#allocation4], 0 }
   0x4   :  { %14 = vsyncpa [#allocation4 + $0x1], 0  ;;  %s9456_s12 = smov 0   ;;  %s9458_s13 = smov 0  }
   0x5   :  { %s9460_s14 = smov 0   ;;  %s9462_s15 = smov 0  }
   0x6 LB: > { %s9477_s16 = sadd.s32 4294967295, %s9423_s15   ;;  %s6733_s17 = sadd.s32 4294967294, %s9423_s15   ;;  %s9423_s15 = sphi %s9462_s15, %s17063_s15   ;;  %s9419_s14 = sphi %s9460_s14, %s17062_s14   ;;  %s9415_s13 = sphi %s9458_s13, %s17061_s13   ;;  %s9411_s12 = sphi %s9456_s12, %s17060_s12  }
   0x7   : > { %p40_p0 = scmp.ne.s32.totalorder %s9415_s13, %s9411_s12  ;;  %p15176_p1 = scmp.eq.s32.totalorder %s9477_s16, 0 }
   0x8   : > { %p112_p3 = scmp.eq.s32.totalorder %s6733_s17, 1  ;;  %p6734_p5 = scmp.ge.s32.totalorder %s9423_s15, 1 }
   0x9   : > { %p9486_p4 = por %p15176_p1, %p40_p0  ;;  %p119_p7 = scmp.lt.s32.totalorder %s9423_s15, 3 }
   0xa   : > { %p9491_p6 = por %p112_p3, %p40_p0  ;;  %s9425_s21 = smov [#allocation5]  }
   0xb   : > { %s15749_s18 = scalar_select %p9486_p4, 1, 0 }
   0xc   : > { %s15750_s19 = scalar_select %p9491_p6, 1, 0 }
   0xd   : > { %p9496_p8 = pnand %p6734_p5, %p119_p7  ;;  %s131_s22 = sshll.u32 %s9425_s21, 4  ;;  %s9500_s22 = int_to_ptr.vmem [resolvable:$true] %s131_s22 }
   0xe   : > { %s9512_s24 = sadd.s32 1, %s9423_s15   ;;  %s27_s25 = sadd.s32 1, %s9419_s14 }
   0xf   : > { %s15751_s20 = scalar_select %p9496_p8, 1, 0 }
  0x10   : > { %p7532_p9 = pneg %p9496_p8  ;;  %s24_s26 = ssub.s32 %s9423_s15, %s9512_s24 }
  0x11   : > { %s9295_s29 = scalar_lea.hbm %s15173_s1, 256 }
  0x12   : > { %p9507_p11 = pnand %p7532_p9, %p15176_p1  ;;  %p9296_p12 = scmp.ne.s32.totalorder %s15173_s1, %s9295_s29 }
  0x13   : > { %p9302_p5 = scmp.lt.u32.totalorder %s9295_s29, %s15173_s1 }
  0x14   : > { %p9297_p13 = pneg %p9507_p11 }
  0x16   : > { %p9298_p0 = pnand %p9297_p13, %p9296_p12 }
  0x18   : > { %p9299_p3 = pneg %p9298_p0 }
  0x1a   : > { %p9304_p7 = pnand %p9302_p5, %p9299_p3 }
  0x1c   : > { %9307 = shalt.err (!%p9304_p7)
}
  0x1d   : > { %s9308_s7 = scalar_lea.vmem %s9500_s22, 256  ;;  %p9316_p2 = scmp.lt.s32.totalorder %s9500_s22, %s9500_s22 }
  0x1e   : > { %p9309_p9 = scmp.ne.s32.totalorder %s9500_s22, %s9308_s7  ;;  %p9317_p6 = scmp.lt.s32.totalorder %s9308_s7, %s9308_s7 }
  0x20   : > { %p9311_p10 = pnand %p9309_p9, %p9297_p13  ;;  %p9318_p4 = por %p9317_p6, %p9316_p2 }
  0x22   : > { %p9312_p1 = pneg %p9311_p10 }
  0x24   : > { %p9319_p8 = pnand %p9318_p4, %p9312_p1 }
  0x26   : > { %9322 = shalt.err (!%p9319_p8)
}
  0x27   : > { %s9426_s8 = smov 64   ;;  %s9427_s9 = smov 4  }
  0x28   : > { %7535 = dma.hbm_to_vmem [thread:$0]  (!%p9507_p11), %s15173_s1, 256, %s9500_s22, [#allocation6], %s9426_s8, %s9426_s8, %s9427_s9  }
  0x29   : > { %p25_p1 = scmp.eq.s32.totalorder %s24_s26, 0  ;;  %p34_p2 = scmp.ne.s32.totalorder %s9419_s14, %s9415_s13 }
  0x2a   : > { %p35_p4 = scmp.eq.s32.totalorder %s9423_s15, 0  ;;  %p7545_p6 = scmp.lt.s32.totalorder %s9423_s15, 2 }
  0x2b   : > { %s9546_s17 = scalar_select %p25_p1, %s9419_s14, %s27_s25  }
  0x2c   : > { %p36_p8 = por %p35_p4, %p34_p2  ;;  %p15753_p10 = scmp.eq.s32.totalorder %s9477_s16, 1 }
  0x2d   : > { %s148_s23 = sand.u32 1, %s9419_s14   ;;  %s7008_s27 = sshll.u32 %s9423_s15, 12 }
  0x2e   : > { %p9550_p12 = por %p15753_p10, %p34_p2  ;;  %s6737_s28 = sshll.u32 %s148_s23, 8 }
  0x2f   : > { %s9559_s4 = scalar_lea.hbm %s15172_s0, %s7008_s27  ;;  %s152_s22 = scalar_lea.vmem [#allocation2], %s6737_s28 }
  0x30   : > { %s159_s25 = sshll.u32 %s152_s22, 4  ;;  %p9561_p11 = pnand %p7545_p6, %p36_p8  ;;  %s9565_s25 = int_to_ptr.vmem [resolvable:$true] %s159_s25 }
  0x31   : > { %s9567_s5 = scalar_lea.sflag [#allocation3], %s148_s23  ;;  %s9323_s6 = scalar_lea.hbm %s9559_s4, 4096 }
  0x32   : > { %p9324_p13 = scmp.ne.s32.totalorder %s9559_s4, %s9323_s6  ;;  %p9325_p0 = pneg %p9561_p11 }
  0x33   : > { %s9328_s11 = scalar_lea.hbm %s15172_s0, 8192  ;;  %p9329_p7 = scmp.lt.u32.totalorder %s9559_s4, %s15172_s0 }
  0x34   : > { %p9326_p3 = pnand %p9325_p0, %p9324_p13  ;;  %p9330_p9 = scmp.lt.u32.totalorder %s9328_s11, %s9323_s6 }
  0x35   : > { %p9332_p2 = scmp.lt.u32.totalorder %s9323_s6, %s9559_s4 }
  0x36   : > { %p9327_p5 = pneg %p9326_p3  ;;  %p9331_p1 = por %p9330_p9, %p9329_p7 }
  0x38   : > { %p9333_p4 = por %p9332_p2, %p9331_p1 }
  0x3a   : > { %p9334_p6 = pnand %p9333_p4, %p9327_p5 }
  0x3c   : > { %9337 = shalt.err (!%p9334_p6)
}
  0x3d   : > { %s9338_s23 = scalar_lea.vmem %s9565_s25, 4096  ;;  %s9428_s29 = smov [#allocation2]  }
  0x3e   : > { %p9339_p8 = scmp.ne.s32.totalorder %s9565_s25, %s9338_s23  ;;  %s9343_s30 = sshll.u32 %s9428_s29, 4  ;;  %s9344_s30 = int_to_ptr.vmem [resolvable:$false] %s9343_s30 }
  0x3f   : > { %s9345_s22 = scalar_lea.vmem %s9344_s30, 8192  ;;  %p9346_p3 = scmp.lt.s32.totalorder %s9565_s25, %s9344_s30 }
  0x40   : > { %p9341_p10 = pnand %p9339_p8, %p9325_p0  ;;  %p9347_p7 = scmp.lt.s32.totalorder %s9345_s22, %s9338_s23 }
  0x42   : > { %p9342_p13 = pneg %p9341_p10  ;;  %p9348_p9 = por %p9347_p7, %p9346_p3 }
  0x44   : > { %p9349_p1 = pnand %p9348_p9, %p9342_p13 }
  0x46   : > { %9352 = shalt.err (!%p9349_p1)
}
  0x47   : > { %7539 = dma.hbm_to_vmem [thread:$0]  (!%p9561_p11), %s9559_s4, 4096, %s9565_s25, %s9567_s5, %s9426_s8, %s9426_s8, %s9427_s9  }
  0x48   : > { %p15756_p0 = scmp.ne.s32.totalorder %s15751_s20, 0 }
  0x4a   : > { %171 = sbr.rel (%p15756_p0) target bundleno = 1314 (0x522), region = 32 }
  0x51   : > { %s9601_s6 = sand.u32 1, %s9415_s13   ;;  %p15757_p5 = scmp.ne.s32.totalorder %s15749_s18, 0 }
  0x52   : > { %s6741_s7 = sshll.u32 %s9601_s6, 8  ;;  %s174_s10 = scalar_lea.sflag [#allocation3], %s9601_s6 }
  0x53   : > { %s9605_s11 = scalar_lea.vmem [#allocation2], %s6741_s7 }
  0x54   : > { %9398 = dma.done.wait (%p15757_p5), %s174_s10, 4096  }
  0x55   : > { %9400 = vsyncadd (%p15757_p5), %s174_s10, 4294963200  ;;  %p15758_p11 = scmp.eq.s32.totalorder %s9477_s16, 0 }
  0x57   : > { %9402 = dma.done.wait (%p15758_p11), [#allocation6], 256   ;;  %p15759_p2 = pmov %p15758_p11 }
  0x58   : > { %v9616_v0 = vld [vmem:[%s9605_s11] sm:$0xf]  ;;  %v9619_v1 = vld [vmem:[%s9605_s11 + $0x4] sm:$0xf]  ;;  %v9622_v2 = vld [vmem:[%s9605_s11 + $0x8] sm:$0xf] }
  0x59   : > { %9404 = vsyncadd (%p15759_p2), [#allocation6], 4294967040  ;;  %v15243_v3 = vmov 0   ;;  %v9629_v6 = vld [vmem:[%s9605_s11 + $0xc] sm:$0xf]  ;;  %vm1478_vm0 = vcmask 261120  }
  0x5a   : > { %v1236_v4 = vmax.bf16 %v15243_v3, %v9616_v0  ;;  %v1237_v5 = vmax.bf16 %v15243_v3, %v9619_v1  ;;  %v9632_v7 = vld [vmem:[%s9605_s11 + $0x18] sm:$0xf]  ;;  %v1238_v8 = vmax.bf16 %v15243_v3, %v9622_v2  ;;  %v1239_v9 = vmax.bf16 %v15243_v3, %v9629_v6  ;;  %v9639_v10 = vld [vmem:[%s9605_s11 + $0x1c] sm:$0xf]  ;;  %v9642_v11 = vld [vmem:[%s9605_s11 + $0x10] sm:$0xf] }
  0x5b   : > { %15760 = vst [vmem:[#allocation11_spill] sm:$0xff] %v9642_v11  ;;  %v9645_v12 = vld [vmem:[%s9605_s11 + $0x14] sm:$0xf]  ;;  %v1242_v15 = vmax.bf16 %v15243_v3, %v9632_v7  ;;  %s9430_s18 = smov 64   ;;  %s9431_s20 = smov 96   ;;  %v1243_v16 = vmax.bf16 %v15243_v3, %v9639_v10  ;;  %v1240_v17 = vmax.bf16 %v15243_v3, %v9642_v11  ;;  %v9665_v19 = vld [vmem:[#allocation5] sm:$0xff]  }
  0x5c   : > { %v9647_v13 = vcombine.low %v1236_v4, %v1237_v5  ;;  %v9649_v14 = vcombine.low %v1238_v8, %v1239_v9  ;;  %v1241_v18 = vmax.bf16 %v15243_v3, %v9645_v12  ;;  %v9676_v22 = vld [vmem:[%s9605_s11 + $0x28] sm:$0xf]  ;;  %v9679_v23 = vld [vmem:[%s9605_s11 + $0x2c] sm:$0xf]  ;;  %v9682_v24 = vld [vmem:[%s9605_s11 + $0x20] sm:$0xf]  ;;  %7180 = vmatprep.subr.bf16.mxu0 %v9665_v19  ;;  %7520 = vmatprep.subr.bf16.mxu1 %v9665_v19 }
  0x5d   : > { %v9671_v20 = vcombine.low %v1242_v15, %v1243_v16  ;;  %15761 = vst [vmem:[#allocation12_spill] sm:$0xff] %v9676_v22  ;;  %15762 = vst [vmem:[#allocation13_spill] sm:$0xff] %v9679_v23  ;;  %v9685_v25 = vld [vmem:[%s9605_s11 + $0x24] sm:$0xf]  ;;  %7181 = vmatpush3.bf16.msra.mxu0 %v9665_v19  ;;  %7522 = vmatpush3.bf16.msra.mxu1 %v9665_v19  ;;  %v9691_v26 = vld [vmem:[#allocation5 + $0x8] sm:$0xff]   ;;  %v1246_v27 = vmax.bf16 %v15243_v3, %v9676_v22  ;;  %s9432_s8 = smov 32  }
  0x5e   : > { %2313 = vrot.lane.b32.xlu1 %v9647_v13, %s9430_s18  ;;  %1864 = vrot.lane.b32.xlu0 %v9647_v13, %s9431_s20  ;;  %v9673_v21 = vcombine.low %v1240_v17, %v1241_v18  ;;  %15763 = vst [vmem:[#allocation14_spill] sm:$0xff] %v9682_v24  ;;  %15764 = vst [vmem:[#allocation15_spill] sm:$0xff] %v9685_v25  ;;  %v1247_v28 = vmax.bf16 %v15243_v3, %v9679_v23  ;;  %v9710_v31 = vld [vmem:[%s9605_s11 + $0x80] sm:$0xf]  ;;  %v9713_v32 = vld [vmem:[%s9605_s11 + $0x38] sm:$0xf] }
  0x5f   : > { %7184 = vmatprep.mubr.msk.bf16.mxu0 %vm1478_vm0, %v9647_v13  ;;  %v1244_v29 = vmax.bf16 %v15243_v3, %v9682_v24  ;;  %v1245_v30 = vmax.bf16 %v15243_v3, %v9685_v25  ;;  %7182 = vmatprep.subr.bf16.mxu0 %v9691_v26  ;;  %15765 = vst [vmem:[#allocation16_spill] sm:$0xff] %v9710_v31  ;;  %15766 = vst [vmem:[#allocation17_spill] sm:$0xff] %v9713_v32  ;;  %v9716_v33 = vld [vmem:[%s9605_s11 + $0x3c] sm:$0xf]  ;;  %v9719_v34 = vld [vmem:[%s9605_s11 + $0x84] sm:$0xf] }
  0x60   : > { %7521 = vmatprep.subr.bf16.mxu1 %v9691_v26  ;;  %15767 = vst [vmem:[#allocation18_spill] sm:$0xff] %v9716_v33  ;;  %15768 = vst [vmem:[#allocation19_spill] sm:$0xff] %v9719_v34  ;;  %v9727_v35 = vcombine.low %v1246_v27, %v1247_v28  ;;  %v9732_v37 = vld [vmem:[%s9605_s11 + $0x88] sm:$0xf]  ;;  %v9735_v38 = vld [vmem:[%s9605_s11 + $0x8c] sm:$0xf]  ;;  %v1268_v41 = vmax.bf16 %v15243_v3, %v9710_v31  ;;  %v1269_v42 = vmax.bf16 %v15243_v3, %v9719_v34 }
  0x61   : > { %7183 = vmatpush3.bf16.msra.mxu0 %v9691_v26  ;;  %7523 = vmatpush3.bf16.msra.mxu1 %v9691_v26  ;;  %v9729_v36 = vcombine.low %v1244_v29, %v1245_v30  ;;  %15769 = vst [vmem:[#allocation20_spill] sm:$0xff] %v9732_v37  ;;  %15770 = vst [vmem:[#allocation21_spill] sm:$0xff] %v9735_v38  ;;  %v9738_v39 = vld [vmem:[%s9605_s11 + $0x30] sm:$0xf]  ;;  %v9741_v40 = vld [vmem:[%s9605_s11 + $0x34] sm:$0xf]  ;;  %v1250_v43 = vmax.bf16 %v15243_v3, %v9713_v32 }
  0x62   : > { %2315 = vrot.lane.b32.xlu1 %v9649_v14, %s9430_s18  ;;  %1866 = vrot.lane.b32.xlu0 %v9649_v14, %s9431_s20  ;;  %15771 = vst [vmem:[#allocation22_spill] sm:$0xff] %v9738_v39  ;;  %15772 = vst [vmem:[#allocation23_spill] sm:$0xff] %v9741_v40  ;;  %v1251_v44 = vmax.bf16 %v15243_v3, %v9716_v33  ;;  %v1270_v45 = vmax.bf16 %v15243_v3, %v9732_v37  ;;  %v9761_v47 = vld [vmem:[%s9605_s11 + $0x90] sm:$0xf]  ;;  %v9775_v51 = vld [vmem:[%s9605_s11 + $0x94] sm:$0xf] }
  0x63   : > { %7248 = vmatprep.subr.bf16.mxu1 %v9665_v19  ;;  %7316 = vmatprep.subr.bf16.mxu0 %v9665_v19  ;;  %v1271_v46 = vmax.bf16 %v15243_v3, %v9735_v38  ;;  %15773 = vst [vmem:[#allocation24_spill] sm:$0xff] %v9761_v47  ;;  %v1248_v48 = vmax.bf16 %v15243_v3, %v9738_v39  ;;  %15775 = vst [vmem:[#allocation26_spill] sm:$0xff] %v9775_v51  ;;  %v9780_v53 = vld [vmem:[%s9605_s11 + $0x98] sm:$0xf]  ;;  %v9783_v54 = vld [vmem:[%s9605_s11 + $0x9c] sm:$0xf] }
  0x64   : > { %7185 = vmatmul.mubr.msk.bf16.vlgmr.msra.gmra.mrb[0].mxu0 %vm1478_vm0, %v9649_v14  ;;  %v1249_v49 = vmax.bf16 %v15243_v3, %v9741_v40  ;;  %v9772_v50 = vcombine.low %v1268_v41, %v1269_v42  ;;  %15777 = vst [vmem:[#allocation28_spill] sm:$0xff] %v9780_v53  ;;  %15778 = vst [vmem:[#allocation29_spill] sm:$0xff] %v9783_v54  ;;  %v1272_v55 = vmax.bf16 %v15243_v3, %v9761_v47  ;;  %v9790_v56 = vld [vmem:[%s9605_s11 + $0xa0] sm:$0xf]  ;;  %v9793_v57 = vld [vmem:[%s9605_s11 + $0xa4] sm:$0xf] }
  0x65   : > { %7188 = vmatprep.mubr.msk.bf16.mxu0 %vm1478_vm0, %v9673_v21  ;;  %7317 = vmatpush3.bf16.msra.mxu0 %v9665_v19  ;;  %v9777_v52 = vcombine.low %v1270_v45, %v1271_v46  ;;  %15779 = vst [vmem:[#allocation30_spill] sm:$0xff] %v9790_v56  ;;  %15780 = vst [vmem:[#allocation31_spill] sm:$0xff] %v9793_v57  ;;  %v9796_v58 = vcombine.low %v1250_v43, %v1251_v44  ;;  %v9810_v61 = vld [vmem:[%s9605_s11 + $0x48] sm:$0xf]  ;;  %v9817_v4 = vld [vmem:[%s9605_s11 + $0x4c] sm:$0xf] }
  0x66   : > { %1870 = vrot.lane.b32.xlu1 %v9671_v20, %s9431_s20  ;;  %1868 = vrot.lane.b32.xlu0 %v9673_v21, %s9431_s20  ;;  %15774 = vst [vmem:[#allocation25_spill] sm:$0xff] %v9772_v50  ;;  %v1273_v59 = vmax.bf16 %v15243_v3, %v9775_v51  ;;  %v9807_v60 = vcombine.low %v1248_v48, %v1249_v49  ;;  %15781 = vst [vmem:[#allocation32_spill] sm:$0xff] %v9810_v61  ;;  %v9820_v5 = vld [vmem:[%s9605_s11 + $0x40] sm:$0xf]  ;;  %v9823_v8 = vld [vmem:[%s9605_s11 + $0x44] sm:$0xf] }
  0x67   : > { %7318 = vmatprep.subr.bf16.mxu0 %v9691_v26  ;;  %15776 = vst [vmem:[#allocation27_spill] sm:$0xff] %v9777_v52  ;;  %7216 = vmatprep.mubr.msk.bf16.mxu1 %vm1478_vm0, %v9772_v50  ;;  %v1274_v62 = vmax.bf16 %v15243_v3, %v9780_v53  ;;  %v1275_v63 = vmax.bf16 %v15243_v3, %v9783_v54  ;;  %15782 = vst [vmem:[#allocation33_spill] sm:$0xff] %v9817_v4  ;;  %v9854_v30 = vld [vmem:[%s9605_s11 + $0xa8] sm:$0xf]  ;;  %v9857_v41 = vld [vmem:[%s9605_s11 + $0xac] sm:$0xf] }
  0x68   : > { %7217 = vmatmul.mubr.msk.bf16.vlgmr.msra.gmra.mrb[0].mxu1 %vm1478_vm0, %v9777_v52  ;;  %15783 = vst [vmem:[#allocation34_spill] sm:$0xff] %v9820_v5  ;;  %15784 = vst [vmem:[#allocation35_spill] sm:$0xff] %v9823_v8  ;;  %v9825_v9 = vcombine.low %v1272_v55, %v1273_v59  ;;  %v1276_v15 = vmax.bf16 %v15243_v3, %v9790_v56  ;;  %v1277_v16 = vmax.bf16 %v15243_v3, %v9793_v57  ;;  %v9863_v43 = vld [vmem:[%s9605_s11 + $0xb0] sm:$0xf]  ;;  %v9866_v44 = vld [vmem:[%s9605_s11 + $0xb4] sm:$0xf] }
  0x69   : > { %7319 = vmatpush3.bf16.msra.mxu0 %v9691_v26  ;;  %7249 = vmatpush3.bf16.msra.mxu1 %v9665_v19  ;;  %v1254_v17 = vmax.bf16 %v15243_v3, %v9810_v61  ;;  %v9841_v18 = vcombine.low %v1274_v62, %v1275_v63  ;;  %v1255_v27 = vmax.bf16 %v15243_v3, %v9817_v4  ;;  %v9884_v55 = vld [vmem:[%s9605_s11 + $0x58] sm:$0xf]  ;;  %v9887_v59 = vld [vmem:[%s9605_s11 + $0x5c] sm:$0xf]  ;;  %v9890_v62 = vld [vmem:[%s9605_s11 + $0x50] sm:$0xf] }
  0x6a   : > { %2319 = vrot.lane.b32.xlu1 %v9671_v20, %s9430_s18  ;;  %2317 = vrot.lane.b32.xlu0 %v9673_v21, %s9430_s18  ;;  %15785 = vst [vmem:[#allocation36_spill] sm:$0xff] %v9825_v9  ;;  %v1252_v28 = vmax.bf16 %v15243_v3, %v9820_v5  ;;  %v1253_v29 = vmax.bf16 %v15243_v3, %v9823_v8  ;;  %15787 = vst [vmem:[#allocation38_spill] sm:$0xff] %v9854_v30  ;;  %v9893_v63 = vld [vmem:[%s9605_s11 + $0x54] sm:$0xf]  ;;  %v9948_v54 = vld [vmem:[%s9605_s11 + $0x68] sm:$0xf] }
  0x6b   : > { %7452 = vmatprep.subr.bf16.mxu0 %v9665_v19  ;;  %7250 = vmatprep.subr.bf16.mxu1 %v9691_v26  ;;  %15786 = vst [vmem:[#allocation37_spill] sm:$0xff] %v9841_v18  ;;  %15788 = vst [vmem:[#allocation39_spill] sm:$0xff] %v9857_v41  ;;  %v9859_v42 = vcombine.low %v1276_v15, %v1277_v16  ;;  %v1278_v45 = vmax.bf16 %v15243_v3, %v9854_v30  ;;  %v9931_v30 = vld [vmem:[%s9605_s11 + $0xc4] sm:$0xf]  ;;  %v9951_v53 = vld [vmem:[%s9605_s11 + $0x6c] sm:$0xf] }
  0x6c   : > { %7189 = vmatmul.mubr.msk.bf16.gmra.mrb[4].mxu0 %vm1478_vm0, %v9671_v20  ;;  %7220 = vmatprep.mubr.msk.bf16.mxu1 %vm1478_vm0, %v9825_v9  ;;  %15790 = vst [vmem:[#allocation41_spill] sm:$0xff] %v9863_v43  ;;  %15791 = vst [vmem:[#allocation42_spill] sm:$0xff] %v9866_v44  ;;  %v1279_v46 = vmax.bf16 %v15243_v3, %v9857_v41  ;;  %v9879_v48 = vcombine.low %v1254_v17, %v1255_v27  ;;  %v9928_v41 = vld [vmem:[%s9605_s11 + $0xc0] sm:$0xf]  ;;  %v9957_v51 = vld [vmem:[%s9605_s11 + $0x64] sm:$0xf] }
  0x6d   : > { %7192 = vmatprep.mubr.msk.bf16.mxu0 %vm1478_vm0, %v9729_v36  ;;  %15789 = vst [vmem:[#allocation40_spill] sm:$0xff] %v9859_v42  ;;  %7251 = vmatpush3.bf16.msra.mxu1 %v9691_v26  ;;  %v9881_v49 = vcombine.low %v1252_v28, %v1253_v29  ;;  %15793 = vst [vmem:[#allocation44_spill] sm:$0xff] %v9884_v55  ;;  %v1280_v15 = vmax.bf16 %v15243_v3, %v9863_v43  ;;  %v9992_v38 = vld [vmem:[%s9605_s11 + $0xd0] sm:$0xf]  ;;  %v9995_v37 = vld [vmem:[%s9605_s11 + $0xd4] sm:$0xf] }
  0x6e   : > { %1874 = vrot.lane.b32.xlu1 %v9727_v35, %s9431_s20  ;;  %1872 = vrot.lane.b32.xlu0 %v9729_v36, %s9431_s20  ;;  %15792 = vst [vmem:[#allocation43_spill] sm:$0xff] %v9879_v48  ;;  %15794 = vst [vmem:[#allocation45_spill] sm:$0xff] %v9887_v59  ;;  %v1281_v16 = vmax.bf16 %v15243_v3, %v9866_v44  ;;  %v1258_v17 = vmax.bf16 %v15243_v3, %v9884_v55  ;;  %s6743_s29 = sshll.u32 %s9601_s6, 9  ;;  %s7009_s26 = sshll.u32 %s9477_s16, 13 }
  0x6f   : > { %7384 = vmatprep.subr.bf16.mxu1 %v9665_v19  ;;  %15795 = vst [vmem:[#allocation46_spill] sm:$0xff] %v9890_v62  ;;  %15796 = vst [vmem:[#allocation47_spill] sm:$0xff] %v9893_v63  ;;  %v9907_v27 = vcombine.low %v1278_v45, %v1279_v46  ;;  %v1259_v28 = vmax.bf16 %v15243_v3, %v9887_v59  ;;  %v1256_v29 = vmax.bf16 %v15243_v3, %v9890_v62  ;;  %v9920_v45 = vld [vmem:[%s9605_s11 + $0xb8] sm:$0xf]  ;;  %v9923_v46 = vld [vmem:[%s9605_s11 + $0xbc] sm:$0xf]  ;;  %s15125_s23 = scalar_lea.hbm %s15175_s3, %s7009_s26 }
  0x70   : > { %7221 = vmatmul.mubr.msk.bf16.gmra.mrb[4].mxu1 %vm1478_vm0, %v9841_v18  ;;  %v1257_v44 = vmax.bf16 %v15243_v3, %v9893_v63  ;;  %15798 = vst [vmem:[#allocation49_spill] sm:$0xff] %v9920_v45  ;;  %15799 = vst [vmem:[#allocation50_spill] sm:$0xff] %v9923_v46  ;;  %v9925_v43 = vcombine.low %v1280_v15, %v1281_v16  ;;  %v1282_v57 = vmax.bf16 %v15243_v3, %v9920_v45  ;;  %v9954_v45 = vld [vmem:[%s9605_s11 + $0x60] sm:$0xf]  ;;  %s13384_s30 = scalar_lea.vmem [#allocation7], %s6743_s29  ;;  %s6637_s29 = scalar_lea.sflag [#allocation4], %s9601_s6 }
  0x71   : > { %7224 = vmatprep.mubr.msk.bf16.mxu1 %vm1478_vm0, %v9859_v42  ;;  %15797 = vst [vmem:[#allocation48_spill] sm:$0xff] %v9907_v27  ;;  %15801 = vst [vmem:[#allocation52_spill] sm:$0xff] %v9928_v41  ;;  %v1283_v56 = vmax.bf16 %v15243_v3, %v9923_v46  ;;  %v9943_v15 = vcombine.low %v1258_v17, %v1259_v28  ;;  %v1285_v17 = vmax.bf16 %v15243_v3, %v9931_v30  ;;  %s6650_s5 = sshll.u32 %s13384_s30, 4  ;;  %s9433_s16 = smov [#allocation7]   ;;  %s15127_s5 = int_to_ptr.vmem [resolvable:$true] %s6650_s5 }
  0x72   : > { %2323 = vrot.lane.b32.xlu1 %v9727_v35, %s9430_s18  ;;  %2321 = vrot.lane.b32.xlu0 %v9729_v36, %s9430_s18  ;;  %15800 = vst [vmem:[#allocation51_spill] sm:$0xff] %v9925_v43  ;;  %15802 = vst [vmem:[#allocation53_spill] sm:$0xff] %v9931_v30  ;;  %v9945_v16 = vcombine.low %v1256_v29, %v1257_v44  ;;  %v1284_v44 = vmax.bf16 %v15243_v3, %v9928_v41  ;;  %s9353_s22 = scalar_lea.vmem %s15127_s5, 8192  ;;  %s9357_s7 = sshll.u32 %s9433_s16, 4  ;;  %s9358_s7 = int_to_ptr.vmem [resolvable:$false] %s9357_s7 }
  0x73   : > { %15804 = vst [vmem:[#allocation55_spill] sm:$0xff] %v9948_v54  ;;  %15805 = vst [vmem:[#allocation56_spill] sm:$0xff] %v9951_v53  ;;  %v1262_v28 = vmax.bf16 %v15243_v3, %v9948_v54  ;;  %v9971_v29 = vcombine.low %v1282_v57, %v1283_v56  ;;  %v1263_v41 = vmax.bf16 %v15243_v3, %v9951_v53  ;;  %v9984_v56 = vld [vmem:[%s9605_s11 + $0xc8] sm:$0xf]  ;;  %v9987_v57 = vld [vmem:[%s9605_s11 + $0xcc] sm:$0xf]  ;;  %p9354_p4 = scmp.ne.s32.totalorder %s15127_s5, %s9353_s22  ;;  %p9360_p10 = scmp.lt.s32.totalorder %s15127_s5, %s9358_s7 }
  0x74   : > { %7193 = vmatmul.mubr.msk.bf16.gmra.mrb[8].mxu0 %vm1478_vm0, %v9727_v35  ;;  %15803 = vst [vmem:[#allocation54_spill] sm:$0xff] %v9945_v16  ;;  %15806 = vst [vmem:[#allocation57_spill] sm:$0xff] %v9954_v45  ;;  %v1260_v30 = vmax.bf16 %v15243_v3, %v9954_v45  ;;  %v1261_v46 = vmax.bf16 %v15243_v3, %v9957_v51  ;;  %v9989_v47 = vcombine.low %v1284_v44, %v1285_v17  ;;  %v10015_v45 = vld [vmem:[%s9605_s11 + $0x7c] sm:$0xf]  ;;  %v10021_v53 = vld [vmem:[%s9605_s11 + $0x74] sm:$0xf] }
  0x75   : > { %7196 = vmatprep.mubr.msk.bf16.mxu0 %vm1478_vm0, %v9807_v60  ;;  %15807 = vst [vmem:[#allocation58_spill] sm:$0xff] %v9957_v51  ;;  %15808 = vst [vmem:[#allocation59_spill] sm:$0xff] %v9971_v29  ;;  %v1286_v34 = vmax.bf16 %v15243_v3, %v9984_v56  ;;  %v1287_v31 = vmax.bf16 %v15243_v3, %v9987_v57  ;;  %v10007_v44 = vcombine.low %v1262_v28, %v1263_v41  ;;  %v10012_v51 = vld [vmem:[%s9605_s11 + $0x78] sm:$0xf]  ;;  %p9355_p6 = pnand %p9354_p4, %p9550_p12  ;;  %s9359_s10 = scalar_lea.vmem %s9358_s7, 16384 }
  0x76   : > { %1878 = vrot.lane.b32.xlu1 %v9796_v58, %s9431_s20  ;;  %1876 = vrot.lane.b32.xlu0 %v9807_v60, %s9431_s20  ;;  %15809 = vst [vmem:[#allocation60_spill] sm:$0xff] %v9984_v56  ;;  %15810 = vst [vmem:[#allocation61_spill] sm:$0xff] %v9987_v57  ;;  %v10009_v17 = vcombine.low %v1260_v30, %v1261_v46  ;;  %v10018_v56 = vld [vmem:[%s9605_s11 + $0x70] sm:$0xf]  ;;  %v1288_v30 = vmax.bf16 %v15243_v3, %v9992_v38  ;;  %p9361_p13 = scmp.lt.s32.totalorder %s9359_s10, %s9353_s22 }
  0x77   : > { %15811 = vst [vmem:[#allocation62_spill] sm:$0xff] %v9989_v47  ;;  %15812 = vst [vmem:[#allocation63_spill] sm:$0xff] %v9992_v38  ;;  %v1289_v41 = vmax.bf16 %v15243_v3, %v9995_v37  ;;  %v1266_v46 = vmax.bf16 %v15243_v3, %v10012_v51  ;;  %v10035_v28 = vcombine.low %v1286_v34, %v1287_v31  ;;  %v10056_v34 = vld [vmem:[%s9605_s11 + $0xe0] sm:$0xf]  ;;  %p9356_p8 = pneg %p9355_p6 }
  0x78   : > { %7225 = vmatmul.mubr.msk.bf16.gmra.mrb[8].mxu1 %vm1478_vm0, %v9907_v27  ;;  %15813 = vst [vmem:[#allocation64_spill] sm:$0xff] %v9995_v37  ;;  %15814 = vst [vmem:[#allocation65_spill] sm:$0xff] %v10007_v44  ;;  %v1267_v38 = vmax.bf16 %v15243_v3, %v10015_v45  ;;  %v1264_v37 = vmax.bf16 %v15243_v3, %v10018_v56  ;;  %v1265_v57 = vmax.bf16 %v15243_v3, %v10021_v53  ;;  %p9362_p3 = por %p9361_p13, %p9360_p10 }
  0x79   : > { %7228 = vmatprep.mubr.msk.bf16.mxu1 %vm1478_vm0, %v9925_v43  ;;  %15815 = vst [vmem:[#allocation66_spill] sm:$0xff] %v10009_v17  ;;  %15816 = vst [vmem:[#allocation67_spill] sm:$0xff] %v10012_v51  ;;  %v10051_v51 = vld [vmem:[%s9605_s11 + $0xdc] sm:$0xf]  ;;  %v10053_v31 = vcombine.low %v1288_v30, %v1289_v41 }
  0x7a   : > { %2327 = vrot.lane.b32.xlu1 %v9796_v58, %s9430_s18  ;;  %2325 = vrot.lane.b32.xlu0 %v9807_v60, %s9430_s18  ;;  %15817 = vst [vmem:[#allocation68_spill] sm:$0xff] %v10015_v45  ;;  %15818 = vst [vmem:[#allocation69_spill] sm:$0xff] %v10018_v56  ;;  %v10071_v30 = vcombine.low %v1266_v46, %v1267_v38  ;;  %v10073_v41 = vcombine.low %v1264_v37, %v1265_v57  ;;  %v10092_v37 = vld [vmem:[%s9605_s11 + $0xe8] sm:$0xf]  ;;  %v10095_v38 = vld [vmem:[%s9605_s11 + $0xec] sm:$0xf]  ;;  %p9363_p7 = pnand %p9362_p3, %p9356_p8 }
  0x7b   : > { %15819 = vst [vmem:[#allocation70_spill] sm:$0xff] %v10021_v53  ;;  %15820 = vst [vmem:[#allocation71_spill] sm:$0xff] %v10035_v28  ;;  %v1291_v53 = vmax.bf16 %v15243_v3, %v10051_v51  ;;  %v10100_v46 = vld [vmem:[%s9605_s11 + $0xf0] sm:$0xf] }
  0x7c   : > { %7197 = vmatmul.mubr.msk.bf16.gmra.mrb[12].mxu0 %vm1478_vm0, %v9796_v58  ;;  %15822 = vst [vmem:[#allocation73_spill] sm:$0xff] %v10051_v51  ;;  %15823 = vst [vmem:[#allocation74_spill] sm:$0xff] %v10053_v31  ;;  %v1292_v51 = vmax.bf16 %v15243_v3, %v10056_v34 }
  0x7d   : > { %7200 = vmatprep.mubr.msk.bf16.mxu0 %vm1478_vm0, %v9881_v49  ;;  %15824 = vst [vmem:[#allocation75_spill] sm:$0xff] %v10056_v34  ;;  %15826 = vst [vmem:[#allocation77_spill] sm:$0xff] %v10073_v41 }
  0x7e   : > { %1882 = vrot.lane.b32.xlu1 %v9879_v48, %s9431_s20  ;;  %1880 = vrot.lane.b32.xlu0 %v9881_v49, %s9431_s20  ;;  %15828 = vst [vmem:[#allocation79_spill] sm:$0xff] %v10092_v37  ;;  %15829 = vst [vmem:[#allocation80_spill] sm:$0xff] %v10095_v38 }
  0x7f   : > { %15831 = vst [vmem:[#allocation82_spill] sm:$0xff] %v10100_v46 }
  0x80   : > { %7229 = vmatmul.mubr.msk.bf16.gmra.mrb[12].mxu1 %vm1478_vm0, %v9971_v29 }
  0x81   : > { %7232 = vmatprep.mubr.msk.bf16.mxu1 %vm1478_vm0, %v9989_v47 }
  0x82   : > { %2331 = vrot.lane.b32.xlu1 %v9879_v48, %s9430_s18  ;;  %2329 = vrot.lane.b32.xlu0 %v9881_v49, %s9430_s18 }
  0x84   : > { %7201 = vmatmul.mubr.msk.bf16.gmra.mrb[16].mxu0 %vm1478_vm0, %v9879_v48  ;;  %v10059_v48 = vld [vmem:[%s9605_s11 + $0xe4] sm:$0xf] }
  0x85   : > { %7204 = vmatprep.mubr.msk.bf16.mxu0 %vm1478_vm0, %v9945_v16  ;;  %15825 = vst [vmem:[#allocation76_spill] sm:$0xff] %v10059_v48 }
  0x86   : > { %1886 = vrot.lane.b32.xlu1 %v9943_v15, %s9431_s20  ;;  %1884 = vrot.lane.b32.xlu0 %v9945_v16, %s9431_s20 }
  0x88   : > { %7233 = vmatmul.mubr.msk.bf16.gmra.mrb[16].mxu1 %vm1478_vm0, %v10035_v28 }
  0x89   : > { %7236 = vmatprep.mubr.msk.bf16.mxu1 %vm1478_vm0, %v10053_v31 }
  0x8a   : > { %2335 = vrot.lane.b32.xlu1 %v9943_v15, %s9430_s18  ;;  %2333 = vrot.lane.b32.xlu0 %v9945_v16, %s9430_s18  ;;  %v10048_v16 = vld [vmem:[%s9605_s11 + $0xd8] sm:$0xf] }
  0x8b   : > { %15821 = vst [vmem:[#allocation72_spill] sm:$0xff] %v10048_v16  ;;  %v1290_v56 = vmax.bf16 %v15243_v3, %v10048_v16  ;;  %v1293_v16 = vmax.bf16 %v15243_v3, %v10059_v48  ;;  %v10103_v3 = vld [vmem:[%s9605_s11 + $0xf4] sm:$0xf] }
  0x8c   : > { %7205 = vmatmul.mubr.msk.bf16.gmra.mrb[20].mxu0 %vm1478_vm0, %v9943_v15  ;;  %15832 = vst [vmem:[#allocation83_spill] sm:$0xff] %v10103_v3 }
  0x8d   : > { %7208 = vmatprep.mubr.msk.bf16.mxu0 %vm1478_vm0, %v10009_v17  ;;  %v10085_v45 = vcombine.low %v1290_v56, %v1291_v53  ;;  %v10097_v57 = vcombine.low %v1292_v51, %v1293_v16  ;;  %v15833_v53 = vmov 0  }
  0x8e   : > { %1890 = vrot.lane.b32.xlu1 %v10007_v44, %s9431_s20  ;;  %1888 = vrot.lane.b32.xlu0 %v10009_v17, %s9431_s20  ;;  %v1294_v56 = vmax.bf16 %v15833_v53, %v10092_v37  ;;  %v1296_v51 = vmax.bf16 %v15833_v53, %v10100_v46  ;;  %v1297_v16 = vmax.bf16 %v15833_v53, %v10103_v3  ;;  %v10132_v37 = vld [vmem:[%s9605_s11 + $0xf8] sm:$0xf] }
  0x8f   : > { %15827 = vst [vmem:[#allocation78_spill] sm:$0xff] %v10085_v45  ;;  %15830 = vst [vmem:[#allocation81_spill] sm:$0xff] %v10097_v57 }
  0x90   : > { %7237 = vmatmul.mubr.msk.bf16.gmra.mrb[20].mxu1 %vm1478_vm0, %v10085_v45  ;;  %15835 = vst [vmem:[#allocation85_spill] sm:$0xff] %v10132_v37  ;;  %v10137_v48 = vcombine.low %v1296_v51, %v1297_v16  ;;  %v15258_v51 = vunpack.c.l.bf16 %v9622_v2  ;;  %v15259_v16 = vunpack.c.l.bf16 %v9629_v6 }
  0x91   : > { %7240 = vmatprep.mubr.msk.bf16.mxu1 %vm1478_vm0, %v10097_v57 }
  0x92   : > { %2339 = vrot.lane.b32.xlu1 %v10007_v44, %s9430_s18  ;;  %2337 = vrot.lane.b32.xlu0 %v10009_v17, %s9430_s18  ;;  %v1295_v17 = vmax.bf16 %v15833_v53, %v10095_v38  ;;  %15837 = vst [vmem:[#allocation87_spill] sm:$0xff] %v10137_v48 }
  0x94   : > { %7209 = vmatmul.mubr.msk.bf16.gmra.mrb[24].mxu0 %vm1478_vm0, %v10007_v44  ;;  %v10125_v38 = vcombine.low %v1294_v56, %v1295_v17  ;;  %v10135_v44 = vld [vmem:[%s9605_s11 + $0xfc] sm:$0xf] }
  0x95   : > { %7212 = vmatprep.mubr.msk.bf16.mxu0 %vm1478_vm0, %v10073_v41  ;;  %15836 = vst [vmem:[#allocation86_spill] sm:$0xff] %v10135_v44  ;;  %v1299_v17 = vmax.bf16 %v15833_v53, %v10135_v44 }
  0x96   : > { %1894 = vrot.lane.b32.xlu1 %v10071_v30, %s9431_s20  ;;  %1892 = vrot.lane.b32.xlu0 %v10073_v41, %s9431_s20  ;;  %15834 = vst [vmem:[#allocation84_spill] sm:$0xff] %v10125_v38 }
  0x98   : > { %7241 = vmatmul.mubr.msk.bf16.gmra.mrb[24].mxu1 %vm1478_vm0, %v10125_v38 }
  0x99   : > { %7244 = vmatprep.mubr.msk.bf16.mxu1 %vm1478_vm0, %v10137_v48 }
  0x9a   : > { %2343 = vrot.lane.b32.xlu1 %v10071_v30, %s9430_s18  ;;  %2341 = vrot.lane.b32.xlu0 %v10073_v41, %s9430_s18  ;;  %v1298_v41 = vmax.bf16 %v15833_v53, %v10132_v37  ;;  %v15260_v53 = vunpack.c.l.bf16 %v9616_v0 }
  0x9c   : > { %7213 = vmatmul.mubr.msk.bf16.gmra.mrb[28].mxu0 %vm1478_vm0, %v10071_v30  ;;  %v10153_v56 = vcombine.low %v1298_v41, %v1299_v17  ;;  %v7594_v41 = vpack.i.bf16 %v15259_v16, %v15258_v51  ;;  %v15261_v16 = vunpack.c.l.bf16 %v9642_v11  ;;  %v15882_v11 = vld [vmem:[#allocation80_spill] sm:$0xff] }
  0x9e   : > { %1898 = vrot.lane.b32.xlu1 %v9777_v52, %s9431_s20  ;;  %1896 = vrot.lane.b32.xlu0 %v9772_v50, %s9431_s20  ;;  %15838 = vst [vmem:[#allocation88_spill] sm:$0xff] %v10153_v56 }
  0xa0   : > { %7245 = vmatmul.mubr.msk.bf16.gmra.mrb[28].mxu1 %vm1478_vm0, %v10153_v56 }
  0xa2   : > { %2347 = vrot.lane.b32.xlu1 %v9777_v52, %s9430_s18  ;;  %2345 = vrot.lane.b32.xlu0 %v9772_v50, %s9430_s18  ;;  %v15881_v52 = vld [vmem:[#allocation79_spill] sm:$0xff] }
  0xa6   : > { %1902 = vrot.lane.b32.xlu1 %v9841_v18, %s9431_s20  ;;  %1900 = vrot.lane.b32.xlu0 %v9825_v9, %s9431_s20 }
  0xaa   : > { %2351 = vrot.lane.b32.xlu1 %v9841_v18, %s9430_s18  ;;  %2349 = vrot.lane.b32.xlu0 %v9825_v9, %s9430_s18  ;;  %v15877_v18 = vld [vmem:[#allocation64_spill] sm:$0xff] }
  0xae   : > { %1906 = vrot.lane.b32.xlu1 %v9907_v27, %s9431_s20  ;;  %1904 = vrot.lane.b32.xlu0 %v9859_v42, %s9431_s20 }
  0xb2   : > { %2355 = vrot.lane.b32.xlu1 %v9907_v27, %s9430_s18  ;;  %2353 = vrot.lane.b32.xlu0 %v9859_v42, %s9430_s18 }
  0xb6   : > { %1910 = vrot.lane.b32.xlu1 %v9971_v29, %s9431_s20  ;;  %1908 = vrot.lane.b32.xlu0 %v9925_v43, %s9431_s20 }
  0xba   : > { %2359 = vrot.lane.b32.xlu1 %v9971_v29, %s9430_s18  ;;  %2357 = vrot.lane.b32.xlu0 %v9925_v43, %s9430_s18  ;;  %v15865_v29 = vld [vmem:[#allocation39_spill] sm:$0xff] }
  0xbe   : > { %1914 = vrot.lane.b32.xlu1 %v10035_v28, %s9431_s20  ;;  %1912 = vrot.lane.b32.xlu0 %v9989_v47, %s9431_s20 }
  0xc2   : > { %2363 = vrot.lane.b32.xlu1 %v10035_v28, %s9430_s18  ;;  %2361 = vrot.lane.b32.xlu0 %v9989_v47, %s9430_s18 }
  0xc6   : > { %1918 = vrot.lane.b32.xlu1 %v10085_v45, %s9431_s20  ;;  %1916 = vrot.lane.b32.xlu0 %v10053_v31, %s9431_s20 }
  0xca   : > { %2367 = vrot.lane.b32.xlu1 %v10085_v45, %s9430_s18  ;;  %2365 = vrot.lane.b32.xlu0 %v10053_v31, %s9430_s18  ;;  %v15839_v45 = vunpack.c.l.bf16 %v9619_v1 }
  0xcc   : > { %v7589_v31 = vpack.i.bf16 %v15839_v45, %v15260_v53 }
  0xce   : > { %1922 = vrot.lane.b32.xlu1 %v10125_v38, %s9431_s20  ;;  %1920 = vrot.lane.b32.xlu0 %v10097_v57, %s9431_s20 }
  0xd0   : > { %v2314_v17 = vpop.permute.xlu1 %2313  ;;  %v1865_v28 = vpop.permute.xlu0 %1864 }
  0xd1   : > { %7252 = vmatprep.mubr.msk.bf16.mxu1 %vm1478_vm0, %v1865_v28  ;;  %7320 = vmatprep.mubr.msk.bf16.mxu0 %vm1478_vm0, %v2314_v17 }
  0xd2   : > { %2371 = vrot.lane.b32.xlu1 %v10125_v38, %s9430_s18  ;;  %2369 = vrot.lane.b32.xlu0 %v10097_v57, %s9430_s18  ;;  %v15852_v57 = vld [vmem:[#allocation21_spill] sm:$0xff] }
  0xd4   : > { %v2316_v47 = vpop.permute.xlu1 %2315  ;;  %v1867_v28 = vpop.permute.xlu0 %1866 }
  0xd5   : > { %7253 = vmatmul.mubr.msk.bf16.vlgmr.msra.gmra.mrb[32].mxu1 %vm1478_vm0, %v1867_v28  ;;  %7321 = vmatmul.mubr.msk.bf16.vlgmr.msra.gmra.mrb[32].mxu0 %vm1478_vm0, %v2316_v47  ;;  %v15263_v28 = vunpack.c.l.bf16 %v9632_v7 }
  0xd6   : > { %7595 = vrot.lane.b32.xlu1 %v7594_v41, %s9431_s20  ;;  %7590 = vrot.lane.b32.xlu0 %v7589_v31, %s9431_s20 }
  0xd7   : > { %7385 = vmatpush3.bf16.msra.mxu1 %v9665_v19  ;;  %7453 = vmatpush3.bf16.msra.mxu0 %v9665_v19 }
  0xd8   : > { %v1871_v17 = vpop.permute.xlu1 %1870  ;;  %v1869_v51 = vpop.permute.xlu0 %1868  ;;  %7454 = vmatprep.subr.bf16.mxu0 %v9691_v26  ;;  %7386 = vmatprep.subr.bf16.mxu1 %v9691_v26 }
  0xd9   : > { %7256 = vmatprep.mubr.msk.bf16.mxu1 %vm1478_vm0, %v1869_v51 }
  0xda   : > { %1924 = vrot.lane.b32.xlu1 %v10137_v48, %s9431_s20  ;;  %7600 = vrot.lane.b32.xlu0 %v7589_v31, %s9430_s18 }
  0xdb   : > { %7455 = vmatpush3.bf16.msra.mxu0 %v9691_v26  ;;  %7387 = vmatpush3.bf16.msra.mxu1 %v9691_v26  ;;  %v15284_v26 = vunpack.c.l.bf16 %v9639_v10 }
  0xdc   : > { %v2320_v47 = vpop.permute.xlu1 %2319  ;;  %v2318_v45 = vpop.permute.xlu0 %2317 }
  0xdd   : > { %7257 = vmatmul.mubr.msk.bf16.gmra.mrb[36].mxu1 %vm1478_vm0, %v1871_v17  ;;  %7324 = vmatprep.mubr.msk.bf16.mxu0 %vm1478_vm0, %v2318_v45  ;;  %v15262_v17 = vunpack.c.l.bf16 %v9645_v12 }
  0xde   : > { %1926 = vrot.lane.b32.xlu1 %v10153_v56, %s9431_s20  ;;  %7605 = vrot.lane.b32.xlu0 %v7594_v41, %s9430_s18 }
  0xdf   : > { %7325 = vmatmul.mubr.msk.bf16.gmra.mrb[36].mxu0 %vm1478_vm0, %v2320_v47 }
  0xe0   : > { %v1875_v19 = vpop.permute.xlu1 %1874  ;;  %v1873_v51 = vpop.permute.xlu0 %1872 }
  0xe1   : > { %7260 = vmatprep.mubr.msk.bf16.mxu1 %vm1478_vm0, %v1873_v51  ;;  %v7624_v51 = vpack.i.bf16 %v15284_v26, %v15263_v28  ;;  %v15264_v28 = vunpack.c.l.bf16 %v9682_v24  ;;  %v15878_v24 = vld [vmem:[#allocation72_spill] sm:$0xff] }
  0xe2   : > { %2373 = vrot.lane.b32.xlu1 %v10137_v48, %s9430_s18  ;;  %7610 = vrot.lane.b32.xlu0 %v7589_v31, %s9432_s8  ;;  %v7619_v31 = vpack.i.bf16 %v15262_v17, %v15261_v16  ;;  %v15283_v17 = vunpack.c.l.bf16 %v9679_v23 }
  0xe4   : > { %v2324_v45 = vpop.permute.xlu1 %2323  ;;  %v2322_v47 = vpop.permute.xlu0 %2321 }
  0xe5   : > { %7261 = vmatmul.mubr.msk.bf16.gmra.mrb[40].mxu1 %vm1478_vm0, %v1875_v19  ;;  %7328 = vmatprep.mubr.msk.bf16.mxu0 %vm1478_vm0, %v2322_v47 }
  0xe6   : > { %2375 = vrot.lane.b32.xlu1 %v10153_v56, %s9430_s18  ;;  %7615 = vrot.lane.b32.xlu0 %v7594_v41, %s9432_s8 }
  0xe7   : > { %7329 = vmatmul.mubr.msk.bf16.gmra.mrb[40].mxu0 %vm1478_vm0, %v2324_v45 }
  0xe8   : > { %v1879_v19 = vpop.permute.xlu1 %1878  ;;  %v1877_v53 = vpop.permute.xlu0 %1876 }
  0xe9   : > { %7264 = vmatprep.mubr.msk.bf16.mxu1 %vm1478_vm0, %v1877_v53  ;;  %v15282_v53 = vunpack.c.l.bf16 %v9676_v22  ;;  %v15880_v22 = vld [vmem:[#allocation76_spill] sm:$0xff] }
  0xea   : > { %7625 = vrot.lane.b32.xlu1 %v7624_v51, %s9431_s20  ;;  %7620 = vrot.lane.b32.xlu0 %v7619_v31, %s9431_s20 }
  0xec   : > { %v2328_v41 = vpop.permute.xlu1 %2327  ;;  %v2326_v47 = vpop.permute.xlu0 %2325 }
  0xed   : > { %7265 = vmatmul.mubr.msk.bf16.gmra.mrb[44].mxu1 %vm1478_vm0, %v1879_v19  ;;  %7332 = vmatprep.mubr.msk.bf16.mxu0 %vm1478_vm0, %v2326_v47  ;;  %v15265_v19 = vunpack.c.l.bf16 %v9685_v25  ;;  %v15879_v25 = vld [vmem:[#allocation73_spill] sm:$0xff] }
  0xee   : > { %2762 = vrot.lane.b32.xlu1 %v9647_v13, %s9432_s8  ;;  %7630 = vrot.lane.b32.xlu0 %v7619_v31, %s9430_s18 }
  0xef   : > { %7333 = vmatmul.mubr.msk.bf16.gmra.mrb[44].mxu0 %vm1478_vm0, %v2328_v41 }
  0xf0   : > { %v1883_v45 = vpop.permute.xlu1 %1882  ;;  %v1881_v16 = vpop.permute.xlu0 %1880 }
  0xf1   : > { %7268 = vmatprep.mubr.msk.bf16.mxu1 %vm1478_vm0, %v1881_v16  ;;  %v7654_v16 = vpack.i.bf16 %v15283_v17, %v15282_v53  ;;  %v15848_v53 = vld [vmem:[#allocation70_spill] sm:$0xff]  ;;  %v15851_v17 = vld [vmem:[#allocation20_spill] sm:$0xff] }
  0xf2   : > { %2764 = vrot.lane.b32.xlu1 %v9649_v14, %s9432_s8  ;;  %7635 = vrot.lane.b32.xlu0 %v7624_v51, %s9430_s18  ;;  %v7649_v14 = vpack.i.bf16 %v15265_v19, %v15264_v28  ;;  %v15281_v28 = vunpack.c.l.bf16 %v9716_v33  ;;  %v15266_v19 = vunpack.c.l.bf16 %v9738_v39  ;;  %v15884_v33 = vld [vmem:[#allocation66_spill] sm:$0xff]  ;;  %v15885_v23 = vunpack.c.l.bf16 %v15851_v17 }
  0xf4   : > { %v2332_v13 = vpop.permute.xlu1 %2331  ;;  %v2330_v47 = vpop.permute.xlu0 %2329 }
  0xf5   : > { %7269 = vmatmul.mubr.msk.bf16.gmra.mrb[48].mxu1 %vm1478_vm0, %v1883_v45  ;;  %7336 = vmatprep.mubr.msk.bf16.mxu0 %vm1478_vm0, %v2330_v47 }
  0xf6   : > { %7645 = vrot.lane.b32.xlu1 %v7624_v51, %s9432_s8  ;;  %7640 = vrot.lane.b32.xlu0 %v7619_v31, %s9432_s8 }
  0xf7   : > { %7337 = vmatmul.mubr.msk.bf16.gmra.mrb[48].mxu0 %vm1478_vm0, %v2332_v13 }
  0xf8   : > { %v1887_v41 = vpop.permute.xlu1 %1886  ;;  %v1885_v45 = vpop.permute.xlu0 %1884 }
  0xf9   : > { %7272 = vmatprep.mubr.msk.bf16.mxu1 %vm1478_vm0, %v1885_v45  ;;  %v15280_v45 = vunpack.c.l.bf16 %v9713_v32  ;;  %v15873_v32 = vld [vmem:[#allocation60_spill] sm:$0xff] }
  0xfa   : > { %7655 = vrot.lane.b32.xlu1 %v7654_v16, %s9431_s20  ;;  %7650 = vrot.lane.b32.xlu0 %v7649_v14, %s9431_s20 }
  0xfc   : > { %v2336_v51 = vpop.permute.xlu1 %2335  ;;  %v2334_v31 = vpop.permute.xlu0 %2333 }
  0xfd   : > { %7273 = vmatmul.mubr.msk.bf16.gmra.mrb[52].mxu1 %vm1478_vm0, %v1887_v41  ;;  %7340 = vmatprep.mubr.msk.bf16.mxu0 %vm1478_vm0, %v2334_v31  ;;  %v15267_v41 = vunpack.c.l.bf16 %v9741_v40  ;;  %v15872_v40 = vld [vmem:[#allocation53_spill] sm:$0xff] }
  0xfe   : > { %2766 = vrot.lane.b32.xlu1 %v9673_v21, %s9432_s8  ;;  %7660 = vrot.lane.b32.xlu0 %v7649_v14, %s9430_s18 }
  0xff   : > { %7341 = vmatmul.mubr.msk.bf16.gmra.mrb[52].mxu0 %vm1478_vm0, %v2336_v51  ;;  %v7684_v51 = vpack.i.bf16 %v15281_v28, %v15280_v45  ;;  %v15846_v45 = vld [vmem:[#allocation68_spill] sm:$0xff]  ;;  %v15850_v28 = vld [vmem:[#allocation19_spill] sm:$0xff] }
 0x100   : > { %v1891_v13 = vpop.permute.xlu1 %1890  ;;  %v1889_v47 = vpop.permute.xlu0 %1888  ;;  %v15854_v56 = vunpack.c.l.bf16 %v15846_v45 }
 0x101   : > { %7276 = vmatprep.mubr.msk.bf16.mxu1 %vm1478_vm0, %v1889_v47 }
 0x102   : > { %2768 = vrot.lane.b32.xlu1 %v9671_v20, %s9432_s8  ;;  %7665 = vrot.lane.b32.xlu0 %v7654_v16, %s9430_s18  ;;  %v7679_v20 = vpack.i.bf16 %v15267_v41, %v15266_v19  ;;  %v15275_v19 = vunpack.c.l.bf16 %v9817_v4  ;;  %v15268_v41 = vunpack.c.l.bf16 %v9820_v5  ;;  %v15866_v5 = vld [vmem:[#allocation41_spill] sm:$0xff]  ;;  %v15869_v4 = vld [vmem:[#allocation50_spill] sm:$0xff] }
 0x104   : > { %v2340_v21 = vpop.permute.xlu1 %2339  ;;  %v2338_v31 = vpop.permute.xlu0 %2337 }
 0x105   : > { %7277 = vmatmul.mubr.msk.bf16.gmra.mrb[56].mxu1 %vm1478_vm0, %v1891_v13  ;;  %7344 = vmatprep.mubr.msk.bf16.mxu0 %vm1478_vm0, %v2338_v31 }
 0x106   : > { %7675 = vrot.lane.b32.xlu1 %v7654_v16, %s9432_s8  ;;  %7670 = vrot.lane.b32.xlu0 %v7649_v14, %s9432_s8 }
 0x107   : > { %7345 = vmatmul.mubr.msk.bf16.gmra.mrb[56].mxu0 %vm1478_vm0, %v2340_v21 }
 0x108   : > { %v1895_v47 = vpop.permute.xlu1 %1894  ;;  %v1893_v13 = vpop.permute.xlu0 %1892 }
 0x109   : > { %7280 = vmatprep.mubr.msk.bf16.mxu1 %vm1478_vm0, %v1893_v13  ;;  %v15274_v13 = vunpack.c.l.bf16 %v9810_v61  ;;  %v15868_v61 = vld [vmem:[#allocation49_spill] sm:$0xff] }
 0x10a   : > { %7685 = vrot.lane.b32.xlu1 %v7684_v51, %s9431_s20  ;;  %7680 = vrot.lane.b32.xlu0 %v7679_v20, %s9431_s20 }
 0x10c   : > { %v2344_v16 = vpop.permute.xlu1 %2343  ;;  %v2342_v14 = vpop.permute.xlu0 %2341 }
 0x10d   : > { %7281 = vmatmul.mubr.msk.bf16.gmra.mrb[60].mxu1 %vm1478_vm0, %v1895_v47  ;;  %7348 = vmatprep.mubr.msk.bf16.mxu0 %vm1478_vm0, %v2342_v14  ;;  %v15269_v47 = vunpack.c.l.bf16 %v9823_v8  ;;  %v15867_v8 = vld [vmem:[#allocation42_spill] sm:$0xff] }
 0x10e   : > { %2770 = vrot.lane.b32.xlu1 %v9729_v36, %s9432_s8  ;;  %7690 = vrot.lane.b32.xlu0 %v7679_v20, %s9430_s18 }
 0x10f   : > { %7349 = vmatmul.mubr.msk.bf16.gmra.mrb[60].mxu0 %vm1478_vm0, %v2344_v16  ;;  %v7714_v16 = vpack.i.bf16 %v15275_v19, %v15274_v13 }
 0x110   : > { %v1899_v21 = vpop.permute.xlu1 %1898  ;;  %v1897_v31 = vpop.permute.xlu0 %1896 }
 0x111   : > { %7284 = vmatprep.mubr.msk.bf16.mxu1 %vm1478_vm0, %v1897_v31 }
 0x112   : > { %2772 = vrot.lane.b32.xlu1 %v9727_v35, %s9432_s8  ;;  %7695 = vrot.lane.b32.xlu0 %v7684_v51, %s9430_s18  ;;  %v7709_v35 = vpack.i.bf16 %v15269_v47, %v15268_v41  ;;  %v15273_v41 = vunpack.c.l.bf16 %v9887_v59  ;;  %v15270_v47 = vunpack.c.l.bf16 %v9890_v62  ;;  %v15859_v62 = vld [vmem:[#allocation28_spill] sm:$0xff] }
 0x114   : > { %v2348_v36 = vpop.permute.xlu1 %2347  ;;  %v2346_v14 = vpop.permute.xlu0 %2345 }
 0x115   : > { %7285 = vmatmul.mubr.msk.bf16.gmra.mrb[64].mxu1 %vm1478_vm0, %v1899_v21  ;;  %7352 = vmatprep.mubr.msk.bf16.mxu0 %vm1478_vm0, %v2346_v14 }
 0x116   : > { %7705 = vrot.lane.b32.xlu1 %v7684_v51, %s9432_s8  ;;  %7700 = vrot.lane.b32.xlu0 %v7679_v20, %s9432_s8 }
 0x117   : > { %7353 = vmatmul.mubr.msk.bf16.gmra.mrb[64].mxu0 %vm1478_vm0, %v2348_v36 }
 0x118   : > { %v1903_v31 = vpop.permute.xlu1 %1902  ;;  %v1901_v21 = vpop.permute.xlu0 %1900 }
 0x119   : > { %7288 = vmatprep.mubr.msk.bf16.mxu1 %vm1478_vm0, %v1901_v21  ;;  %v15272_v21 = vunpack.c.l.bf16 %v9884_v55  ;;  %v15864_v55 = vld [vmem:[#allocation38_spill] sm:$0xff] }
 0x11a   : > { %7715 = vrot.lane.b32.xlu1 %v7714_v16, %s9431_s20  ;;  %7710 = vrot.lane.b32.xlu0 %v7709_v35, %s9431_s20 }
 0x11c   : > { %v2352_v51 = vpop.permute.xlu1 %2351  ;;  %v2350_v20 = vpop.permute.xlu0 %2349 }
 0x11d   : > { %7289 = vmatmul.mubr.msk.bf16.gmra.mrb[68].mxu1 %vm1478_vm0, %v1903_v31  ;;  %7356 = vmatprep.mubr.msk.bf16.mxu0 %vm1478_vm0, %v2350_v20  ;;  %v15271_v31 = vunpack.c.l.bf16 %v9893_v63  ;;  %v15860_v63 = vld [vmem:[#allocation29_spill] sm:$0xff] }
 0x11e   : > { %2774 = vrot.lane.b32.xlu1 %v9807_v60, %s9432_s8  ;;  %7720 = vrot.lane.b32.xlu0 %v7709_v35, %s9430_s18 }
 0x11f   : > { %7357 = vmatmul.mubr.msk.bf16.gmra.mrb[68].mxu0 %vm1478_vm0, %v2352_v51  ;;  %v7744_v51 = vpack.i.bf16 %v15273_v41, %v15272_v21  ;;  %v15841_v21 = vld [vmem:[#allocation57_spill] sm:$0xff] }
 0x120   : > { %v1907_v36 = vpop.permute.xlu1 %1906  ;;  %v1905_v14 = vpop.permute.xlu0 %1904  ;;  %v15276_v41 = vunpack.c.l.bf16 %v15841_v21 }
 0x121   : > { %7292 = vmatprep.mubr.msk.bf16.mxu1 %vm1478_vm0, %v1905_v14 }
 0x122   : > { %2776 = vrot.lane.b32.xlu1 %v9796_v58, %s9432_s8  ;;  %7725 = vrot.lane.b32.xlu0 %v7714_v16, %s9430_s18  ;;  %v7739_v58 = vpack.i.bf16 %v15271_v31, %v15270_v47  ;;  %v15840_v47 = vld [vmem:[#allocation56_spill] sm:$0xff] }
 0x123   : > { %v15279_v31 = vunpack.c.l.bf16 %v15840_v47  ;;  %v15858_v47 = vld [vmem:[#allocation26_spill] sm:$0xff] }
 0x124   : > { %v2356_v60 = vpop.permute.xlu1 %2355  ;;  %v2354_v20 = vpop.permute.xlu0 %2353 }
 0x125   : > { %7293 = vmatmul.mubr.msk.bf16.gmra.mrb[72].mxu1 %vm1478_vm0, %v1907_v36  ;;  %7360 = vmatprep.mubr.msk.bf16.mxu0 %vm1478_vm0, %v2354_v20 }
 0x126   : > { %7735 = vrot.lane.b32.xlu1 %v7714_v16, %s9432_s8  ;;  %7730 = vrot.lane.b32.xlu0 %v7709_v35, %s9432_s8 }
 0x127   : > { %7361 = vmatmul.mubr.msk.bf16.gmra.mrb[72].mxu0 %vm1478_vm0, %v2356_v60 }
 0x128   : > { %v1911_v14 = vpop.permute.xlu1 %1910  ;;  %v1909_v36 = vpop.permute.xlu0 %1908 }
 0x129   : > { %7296 = vmatprep.mubr.msk.bf16.mxu1 %vm1478_vm0, %v1909_v36  ;;  %v15278_v36 = vunpack.c.l.bf16 %v9948_v54 }
 0x12a   : > { %7745 = vrot.lane.b32.xlu1 %v7744_v51, %s9431_s20  ;;  %7740 = vrot.lane.b32.xlu0 %v7739_v58, %s9431_s20 }
 0x12c   : > { %v2360_v16 = vpop.permute.xlu1 %2359  ;;  %v2358_v35 = vpop.permute.xlu0 %2357 }
 0x12d   : > { %7297 = vmatmul.mubr.msk.bf16.gmra.mrb[76].mxu1 %vm1478_vm0, %v1911_v14  ;;  %7364 = vmatprep.mubr.msk.bf16.mxu0 %vm1478_vm0, %v2358_v35  ;;  %v15842_v14 = vld [vmem:[#allocation58_spill] sm:$0xff]  ;;  %v15843_v35 = vld [vmem:[#allocation43_spill] sm:$0xff] }
 0x12e   : > { %2778 = vrot.lane.b32.xlu1 %v9881_v49, %s9432_s8  ;;  %7750 = vrot.lane.b32.xlu0 %v7739_v58, %s9430_s18  ;;  %v15277_v13 = vunpack.c.l.bf16 %v15842_v14 }
 0x12f   : > { %7365 = vmatmul.mubr.msk.bf16.gmra.mrb[76].mxu0 %vm1478_vm0, %v2360_v16  ;;  %v7774_v16 = vpack.i.bf16 %v15279_v31, %v15278_v36  ;;  %v15845_v36 = vld [vmem:[#allocation67_spill] sm:$0xff]  ;;  %v15849_v31 = vld [vmem:[#allocation16_spill] sm:$0xff] }
 0x130   : > { %v1915_v60 = vpop.permute.xlu1 %1914  ;;  %v1913_v20 = vpop.permute.xlu0 %1912  ;;  %v15853_v21 = vunpack.c.l.bf16 %v15845_v36  ;;  %v15875_v36 = vld [vmem:[#allocation61_spill] sm:$0xff] }
 0x131   : > { %7300 = vmatprep.mubr.msk.bf16.mxu1 %vm1478_vm0, %v1913_v20  ;;  %v7769_v20 = vpack.i.bf16 %v15277_v13, %v15276_v41 }
 0x132   : > { %2780 = vrot.lane.b32.xlu1 %v15843_v35, %s9432_s8  ;;  %7755 = vrot.lane.b32.xlu0 %v7744_v51, %s9430_s18  ;;  %v10450_v14 = vpack.i.bf16 %v15854_v56, %v15853_v21 }
 0x134   : > { %v2364_v49 = vpop.permute.xlu1 %2363  ;;  %v2362_v19 = vpop.permute.xlu0 %2361 }
 0x135   : > { %7301 = vmatmul.mubr.msk.bf16.gmra.mrb[80].mxu1 %vm1478_vm0, %v1915_v60  ;;  %7368 = vmatprep.mubr.msk.bf16.mxu0 %vm1478_vm0, %v2362_v19 }
 0x136   : > { %7765 = vrot.lane.b32.xlu1 %v7744_v51, %s9432_s8  ;;  %7760 = vrot.lane.b32.xlu0 %v7739_v58, %s9432_s8  ;;  %v15844_v58 = vld [vmem:[#allocation54_spill] sm:$0xff] }
 0x137   : > { %7369 = vmatmul.mubr.msk.bf16.gmra.mrb[80].mxu0 %vm1478_vm0, %v2364_v49  ;;  %v10419_v49 = vpop.f32.mrb[0].mxu0 }
 0x138   : > { %v1919_v35 = vpop.permute.xlu1 %1918  ;;  %v1917_v60 = vpop.permute.xlu0 %1916 }
 0x139   : > { %7304 = vmatprep.mubr.msk.bf16.mxu1 %vm1478_vm0, %v1917_v60  ;;  %v10422_v60 = vpop.f32.mrb[1].mxu0 }
 0x13a   : > { %7775 = vrot.lane.b32.xlu1 %v7774_v16, %s9431_s20  ;;  %7770 = vrot.lane.b32.xlu0 %v7769_v20, %s9431_s20 }
 0x13c   : > { %v2368_v19 = vpop.permute.xlu1 %2367  ;;  %v2366_v51 = vpop.permute.xlu0 %2365 }
 0x13d   : > { %7305 = vmatmul.mubr.msk.bf16.gmra.mrb[84].mxu1 %vm1478_vm0, %v1919_v35  ;;  %7372 = vmatprep.mubr.msk.bf16.mxu0 %vm1478_vm0, %v2366_v51  ;;  %v10427_v35 = vpop.f32.mrb[2].mxu0  ;;  %v15847_v51 = vld [vmem:[#allocation69_spill] sm:$0xff] }
 0x13e   : > { %2782 = vrot.lane.b32.xlu1 %v15844_v58, %s9432_s8  ;;  %7780 = vrot.lane.b32.xlu0 %v7769_v20, %s9430_s18 }
 0x13f   : > { %7373 = vmatmul.mubr.msk.bf16.gmra.mrb[84].mxu0 %vm1478_vm0, %v2368_v19  ;;  %v10434_v19 = vpop.f32.mrb[3].mxu0 }
 0x140   : > { %v1923_v41 = vpop.permute.xlu1 %1922  ;;  %v1921_v13 = vpop.permute.xlu0 %1920 }
 0x141   : > { %7308 = vmatprep.mubr.msk.bf16.mxu1 %vm1478_vm0, %v1921_v13  ;;  %v10440_v13 = vpop.f32.mrb[0].mxu1  ;;  %v10460_v58 = vpop.f32.mrb[4].mxu0 }
 0x142   : > { %2784 = vrot.lane.b32.xlu1 %v9943_v15, %s9432_s8  ;;  %7785 = vrot.lane.b32.xlu0 %v7774_v16, %s9430_s18  ;;  %v10458_v54 = vpop.f32.mrb[1].mxu1  ;;  %v15857_v15 = vld [vmem:[#allocation24_spill] sm:$0xff]  ;;  %v10469_v21 = vpop.f32.mrb[5].mxu0 }
 0x143   : > { %v10467_v56 = vpop.f32.mrb[2].mxu1  ;;  %15861 = vst [vmem:[#allocation43_spill] sm:$0xff] %v10469_v21  ;;  %v10481_v39 = vpop.f32.mrb[6].mxu0 }
 0x144   : > { %v2372_v26 = vpop.permute.xlu1 %2371  ;;  %v2370_v48 = vpop.permute.xlu0 %2369  ;;  %15870 = vst [vmem:[#allocation54_spill] sm:$0xff] %v10481_v39 }
 0x145   : > { %7309 = vmatmul.mubr.msk.bf16.gmra.mrb[88].mxu1 %vm1478_vm0, %v1923_v41  ;;  %7376 = vmatprep.mubr.msk.bf16.mxu0 %vm1478_vm0, %v2370_v48  ;;  %v15855_v41 = vunpack.c.l.bf16 %v15847_v51  ;;  %v15856_v48 = vunpack.c.l.bf16 %v15848_v53  ;;  %v15863_v51 = vld [vmem:[#allocation31_spill] sm:$0xff]  ;;  %v10479_v42 = vpop.f32.mrb[3].mxu1  ;;  %v10490_v45 = vpop.f32.mrb[7].mxu0 }
 0x146   : > { %7795 = vrot.lane.b32.xlu1 %v7774_v16, %s9432_s8  ;;  %7790 = vrot.lane.b32.xlu0 %v7769_v20, %s9432_s8  ;;  %15874 = vst [vmem:[#allocation89_spill] sm:$0xff] %v10490_v45  ;;  %v10502_v27 = vpop.f32.mrb[4].mxu1  ;;  %v15886_v16 = vunpack.c.l.bf16 %v15852_v57  ;;  %v15887_v45 = vunpack.c.l.bf16 %v15849_v31  ;;  %v15892_v57 = vunpack.c.l.bf16 %v15859_v62  ;;  %v15894_v31 = vunpack.c.l.bf16 %v15857_v15 }
 0x147   : > { %v10456_v38 = vpack.i.bf16 %v15856_v48, %v15855_v41  ;;  %7377 = vmatmul.mubr.msk.bf16.gmra.mrb[88].mxu0 %vm1478_vm0, %v2372_v26  ;;  %v15862_v41 = vld [vmem:[#allocation30_spill] sm:$0xff]  ;;  %v15871_v48 = vld [vmem:[#allocation52_spill] sm:$0xff]  ;;  %v15876_v26 = vld [vmem:[#allocation63_spill] sm:$0xff]  ;;  %15883 = vst [vmem:[#allocation90_spill] sm:$0xff] %v10502_v27  ;;  %v10521_v53 = vpop.f32.mrb[5].mxu1  ;;  %v10523_v9 = vpop.f32.mrb[8].mxu0 }
 0x148   : > { %v7596_v43 = vpop.permute.xlu1 %7595  ;;  %v7591_v20 = vpop.permute.xlu0 %7590  ;;  %v10513_v50 = vpack.i.bf16 %v15886_v16, %v15885_v23  ;;  %15889 = vst [vmem:[#allocation66_spill] sm:$0xff] %v10523_v9  ;;  %v15893_v23 = vunpack.c.l.bf16 %v15860_v63  ;;  %v15903_v63 = vunpack.c.l.bf16 %v15862_v41  ;;  %v15916_v41 = vunpack.c.l.bf16 %v15872_v40 }
 0x149   : > { %v10527_v46 = vpop.f32.mrb[9].mxu0 }
 0x14a   : > { %7805 = vrot.lane.b32.xlu1 %v10450_v14, %s9431_s20  ;;  %7800 = vrot.lane.b32.xlu0 %v10456_v38, %s9431_s20  ;;  %15891 = vst [vmem:[#allocation92_spill] sm:$0xff] %v10527_v46  ;;  %v10533_v16 = vpack.i.bf16 %v15893_v23, %v15892_v57  ;;  %v10544_v9 = vpop.f32.mrb[10].mxu0  ;;  %v15898_v46 = vld [vmem:[#allocation65_spill] sm:$0xff]  ;;  %v15899_v57 = vunpack.c.l.bf16 %v15864_v55  ;;  %v15900_v23 = vunpack.c.l.bf16 %v15865_v29 }
 0x14b   : > { %15897 = vst [vmem:[#allocation94_spill] sm:$0xff] %v10544_v9 }
 0x14c   : > { %v1925_v39 = vpop.permute.xlu1 %1924  ;;  %v7601_v21 = vpop.permute.xlu0 %7600  ;;  %v10554_v15 = vpack.i.bf16 %v15900_v23, %v15899_v57  ;;  %v15905_v23 = vunpack.c.l.bf16 %v9629_v6  ;;  %v15908_v6 = vunpack.c.l.bf16 %v15869_v4  ;;  %v15915_v4 = vunpack.c.l.bf16 %v15871_v48 }
 0x14d   : > { %7312 = vmatprep.mubr.msk.bf16.mxu1 %vm1478_vm0, %v1925_v39  ;;  %v15888_v39 = vunpack.c.l.bf16 %v15850_v28 }
 0x14e   : > { %2786 = vrot.lane.b32.xlu1 %v15884_v33, %s9432_s8  ;;  %7810 = vrot.lane.b32.xlu0 %v10456_v38, %s9430_s18  ;;  %v10525_v33 = vpop.f32.mrb[6].mxu1 }
 0x14f   : > { %v10519_v59 = vpack.i.bf16 %v15888_v39, %v15887_v45  ;;  %15890 = vst [vmem:[#allocation91_spill] sm:$0xff] %v10525_v33  ;;  %v15895_v45 = vunpack.c.l.bf16 %v15858_v47  ;;  %v10542_v28 = vpop.f32.mrb[7].mxu1  ;;  %v15902_v47 = vunpack.c.l.bf16 %v9616_v0  ;;  %v9107_v0 = vadd.high.f32.bf16 %v15905_v23, %v7596_v43 }
 0x150   : > { %v1927_v27 = vpop.permute.xlu1 %1926  ;;  %v7606_v17 = vpop.permute.xlu0 %7605  ;;  %15896 = vst [vmem:[#allocation93_spill] sm:$0xff] %v10542_v28 }
 0x151   : > { %v10539_v39 = vpack.i.bf16 %v15895_v45, %v15894_v31  ;;  %7313 = vmatmul.mubr.msk.bf16.gmra.mrb[92].mxu1 %vm1478_vm0, %v1927_v27  ;;  %v10556_v31 = vpop.f32.mrb[11].mxu0  ;;  %v15901_v27 = vunpack.c.l.bf16 %v9619_v1  ;;  %v9104_v62 = vadd.low.f32.bf16 %v15902_v47, %v7591_v20  ;;  %v10569_v57 = vpop.f32.mrb[8].mxu1  ;;  %v15906_v47 = vunpack.c.l.bf16 %v9622_v2 }
 0x152   : > { %2788 = vrot.lane.b32.xlu1 %v15898_v46, %s9432_s8  ;;  %7815 = vrot.lane.b32.xlu0 %v10450_v14, %s9430_s18  ;;  %v15904_v46 = vunpack.c.l.bf16 %v15863_v51  ;;  %v15910_v2 = vunpack.c.l.bf16 %v15866_v5  ;;  %v9111_v23 = vadd.high.f32.bf16 %v9107_v0, %v7606_v17  ;;  %v10627_v51 = vpack.i.bf16 %v15916_v41, %v15915_v4 }
 0x153   : > { %v9103_v45 = vadd.high.f32.bf16 %v15901_v27, %v7591_v20  ;;  %v9105_v33 = vadd.low.f32.bf16 %v9104_v62, %v7601_v21  ;;  %v9108_v20 = vadd.low.f32.bf16 %v15906_v47, %v7596_v43  ;;  %v10580_v62 = vpop.f32.mrb[9].mxu1  ;;  %v15907_v27 = vunpack.c.l.bf16 %v15868_v61 }
 0x154   : > { %v10566_v9 = vpack.i.bf16 %v15904_v46, %v15903_v63  ;;  %v2374_v28 = vpop.permute.xlu1 %2373  ;;  %v7611_v55 = vpop.permute.xlu0 %7610  ;;  %v15911_v43 = vunpack.c.l.bf16 %v15867_v8 }
 0x155   : > { %v9106_v29 = vadd.high.f32.bf16 %v9103_v45, %v7601_v21  ;;  %7380 = vmatprep.mubr.msk.bf16.mxu0 %vm1478_vm0, %v2374_v28  ;;  %v10582_v63 = vpop.f32.mrb[12].mxu0  ;;  %v9109_v28 = vadd.low.f32.bf16 %v9105_v33, %v7611_v55  ;;  %v10588_v45 = vpack.i.bf16 %v15908_v6, %v15907_v27  ;;  %v10596_v46 = vpop.f32.mrb[10].mxu1  ;;  %v9112_v47 = vadd.low.f32.bf16 %v9108_v20, %v7606_v17  ;;  %v10613_v17 = vld [vmem:[%s15174_s2] ss:$0 sm:$0xff] }
 0x156   : > { %7825 = vrot.lane.b32.xlu1 %v10450_v14, %s9432_s8  ;;  %7820 = vrot.lane.b32.xlu0 %v10456_v38, %s9432_s8  ;;  %v10594_v14 = vpack.i.bf16 %v15911_v43, %v15910_v2  ;;  %v10598_v38 = vpop.f32.mrb[13].mxu0  ;;  %v10601_v27 = vpop.f32.mrb[11].mxu1  ;;  %v15913_v20 = vunpack.c.l.bf16 %v15873_v32  ;;  %v10631_v32 = vadd.f32 %v10419_v49, %v10613_v17  ;;  %v15920_v49 = vunpack.c.l.bf16 %v15879_v25 }
 0x157   : > { %v9110_v21 = vadd.high.f32.bf16 %v9106_v29, %v7611_v55  ;;  %15909 = vst [vmem:[#allocation65_spill] sm:$0xff] %v10588_v45  ;;  %v1172_v29 = vmul.f32 0.25, %v9109_v28  ;;  %v10603_v6 = vpop.f32.mrb[14].mxu0  ;;  %v15914_v28 = vunpack.c.l.bf16 %v15875_v36 }
 0x158   : > { %15912 = vst [vmem:[#allocation95_spill] sm:$0xff] %v10594_v14  ;;  %v2376_v33 = vpop.permute.xlu1 %2375  ;;  %v7616_v55 = vpop.permute.xlu0 %7615  ;;  %15917 = vst [vmem:[#allocation96_spill] sm:$0xff] %v10631_v32 }
 0x159   : > { %v1173_v1 = vmul.f32 0.25, %v9110_v21  ;;  %7381 = vmatmul.mubr.msk.bf16.gmra.mrb[92].mxu0 %vm1478_vm0, %v2376_v33  ;;  %v10615_v0 = vpop.f32.mrb[15].mxu0  ;;  %v10621_v21 = vpack.i.bf16 %v15914_v28, %v15913_v20  ;;  %v3211_v2 = vmax.f32 %v1172_v29, 0.0  ;;  %v9113_v33 = vadd.low.f32.bf16 %v9112_v47, %v7616_v55  ;;  %v10633_v20 = vpop.f32.mrb[12].mxu1 }
 0x15a   : > { %7835 = vrot.lane.b32.xlu1 %v10513_v50, %s9431_s20  ;;  %7830 = vrot.lane.b32.xlu0 %v10519_v59, %s9431_s20  ;;  %v9114_v5 = vadd.high.f32.bf16 %v9111_v23, %v7616_v55  ;;  %v15918_v23 = vld [vmem:[#allocation77_spill] sm:$0xff]  ;;  %v10640_v55 = vpop.f32.mrb[13].mxu1  ;;  %v10642_v4 = vpop.f32.mrb[16].mxu0  ;;  %v15922_v29 = vunpack.c.l.bf16 %v15876_v26  ;;  %v15923_v28 = vunpack.c.l.bf16 %v15877_v18  ;;  %v15926_v26 = vunpack.c.l.bf16 %v15881_v52  ;;  %v15944_v52 = vld [vmem:[#allocation11_spill] sm:$0xff] }
 0x15b   : > { %v3212_v43 = vmax.f32 %v1173_v1, 0.0  ;;  %v1174_v14 = vmul.f32 0.25, %v9113_v33  ;;  %v10662_v48 = vpop.f32.mrb[17].mxu0  ;;  %v15927_v18 = vunpack.c.l.bf16 %v15882_v11 }
 0x15c   : > { %v7626_v8 = vpop.permute.xlu1 %7625  ;;  %v7621_v61 = vpop.permute.xlu0 %7620  ;;  %v1175_v45 = vmul.f32 0.25, %v9114_v5  ;;  %v15919_v5 = vunpack.c.l.bf16 %v15878_v24  ;;  %v10654_v33 = vpack.i.bf16 %v15923_v28, %v15922_v29  ;;  %v15931_v24 = vunpack.c.l.bf16 %v15880_v22 }
 0x15d   : > { %v3275_v47 = vpack.c.bf16 %v3212_v43, %v3211_v2  ;;  %v10658_v2 = vadd.f32 %v10613_v17, %v10422_v60  ;;  %v10660_v43 = vpop.f32.mrb[14].mxu1  ;;  %v10669_v29 = vpack.i.bf16 %v15927_v18, %v15926_v26  ;;  %v10673_v60 = vmul.f32 0.5, %v10631_v32  ;;  %v10677_v28 = vpop.f32.mrb[18].mxu0 }
 0x15e   : > { %2790 = vrot.lane.b32.xlu1 %v15918_v23, %s9432_s8  ;;  %7840 = vrot.lane.b32.xlu0 %v10519_v59, %s9430_s18  ;;  %v10648_v41 = vpack.i.bf16 %v15920_v49, %v15919_v5  ;;  %15924 = vst [vmem:[#allocation97_spill] sm:$0xff] %v10654_v33  ;;  %v3213_v23 = vmax.f32 %v1174_v14, 0.0  ;;  %v3214_v1 = vmax.f32 %v1175_v45, 0.0  ;;  %v10675_v45 = vpop.f32.mrb[15].mxu1  ;;  %v10691_v18 = vadd.f32 %v10427_v35, %v10613_v17  ;;  %v10693_v26 = vpop.f32.mrb[19].mxu0 }
 0x15f   : > { %15925 = vst [vmem:[#allocation98_spill] sm:$0xff] %v10658_v2  ;;  %7456 = vmatprep.mubr.msk.bf16.mxu0 %vm1478_vm0, %v3275_v47  ;;  %15928 = vst [vmem:[#allocation99_spill] sm:$0xff] %v10669_v29  ;;  %v15930_v47 = vunpack.c.l.bf16 %v10056_v34  ;;  %v15942_v32 = vunpack.c.l.bf16 %v9632_v7 }
 0x160   : > { %15921 = vst [vmem:[#allocation77_spill] sm:$0xff] %v10648_v41  ;;  %v2763_v5 = vpop.permute.xlu1 %2762  ;;  %v7631_v49 = vpop.permute.xlu0 %7630  ;;  %v3276_v14 = vpack.c.bf16 %v3214_v1, %v3213_v23  ;;  %15929 = vst [vmem:[#allocation100_spill] sm:$0xff] %v10673_v60  ;;  %v10698_v1 = vadd.f32 %v10440_v13, %v10613_v17  ;;  %v10709_v23 = vadd.f32 %v10613_v17, %v10434_v19  ;;  %v15971_v60 = vld [vmem:[#allocation92_spill] sm:$0xff]  ;;  %v15989_v41 = vld [vmem:[#allocation14_spill] sm:$0xff] }
 0x161   : > { %7388 = vmatprep.mubr.msk.bf16.mxu1 %vm1478_vm0, %v2763_v5  ;;  %v10683_v25 = vpack.i.bf16 %v15931_v24, %v15930_v47  ;;  %15933 = vst [vmem:[#allocation102_spill] sm:$0xff] %v10691_v18  ;;  %v10701_v24 = vmul.f32 0.5, %v10658_v2  ;;  %v10717_v13 = vadd.f32 %v10460_v58, %v10613_v17  ;;  %v15940_v47 = vunpack.c.l.bf16 %v9639_v10  ;;  %v10726_v19 = vpop.f32.mrb[16].mxu1 }
 0x162   : > { %2792 = vrot.lane.b32.xlu1 %v10071_v30, %s9432_s8  ;;  %7845 = vrot.lane.b32.xlu0 %v10513_v50, %s9430_s18  ;;  %15934 = vst [vmem:[#allocation103_spill] sm:$0xff] %v10698_v1  ;;  %v10705_v30 = vadd.f32 %v10613_v17, %v10458_v54  ;;  %15937 = vst [vmem:[#allocation106_spill] sm:$0xff] %v10709_v23  ;;  %v10724_v54 = vadd.f32 %v10613_v17, %v10479_v42  ;;  %v15945_v58 = vunpack.c.l.bf16 %v15944_v52  ;;  %v10741_v42 = vpop.f32.mrb[17].mxu1 }
 0x163   : > { %15932 = vst [vmem:[#allocation101_spill] sm:$0xff] %v10683_v25  ;;  %7457 = vmatmul.mubr.msk.bf16.vlgmr.msra.gmra.mrb[96].mxu0 %vm1478_vm0, %v3276_v14  ;;  %15935 = vst [vmem:[#allocation104_spill] sm:$0xff] %v10701_v24  ;;  %v10713_v14 = vadd.f32 %v10467_v56, %v10613_v17  ;;  %v9115_v2 = vadd.high.f32.bf16 %v15940_v47, %v7626_v8  ;;  %v9116_v34 = vadd.low.f32.bf16 %v15942_v32, %v7626_v8  ;;  %v15949_v32 = vld [vmem:[#allocation43_spill] sm:$0xff] }
 0x164   : > { %15936 = vst [vmem:[#allocation105_spill] sm:$0xff] %v10705_v30  ;;  %v2765_v35 = vpop.permute.xlu1 %2764  ;;  %v7636_v5 = vpop.permute.xlu0 %7635  ;;  %15939 = vst [vmem:[#allocation108_spill] sm:$0xff] %v10717_v13  ;;  %v15943_v56 = vunpack.c.l.bf16 %v9645_v12  ;;  %v9118_v11 = vadd.low.f32.bf16 %v15945_v58, %v7621_v61  ;;  %v10739_v10 = vmul.f32 0.5, %v10691_v18  ;;  %v10746_v7 = vmul.f32 0.5, %v10698_v1 }
 0x165   : > { %15938 = vst [vmem:[#allocation107_spill] sm:$0xff] %v10713_v14  ;;  %7389 = vmatmul.mubr.msk.bf16.vlgmr.msra.gmra.mrb[96].mxu1 %vm1478_vm0, %v2765_v35  ;;  %15941 = vst [vmem:[#allocation109_spill] sm:$0xff] %v10724_v54  ;;  %v10743_v35 = vpop.f32.mrb[20].mxu0  ;;  %v10749_v12 = vmul.f32 0.5, %v10709_v23  ;;  %v10753_v52 = vadd.f32 %v10613_v17, %v15949_v32  ;;  %v9121_v47 = vadd.high.f32.bf16 %v9115_v2, %v7636_v5  ;;  %v10768_v32 = vmul.f32 0.5, %v10705_v30  ;;  %v15955_v30 = vld [vmem:[#allocation90_spill] sm:$0xff] }
 0x166   : > { %v9117_v22 = vadd.high.f32.bf16 %v15943_v56, %v7621_v61  ;;  %7855 = vrot.lane.b32.xlu1 %v10513_v50, %s9432_s8  ;;  %7850 = vrot.lane.b32.xlu0 %v10519_v59, %s9432_s8  ;;  %15946 = vst [vmem:[#allocation11_spill] sm:$0xff] %v10739_v10  ;;  %15947 = vst [vmem:[#allocation110_spill] sm:$0xff] %v10746_v7  ;;  %v10755_v50 = vpop.f32.mrb[18].mxu1  ;;  %v10757_v61 = vpop.f32.mrb[21].mxu0  ;;  %v9119_v8 = vadd.low.f32.bf16 %v9118_v11, %v7631_v49  ;;  %v10771_v11 = vmul.f32 0.5, %v10713_v14  ;;  %v15957_v14 = vld [vmem:[#allocation54_spill] sm:$0xff] }
 0x167   : > { %15948 = vst [vmem:[#allocation111_spill] sm:$0xff] %v10749_v12  ;;  %15950 = vst [vmem:[#allocation43_spill] sm:$0xff] %v10753_v52  ;;  %v9122_v56 = vadd.low.f32.bf16 %v9116_v34, %v7636_v5  ;;  %v10759_v40 = vpop.f32.mrb[19].mxu1  ;;  %v10761_v1 = vpop.f32.mrb[22].mxu0  ;;  %v10777_v34 = vmul.f32 0.5, %v10717_v13 }
 0x168   : > { %v9120_v59 = vadd.high.f32.bf16 %v9117_v22, %v7631_v49  ;;  %v7646_v58 = vpop.permute.xlu1 %7645  ;;  %v7641_v18 = vpop.permute.xlu0 %7640  ;;  %15951 = vst [vmem:[#allocation112_spill] sm:$0xff] %v10768_v32  ;;  %15952 = vst [vmem:[#allocation113_spill] sm:$0xff] %v10771_v11  ;;  %v10774_v22 = vmul.f32 0.5, %v10724_v54  ;;  %v10783_v32 = vadd.f32 %v15955_v30, %v10613_v17  ;;  %v10787_v11 = vadd.f32 %v15957_v14, %v10613_v17  ;;  %v15959_v54 = vld [vmem:[#allocation89_spill] sm:$0xff] }
 0x169   : > { %15954 = vst [vmem:[#allocation115_spill] sm:$0xff] %v10777_v34  ;;  %v10779_v2 = vpop.f32.mrb[23].mxu0  ;;  %v9123_v49 = vadd.low.f32.bf16 %v9122_v56, %v7646_v58  ;;  %v9124_v5 = vadd.high.f32.bf16 %v9121_v47, %v7646_v58  ;;  %v9125_v23 = vadd.low.f32.bf16 %v9119_v8, %v7641_v18  ;;  %v10791_v13 = vadd.f32 %v10613_v17, %v15959_v54  ;;  %v10793_v8 = vpop.f32.mrb[20].mxu1  ;;  %v15964_v54 = vld [vmem:[#allocation91_spill] sm:$0xff] }
 0x16a   : > { %7865 = vrot.lane.b32.xlu1 %v10533_v16, %s9431_s20  ;;  %7860 = vrot.lane.b32.xlu0 %v10539_v39, %s9431_s20  ;;  %15953 = vst [vmem:[#allocation114_spill] sm:$0xff] %v10774_v22  ;;  %v9126_v36 = vadd.high.f32.bf16 %v9120_v59, %v7641_v18  ;;  %15956 = vst [vmem:[#allocation90_spill] sm:$0xff] %v10783_v32  ;;  %v15961_v18 = vld [vmem:[#allocation25_spill] sm:$0xff]  ;;  %v10800_v30 = vmul.f32 0.5, %v10753_v52  ;;  %v10804_v14 = vadd.f32 %v10613_v17, %v10521_v53  ;;  %v10814_v58 = vpop.f32.mrb[21].mxu1 }
 0x16b   : > { %15958 = vst [vmem:[#allocation54_spill] sm:$0xff] %v10787_v11  ;;  %15960 = vst [vmem:[#allocation89_spill] sm:$0xff] %v10791_v13  ;;  %v1178_v22 = vmul.f32 0.25, %v9123_v49  ;;  %v1179_v29 = vmul.f32 0.25, %v9124_v5  ;;  %v1176_v56 = vmul.f32 0.25, %v9125_v23  ;;  %v10808_v59 = vadd.f32 %v15964_v54, %v10613_v17  ;;  %v10816_v49 = vpop.f32.mrb[24].mxu0 }
 0x16c   : > { %v7656_v7 = vpop.permute.xlu1 %7655  ;;  %v7651_v25 = vpop.permute.xlu0 %7650  ;;  %v1177_v47 = vmul.f32 0.25, %v9126_v36  ;;  %15962 = vst [vmem:[#allocation25_spill] sm:$0xff] %v10800_v30  ;;  %15963 = vst [vmem:[#allocation116_spill] sm:$0xff] %v10804_v14  ;;  %v15966_v36 = vld [vmem:[#allocation66_spill] sm:$0xff]  ;;  %v10823_v54 = vmul.f32 0.5, %v10783_v32  ;;  %v10829_v24 = vmul.f32 0.5, %v10791_v13 }
 0x16d   : > { %15965 = vst [vmem:[#allocation91_spill] sm:$0xff] %v10808_v59  ;;  %v10812_v23 = vadd.f32 %v15966_v36, %v10613_v17  ;;  %v3217_v5 = vmax.f32 %v1178_v22, 0.0  ;;  %v3215_v52 = vmax.f32 %v1176_v56, 0.0  ;;  %v10818_v34 = vpop.f32.mrb[22].mxu1  ;;  %v10820_v53 = vpop.f32.mrb[25].mxu0  ;;  %v10826_v36 = vmul.f32 0.5, %v10787_v11 }
 0x16e   : > { %2794 = vrot.lane.b32.xlu1 %v15961_v18, %s9432_s8  ;;  %7870 = vrot.lane.b32.xlu0 %v10539_v39, %s9430_s18  ;;  %v3218_v18 = vmax.f32 %v1179_v29, 0.0  ;;  %v3216_v30 = vmax.f32 %v1177_v47, 0.0  ;;  %15968 = vst [vmem:[#allocation117_spill] sm:$0xff] %v10823_v54  ;;  %15970 = vst [vmem:[#allocation119_spill] sm:$0xff] %v10829_v24  ;;  %v10833_v29 = vadd.f32 %v10613_v17, %v15971_v60  ;;  %v10836_v47 = vpop.f32.mrb[23].mxu1  ;;  %v10838_v33 = vpop.f32.mrb[26].mxu0 }
 0x16f   : > { %15967 = vst [vmem:[#allocation66_spill] sm:$0xff] %v10812_v23  ;;  %15969 = vst [vmem:[#allocation118_spill] sm:$0xff] %v10826_v36  ;;  %v15973_v32 = vld [vmem:[#allocation27_spill] sm:$0xff]  ;;  %v15974_v13 = vld [vmem:[#allocation93_spill] sm:$0xff]  ;;  %v10848_v60 = vpop.f32.mrb[27].mxu0 }
 0x170   : > { %v2767_v12 = vpop.permute.xlu1 %2766  ;;  %v7661_v10 = vpop.permute.xlu0 %7660  ;;  %15972 = vst [vmem:[#allocation92_spill] sm:$0xff] %v10833_v29  ;;  %v3277_v22 = vpack.c.bf16 %v3216_v30, %v3215_v52  ;;  %v3278_v56 = vpack.c.bf16 %v3218_v18, %v3217_v5  ;;  %v10846_v11 = vadd.f32 %v10613_v17, %v15974_v13  ;;  %v10855_v52 = vmul.f32 0.5, %v10808_v59  ;;  %v15983_v59 = vld [vmem:[#allocation13_spill] sm:$0xff]  ;;  %v15987_v24 = vld [vmem:[#allocation15_spill] sm:$0xff] }
 0x171   : > { %7392 = vmatprep.mubr.msk.bf16.mxu1 %vm1478_vm0, %v2767_v12  ;;  %v10852_v12 = vmul.f32 0.5, %v10804_v14  ;;  %v10858_v30 = vmul.f32 0.5, %v10812_v23  ;;  %v10866_v54 = vmul.f32 0.5, %v10833_v29  ;;  %v15984_v14 = vunpack.c.l.bf16 %v15983_v59  ;;  %v10875_v23 = vpop.f32.mrb[24].mxu1  ;;  %v10892_v59 = vpop.f32.mrb[28].mxu0 }
 0x172   : > { %2796 = vrot.lane.b32.xlu1 %v15973_v32, %s9432_s8  ;;  %7875 = vrot.lane.b32.xlu0 %v10533_v16, %s9430_s18  ;;  %15975 = vst [vmem:[#allocation27_spill] sm:$0xff] %v10846_v11  ;;  %15977 = vst [vmem:[#allocation120_spill] sm:$0xff] %v10855_v52  ;;  %v15979_v32 = vld [vmem:[#allocation94_spill] sm:$0xff]  ;;  %v15988_v36 = vunpack.c.l.bf16 %v15987_v24  ;;  %v15990_v29 = vunpack.c.l.bf16 %v15989_v41  ;;  %v10896_v24 = vadd.f32 %v10569_v57, %v10613_v17 }
 0x173   : > { %7460 = vmatprep.mubr.msk.bf16.mxu0 %vm1478_vm0, %v3277_v22  ;;  %15976 = vst [vmem:[#allocation93_spill] sm:$0xff] %v10852_v12  ;;  %15978 = vst [vmem:[#allocation121_spill] sm:$0xff] %v10858_v30  ;;  %v10862_v5 = vadd.f32 %v15979_v32, %v10613_v17  ;;  %v10870_v22 = vadd.f32 %v10613_v17, %v10556_v31  ;;  %v9127_v52 = vadd.high.f32.bf16 %v15984_v14, %v7656_v7  ;;  %v15985_v32 = vld [vmem:[#allocation12_spill] sm:$0xff]  ;;  %v10890_v14 = vpop.f32.mrb[25].mxu1 }
 0x174   : > { %v2769_v18 = vpop.permute.xlu1 %2768  ;;  %v7666_v13 = vpop.permute.xlu0 %7665  ;;  %7461 = vmatmul.mubr.msk.bf16.gmra.mrb[100].mxu0 %vm1478_vm0, %v3278_v56  ;;  %15981 = vst [vmem:[#allocation122_spill] sm:$0xff] %v10866_v54  ;;  %v15986_v12 = vunpack.c.l.bf16 %v15985_v32  ;;  %v9129_v56 = vadd.high.f32.bf16 %v15988_v36, %v7651_v25  ;;  %v9130_v54 = vadd.low.f32.bf16 %v15990_v29, %v7651_v25  ;;  %v10888_v31 = vmul.f32 0.5, %v10846_v11  ;;  %15992 = vst [vmem:[#allocation12_spill] sm:$0xff] %v10892_v59  ;;  %v15999_v29 = vld [vmem:[#allocation82_spill] sm:$0xff] }
 0x175   : > { %15980 = vst [vmem:[#allocation94_spill] sm:$0xff] %v10862_v5  ;;  %15982 = vst [vmem:[#allocation123_spill] sm:$0xff] %v10870_v22  ;;  %7393 = vmatmul.mubr.msk.bf16.gmra.mrb[100].mxu1 %vm1478_vm0, %v2769_v18  ;;  %v10899_v41 = vmul.f32 0.5, %v10862_v5  ;;  %v10901_v25 = vpop.f32.mrb[26].mxu1  ;;  %v16001_v18 = vunpack.c.l.bf16 %v10103_v3  ;;  %v9133_v5 = vadd.high.f32.bf16 %v9127_v52, %v7666_v13  ;;  %v10938_v52 = vadd.f32 %v10582_v63, %v10613_v17 }
 0x176   : > { %v9128_v30 = vadd.low.f32.bf16 %v15986_v12, %v7656_v7  ;;  %7885 = vrot.lane.b32.xlu1 %v10533_v16, %s9432_s8  ;;  %7880 = vrot.lane.b32.xlu0 %v10539_v39, %s9432_s8  ;;  %15991 = vst [vmem:[#allocation13_spill] sm:$0xff] %v10888_v31  ;;  %15993 = vst [vmem:[#allocation15_spill] sm:$0xff] %v10896_v24  ;;  %v10903_v16 = vpop.f32.mrb[29].mxu0  ;;  %v15997_v39 = vunpack.c.l.bf16 %v10132_v37  ;;  %v15998_v7 = vunpack.c.l.bf16 %v10135_v44  ;;  %v16000_v12 = vunpack.c.l.bf16 %v15999_v29 }
 0x177   : > { %15994 = vst [vmem:[#allocation14_spill] sm:$0xff] %v10899_v41  ;;  %15995 = vst [vmem:[#allocation124_spill] sm:$0xff] %v10901_v25  ;;  %v9131_v57 = vadd.low.f32.bf16 %v9130_v54, %v7661_v10  ;;  %v9132_v11 = vadd.high.f32.bf16 %v9129_v56, %v7661_v10  ;;  %v10917_v25 = vpop.f32.mrb[27].mxu1  ;;  %v10931_v10 = vadd.f32 %v10596_v46, %v10613_v17  ;;  %v10934_v54 = vmul.f32 0.5, %v10870_v22 }
 0x178   : > { %15996 = vst [vmem:[#allocation125_spill] sm:$0xff] %v10903_v16  ;;  %v10909_v36 = vpack.i.bf16 %v15998_v7, %v15997_v39  ;;  %v10915_v32 = vpack.i.bf16 %v16001_v18, %v16000_v12  ;;  %v9134_v31 = vadd.low.f32.bf16 %v9128_v30, %v7666_v13  ;;  %v7676_v41 = vpop.permute.xlu1 %7675  ;;  %v7671_v59 = vpop.permute.xlu0 %7670  ;;  %v10927_v39 = vadd.f32 %v10613_v17, %v10580_v62 }
 0x179   : > { %v10919_v16 = vpop.f32.mrb[30].mxu0  ;;  %16003 = vst [vmem:[#allocation127_spill] sm:$0xff] %v10931_v10  ;;  %16004 = vst [vmem:[#allocation128_spill] sm:$0xff] %v10934_v54  ;;  %v9136_v56 = vadd.high.f32.bf16 %v9133_v5, %v7676_v41  ;;  %v9137_v7 = vadd.low.f32.bf16 %v9131_v57, %v7671_v59  ;;  %v9138_v12 = vadd.high.f32.bf16 %v9132_v11, %v7671_v59  ;;  %v10943_v29 = vmul.f32 0.5, %v10896_v24  ;;  %v16010_v57 = vld [vmem:[#allocation36_spill] sm:$0xff] }
 0x17a   : > { %7895 = vrot.lane.b32.xlu1 %v10554_v15, %s9431_s20  ;;  %7890 = vrot.lane.b32.xlu0 %v10566_v9, %s9431_s20  ;;  %16002 = vst [vmem:[#allocation126_spill] sm:$0xff] %v10927_v39  ;;  %16005 = vst [vmem:[#allocation129_spill] sm:$0xff] %v10938_v52  ;;  %v10940_v30 = vpop.f32.mrb[31].mxu0  ;;  %v9135_v13 = vadd.low.f32.bf16 %v9134_v31, %v7676_v41  ;;  %v10947_v46 = vadd.f32 %v10613_v17, %v10601_v27  ;;  %v10957_v41 = vpop.f32.mrb[28].mxu1  ;;  %v10964_v27 = vmul.f32 0.5, %v10927_v39 }
 0x17b   : > { %16006 = vst [vmem:[#allocation130_spill] sm:$0xff] %v10943_v29  ;;  %v10951_v22 = vadd.f32 %v10633_v20, %v10613_v17  ;;  %v10955_v63 = vadd.f32 %v10613_v17, %v10598_v38  ;;  %v1183_v31 = vmul.f32 0.25, %v9136_v56  ;;  %v1180_v11 = vmul.f32 0.25, %v9137_v7  ;;  %v10976_v56 = vpop.f32.mrb[29].mxu1 }
 0x17c   : > { %v7686_v18 = vpop.permute.xlu1 %7685  ;;  %v7681_v62 = vpop.permute.xlu0 %7680  ;;  %16007 = vst [vmem:[#allocation131_spill] sm:$0xff] %v10947_v46  ;;  %v1182_v5 = vmul.f32 0.25, %v9135_v13  ;;  %v1181_v59 = vmul.f32 0.25, %v9138_v12  ;;  %16011 = vst [vmem:[#allocation36_spill] sm:$0xff] %v10964_v27  ;;  %v10967_v20 = vmul.f32 0.5, %v10931_v10  ;;  %v10970_v38 = vmul.f32 0.5, %v10938_v52 }
 0x17d   : > { %16008 = vst [vmem:[#allocation132_spill] sm:$0xff] %v10951_v22  ;;  %16009 = vst [vmem:[#allocation133_spill] sm:$0xff] %v10955_v63  ;;  %v10974_v13 = vadd.f32 %v10603_v6, %v10613_v17  ;;  %v3222_v12 = vmax.f32 %v1183_v31, 0.0  ;;  %v10978_v3 = vpop.f32.mrb[30].mxu1  ;;  %v10981_v10 = vmul.f32 0.5, %v10947_v46  ;;  %v10984_v52 = vmul.f32 0.5, %v10955_v63 }
 0x17e   : > { %2798 = vrot.lane.b32.xlu1 %v16010_v57, %s9432_s8  ;;  %7900 = vrot.lane.b32.xlu0 %v10566_v9, %s9430_s18  ;;  %16012 = vst [vmem:[#allocation134_spill] sm:$0xff] %v10967_v20  ;;  %16013 = vst [vmem:[#allocation135_spill] sm:$0xff] %v10970_v38  ;;  %v3221_v7 = vmax.f32 %v1182_v5, 0.0  ;;  %v3219_v57 = vmax.f32 %v1180_v11, 0.0  ;;  %v3220_v24 = vmax.f32 %v1181_v59, 0.0  ;;  %v10988_v6 = vadd.f32 %v10613_v17, %v10640_v55  ;;  %v10998_v46 = vpop.f32.mrb[31].mxu1 }
 0x17f   : > { %16014 = vst [vmem:[#allocation136_spill] sm:$0xff] %v10974_v13  ;;  %16015 = vst [vmem:[#allocation137_spill] sm:$0xff] %v10981_v10  ;;  %v10992_v5 = vadd.f32 %v10613_v17, %v10615_v0  ;;  %v10996_v59 = vmul.f32 0.5, %v10951_v22  ;;  %v16020_v63 = vld [vmem:[#allocation37_spill] sm:$0xff]  ;;  %v11005_v55 = vmul.f32 0.5, %v10974_v13  ;;  %v11010_v0 = vadd.f32 %v10660_v43, %v10613_v17 }
 0x180   : > { %v2771_v39 = vpop.permute.xlu1 %2770  ;;  %v7691_v37 = vpop.permute.xlu0 %7690  ;;  %16016 = vst [vmem:[#allocation138_spill] sm:$0xff] %v10984_v52  ;;  %16017 = vst [vmem:[#allocation139_spill] sm:$0xff] %v10988_v6  ;;  %v3279_v31 = vpack.c.bf16 %v3220_v24, %v3219_v57  ;;  %v3280_v11 = vpack.c.bf16 %v3222_v12, %v3221_v7  ;;  %v11014_v24 = vadd.f32 %v10613_v17, %v10675_v45  ;;  %v11026_v57 = vmul.f32 0.5, %v10988_v6  ;;  %v16028_v45 = vld [vmem:[#allocation18_spill] sm:$0xff] }
 0x181   : > { %16018 = vst [vmem:[#allocation140_spill] sm:$0xff] %v10992_v5  ;;  %7396 = vmatprep.mubr.msk.bf16.mxu1 %vm1478_vm0, %v2771_v39  ;;  %16019 = vst [vmem:[#allocation141_spill] sm:$0xff] %v10996_v59  ;;  %v11018_v39 = vadd.f32 %v10642_v4, %v10613_v17  ;;  %v11030_v43 = vadd.f32 %v10677_v28, %v10613_v17  ;;  %v16031_v4 = vld [vmem:[#allocation17_spill] sm:$0xff]  ;;  %v11050_v28 = vmul.f32 0.5, %v10992_v5 }
 0x182   : > { %2800 = vrot.lane.b32.xlu1 %v16020_v63, %s9432_s8  ;;  %7905 = vrot.lane.b32.xlu0 %v10554_v15, %s9430_s18  ;;  %16021 = vst [vmem:[#allocation37_spill] sm:$0xff] %v11005_v55  ;;  %16022 = vst [vmem:[#allocation142_spill] sm:$0xff] %v11010_v0  ;;  %v11022_v63 = vadd.f32 %v10613_v17, %v10662_v48  ;;  %v11037_v48 = vadd.f32 %v10613_v17, %v10693_v26  ;;  %v16032_v13 = vunpack.c.l.bf16 %v16031_v4 }
 0x183   : > { %7464 = vmatprep.mubr.msk.bf16.mxu0 %vm1478_vm0, %v3279_v31  ;;  %16023 = vst [vmem:[#allocation143_spill] sm:$0xff] %v11014_v24  ;;  %16024 = vst [vmem:[#allocation144_spill] sm:$0xff] %v11018_v39  ;;  %v16029_v31 = vunpack.c.l.bf16 %v16028_v45  ;;  %v11053_v26 = vmul.f32 0.5, %v11010_v0  ;;  %v16042_v45 = vld [vmem:[#allocation65_spill] sm:$0xff]  ;;  %v11070_v4 = vadd.f32 %v10726_v19, %v10613_v17  ;;  %v11084_v19 = vadd.f32 %v10755_v50, %v10613_v17 }
 0x184   : > { %16025 = vst [vmem:[#allocation145_spill] sm:$0xff] %v11022_v63  ;;  %v2773_v7 = vpop.permute.xlu1 %2772  ;;  %v7696_v12 = vpop.permute.xlu0 %7695  ;;  %7465 = vmatmul.mubr.msk.bf16.gmra.mrb[104].mxu0 %vm1478_vm0, %v3280_v11  ;;  %16026 = vst [vmem:[#allocation146_spill] sm:$0xff] %v11026_v57  ;;  %v9140_v44 = vadd.low.f32.bf16 %v16032_v13, %v7686_v18  ;;  %v16033_v11 = vld [vmem:[#allocation23_spill] sm:$0xff]  ;;  %v16035_v57 = vld [vmem:[#allocation22_spill] sm:$0xff]  ;;  %v11059_v13 = vmul.f32 0.5, %v11018_v39 }
 0x185   : > { %16027 = vst [vmem:[#allocation147_spill] sm:$0xff] %v11030_v43  ;;  %v9139_v22 = vadd.high.f32.bf16 %v16029_v31, %v7686_v18  ;;  %7397 = vmatmul.mubr.msk.bf16.gmra.mrb[104].mxu1 %vm1478_vm0, %v2773_v7  ;;  %16030 = vst [vmem:[#allocation18_spill] sm:$0xff] %v11037_v48  ;;  %v16034_v59 = vunpack.c.l.bf16 %v16033_v11  ;;  %v16036_v10 = vunpack.c.l.bf16 %v16035_v57  ;;  %v11056_v18 = vmul.f32 0.5, %v11014_v24  ;;  %v16043_v31 = vld [vmem:[#allocation95_spill] sm:$0xff] }
 0x186   : > { %7915 = vrot.lane.b32.xlu1 %v10554_v15, %s9432_s8  ;;  %7910 = vrot.lane.b32.xlu0 %v10566_v9, %s9432_s8  ;;  %16037 = vst [vmem:[#allocation17_spill] sm:$0xff] %v11050_v28  ;;  %16038 = vst [vmem:[#allocation23_spill] sm:$0xff] %v11053_v26  ;;  %v9146_v7 = vadd.low.f32.bf16 %v9140_v44, %v7696_v12  ;;  %v11074_v11 = vadd.f32 %v10613_v17, %v10741_v42  ;;  %v11080_v44 = vmul.f32 0.5, %v11037_v48 }
 0x187   : > { %v9141_v6 = vadd.high.f32.bf16 %v16034_v59, %v7681_v62  ;;  %v9142_v20 = vadd.low.f32.bf16 %v16036_v10, %v7681_v62  ;;  %16039 = vst [vmem:[#allocation22_spill] sm:$0xff] %v11056_v18  ;;  %16040 = vst [vmem:[#allocation148_spill] sm:$0xff] %v11059_v13  ;;  %v11062_v10 = vmul.f32 0.5, %v11022_v63  ;;  %v9145_v59 = vadd.high.f32.bf16 %v9139_v22, %v7696_v12 }
 0x188   : > { %v7706_v9 = vpop.permute.xlu1 %7705  ;;  %v7701_v57 = vpop.permute.xlu0 %7700  ;;  %16044 = vst [vmem:[#allocation65_spill] sm:$0xff] %v11070_v4  ;;  %16045 = vst [vmem:[#allocation95_spill] sm:$0xff] %v11074_v11  ;;  %v11088_v42 = vadd.f32 %v10613_v17, %v10759_v40  ;;  %v11099_v50 = vmul.f32 0.5, %v11070_v4  ;;  %v11102_v40 = vmul.f32 0.5, %v11074_v11  ;;  %v11116_v11 = vadd.f32 %v10761_v1, %v10613_v17 }
 0x189   : > { %16041 = vst [vmem:[#allocation149_spill] sm:$0xff] %v11062_v10  ;;  %v9143_v62 = vadd.low.f32.bf16 %v9142_v20, %v7691_v37  ;;  %v9144_v15 = vadd.high.f32.bf16 %v9141_v6, %v7691_v37  ;;  %v11077_v37 = vmul.f32 0.5, %v11030_v43  ;;  %16047 = vst [vmem:[#allocation151_spill] sm:$0xff] %v11080_v44  ;;  %v9147_v22 = vadd.low.f32.bf16 %v9146_v7, %v7706_v9 }
 0x18a   : > { %7925 = vrot.lane.b32.xlu1 %v16042_v45, %s9431_s20  ;;  %7920 = vrot.lane.b32.xlu0 %v16043_v31, %s9431_s20  ;;  %v9148_v20 = vadd.high.f32.bf16 %v9145_v59, %v7706_v9  ;;  %16048 = vst [vmem:[#allocation152_spill] sm:$0xff] %v11084_v19  ;;  %16049 = vst [vmem:[#allocation153_spill] sm:$0xff] %v11088_v42  ;;  %v11092_v43 = vadd.f32 %v10743_v35, %v10613_v17 }
 0x18b   : > { %16046 = vst [vmem:[#allocation150_spill] sm:$0xff] %v11077_v37  ;;  %v9149_v6 = vadd.low.f32.bf16 %v9143_v62, %v7701_v57  ;;  %v9150_v12 = vadd.high.f32.bf16 %v9144_v15, %v7701_v57  ;;  %v1186_v48 = vmul.f32 0.25, %v9147_v22  ;;  %v16051_v62 = vld [vmem:[#allocation40_spill] sm:$0xff]  ;;  %16053 = vst [vmem:[#allocation155_spill] sm:$0xff] %v11102_v40  ;;  %v11106_v35 = vadd.f32 %v10613_v17, %v10757_v61 }
 0x18c   : > { %v7716_v24 = vpop.permute.xlu1 %7715  ;;  %v7711_v0 = vpop.permute.xlu0 %7710  ;;  %16050 = vst [vmem:[#allocation154_spill] sm:$0xff] %v11092_v43  ;;  %v1187_v63 = vmul.f32 0.25, %v9148_v20  ;;  %16052 = vst [vmem:[#allocation40_spill] sm:$0xff] %v11099_v50  ;;  %v11120_v61 = vadd.f32 %v10613_v17, %v10779_v2  ;;  %v11132_v1 = vadd.f32 %v10793_v8, %v10613_v17 }
 0x18d   : > { %v1184_v7 = vmul.f32 0.25, %v9149_v6  ;;  %v1185_v59 = vmul.f32 0.25, %v9150_v12  ;;  %16054 = vst [vmem:[#allocation156_spill] sm:$0xff] %v11106_v35  ;;  %v3225_v15 = vmax.f32 %v1186_v48, 0.0  ;;  %v11109_v12 = vmul.f32 0.5, %v11084_v19  ;;  %16057 = vst [vmem:[#allocation159_spill] sm:$0xff] %v11116_v11 }
 0x18e   : > { %2802 = vrot.lane.b32.xlu1 %v16051_v62, %s9432_s8  ;;  %7930 = vrot.lane.b32.xlu0 %v16043_v31, %s9430_s18  ;;  %v3226_v9 = vmax.f32 %v1187_v63, 0.0  ;;  %v11112_v62 = vmul.f32 0.5, %v11092_v43  ;;  %16058 = vst [vmem:[#allocation160_spill] sm:$0xff] %v11120_v61  ;;  %v11136_v2 = vmul.f32 0.5, %v11106_v35  ;;  %v16073_v35 = vld [vmem:[#allocation35_spill] sm:$0xff] }
 0x18f   : > { %v3223_v57 = vmax.f32 %v1184_v7, 0.0  ;;  %v3224_v22 = vmax.f32 %v1185_v59, 0.0  ;;  %16055 = vst [vmem:[#allocation157_spill] sm:$0xff] %v11109_v12  ;;  %v11124_v7 = vmul.f32 0.5, %v11088_v42  ;;  %v16060_v59 = vld [vmem:[#allocation48_spill] sm:$0xff] }
 0x190   : > { %v2775_v20 = vpop.permute.xlu1 %2774  ;;  %v7721_v6 = vpop.permute.xlu0 %7720  ;;  %16056 = vst [vmem:[#allocation158_spill] sm:$0xff] %v11112_v62  ;;  %v3282_v48 = vpack.c.bf16 %v3226_v9, %v3225_v15  ;;  %16061 = vst [vmem:[#allocation48_spill] sm:$0xff] %v11132_v1  ;;  %v11140_v15 = vadd.f32 %v10613_v17, %v10814_v58  ;;  %v11144_v9 = vadd.f32 %v10818_v34, %v10613_v17  ;;  %v16068_v58 = vld [vmem:[#allocation33_spill] sm:$0xff] }
 0x191   : > { %7400 = vmatprep.mubr.msk.bf16.mxu1 %vm1478_vm0, %v2775_v20  ;;  %v3281_v63 = vpack.c.bf16 %v3224_v22, %v3223_v57  ;;  %16059 = vst [vmem:[#allocation161_spill] sm:$0xff] %v11124_v7  ;;  %16062 = vst [vmem:[#allocation162_spill] sm:$0xff] %v11136_v2  ;;  %v11148_v57 = vadd.f32 %v10613_v17, %v10836_v47  ;;  %v11152_v20 = vmul.f32 0.5, %v11116_v11  ;;  %v16071_v47 = vld [vmem:[#allocation32_spill] sm:$0xff]  ;;  %v16075_v11 = vld [vmem:[#allocation34_spill] sm:$0xff] }
 0x192   : > { %2804 = vrot.lane.b32.xlu1 %v16060_v59, %s9432_s8  ;;  %7935 = vrot.lane.b32.xlu0 %v16042_v45, %s9430_s18  ;;  %16063 = vst [vmem:[#allocation163_spill] sm:$0xff] %v11140_v15  ;;  %16064 = vst [vmem:[#allocation164_spill] sm:$0xff] %v11144_v9  ;;  %v16069_v59 = vunpack.c.l.bf16 %v16068_v58  ;;  %v11162_v34 = vadd.f32 %v10816_v49, %v10613_v17  ;;  %v16072_v19 = vunpack.c.l.bf16 %v16071_v47  ;;  %v16076_v39 = vunpack.c.l.bf16 %v16075_v11 }
 0x193   : > { %7468 = vmatprep.mubr.msk.bf16.mxu0 %vm1478_vm0, %v3281_v63  ;;  %16065 = vst [vmem:[#allocation165_spill] sm:$0xff] %v11148_v57  ;;  %16066 = vst [vmem:[#allocation166_spill] sm:$0xff] %v11152_v20  ;;  %v11155_v63 = vmul.f32 0.5, %v11120_v61  ;;  %v11178_v49 = vmul.f32 0.5, %v11140_v15  ;;  %v11199_v47 = vadd.f32 %v10875_v23, %v10613_v17  ;;  %v11214_v23 = vadd.f32 %v10613_v17, %v10890_v14 }
 0x194   : > { %v2777_v22 = vpop.permute.xlu1 %2776  ;;  %v7726_v8 = vpop.permute.xlu0 %7725  ;;  %7469 = vmatmul.mubr.msk.bf16.gmra.mrb[108].mxu0 %vm1478_vm0, %v3282_v48  ;;  %v9151_v42 = vadd.high.f32.bf16 %v16069_v59, %v7716_v24  ;;  %16070 = vst [vmem:[#allocation33_spill] sm:$0xff] %v11162_v34  ;;  %v9152_v4 = vadd.low.f32.bf16 %v16072_v19, %v7716_v24  ;;  %v16074_v48 = vunpack.c.l.bf16 %v16073_v35  ;;  %v9154_v5 = vadd.low.f32.bf16 %v16076_v39, %v7711_v0 }
 0x195   : > { %16067 = vst [vmem:[#allocation167_spill] sm:$0xff] %v11155_v63  ;;  %7401 = vmatmul.mubr.msk.bf16.gmra.mrb[108].mxu1 %vm1478_vm0, %v2777_v22  ;;  %v11175_v22 = vmul.f32 0.5, %v11132_v1  ;;  %16078 = vst [vmem:[#allocation35_spill] sm:$0xff] %v11178_v49  ;;  %v11181_v24 = vmul.f32 0.5, %v11144_v9  ;;  %v11184_v19 = vmul.f32 0.5, %v11148_v57  ;;  %v11195_v59 = vmul.f32 0.5, %v11162_v34 }
 0x196   : > { %v9153_v43 = vadd.high.f32.bf16 %v16074_v48, %v7711_v0  ;;  %7945 = vrot.lane.b32.xlu1 %v16042_v45, %s9432_s8  ;;  %7940 = vrot.lane.b32.xlu0 %v16043_v31, %s9432_s8  ;;  %v11188_v0 = vadd.f32 %v10613_v17, %v10820_v53  ;;  %v9155_v39 = vadd.low.f32.bf16 %v9154_v5, %v7721_v6  ;;  %v11229_v14 = vmul.f32 0.5, %v11199_v47 }
 0x197   : > { %16077 = vst [vmem:[#allocation32_spill] sm:$0xff] %v11175_v22  ;;  %16079 = vst [vmem:[#allocation34_spill] sm:$0xff] %v11181_v24  ;;  %v9157_v11 = vadd.high.f32.bf16 %v9151_v42, %v7726_v8  ;;  %v9158_v31 = vadd.low.f32.bf16 %v9152_v4, %v7726_v8  ;;  %v11203_v53 = vadd.f32 %v10838_v33, %v10613_v17  ;;  %v16088_v33 = vld [vmem:[#allocation124_spill] sm:$0xff] }
 0x198   : > { %16080 = vst [vmem:[#allocation168_spill] sm:$0xff] %v11184_v19  ;;  %16081 = vst [vmem:[#allocation169_spill] sm:$0xff] %v11188_v0  ;;  %v9156_v45 = vadd.high.f32.bf16 %v9153_v43, %v7721_v6  ;;  %v7736_v35 = vpop.permute.xlu1 %7735  ;;  %v7731_v58 = vpop.permute.xlu0 %7730  ;;  %v11207_v5 = vadd.f32 %v10613_v17, %v10848_v60  ;;  %v11210_v57 = vmul.f32 0.5, %v11188_v0  ;;  %v11218_v9 = vadd.f32 %v16088_v33, %v10613_v17 }
 0x199   : > { %16082 = vst [vmem:[#allocation170_spill] sm:$0xff] %v11195_v59  ;;  %16083 = vst [vmem:[#allocation171_spill] sm:$0xff] %v11199_v47  ;;  %v9159_v43 = vadd.low.f32.bf16 %v9158_v31, %v7736_v35  ;;  %v9160_v4 = vadd.high.f32.bf16 %v9157_v11, %v7736_v35  ;;  %v9161_v42 = vadd.low.f32.bf16 %v9155_v39, %v7731_v58  ;;  %v16091_v35 = vld [vmem:[#allocation51_spill] sm:$0xff]  ;;  %v11242_v0 = vmul.f32 0.5, %v11214_v23 }
 0x19a   : > { %7955 = vrot.lane.b32.xlu1 %v10621_v21, %s9431_s20  ;;  %7950 = vrot.lane.b32.xlu0 %v10627_v51, %s9431_s20  ;;  %16084 = vst [vmem:[#allocation172_spill] sm:$0xff] %v11203_v53  ;;  %16085 = vst [vmem:[#allocation173_spill] sm:$0xff] %v11207_v5  ;;  %v9162_v6 = vadd.high.f32.bf16 %v9156_v45, %v7731_v58  ;;  %v11222_v60 = vadd.f32 %v10613_v17, %v10917_v25  ;;  %v11232_v58 = vmul.f32 0.5, %v11203_v53  ;;  %v16095_v25 = vld [vmem:[#allocation12_spill] sm:$0xff]  ;;  %v16099_v53 = vld [vmem:[#allocation125_spill] sm:$0xff] }
 0x19b   : > { %16086 = vst [vmem:[#allocation174_spill] sm:$0xff] %v11210_v57  ;;  %16087 = vst [vmem:[#allocation175_spill] sm:$0xff] %v11214_v23  ;;  %v1190_v11 = vmul.f32 0.25, %v9159_v43  ;;  %v1191_v39 = vmul.f32 0.25, %v9160_v4  ;;  %v1188_v45 = vmul.f32 0.25, %v9161_v42  ;;  %v11235_v33 = vmul.f32 0.5, %v11207_v5 }
 0x19c   : > { %v7746_v8 = vpop.permute.xlu1 %7745  ;;  %v7741_v48 = vpop.permute.xlu0 %7740  ;;  %16089 = vst [vmem:[#allocation124_spill] sm:$0xff] %v11218_v9  ;;  %16090 = vst [vmem:[#allocation176_spill] sm:$0xff] %v11222_v60  ;;  %v1189_v31 = vmul.f32 0.25, %v9162_v6  ;;  %v11239_v43 = vadd.f32 %v16095_v25, %v10613_v17  ;;  %v11245_v47 = vmul.f32 0.5, %v11218_v9  ;;  %v11249_v5 = vadd.f32 %v10613_v17, %v16099_v53 }
 0x19d   : > { %16092 = vst [vmem:[#allocation51_spill] sm:$0xff] %v11229_v14  ;;  %16093 = vst [vmem:[#allocation177_spill] sm:$0xff] %v11232_v58  ;;  %v3229_v4 = vmax.f32 %v1190_v11, 0.0  ;;  %v3230_v42 = vmax.f32 %v1191_v39, 0.0  ;;  %v3227_v6 = vmax.f32 %v1188_v45, 0.0  ;;  %v11253_v25 = vadd.f32 %v10919_v16, %v10613_v17 }
 0x19e   : > { %2806 = vrot.lane.b32.xlu1 %v16091_v35, %s9432_s8  ;;  %7960 = vrot.lane.b32.xlu0 %v10627_v51, %s9430_s18  ;;  %16094 = vst [vmem:[#allocation178_spill] sm:$0xff] %v11235_v33  ;;  %16096 = vst [vmem:[#allocation12_spill] sm:$0xff] %v11239_v43  ;;  %v3228_v35 = vmax.f32 %v1189_v31, 0.0  ;;  %v11257_v45 = vmul.f32 0.5, %v11222_v60  ;;  %v16103_v31 = vld [vmem:[#allocation59_spill] sm:$0xff]  ;;  %v11265_v53 = vadd.f32 %v10957_v41, %v10613_v17  ;;  %v11269_v16 = vmul.f32 0.5, %v11239_v43 }
 0x19f   : > { %16097 = vst [vmem:[#allocation179_spill] sm:$0xff] %v11242_v0  ;;  %16098 = vst [vmem:[#allocation180_spill] sm:$0xff] %v11245_v47  ;;  %v3284_v11 = vpack.c.bf16 %v3230_v42, %v3229_v4  ;;  %v11277_v4 = vadd.f32 %v10978_v3, %v10613_v17  ;;  %v11281_v42 = vadd.f32 %v10613_v17, %v10940_v30  ;;  %v16114_v30 = vld [vmem:[#allocation44_spill] sm:$0xff]  ;;  %v16116_v43 = vld [vmem:[#allocation47_spill] sm:$0xff] }
 0x1a0   : > { %v2779_v15 = vpop.permute.xlu1 %2778  ;;  %v7751_v1 = vpop.permute.xlu0 %7750  ;;  %16100 = vst [vmem:[#allocation125_spill] sm:$0xff] %v11249_v5  ;;  %16101 = vst [vmem:[#allocation181_spill] sm:$0xff] %v11253_v25  ;;  %v3283_v39 = vpack.c.bf16 %v3228_v35, %v3227_v6  ;;  %v11285_v35 = vmul.f32 0.5, %v11249_v5  ;;  %v11295_v3 = vadd.f32 %v10613_v17, %v10998_v46  ;;  %v16115_v9 = vunpack.c.l.bf16 %v16114_v30  ;;  %v16118_v5 = vld [vmem:[#allocation46_spill] sm:$0xff] }
 0x1a1   : > { %7404 = vmatprep.mubr.msk.bf16.mxu1 %vm1478_vm0, %v2779_v15  ;;  %16102 = vst [vmem:[#allocation182_spill] sm:$0xff] %v11257_v45  ;;  %16104 = vst [vmem:[#allocation59_spill] sm:$0xff] %v11265_v53  ;;  %v11273_v15 = vadd.f32 %v10613_v17, %v10976_v56  ;;  %v16111_v56 = vld [vmem:[#allocation45_spill] sm:$0xff]  ;;  %v16119_v61 = vunpack.c.l.bf16 %v16118_v5  ;;  %v16137_v47 = vld [vmem:[#allocation62_spill] sm:$0xff] }
 0x1a2   : > { %2808 = vrot.lane.b32.xlu1 %v16103_v31, %s9432_s8  ;;  %7965 = vrot.lane.b32.xlu0 %v10621_v21, %s9430_s18  ;;  %16105 = vst [vmem:[#allocation183_spill] sm:$0xff] %v11269_v16  ;;  %16107 = vst [vmem:[#allocation185_spill] sm:$0xff] %v11277_v4  ;;  %v16112_v31 = vunpack.c.l.bf16 %v16111_v56  ;;  %v9164_v23 = vadd.low.f32.bf16 %v16115_v9, %v7746_v8  ;;  %v11314_v9 = vmul.f32 0.5, %v11277_v4  ;;  %v11320_v30 = vmul.f32 0.5, %v11295_v3 }
 0x1a3   : > { %7472 = vmatprep.mubr.msk.bf16.mxu0 %vm1478_vm0, %v3283_v39  ;;  %16106 = vst [vmem:[#allocation184_spill] sm:$0xff] %v11273_v15  ;;  %16108 = vst [vmem:[#allocation186_spill] sm:$0xff] %v11281_v42  ;;  %v11288_v39 = vmul.f32 0.5, %v11253_v25  ;;  %v9166_v45 = vadd.low.f32.bf16 %v16119_v61, %v7741_v48  ;;  %v11304_v25 = vmul.f32 0.5, %v11265_v53  ;;  %v11311_v46 = vmul.f32 0.5, %v11273_v15 }
 0x1a4   : > { %v2781_v6 = vpop.permute.xlu1 %2780  ;;  %v7756_v41 = vpop.permute.xlu0 %7755  ;;  %7473 = vmatmul.mubr.msk.bf16.gmra.mrb[112].mxu0 %vm1478_vm0, %v3284_v11  ;;  %16109 = vst [vmem:[#allocation187_spill] sm:$0xff] %v11285_v35  ;;  %v9163_v60 = vadd.high.f32.bf16 %v16112_v31, %v7746_v8  ;;  %16113 = vst [vmem:[#allocation45_spill] sm:$0xff] %v11295_v3  ;;  %v16117_v11 = vunpack.c.l.bf16 %v16116_v43  ;;  %v11317_v8 = vmul.f32 0.5, %v11281_v42 }
 0x1a5   : > { %16110 = vst [vmem:[#allocation188_spill] sm:$0xff] %v11288_v39  ;;  %7405 = vmatmul.mubr.msk.bf16.gmra.mrb[112].mxu1 %vm1478_vm0, %v2781_v6  ;;  %16120 = vst [vmem:[#allocation44_spill] sm:$0xff] %v11304_v25  ;;  %v9167_v5 = vadd.low.f32.bf16 %v9166_v45, %v7751_v1  ;;  %v9170_v43 = vadd.low.f32.bf16 %v9164_v23, %v7756_v41  ;;  %v16127_v45 = vld [vmem:[#allocation77_spill] sm:$0xff] }
 0x1a6   : > { %v9165_v34 = vadd.high.f32.bf16 %v16117_v11, %v7741_v48  ;;  %7975 = vrot.lane.b32.xlu1 %v10621_v21, %s9432_s8  ;;  %7970 = vrot.lane.b32.xlu0 %v10627_v51, %s9432_s8  ;;  %16121 = vst [vmem:[#allocation47_spill] sm:$0xff] %v11311_v46  ;;  %16122 = vst [vmem:[#allocation46_spill] sm:$0xff] %v11314_v9  ;;  %v9169_v48 = vadd.high.f32.bf16 %v9163_v60, %v7756_v41 }
 0x1a7   : > { %16123 = vst [vmem:[#allocation189_spill] sm:$0xff] %v11317_v8  ;;  %16124 = vst [vmem:[#allocation190_spill] sm:$0xff] %v11320_v30 }
 0x1a8   : > { %v9168_v61 = vadd.high.f32.bf16 %v9165_v34, %v7751_v1  ;;  %v7766_v6 = vpop.permute.xlu1 %7765  ;;  %v7761_v56 = vpop.permute.xlu0 %7760  ;;  %v16128_v1 = vld [vmem:[#allocation97_spill] sm:$0xff] }
 0x1a9   : > { %v7254_v31 = vpop.f32.mrb[32].mxu1  ;;  %v7322_v21 = vpop.f32.mrb[32].mxu0  ;;  %v9171_v34 = vadd.low.f32.bf16 %v9170_v43, %v7766_v6  ;;  %v9172_v23 = vadd.high.f32.bf16 %v9169_v48, %v7766_v6  ;;  %v9173_v60 = vadd.low.f32.bf16 %v9167_v5, %v7761_v56 }
 0x1aa   : > { %v11323_v51 = vadd.f32 %v7254_v31, %v10613_v17  ;;  %v11326_v11 = vadd.f32 %v7322_v21, %v10613_v17  ;;  %v2058_v4 = vpop.f32.mrb[33].mxu1  ;;  %v2507_v15 = vpop.f32.mrb[33].mxu0  ;;  %7985 = vrot.lane.b32.xlu1 %v16127_v45, %s9431_s20  ;;  %7980 = vrot.lane.b32.xlu0 %v16128_v1, %s9431_s20  ;;  %v9174_v41 = vadd.high.f32.bf16 %v9168_v61, %v7761_v56 }
 0x1ab   : > { %v7255_v3 = vpop.f32.mrb[34].mxu1  ;;  %v7323_v53 = vpop.f32.mrb[34].mxu0  ;;  %v11339_v42 = vadd.f32 %v10613_v17, %v2058_v4  ;;  %v11342_v30 = vadd.f32 %v10613_v17, %v2507_v15  ;;  %v1194_v43 = vmul.f32 0.25, %v9171_v34  ;;  %v1195_v48 = vmul.f32 0.25, %v9172_v23 }
 0x1ac   : > { %16125 = vst [vmem:[#allocation191_spill] sm:$0xff] %v11323_v51  ;;  %16126 = vst [vmem:[#allocation192_spill] sm:$0xff] %v11326_v11  ;;  %v11333_v31 = vmul.f32 0.5, %v11323_v51  ;;  %v11336_v21 = vmul.f32 0.5, %v11326_v11  ;;  %v2061_v9 = vpop.f32.mrb[35].mxu1  ;;  %v2510_v46 = vpop.f32.mrb[35].mxu0  ;;  %v11353_v15 = vadd.f32 %v7255_v3, %v10613_v17  ;;  %v11368_v3 = vadd.f32 %v7323_v53, %v10613_v17 }
 0x1ad   : > { %16131 = vst [vmem:[#allocation193_spill] sm:$0xff] %v11339_v42  ;;  %16132 = vst [vmem:[#allocation194_spill] sm:$0xff] %v11342_v30  ;;  %v1192_v5 = vmul.f32 0.25, %v9173_v60  ;;  %v1193_v61 = vmul.f32 0.25, %v9174_v41  ;;  %v7776_v6 = vpop.permute.xlu1 %7775  ;;  %v7771_v56 = vpop.permute.xlu0 %7770  ;;  %v16133_v51 = vld [vmem:[#allocation100_spill] sm:$0xff]  ;;  %v11347_v11 = vmul.f32 0.5, %v11339_v42 }
 0x1ae   : > { %16129 = vst [vmem:[#allocation77_spill] sm:$0xff] %v11333_v31  ;;  %16130 = vst [vmem:[#allocation97_spill] sm:$0xff] %v11336_v21  ;;  %v4014_v25 = vmax.f32 %v16133_v51, %v11333_v31  ;;  %v11350_v4 = vmul.f32 0.5, %v11342_v30  ;;  %2810 = vrot.lane.b32.xlu1 %v16137_v47, %s9432_s8  ;;  %7990 = vrot.lane.b32.xlu0 %v16128_v1, %s9430_s18  ;;  %v3233_v34 = vmax.f32 %v1194_v43, 0.0  ;;  %v3234_v23 = vmax.f32 %v1195_v48, 0.0  ;;  %v16139_v42 = vld [vmem:[#allocation104_spill] sm:$0xff] }
 0x1af   : > { %16134 = vst [vmem:[#allocation195_spill] sm:$0xff] %v11347_v11  ;;  %16136 = vst [vmem:[#allocation197_spill] sm:$0xff] %v11353_v15  ;;  %v3231_v60 = vmax.f32 %v1192_v5, 0.0  ;;  %v3232_v41 = vmax.f32 %v1193_v61, 0.0  ;;  %v4012_v30 = vmax.f32 %v16139_v42, %v11347_v11  ;;  %v11365_v51 = vmul.f32 0.5, %v11353_v15  ;;  %v16145_v15 = vld [vmem:[#allocation11_spill] sm:$0xff] }
 0x1b0   : > { %16135 = vst [vmem:[#allocation196_spill] sm:$0xff] %v11350_v4  ;;  %v11360_v31 = vmax.f32 %v4014_v25, %v11336_v21  ;;  %16141 = vst [vmem:[#allocation199_spill] sm:$0xff] %v11368_v3  ;;  %v7258_v47 = vpop.f32.mrb[36].mxu1  ;;  %v3286_v0 = vpack.c.bf16 %v3234_v23, %v3233_v34  ;;  %v11371_v43 = vadd.f32 %v10613_v17, %v2061_v9  ;;  %v11384_v53 = vmul.f32 0.5, %v11368_v3  ;;  %v16147_v9 = vld [vmem:[#allocation71_spill] sm:$0xff]  ;;  %v16151_v3 = vld [vmem:[#allocation56_spill] sm:$0xff] }
 0x1b1   : > { %16140 = vst [vmem:[#allocation198_spill] sm:$0xff] %v11365_v51  ;;  %v3285_v14 = vpack.c.bf16 %v3232_v41, %v3231_v60  ;;  %v11374_v48 = vadd.f32 %v10613_v17, %v2510_v46  ;;  %v2783_v25 = vpop.permute.xlu1 %2782  ;;  %v11376_v5 = vpop.permute.xlu0 %7780  ;;  %v11379_v61 = vmax.f32 %v4012_v30, %v11350_v4  ;;  %v4015_v11 = vmax.f32 %v16145_v15, %v11365_v51  ;;  %v16154_v42 = vld [vmem:[#allocation55_spill] sm:$0xff] }
 0x1b2   : > { %16138 = vst [vmem:[#allocation62_spill] sm:$0xff] %v11360_v31  ;;  %16142 = vst [vmem:[#allocation200_spill] sm:$0xff] %v11371_v43  ;;  %v2074_v34 = vpop.f32.mrb[37].mxu1  ;;  %v7326_v23 = vpop.f32.mrb[36].mxu0  ;;  %2812 = vrot.lane.b32.xlu1 %v16147_v9, %s9432_s8  ;;  %7995 = vrot.lane.b32.xlu0 %v16127_v45, %s9430_s18  ;;  %v11391_v17 = vmul.f32 0.5, %v11371_v43  ;;  %v16152_v9 = vunpack.c.l.bf16 %v16151_v3  ;;  %v16153_v43 = vld [vmem:[#allocation111_spill] sm:$0xff]  ;;  %v16155_v21 = vunpack.c.l.bf16 %v16154_v42 }
 0x1b3   : > { %16143 = vst [vmem:[#allocation201_spill] sm:$0xff] %v11374_v48  ;;  %16144 = vst [vmem:[#allocation202_spill] sm:$0xff] %v11379_v61  ;;  %v11394_v46 = vmul.f32 0.5, %v11374_v48  ;;  %v7259_v30 = vpop.f32.mrb[38].mxu1  ;;  %v2523_v60 = vpop.f32.mrb[37].mxu0  ;;  %7408 = vmatprep.mubr.msk.bf16.mxu1 %vm1478_vm0, %v2783_v25  ;;  %7476 = vmatprep.mubr.msk.bf16.mxu0 %vm1478_vm0, %v3285_v14  ;;  %v11399_v41 = vmax.f32 %v4015_v11, %v11384_v53  ;;  %v16156_v31 = vld [vmem:[#allocation58_spill] sm:$0xff] }
 0x1b4   : > { %16146 = vst [vmem:[#allocation203_spill] sm:$0xff] %v11384_v53  ;;  %16148 = vst [vmem:[#allocation71_spill] sm:$0xff] %v11391_v17  ;;  %v9175_v51 = vadd.high.f32.bf16 %v16152_v9, %v7776_v6  ;;  %v2077_v15 = vpop.f32.mrb[39].mxu1  ;;  %v7327_v4 = vpop.f32.mrb[38].mxu0  ;;  %7477 = vmatmul.mubr.msk.bf16.gmra.mrb[116].mxu0 %vm1478_vm0, %v3286_v0  ;;  %v4013_v48 = vmax.f32 %v16153_v43, %v11391_v17  ;;  %v9176_v61 = vadd.low.f32.bf16 %v16155_v21, %v7776_v6  ;;  %v16158_v11 = vld [vmem:[#allocation57_spill] sm:$0xff]  ;;  %v16179_v17 = vld [vmem:[#allocation99_spill] sm:$0xff] }
 0x1b5   : > { %16149 = vst [vmem:[#allocation204_spill] sm:$0xff] %v11394_v46  ;;  %16150 = vst [vmem:[#allocation205_spill] sm:$0xff] %v11399_v41  ;;  %v16157_v25 = vunpack.c.l.bf16 %v16156_v31  ;;  %v2785_v14 = vpop.permute.xlu1 %2784  ;;  %v7786_v24 = vpop.permute.xlu0 %7785  ;;  %v16159_v53 = vunpack.c.l.bf16 %v16158_v11  ;;  %v11415_v3 = vld [vmem:[%s15174_s2] ss:$0 sm:$0xff] }
 0x1b6   : > { %v11418_v0 = vadd.f32 %v11415_v3, %v7258_v47  ;;  %v11421_v9 = vadd.f32 %v11415_v3, %v2074_v34  ;;  %v11424_v42 = vadd.f32 %v11415_v3, %v7326_v23  ;;  %v2526_v31 = vpop.f32.mrb[39].mxu0  ;;  %7409 = vmatmul.mubr.msk.bf16.gmra.mrb[116].mxu1 %vm1478_vm0, %v2785_v14  ;;  %v11428_v21 = vmax.f32 %v4013_v48, %v11394_v46  ;;  %v16173_v14 = vld [vmem:[#allocation115_spill] sm:$0xff] }
 0x1b7   : > { %v9177_v19 = vadd.high.f32.bf16 %v16157_v25, %v7771_v56  ;;  %v9178_v41 = vadd.low.f32.bf16 %v16159_v53, %v7771_v56  ;;  %v11432_v56 = vadd.f32 %v11415_v3, %v7259_v30  ;;  %v11435_v47 = vadd.f32 %v11415_v3, %v2523_v60  ;;  %8005 = vrot.lane.b32.xlu1 %v16127_v45, %s9432_s8 }
 0x1b8   : > { %16160 = vst [vmem:[#allocation56_spill] sm:$0xff] %v11418_v0  ;;  %16161 = vst [vmem:[#allocation55_spill] sm:$0xff] %v11421_v9  ;;  %v11441_v34 = vmul.f32 0.5, %v11418_v0  ;;  %v11444_v23 = vmul.f32 0.5, %v11421_v9  ;;  %v11447_v48 = vmul.f32 0.5, %v11424_v42  ;;  %8000 = vrot.lane.b32.xlu0 %v16128_v1, %s9432_s8  ;;  %v11461_v60 = vadd.f32 %v11415_v3, %v7327_v4  ;;  %v16174_v1 = vld [vmem:[#allocation25_spill] sm:$0xff] }
 0x1b9   : > { %16162 = vst [vmem:[#allocation58_spill] sm:$0xff] %v11424_v42  ;;  %16163 = vst [vmem:[#allocation57_spill] sm:$0xff] %v11428_v21  ;;  %v9179_v6 = vadd.high.f32.bf16 %v9177_v19, %v11376_v5  ;;  %v9180_v53 = vadd.low.f32.bf16 %v9178_v41, %v11376_v5  ;;  %v7262_v19 = vpop.f32.mrb[40].mxu1  ;;  %v11452_v30 = vmul.f32 0.5, %v11432_v56  ;;  %v11455_v45 = vmul.f32 0.5, %v11435_v47  ;;  %v7796_v41 = vpop.permute.xlu1 %7795  ;;  %v16175_v0 = vld [vmem:[#allocation118_spill] sm:$0xff] }
 0x1ba   : > { %16164 = vst [vmem:[#allocation206_spill] sm:$0xff] %v11432_v56  ;;  %16165 = vst [vmem:[#allocation207_spill] sm:$0xff] %v11435_v47  ;;  %v11458_v5 = vadd.f32 %v11415_v3, %v2077_v15  ;;  %v7791_v25 = vpop.permute.xlu0 %7790  ;;  %v4018_v11 = vmax.f32 %v16173_v14, %v11441_v34  ;;  %v4016_v9 = vmax.f32 %v16174_v1, %v11444_v23  ;;  %v2090_v42 = vpop.f32.mrb[41].mxu1  ;;  %v11473_v15 = vmul.f32 0.5, %v11461_v60 }
 0x1bb   : > { %16166 = vst [vmem:[#allocation208_spill] sm:$0xff] %v11441_v34  ;;  %16167 = vst [vmem:[#allocation209_spill] sm:$0xff] %v11444_v23  ;;  %v7330_v56 = vpop.f32.mrb[40].mxu0  ;;  %v4019_v47 = vmax.f32 %v16175_v0, %v11452_v30  ;;  %v11476_v4 = vadd.f32 %v11415_v3, %v2526_v31  ;;  %8015 = vrot.lane.b32.xlu1 %v16179_v17, %s9431_s20  ;;  %v7263_v34 = vpop.f32.mrb[42].mxu1  ;;  %v16182_v0 = vld [vmem:[#allocation101_spill] sm:$0xff]  ;;  %v16183_v31 = vld [vmem:[#allocation119_spill] sm:$0xff] }
 0x1bc   : > { %16168 = vst [vmem:[#allocation210_spill] sm:$0xff] %v11447_v48  ;;  %16169 = vst [vmem:[#allocation211_spill] sm:$0xff] %v11452_v30  ;;  %v11470_v46 = vmul.f32 0.5, %v11458_v5  ;;  %v2539_v14 = vpop.f32.mrb[41].mxu0  ;;  %v11481_v23 = vmax.f32 %v4018_v11, %v11447_v48  ;;  %v11484_v1 = vmax.f32 %v4016_v9, %v11455_v45  ;;  %v9181_v30 = vadd.high.f32.bf16 %v9175_v51, %v7786_v24 }
 0x1bd   : > { %16170 = vst [vmem:[#allocation212_spill] sm:$0xff] %v11455_v45  ;;  %16171 = vst [vmem:[#allocation213_spill] sm:$0xff] %v11458_v5  ;;  %v9182_v5 = vadd.low.f32.bf16 %v9176_v61, %v7786_v24  ;;  %8010 = vrot.lane.b32.xlu0 %v16182_v0, %s9431_s20  ;;  %v7331_v43 = vpop.f32.mrb[42].mxu0  ;;  %v11491_v49 = vmax.f32 %v4019_v47, %v11473_v15  ;;  %v11494_v22 = vmul.f32 0.5, %v11476_v4  ;;  %v7806_v11 = vpop.permute.xlu1 %7805 }
 0x1be   : > { %16172 = vst [vmem:[#allocation214_spill] sm:$0xff] %v11461_v60  ;;  %16176 = vst [vmem:[#allocation215_spill] sm:$0xff] %v11470_v46  ;;  %v2093_v60 = vpop.f32.mrb[43].mxu1  ;;  %v4017_v21 = vmax.f32 %v16183_v31, %v11470_v46  ;;  %v11496_v48 = vpop.permute.xlu0 %7800  ;;  %v11499_v51 = vadd.f32 %v11415_v3, %v7262_v19  ;;  %v9183_v9 = vadd.high.f32.bf16 %v9181_v30, %v7796_v41 }
 0x1bf   : > { %16177 = vst [vmem:[#allocation216_spill] sm:$0xff] %v11473_v15  ;;  %16178 = vst [vmem:[#allocation217_spill] sm:$0xff] %v11476_v4  ;;  %v2542_v24 = vpop.f32.mrb[43].mxu0  ;;  %v11505_v45 = vadd.f32 %v11415_v3, %v2090_v42  ;;  %v11508_v47 = vadd.f32 %v11415_v3, %v7330_v56  ;;  %v16190_v4 = vld [vmem:[#allocation74_spill] sm:$0xff]  ;;  %v9184_v46 = vadd.low.f32.bf16 %v9182_v5, %v7796_v41 }
 0x1c0   : > { %16180 = vst [vmem:[#allocation99_spill] sm:$0xff] %v11481_v23  ;;  %16181 = vst [vmem:[#allocation218_spill] sm:$0xff] %v11484_v1  ;;  %v11502_v61 = vmax.f32 %v4017_v21, %v11494_v22  ;;  %2814 = vrot.lane.b32.xlu1 %v16190_v4, %s9432_s8  ;;  %v9185_v31 = vadd.low.f32.bf16 %v9180_v53, %v7791_v25  ;;  %v9186_v15 = vadd.high.f32.bf16 %v9179_v6, %v7791_v25  ;;  %v7266_v21 = vpop.f32.mrb[44].mxu1  ;;  %v16195_v4 = vld [vmem:[#allocation121_spill] sm:$0xff] }
 0x1c1   : > { %16184 = vst [vmem:[#allocation101_spill] sm:$0xff] %v11491_v49  ;;  %16185 = vst [vmem:[#allocation219_spill] sm:$0xff] %v11494_v22  ;;  %v11513_v19 = vmul.f32 0.5, %v11499_v51  ;;  %8020 = vrot.lane.b32.xlu0 %v16182_v0, %s9430_s18  ;;  %v1199_v30 = vmul.f32 0.25, %v9183_v9  ;;  %v11518_v42 = vmul.f32 0.5, %v11505_v45  ;;  %v11521_v56 = vmul.f32 0.5, %v11508_v47  ;;  %v2787_v5 = vpop.permute.xlu1 %2786 }
 0x1c2   : > { %16186 = vst [vmem:[#allocation220_spill] sm:$0xff] %v11499_v51  ;;  %16187 = vst [vmem:[#allocation221_spill] sm:$0xff] %v11502_v61  ;;  %v11524_v22 = vadd.f32 %v11415_v3, %v7263_v34  ;;  %v11526_v53 = vpop.permute.xlu0 %7810  ;;  %v1198_v6 = vmul.f32 0.25, %v9184_v46  ;;  %v1196_v41 = vmul.f32 0.25, %v9185_v31  ;;  %v1197_v25 = vmul.f32 0.25, %v9186_v15  ;;  %v2106_v61 = vpop.f32.mrb[45].mxu1  ;;  %7412 = vmatprep.mubr.msk.bf16.mxu1 %vm1478_vm0, %v2787_v5 }
 0x1c3   : > { %16188 = vst [vmem:[#allocation222_spill] sm:$0xff] %v11505_v45  ;;  %16189 = vst [vmem:[#allocation223_spill] sm:$0xff] %v11508_v47  ;;  %v4022_v51 = vmax.f32 %v16195_v4, %v11513_v19  ;;  %v7334_v9 = vpop.f32.mrb[44].mxu0  ;;  %v3238_v45 = vmax.f32 %v1199_v30, 0.0  ;;  %v16196_v47 = vld [vmem:[#allocation122_spill] sm:$0xff]  ;;  %v11537_v1 = vadd.f32 %v11415_v3, %v2539_v14  ;;  %v7267_v15 = vpop.f32.mrb[46].mxu1 }
 0x1c4   : > { %16191 = vst [vmem:[#allocation74_spill] sm:$0xff] %v11513_v19  ;;  %16192 = vst [vmem:[#allocation224_spill] sm:$0xff] %v11518_v42  ;;  %v4020_v49 = vmax.f32 %v16196_v47, %v11518_v42  ;;  %v11534_v34 = vmul.f32 0.5, %v11524_v22  ;;  %v16199_v46 = vld [vmem:[#allocation78_spill] sm:$0xff]  ;;  %v2555_v31 = vpop.f32.mrb[45].mxu0  ;;  %v3237_v19 = vmax.f32 %v1198_v6, 0.0  ;;  %v11555_v6 = vadd.f32 %v11415_v3, %v7331_v43 }
 0x1c5   : > { %16193 = vst [vmem:[#allocation225_spill] sm:$0xff] %v11521_v56  ;;  %16194 = vst [vmem:[#allocation226_spill] sm:$0xff] %v11524_v22  ;;  %2816 = vrot.lane.b32.xlu1 %v16199_v46, %s9432_s8  ;;  %v3235_v4 = vmax.f32 %v1196_v41, 0.0  ;;  %v3236_v23 = vmax.f32 %v1197_v25, 0.0  ;;  %v11542_v5 = vmax.f32 %v4022_v51, %v11521_v56  ;;  %8025 = vrot.lane.b32.xlu0 %v16179_v17, %s9430_s18  ;;  %v2109_v30 = vpop.f32.mrb[47].mxu1  ;;  %v7335_v22 = vpop.f32.mrb[46].mxu0 }
 0x1c6   : > { %16197 = vst [vmem:[#allocation227_spill] sm:$0xff] %v11534_v34  ;;  %16198 = vst [vmem:[#allocation228_spill] sm:$0xff] %v11537_v1  ;;  %v16201_v42 = vld [vmem:[#allocation14_spill] sm:$0xff]  ;;  %v11549_v47 = vmul.f32 0.5, %v11537_v1  ;;  %v11552_v46 = vadd.f32 %v11415_v3, %v2093_v60  ;;  %v2789_v41 = vpop.permute.xlu1 %2788  ;;  %v11557_v51 = vpop.permute.xlu0 %7815  ;;  %v3288_v25 = vpack.c.bf16 %v3238_v45, %v3237_v19  ;;  %v11567_v60 = vmul.f32 0.5, %v11555_v6  ;;  %v16207_v43 = vld [vmem:[#allocation68_spill] sm:$0xff] }
 0x1c7   : > { %16200 = vst [vmem:[#allocation78_spill] sm:$0xff] %v11542_v5  ;;  %v4023_v14 = vmax.f32 %v16201_v42, %v11534_v34  ;;  %16204 = vst [vmem:[#allocation231_spill] sm:$0xff] %v11555_v6  ;;  %v3287_v56 = vpack.c.bf16 %v3236_v23, %v3235_v4  ;;  %v2558_v5 = vpop.f32.mrb[47].mxu0  ;;  %7413 = vmatmul.mubr.msk.bf16.gmra.mrb[120].mxu1 %vm1478_vm0, %v2789_v41  ;;  %v16208_v34 = vunpack.c.l.bf16 %v16207_v43  ;;  %v16209_v45 = vld [vmem:[#allocation67_spill] sm:$0xff] }
 0x1c8   : > { %16202 = vst [vmem:[#allocation229_spill] sm:$0xff] %v11549_v47  ;;  %16203 = vst [vmem:[#allocation230_spill] sm:$0xff] %v11552_v46  ;;  %v11561_v7 = vmax.f32 %v4020_v49, %v11549_v47  ;;  %v11564_v1 = vmul.f32 0.5, %v11552_v46  ;;  %v16210_v23 = vunpack.c.l.bf16 %v16209_v45  ;;  %v11578_v4 = vadd.f32 %v11415_v3, %v2542_v24  ;;  %v7270_v49 = vpop.f32.mrb[48].mxu1 }
 0x1c9   : > { %16206 = vst [vmem:[#allocation233_spill] sm:$0xff] %v11567_v60  ;;  %8035 = vrot.lane.b32.xlu1 %v16179_v17, %s9432_s8  ;;  %v9187_v42 = vadd.high.f32.bf16 %v16208_v34, %v7806_v11  ;;  %7480 = vmatprep.mubr.msk.bf16.mxu0 %vm1478_vm0, %v3287_v56  ;;  %v11586_v17 = vmax.f32 %v4023_v14, %v11567_v60  ;;  %v16213_v34 = vld [vmem:[#allocation70_spill] sm:$0xff]  ;;  %v16215_v56 = vld [vmem:[#allocation69_spill] sm:$0xff]  ;;  %v2122_v6 = vpop.f32.mrb[49].mxu1 }
 0x1ca   : > { %16205 = vst [vmem:[#allocation232_spill] sm:$0xff] %v11564_v1  ;;  %v11575_v19 = vadd.low.f32.bf16 %v16210_v23, %v7806_v11  ;;  %16211 = vst [vmem:[#allocation68_spill] sm:$0xff] %v11578_v4  ;;  %8030 = vrot.lane.b32.xlu0 %v16182_v0, %s9432_s8  ;;  %v4021_v41 = vmax.f32 %v10934_v54, %v11564_v1  ;;  %v16214_v43 = vunpack.c.l.bf16 %v16213_v34  ;;  %7481 = vmatmul.mubr.msk.bf16.gmra.mrb[120].mxu0 %vm1478_vm0, %v3288_v25  ;;  %v7826_v24 = vpop.permute.xlu1 %7825  ;;  %v11592_v45 = vpop.permute.xlu0 %7820 }
 0x1cb   : > { %16212 = vst [vmem:[#allocation67_spill] sm:$0xff] %v11586_v17  ;;  %v16216_v23 = vunpack.c.l.bf16 %v16215_v56  ;;  %v11600_v46 = vmul.f32 0.5, %v11578_v4  ;;  %v11603_v14 = vadd.f32 %v11415_v3, %v7266_v21  ;;  %v7338_v1 = vpop.f32.mrb[48].mxu0  ;;  %v11607_v25 = vadd.f32 %v11415_v3, %v2106_v61  ;;  %v16232_v17 = vld [vmem:[#allocation81_spill] sm:$0xff] }
 0x1cc   : > { %v9189_v11 = vadd.high.f32.bf16 %v16214_v43, %v11496_v48  ;;  %v11610_v43 = vadd.f32 %v11415_v3, %v7334_v9  ;;  %v11613_v56 = vadd.f32 %v11415_v3, %v7267_v15  ;;  %v11628_v9 = vadd.f32 %v11415_v3, %v2555_v31 }
 0x1cd   : > { %v11597_v0 = vadd.low.f32.bf16 %v16216_v23, %v11496_v48  ;;  %16217 = vst [vmem:[#allocation70_spill] sm:$0xff] %v11600_v46  ;;  %16218 = vst [vmem:[#allocation69_spill] sm:$0xff] %v11603_v14  ;;  %8045 = vrot.lane.b32.xlu1 %v10909_v36, %s9431_s20  ;;  %v7271_v48 = vpop.f32.mrb[50].mxu1  ;;  %v11617_v23 = vpop.f32.mrb[49].mxu0  ;;  %v11620_v21 = vmax.f32 %v4021_v41, %v11600_v46  ;;  %v11625_v61 = vmul.f32 0.5, %v11603_v14  ;;  %v11637_v54 = vmul.f32 0.5, %v11607_v25 }
 0x1ce   : > { %v9191_v34 = vadd.high.f32.bf16 %v9189_v11, %v11526_v53  ;;  %16219 = vst [vmem:[#allocation234_spill] sm:$0xff] %v11607_v25  ;;  %16220 = vst [vmem:[#allocation235_spill] sm:$0xff] %v11610_v43  ;;  %8040 = vrot.lane.b32.xlu0 %v10915_v32, %s9431_s20  ;;  %v11632_v15 = vpop.f32.mrb[51].mxu1  ;;  %v11634_v4 = vpop.f32.mrb[50].mxu0  ;;  %v11640_v41 = vmul.f32 0.5, %v11610_v43  ;;  %v11658_v25 = vadd.f32 %v11415_v3, %v7335_v22 }
 0x1cf   : > { %16221 = vst [vmem:[#allocation236_spill] sm:$0xff] %v11613_v56  ;;  %16222 = vst [vmem:[#allocation237_spill] sm:$0xff] %v11620_v21  ;;  %v9192_v11 = vadd.low.f32.bf16 %v11597_v0, %v11526_v53  ;;  %v11643_v53 = vmul.f32 0.5, %v11613_v56  ;;  %v11646_v0 = vadd.f32 %v11415_v3, %v2109_v30  ;;  %v11648_v31 = vpop.permute.xlu1 %7835  ;;  %v11650_v14 = vpop.permute.xlu0 %7830  ;;  %v4026_v46 = vmax.f32 %v10970_v38, %v11625_v61 }
 0x1d0   : > { %16223 = vst [vmem:[#allocation238_spill] sm:$0xff] %v11625_v61  ;;  %16224 = vst [vmem:[#allocation239_spill] sm:$0xff] %v11628_v9  ;;  %v11655_v21 = vmul.f32 0.5, %v11628_v9  ;;  %v11660_v43 = vpop.f32.mrb[51].mxu0  ;;  %v4024_v56 = vmax.f32 %v10984_v52, %v11637_v54  ;;  %v11675_v22 = vmul.f32 0.5, %v11658_v25  ;;  %v9193_v61 = vadd.high.f32.bf16 %v9187_v42, %v11557_v51 }
 0x1d1   : > { %16225 = vst [vmem:[#allocation240_spill] sm:$0xff] %v11637_v54  ;;  %16226 = vst [vmem:[#allocation241_spill] sm:$0xff] %v11640_v41  ;;  %v4027_v30 = vmax.f32 %v11005_v55, %v11643_v53  ;;  %v11667_v60 = vmul.f32 0.5, %v11646_v0  ;;  %2818 = vrot.lane.b32.xlu1 %v16232_v17, %s9432_s8  ;;  %v11672_v9 = vmax.f32 %v4026_v46, %v11640_v41  ;;  %v16391_v41 = vld [vmem:[#allocation13_spill] sm:$0xff] }
 0x1d2   : > { %16227 = vst [vmem:[#allocation242_spill] sm:$0xff] %v11643_v53  ;;  %16228 = vst [vmem:[#allocation243_spill] sm:$0xff] %v11646_v0  ;;  %v11679_v38 = vadd.f32 %v11415_v3, %v2558_v5  ;;  %8050 = vrot.lane.b32.xlu0 %v10915_v32, %s9430_s18  ;;  %v11683_v53 = vpop.f32.mrb[52].mxu1  ;;  %v11686_v0 = vmax.f32 %v4024_v56, %v11655_v21  ;;  %v9194_v17 = vadd.low.f32.bf16 %v11575_v19, %v11557_v51  ;;  %v11702_v52 = vpop.f32.mrb[52].mxu0  ;;  %v16241_v19 = vld [vmem:[#allocation84_spill] sm:$0xff] }
 0x1d3   : > { %16229 = vst [vmem:[#allocation244_spill] sm:$0xff] %v11655_v21  ;;  %16230 = vst [vmem:[#allocation245_spill] sm:$0xff] %v11658_v25  ;;  %v4025_v46 = vmax.f32 %v11050_v28, %v11667_v60  ;;  %v2791_v25 = vpop.permute.xlu1 %2790  ;;  %v11692_v55 = vpop.permute.xlu0 %7840  ;;  %v11695_v42 = vmax.f32 %v4027_v30, %v11675_v22  ;;  %v9195_v56 = vadd.high.f32.bf16 %v9193_v61, %v7826_v24 }
 0x1d4   : > { %16231 = vst [vmem:[#allocation246_spill] sm:$0xff] %v11667_v60  ;;  %16233 = vst [vmem:[#allocation81_spill] sm:$0xff] %v11672_v9  ;;  %v11698_v5 = vmul.f32 0.5, %v11679_v38  ;;  %v11700_v54 = vpop.f32.mrb[53].mxu1  ;;  %7416 = vmatprep.mubr.msk.bf16.mxu1 %vm1478_vm0, %v2791_v25  ;;  %v11706_v60 = vadd.f32 %v11415_v3, %v7270_v49  ;;  %v11709_v51 = vadd.f32 %v11415_v3, %v2122_v6 }
 0x1d5   : > { %16234 = vst [vmem:[#allocation247_spill] sm:$0xff] %v11675_v22  ;;  %16235 = vst [vmem:[#allocation248_spill] sm:$0xff] %v11679_v38  ;;  %2820 = vrot.lane.b32.xlu1 %v16241_v19, %s9432_s8  ;;  %v11713_v30 = vpop.f32.mrb[54].mxu1  ;;  %v11715_v38 = vpop.f32.mrb[53].mxu0  ;;  %v9196_v22 = vadd.low.f32.bf16 %v9194_v17, %v7826_v24  ;;  %v9197_v25 = vadd.high.f32.bf16 %v9191_v34, %v11592_v45  ;;  %v11722_v61 = vadd.f32 %v11415_v3, %v7338_v1 }
 0x1d6   : > { %16236 = vst [vmem:[#allocation249_spill] sm:$0xff] %v11686_v0  ;;  %16237 = vst [vmem:[#allocation250_spill] sm:$0xff] %v11695_v42  ;;  %v11718_v28 = vmax.f32 %v4025_v46, %v11698_v5  ;;  %8055 = vrot.lane.b32.xlu0 %v10909_v36, %s9430_s18  ;;  %v11726_v6 = vpop.f32.mrb[55].mxu1  ;;  %v11728_v49 = vpop.f32.mrb[54].mxu0  ;;  %v1203_v19 = vmul.f32 0.25, %v9195_v56  ;;  %v9198_v42 = vadd.low.f32.bf16 %v9192_v11, %v11592_v45  ;;  %v11732_v21 = vmul.f32 0.5, %v11706_v60 }
 0x1d7   : > { %16238 = vst [vmem:[#allocation251_spill] sm:$0xff] %v11698_v5  ;;  %16239 = vst [vmem:[#allocation252_spill] sm:$0xff] %v11706_v60  ;;  %v11735_v24 = vmul.f32 0.5, %v11709_v51  ;;  %v2793_v34 = vpop.permute.xlu1 %2792  ;;  %v11737_v46 = vpop.permute.xlu0 %7845  ;;  %v1202_v1 = vmul.f32 0.25, %v9196_v22  ;;  %v1201_v17 = vmul.f32 0.25, %v9197_v25  ;;  %v11740_v5 = vmul.f32 0.5, %v11722_v61 }
 0x1d8   : > { %16240 = vst [vmem:[#allocation253_spill] sm:$0xff] %v11709_v51  ;;  %16242 = vst [vmem:[#allocation84_spill] sm:$0xff] %v11718_v28  ;;  %v11743_v28 = vadd.f32 %v11415_v3, %v7271_v48  ;;  %v11745_v56 = vpop.f32.mrb[55].mxu0  ;;  %7417 = vmatmul.mubr.msk.bf16.gmra.mrb[124].mxu1 %vm1478_vm0, %v2793_v34  ;;  %v3242_v45 = vmax.f32 %v1203_v19, 0.0  ;;  %v1200_v11 = vmul.f32 0.25, %v9198_v42  ;;  %v4030_v51 = vmax.f32 %v11059_v13, %v11732_v21  ;;  %v11763_v42 = vpop.f32.mrb[56].mxu1 }
 0x1d9   : > { %16243 = vst [vmem:[#allocation254_spill] sm:$0xff] %v11722_v61  ;;  %16244 = vst [vmem:[#allocation255_spill] sm:$0xff] %v11732_v21  ;;  %v4028_v60 = vmax.f32 %v11062_v10, %v11735_v24  ;;  %8065 = vrot.lane.b32.xlu1 %v10909_v36, %s9432_s8  ;;  %v3241_v22 = vmax.f32 %v1202_v1, 0.0  ;;  %v3240_v25 = vmax.f32 %v1201_v17, 0.0  ;;  %v11759_v61 = vadd.f32 %v11415_v3, %v11617_v23 }
 0x1da   : > { %16245 = vst [vmem:[#allocation256_spill] sm:$0xff] %v11735_v24  ;;  %16246 = vst [vmem:[#allocation257_spill] sm:$0xff] %v11740_v5  ;;  %v11755_v48 = vmul.f32 0.5, %v11743_v28  ;;  %8060 = vrot.lane.b32.xlu0 %v10915_v32, %s9432_s8  ;;  %v3239_v19 = vmax.f32 %v1200_v11, 0.0  ;;  %v11766_v34 = vmax.f32 %v4030_v51, %v11740_v5  ;;  %v11770_v36 = vadd.f32 %v11415_v3, %v11632_v15  ;;  %v11785_v51 = vpop.f32.mrb[57].mxu1  ;;  %v11787_v24 = vpop.f32.mrb[56].mxu0 }
 0x1db   : > { %16247 = vst [vmem:[#allocation258_spill] sm:$0xff] %v11743_v28  ;;  %16249 = vst [vmem:[#allocation260_spill] sm:$0xff] %v11759_v61  ;;  %v11774_v1 = vadd.f32 %v11415_v3, %v11634_v4  ;;  %v11776_v17 = vpop.permute.xlu1 %7855  ;;  %v11778_v23 = vpop.permute.xlu0 %7850  ;;  %v3290_v28 = vpack.c.bf16 %v3242_v45, %v3241_v22  ;;  %v11783_v11 = vmul.f32 0.5, %v11759_v61  ;;  %v16256_v22 = vld [vmem:[#allocation88_spill] sm:$0xff] }
 0x1dc   : > { %16248 = vst [vmem:[#allocation259_spill] sm:$0xff] %v11755_v48  ;;  %16250 = vst [vmem:[#allocation261_spill] sm:$0xff] %v11766_v34  ;;  %v4031_v32 = vmax.f32 %v11077_v37, %v11755_v48  ;;  %v3289_v15 = vpack.c.bf16 %v3240_v25, %v3239_v19  ;;  %v11790_v10 = vmul.f32 0.5, %v11770_v36  ;;  %v11795_v5 = vpop.f32.mrb[58].mxu1  ;;  %v11797_v45 = vpop.f32.mrb[57].mxu0  ;;  %v16258_v48 = vld [vmem:[#allocation21_spill] sm:$0xff] }
 0x1dd   : > { %16251 = vst [vmem:[#allocation262_spill] sm:$0xff] %v11770_v36  ;;  %16252 = vst [vmem:[#allocation263_spill] sm:$0xff] %v11774_v1  ;;  %v11793_v4 = vmul.f32 0.5, %v11774_v1  ;;  %2824 = vrot.lane.b32.xlu1 %v16256_v22, %s9432_s8  ;;  %v11802_v61 = vmax.f32 %v4028_v60, %v11783_v11  ;;  %v16259_v37 = vunpack.c.l.bf16 %v16258_v48  ;;  %v16260_v19 = vld [vmem:[#allocation87_spill] sm:$0xff]  ;;  %v11809_v36 = vpop.f32.mrb[59].mxu1  ;;  %v11811_v1 = vpop.f32.mrb[58].mxu0 }
 0x1de   : > { %16253 = vst [vmem:[#allocation264_spill] sm:$0xff] %v11783_v11  ;;  %16254 = vst [vmem:[#allocation265_spill] sm:$0xff] %v11790_v10  ;;  %2822 = vrot.lane.b32.xlu0 %v16260_v19, %s9432_s8  ;;  %v4029_v21 = vmax.f32 %v11080_v44, %v11790_v10  ;;  %v16262_v60 = vld [vmem:[#allocation20_spill] sm:$0xff]  ;;  %7484 = vmatprep.mubr.msk.bf16.mxu0 %vm1478_vm0, %v3289_v15  ;;  %v11844_v15 = vadd.f32 %v11415_v3, %v11683_v53 }
 0x1df   : > { %16255 = vst [vmem:[#allocation266_spill] sm:$0xff] %v11793_v4  ;;  %16257 = vst [vmem:[#allocation88_spill] sm:$0xff] %v11802_v61  ;;  %v9199_v25 = vadd.high.f32.bf16 %v16259_v37, %v11648_v31  ;;  %v11816_v13 = vmax.f32 %v4031_v32, %v11793_v4  ;;  %v16263_v22 = vunpack.c.l.bf16 %v16262_v60  ;;  %v11823_v37 = vadd.f32 %v11415_v3, %v11660_v43  ;;  %v11826_v48 = vpop.permute.xlu1 %7865  ;;  %v11828_v19 = vpop.permute.xlu0 %7860  ;;  %v16265_v61 = vld [vmem:[#allocation19_spill] sm:$0xff]  ;;  %v16267_v32 = vld [vmem:[#allocation16_spill] sm:$0xff] }
 0x1e0   : > { %v16266_v10 = vunpack.c.l.bf16 %v16265_v61  ;;  %v16268_v4 = vunpack.c.l.bf16 %v16267_v32  ;;  %7485 = vmatmul.mubr.msk.bf16.gmra.mrb[124].mxu0 %vm1478_vm0, %v3290_v28  ;;  %16270 = vst [vmem:[#allocation19_spill] sm:$0xff] %v11844_v15  ;;  %v11848_v60 = vadd.f32 %v11415_v3, %v11700_v54  ;;  %v11858_v61 = vadd.f32 %v11415_v3, %v11713_v30 }
 0x1e1   : > { %16261 = vst [vmem:[#allocation21_spill] sm:$0xff] %v11816_v13  ;;  %v9200_v11 = vadd.low.f32.bf16 %v16263_v22, %v11648_v31  ;;  %16264 = vst [vmem:[#allocation87_spill] sm:$0xff] %v11823_v37  ;;  %v11837_v31 = vpop.f32.mrb[59].mxu0  ;;  %v11840_v43 = vmul.f32 0.5, %v11823_v37  ;;  %v11862_v53 = vadd.f32 %v11415_v3, %v11715_v38  ;;  %v11892_v32 = vadd.f32 %v11415_v3, %v11728_v49 }
 0x1e2   : > { %v9201_v44 = vadd.high.f32.bf16 %v16266_v10, %v11650_v14  ;;  %v9202_v13 = vadd.low.f32.bf16 %v16268_v4, %v11650_v14  ;;  %16271 = vst [vmem:[#allocation16_spill] sm:$0xff] %v11848_v60  ;;  %v11852_v10 = vadd.f32 %v11415_v3, %v11702_v52  ;;  %16273 = vst [vmem:[#allocation268_spill] sm:$0xff] %v11858_v61  ;;  %v11864_v4 = vpop.f32.mrb[60].mxu1  ;;  %v11870_v52 = vmul.f32 0.5, %v11844_v15 }
 0x1e3   : > { %16269 = vst [vmem:[#allocation20_spill] sm:$0xff] %v11840_v43  ;;  %16274 = vst [vmem:[#allocation269_spill] sm:$0xff] %v11862_v53  ;;  %v11867_v54 = vmax.f32 %v4029_v21, %v11840_v43  ;;  %v11878_v30 = vpop.permute.xlu0 %7870  ;;  %v11881_v38 = vmul.f32 0.5, %v11858_v61  ;;  %v11884_v22 = vmul.f32 0.5, %v11862_v53  ;;  %v11888_v21 = vadd.f32 %v11415_v3, %v11726_v6 }
 0x1e4   : > { %16272 = vst [vmem:[#allocation267_spill] sm:$0xff] %v11852_v10  ;;  %v9203_v14 = vadd.low.f32.bf16 %v9202_v13, %v11692_v55  ;;  %v9204_v28 = vadd.high.f32.bf16 %v9201_v44, %v11692_v55  ;;  %16276 = vst [vmem:[#allocation271_spill] sm:$0xff] %v11870_v52  ;;  %v11873_v13 = vmul.f32 0.5, %v11848_v60  ;;  %v11876_v55 = vmul.f32 0.5, %v11852_v10  ;;  %v2795_v44 = vpop.permute.xlu1 %2794  ;;  %v11894_v60 = vpop.f32.mrb[61].mxu1 }
 0x1e5   : > { %16275 = vst [vmem:[#allocation270_spill] sm:$0xff] %v11867_v54  ;;  %16279 = vst [vmem:[#allocation274_spill] sm:$0xff] %v11881_v38  ;;  %v11896_v10 = vpop.f32.mrb[60].mxu0  ;;  %7420 = vmatprep.mubr.msk.bf16.mxu1 %vm1478_vm0, %v2795_v44  ;;  %v4034_v61 = vmax.f32 %v11112_v62, %v11870_v52  ;;  %v11903_v15 = vpop.f32.mrb[62].mxu1  ;;  %v4035_v49 = vmax.f32 %v11152_v20, %v11881_v38  ;;  %v11910_v37 = vmul.f32 0.5, %v11888_v21  ;;  %v11913_v43 = vmul.f32 0.5, %v11892_v32 }
 0x1e6   : > { %16277 = vst [vmem:[#allocation272_spill] sm:$0xff] %v11873_v13  ;;  %16278 = vst [vmem:[#allocation273_spill] sm:$0xff] %v11876_v55  ;;  %v4032_v53 = vmax.f32 %v11136_v2, %v11873_v13  ;;  %v11905_v6 = vpop.f32.mrb[61].mxu0  ;;  %v11917_v44 = vadd.f32 %v11415_v3, %v11745_v56  ;;  %v11919_v52 = vpop.f32.mrb[63].mxu1  ;;  %v9206_v38 = vadd.low.f32.bf16 %v9200_v11, %v11737_v46 }
 0x1e7   : > { %16280 = vst [vmem:[#allocation275_spill] sm:$0xff] %v11884_v22  ;;  %16281 = vst [vmem:[#allocation276_spill] sm:$0xff] %v11888_v21  ;;  %v11921_v13 = vpop.f32.mrb[62].mxu0  ;;  %v11924_v2 = vmax.f32 %v4034_v61, %v11876_v55  ;;  %v9205_v21 = vadd.high.f32.bf16 %v9199_v25, %v11737_v46  ;;  %v11931_v20 = vpop.permute.xlu0 %7875  ;;  %v4033_v56 = vmax.f32 %v11155_v63, %v11910_v37  ;;  %v16309_v55 = vld [vmem:[#allocation28_spill] sm:$0xff] }
 0x1e8   : > { %16282 = vst [vmem:[#allocation277_spill] sm:$0xff] %v11892_v32  ;;  %16283 = vst [vmem:[#allocation278_spill] sm:$0xff] %v11910_v37  ;;  %v11927_v62 = vmax.f32 %v4032_v53, %v11884_v22  ;;  %v2797_v32 = vpop.permute.xlu1 %2796  ;;  %v11936_v54 = vmax.f32 %v4035_v49, %v11913_v43  ;;  %v11939_v34 = vmul.f32 0.5, %v11917_v44  ;;  %v11941_v61 = vpop.f32.mrb[63].mxu0  ;;  %v11946_v25 = vadd.f32 %v11415_v3, %v11763_v42 }
 0x1e9   : > { %16284 = vst [vmem:[#allocation279_spill] sm:$0xff] %v11913_v43  ;;  %16285 = vst [vmem:[#allocation280_spill] sm:$0xff] %v11917_v44  ;;  %7421 = vmatmul.mubr.msk.bf16.gmra.mrb[128].mxu1 %vm1478_vm0, %v2797_v32  ;;  %v9207_v11 = vadd.high.f32.bf16 %v9205_v21, %v11776_v17  ;;  %v11954_v53 = vadd.f32 %v11415_v3, %v11785_v51  ;;  %v11958_v49 = vadd.f32 %v11415_v3, %v11787_v24  ;;  %v11960_v44 = vpop.f32.mrb[64].mxu1 }
 0x1ea   : > { %16286 = vst [vmem:[#allocation281_spill] sm:$0xff] %v11924_v2  ;;  %16287 = vst [vmem:[#allocation282_spill] sm:$0xff] %v11927_v62  ;;  %v11949_v46 = vmax.f32 %v4033_v56, %v11939_v34  ;;  %v9208_v32 = vadd.low.f32.bf16 %v9206_v38, %v11776_v17  ;;  %v9209_v42 = vadd.low.f32.bf16 %v9203_v14, %v11778_v23  ;;  %v11966_v56 = vmul.f32 0.5, %v11946_v25  ;;  %v11982_v14 = vpop.f32.mrb[65].mxu1 }
 0x1eb   : > { %16288 = vst [vmem:[#allocation283_spill] sm:$0xff] %v11936_v54  ;;  %16289 = vst [vmem:[#allocation284_spill] sm:$0xff] %v11939_v34  ;;  %v9210_v37 = vadd.high.f32.bf16 %v9204_v28, %v11778_v23  ;;  %v11970_v34 = vpop.permute.xlu0 %7880  ;;  %v1207_v51 = vmul.f32 0.25, %v9207_v11  ;;  %v11973_v63 = vmul.f32 0.5, %v11954_v53  ;;  %v11976_v24 = vmul.f32 0.5, %v11958_v49  ;;  %v11984_v23 = vpop.f32.mrb[64].mxu0 }
 0x1ec   : > { %16290 = vst [vmem:[#allocation285_spill] sm:$0xff] %v11946_v25  ;;  %16291 = vst [vmem:[#allocation286_spill] sm:$0xff] %v11949_v46  ;;  %v11968_v21 = vpop.permute.xlu1 %7885  ;;  %v11980_v17 = vadd.f32 %v11415_v3, %v11795_v5  ;;  %v1206_v28 = vmul.f32 0.25, %v9208_v32  ;;  %v1204_v38 = vmul.f32 0.25, %v9209_v42  ;;  %v4038_v11 = vmax.f32 %v11195_v59, %v11966_v56  ;;  %v11988_v43 = vpop.f32.mrb[66].mxu1 }
 0x1ed   : > { %16292 = vst [vmem:[#allocation287_spill] sm:$0xff] %v11954_v53  ;;  %16293 = vst [vmem:[#allocation288_spill] sm:$0xff] %v11958_v49  ;;  %v1205_v25 = vmul.f32 0.25, %v9210_v37  ;;  %v11990_v53 = vpop.f32.mrb[65].mxu0  ;;  %v3246_v49 = vmax.f32 %v1207_v51, 0.0  ;;  %v4036_v46 = vmax.f32 %v11210_v57, %v11973_v63  ;;  %v11999_v54 = vadd.f32 %v11415_v3, %v11797_v45  ;;  %v12001_v32 = vpop.f32.mrb[67].mxu1 }
 0x1ee   : > { %16294 = vst [vmem:[#allocation289_spill] sm:$0xff] %v11966_v56  ;;  %16295 = vst [vmem:[#allocation290_spill] sm:$0xff] %v11973_v63  ;;  %v11995_v5 = vmul.f32 0.5, %v11980_v17  ;;  %v12003_v37 = vpop.f32.mrb[66].mxu0  ;;  %v3245_v42 = vmax.f32 %v1206_v28, 0.0  ;;  %v3243_v56 = vmax.f32 %v1204_v38, 0.0  ;;  %v12006_v22 = vmax.f32 %v4038_v11, %v11976_v24 }
 0x1ef   : > { %16296 = vst [vmem:[#allocation291_spill] sm:$0xff] %v11976_v24  ;;  %16297 = vst [vmem:[#allocation292_spill] sm:$0xff] %v11980_v17  ;;  %v3244_v59 = vmax.f32 %v1205_v25, 0.0  ;;  %v12010_v63 = vpop.permute.xlu0 %7890  ;;  %v12015_v45 = vmul.f32 0.5, %v11999_v54  ;;  %v12019_v57 = vadd.f32 %v11415_v3, %v11809_v36  ;;  %v12023_v25 = vadd.f32 %v11415_v3, %v11811_v1  ;;  %v12025_v28 = vpop.f32.mrb[67].mxu0  ;;  %v16307_v36 = vld [vmem:[#allocation29_spill] sm:$0xff] }
 0x1f0   : > { %16298 = vst [vmem:[#allocation293_spill] sm:$0xff] %v11995_v5  ;;  %16299 = vst [vmem:[#allocation294_spill] sm:$0xff] %v11999_v54  ;;  %v12008_v51 = vpop.permute.xlu1 %7895  ;;  %v4039_v17 = vmax.f32 %v11232_v58, %v11995_v5  ;;  %v3292_v38 = vpack.c.bf16 %v3246_v49, %v3245_v42  ;;  %v12036_v58 = vpop.f32.mrb[68].mxu1  ;;  %v16310_v62 = vunpack.c.l.bf16 %v16309_v55 }
 0x1f1   : > { %16300 = vst [vmem:[#allocation295_spill] sm:$0xff] %v12006_v22  ;;  %16301 = vst [vmem:[#allocation296_spill] sm:$0xff] %v12015_v45  ;;  %v3291_v11 = vpack.c.bf16 %v3244_v59, %v3243_v56  ;;  %v12028_v24 = vmax.f32 %v4036_v46, %v12015_v45  ;;  %v12031_v5 = vmul.f32 0.5, %v12019_v57  ;;  %v12034_v54 = vmul.f32 0.5, %v12023_v25 }
 0x1f2   : > { %16302 = vst [vmem:[#allocation297_spill] sm:$0xff] %v12019_v57  ;;  %16303 = vst [vmem:[#allocation298_spill] sm:$0xff] %v12023_v25  ;;  %v16308_v22 = vunpack.c.l.bf16 %v16307_v36  ;;  %v12044_v49 = vadd.low.f32.bf16 %v16310_v62, %v11826_v48  ;;  %v12048_v59 = vadd.f32 %v11415_v3, %v11837_v31  ;;  %v12064_v31 = vpop.f32.mrb[68].mxu0 }
 0x1f3   : > { %16304 = vst [vmem:[#allocation299_spill] sm:$0xff] %v12028_v24  ;;  %16305 = vst [vmem:[#allocation300_spill] sm:$0xff] %v12031_v5  ;;  %7488 = vmatprep.mubr.msk.bf16.mxu0 %vm1478_vm0, %v3291_v11  ;;  %v12051_v56 = vpop.permute.xlu0 %7900  ;;  %v4037_v42 = vmax.f32 %v11235_v33, %v12031_v5  ;;  %v12056_v36 = vmax.f32 %v4039_v17, %v12034_v54  ;;  %v16315_v11 = vld [vmem:[#allocation24_spill] sm:$0xff]  ;;  %v12075_v17 = vadd.f32 %v11415_v3, %v11864_v4 }
 0x1f4   : > { %16306 = vst [vmem:[#allocation301_spill] sm:$0xff] %v12034_v54  ;;  %v9211_v1 = vadd.high.f32.bf16 %v16308_v22, %v11826_v48  ;;  %16311 = vst [vmem:[#allocation29_spill] sm:$0xff] %v12048_v59  ;;  %v2799_v46 = vpop.permute.xlu1 %2798  ;;  %v16313_v22 = vld [vmem:[#allocation26_spill] sm:$0xff]  ;;  %7489 = vmatmul.mubr.msk.bf16.gmra.mrb[128].mxu0 %vm1478_vm0, %v3292_v38  ;;  %v12062_v48 = vpop.f32.mrb[69].mxu1  ;;  %v16316_v57 = vunpack.c.l.bf16 %v16315_v11  ;;  %v12071_v5 = vmul.f32 0.5, %v12048_v59 }
 0x1f5   : > { %16312 = vst [vmem:[#allocation28_spill] sm:$0xff] %v12056_v36  ;;  %v16314_v55 = vunpack.c.l.bf16 %v16313_v22  ;;  %7424 = vmatprep.mubr.msk.bf16.mxu1 %vm1478_vm0, %v2799_v46  ;;  %16318 = vst [vmem:[#allocation24_spill] sm:$0xff] %v12075_v17  ;;  %v12077_v22 = vpop.f32.mrb[70].mxu1  ;;  %v12079_v38 = vpop.f32.mrb[69].mxu0  ;;  %v12084_v46 = vadd.f32 %v11415_v3, %v11894_v60  ;;  %v12103_v60 = vmul.f32 0.5, %v12075_v17 }
 0x1f6   : > { %v9214_v25 = vadd.low.f32.bf16 %v16316_v57, %v11828_v19  ;;  %16317 = vst [vmem:[#allocation26_spill] sm:$0xff] %v12071_v5  ;;  %v12088_v57 = vadd.f32 %v11415_v3, %v11896_v10  ;;  %v12094_v4 = vpop.f32.mrb[71].mxu1  ;;  %v12096_v11 = vpop.f32.mrb[70].mxu0  ;;  %v12099_v59 = vmax.f32 %v4037_v42, %v12071_v5  ;;  %v12107_v10 = vadd.f32 %v11415_v3, %v11905_v6 }
 0x1f7   : > { %v9213_v62 = vadd.high.f32.bf16 %v16314_v55, %v11828_v19  ;;  %16319 = vst [vmem:[#allocation302_spill] sm:$0xff] %v12084_v46  ;;  %v12092_v19 = vadd.f32 %v11415_v3, %v11903_v15  ;;  %16323 = vst [vmem:[#allocation306_spill] sm:$0xff] %v12103_v60  ;;  %v12109_v54 = vpop.permute.xlu0 %7905  ;;  %v12112_v15 = vmul.f32 0.5, %v12084_v46  ;;  %v4042_v6 = vmax.f32 %v11269_v16, %v12103_v60 }
 0x1f8   : > { %16320 = vst [vmem:[#allocation303_spill] sm:$0xff] %v12088_v57  ;;  %16322 = vst [vmem:[#allocation305_spill] sm:$0xff] %v12099_v59  ;;  %v2801_v33 = vpop.permute.xlu1 %2800  ;;  %v12115_v45 = vmul.f32 0.5, %v12088_v57  ;;  %v12130_v46 = vmul.f32 0.5, %v12107_v10  ;;  %v12134_v57 = vadd.f32 %v11415_v3, %v11921_v13  ;;  %v9217_v13 = vadd.high.f32.bf16 %v9211_v1, %v11931_v20 }
 0x1f9   : > { %v9215_v55 = vadd.high.f32.bf16 %v9213_v62, %v11878_v30  ;;  %16321 = vst [vmem:[#allocation304_spill] sm:$0xff] %v12092_v19  ;;  %v9216_v62 = vadd.low.f32.bf16 %v9214_v25, %v11878_v30  ;;  %16324 = vst [vmem:[#allocation307_spill] sm:$0xff] %v12107_v10  ;;  %v12118_v42 = vmul.f32 0.5, %v12092_v19  ;;  %v12122_v30 = vadd.f32 %v11415_v3, %v11919_v52  ;;  %v12124_v25 = vpop.f32.mrb[71].mxu0 }
 0x1fa   : > { %16325 = vst [vmem:[#allocation308_spill] sm:$0xff] %v12112_v15  ;;  %16326 = vst [vmem:[#allocation309_spill] sm:$0xff] %v12115_v45  ;;  %7425 = vmatmul.mubr.msk.bf16.gmra.mrb[132].mxu1 %vm1478_vm0, %v2801_v33  ;;  %v4040_v19 = vmax.f32 %v11285_v35, %v12112_v15  ;;  %v12143_v33 = vpop.f32.mrb[72].mxu1  ;;  %v12146_v60 = vmax.f32 %v4042_v6, %v12115_v45  ;;  %v12149_v10 = vmul.f32 0.5, %v12134_v57  ;;  %v12169_v1 = vpop.f32.mrb[72].mxu0 }
 0x1fb   : > { %16327 = vst [vmem:[#allocation310_spill] sm:$0xff] %v12118_v42  ;;  %16328 = vst [vmem:[#allocation311_spill] sm:$0xff] %v12122_v30  ;;  %v4043_v52 = vmax.f32 %v11288_v39, %v12118_v42  ;;  %v12141_v17 = vmul.f32 0.5, %v12122_v30  ;;  %v12154_v16 = vadd.f32 %v11415_v3, %v11941_v61  ;;  %v12158_v42 = vpop.permute.xlu0 %7910  ;;  %v12167_v39 = vpop.f32.mrb[73].mxu1 }
 0x1fc   : > { %16329 = vst [vmem:[#allocation312_spill] sm:$0xff] %v12130_v46  ;;  %16330 = vst [vmem:[#allocation313_spill] sm:$0xff] %v12134_v57  ;;  %v12156_v15 = vpop.permute.xlu1 %7915  ;;  %v12161_v30 = vmax.f32 %v4040_v19, %v12130_v46  ;;  %v9218_v57 = vadd.low.f32.bf16 %v12044_v49, %v11931_v20  ;;  %v12177_v45 = vpop.f32.mrb[74].mxu1  ;;  %v9219_v46 = vadd.high.f32.bf16 %v9217_v13, %v11968_v21 }
 0x1fd   : > { %16331 = vst [vmem:[#allocation314_spill] sm:$0xff] %v12141_v17  ;;  %16332 = vst [vmem:[#allocation315_spill] sm:$0xff] %v12146_v60  ;;  %v4041_v6 = vmax.f32 %v11317_v8, %v12141_v17  ;;  %v12172_v61 = vmax.f32 %v4043_v52, %v12149_v10  ;;  %v12175_v35 = vmul.f32 0.5, %v12154_v16  ;;  %v12179_v19 = vpop.f32.mrb[73].mxu0  ;;  %v12184_v17 = vadd.f32 %v11415_v3, %v11960_v44  ;;  %v12190_v49 = vpop.f32.mrb[75].mxu1 }
 0x1fe   : > { %16333 = vst [vmem:[#allocation316_spill] sm:$0xff] %v12149_v10  ;;  %16334 = vst [vmem:[#allocation317_spill] sm:$0xff] %v12154_v16  ;;  %v12188_v20 = vadd.f32 %v11415_v3, %v11982_v14  ;;  %v12192_v52 = vpop.f32.mrb[74].mxu0  ;;  %v9220_v8 = vadd.low.f32.bf16 %v9218_v57, %v11968_v21  ;;  %v9221_v10 = vadd.high.f32.bf16 %v9215_v55, %v11970_v34  ;;  %v1211_v14 = vmul.f32 0.25, %v9219_v46 }
 0x1ff   : > { %16335 = vst [vmem:[#allocation318_spill] sm:$0xff] %v12161_v30  ;;  %16336 = vst [vmem:[#allocation319_spill] sm:$0xff] %v12172_v61  ;;  %v12195_v16 = vmax.f32 %v4041_v6, %v12175_v35  ;;  %v12201_v13 = vadd.f32 %v11415_v3, %v11984_v23  ;;  %v12205_v61 = vpop.permute.xlu0 %7920  ;;  %v9222_v30 = vadd.low.f32.bf16 %v9216_v62, %v11970_v34  ;;  %v12209_v5 = vmul.f32 0.5, %v12184_v17  ;;  %v12214_v21 = vpop.f32.mrb[75].mxu0  ;;  %v16346_v34 = vld [vmem:[#allocation110_spill] sm:$0xff] }
 0x200   : > { %16337 = vst [vmem:[#allocation320_spill] sm:$0xff] %v12175_v35  ;;  %16338 = vst [vmem:[#allocation321_spill] sm:$0xff] %v12184_v17  ;;  %v12203_v44 = vpop.permute.xlu1 %7925  ;;  %v12212_v6 = vmul.f32 0.5, %v12188_v20  ;;  %v1210_v55 = vmul.f32 0.25, %v9220_v8  ;;  %v1209_v57 = vmul.f32 0.25, %v9221_v10  ;;  %v12221_v35 = vadd.f32 %v11415_v3, %v11988_v43  ;;  %v16347_v17 = vld [vmem:[#allocation112_spill] sm:$0xff] }
 0x201   : > { %16339 = vst [vmem:[#allocation322_spill] sm:$0xff] %v12188_v20  ;;  %16340 = vst [vmem:[#allocation323_spill] sm:$0xff] %v12195_v16  ;;  %v12217_v23 = vmul.f32 0.5, %v12201_v13  ;;  %v3250_v46 = vmax.f32 %v1211_v14, 0.0  ;;  %v1208_v16 = vmul.f32 0.25, %v9222_v30  ;;  %v4046_v62 = vmax.f32 %v16346_v34, %v12209_v5  ;;  %v12227_v60 = vpop.f32.mrb[76].mxu1 }
 0x202   : > { %16341 = vst [vmem:[#allocation324_spill] sm:$0xff] %v12201_v13  ;;  %16342 = vst [vmem:[#allocation325_spill] sm:$0xff] %v12209_v5  ;;  %v4044_v20 = vmax.f32 %v16347_v17, %v12212_v6  ;;  %v3249_v59 = vmax.f32 %v1210_v55, 0.0  ;;  %v3248_v8 = vmax.f32 %v1209_v57, 0.0  ;;  %v12230_v10 = vmul.f32 0.5, %v12221_v35  ;;  %v12249_v57 = vpop.f32.mrb[77].mxu1 }
 0x203   : > { %16343 = vst [vmem:[#allocation326_spill] sm:$0xff] %v12212_v6  ;;  %16344 = vst [vmem:[#allocation327_spill] sm:$0xff] %v12217_v23  ;;  %v12234_v13 = vadd.f32 %v11415_v3, %v11990_v53  ;;  %v12236_v14 = vpop.permute.xlu0 %7930  ;;  %v3247_v30 = vmax.f32 %v1208_v16, 0.0  ;;  %v12239_v5 = vmax.f32 %v4046_v62, %v12217_v23  ;;  %v12243_v6 = vadd.f32 %v11415_v3, %v12001_v32  ;;  %v16353_v16 = vld [vmem:[#allocation113_spill] sm:$0xff]  ;;  %v12259_v23 = vpop.f32.mrb[78].mxu1 }
 0x204   : > { %16345 = vst [vmem:[#allocation328_spill] sm:$0xff] %v12221_v35  ;;  %16348 = vst [vmem:[#allocation329_spill] sm:$0xff] %v12230_v10  ;;  %v2803_v43 = vpop.permute.xlu1 %2802  ;;  %v12247_v55 = vadd.f32 %v11415_v3, %v12003_v37  ;;  %v12251_v35 = vpop.f32.mrb[76].mxu0  ;;  %v3294_v53 = vpack.c.bf16 %v3250_v46, %v3249_v59  ;;  %v4047_v17 = vmax.f32 %v16353_v16, %v12230_v10 }
 0x205   : > { %16349 = vst [vmem:[#allocation330_spill] sm:$0xff] %v12234_v13  ;;  %16350 = vst [vmem:[#allocation331_spill] sm:$0xff] %v12239_v5  ;;  %7428 = vmatprep.mubr.msk.bf16.mxu1 %vm1478_vm0, %v2803_v43  ;;  %v12257_v62 = vmul.f32 0.5, %v12234_v13  ;;  %v12261_v32 = vpop.f32.mrb[77].mxu0  ;;  %v3293_v34 = vpack.c.bf16 %v3248_v8, %v3247_v30  ;;  %v12264_v37 = vmul.f32 0.5, %v12243_v6  ;;  %v12269_v36 = vpop.f32.mrb[79].mxu1 }
 0x206   : > { %16351 = vst [vmem:[#allocation332_spill] sm:$0xff] %v12243_v6  ;;  %16352 = vst [vmem:[#allocation333_spill] sm:$0xff] %v12247_v55  ;;  %v12267_v5 = vmul.f32 0.5, %v12247_v55  ;;  %v12271_v59 = vpop.f32.mrb[78].mxu0  ;;  %v16358_v43 = vld [vmem:[#allocation39_spill] sm:$0xff]  ;;  %v16360_v8 = vld [vmem:[#allocation114_spill] sm:$0xff] }
 0x207   : > { %16354 = vst [vmem:[#allocation334_spill] sm:$0xff] %v12257_v62  ;;  %16355 = vst [vmem:[#allocation335_spill] sm:$0xff] %v12264_v37  ;;  %v12274_v46 = vmax.f32 %v4044_v20, %v12257_v62  ;;  %v16359_v13 = vunpack.c.l.bf16 %v16358_v43  ;;  %v12279_v24 = vpop.permute.xlu0 %7935  ;;  %v4045_v30 = vmax.f32 %v16360_v8, %v12264_v37  ;;  %v16362_v55 = vld [vmem:[#allocation38_spill] sm:$0xff]  ;;  %v12291_v20 = vadd.f32 %v11415_v3, %v12025_v28  ;;  %v16365_v43 = vld [vmem:[#allocation31_spill] sm:$0xff] }
 0x208   : > { %16356 = vst [vmem:[#allocation336_spill] sm:$0xff] %v12267_v5  ;;  %v2805_v16 = vpop.permute.xlu1 %2804  ;;  %v12284_v6 = vmax.f32 %v4047_v17, %v12267_v5  ;;  %v16363_v2 = vunpack.c.l.bf16 %v16362_v55  ;;  %7492 = vmatprep.mubr.msk.bf16.mxu0 %vm1478_vm0, %v3293_v34  ;;  %v16366_v62 = vunpack.c.l.bf16 %v16365_v43  ;;  %v16367_v37 = vld [vmem:[#allocation30_spill] sm:$0xff]  ;;  %v12313_v28 = vadd.f32 %v11415_v3, %v12062_v48 }
 0x209   : > { %16357 = vst [vmem:[#allocation337_spill] sm:$0xff] %v12274_v46  ;;  %v9223_v10 = vadd.high.f32.bf16 %v16359_v13, %v12008_v51  ;;  %16364 = vst [vmem:[#allocation38_spill] sm:$0xff] %v12291_v20  ;;  %v12294_v13 = vpop.f32.mrb[79].mxu0  ;;  %v16368_v17 = vunpack.c.l.bf16 %v16367_v37  ;;  %7493 = vmatmul.mubr.msk.bf16.gmra.mrb[132].mxu0 %vm1478_vm0, %v3294_v53  ;;  %7429 = vmatmul.mubr.msk.bf16.gmra.mrb[136].mxu1 %vm1478_vm0, %v2805_v16  ;;  %v12317_v34 = vadd.f32 %v11415_v3, %v12064_v31 }
 0x20a   : > { %16361 = vst [vmem:[#allocation39_spill] sm:$0xff] %v12284_v6  ;;  %v9224_v0 = vadd.low.f32.bf16 %v16363_v2, %v12008_v51  ;;  %v9225_v46 = vadd.high.f32.bf16 %v16366_v62, %v12010_v63  ;;  %v12305_v2 = vmul.f32 0.5, %v12291_v20  ;;  %v12309_v51 = vadd.f32 %v11415_v3, %v12036_v58  ;;  %16371 = vst [vmem:[#allocation338_spill] sm:$0xff] %v12313_v28 }
 0x20b   : > { %v9226_v8 = vadd.low.f32.bf16 %v16368_v17, %v12010_v63  ;;  %16372 = vst [vmem:[#allocation339_spill] sm:$0xff] %v12317_v34  ;;  %v12319_v63 = vpop.f32.mrb[80].mxu1  ;;  %v12325_v16 = vadd.f32 %v11415_v3, %v12077_v22  ;;  %v12329_v58 = vadd.f32 %v11415_v3, %v12079_v38  ;;  %v12333_v62 = vpop.permute.xlu0 %7940  ;;  %v12345_v22 = vmul.f32 0.5, %v12317_v34 }
 0x20c   : > { %16369 = vst [vmem:[#allocation31_spill] sm:$0xff] %v12305_v2  ;;  %16370 = vst [vmem:[#allocation30_spill] sm:$0xff] %v12309_v51  ;;  %v9228_v53 = vadd.high.f32.bf16 %v9225_v46, %v12051_v56  ;;  %v12331_v48 = vpop.permute.xlu1 %7945  ;;  %v12336_v31 = vmax.f32 %v4045_v30, %v12305_v2  ;;  %v12339_v37 = vmul.f32 0.5, %v12309_v51  ;;  %v12347_v46 = vpop.f32.mrb[81].mxu1  ;;  %v12359_v30 = vadd.f32 %v11415_v3, %v12094_v4  ;;  %v16383_v51 = vld [vmem:[#allocation117_spill] sm:$0xff]  ;;  %v16385_v4 = vld [vmem:[#allocation120_spill] sm:$0xff] }
 0x20d   : > { %v9227_v55 = vadd.low.f32.bf16 %v9226_v8, %v12051_v56  ;;  %16373 = vst [vmem:[#allocation340_spill] sm:$0xff] %v12325_v16  ;;  %16374 = vst [vmem:[#allocation341_spill] sm:$0xff] %v12329_v58  ;;  %v12342_v56 = vmul.f32 0.5, %v12313_v28  ;;  %v12349_v38 = vpop.f32.mrb[80].mxu0  ;;  %v12352_v8 = vmul.f32 0.5, %v12325_v16  ;;  %v12355_v43 = vmul.f32 0.5, %v12329_v58 }
 0x20e   : > { %16375 = vst [vmem:[#allocation342_spill] sm:$0xff] %v12336_v31  ;;  %16376 = vst [vmem:[#allocation343_spill] sm:$0xff] %v12339_v37  ;;  %v12363_v17 = vadd.f32 %v11415_v3, %v12096_v11  ;;  %v12365_v28 = vpop.f32.mrb[82].mxu1  ;;  %v12367_v34 = vpop.f32.mrb[81].mxu0  ;;  %v4050_v20 = vmax.f32 %v16383_v51, %v12339_v37  ;;  %v16384_v16 = vld [vmem:[#allocation93_spill] sm:$0xff]  ;;  %v12380_v3 = vmul.f32 0.5, %v12359_v30 }
 0x20f   : > { %16377 = vst [vmem:[#allocation344_spill] sm:$0xff] %v12342_v56  ;;  %16378 = vst [vmem:[#allocation345_spill] sm:$0xff] %v12345_v22  ;;  %v4048_v2 = vmax.f32 %v16384_v16, %v12342_v56  ;;  %v12373_v58 = vpop.f32.mrb[83].mxu1  ;;  %v12375_v5 = vpop.f32.mrb[82].mxu0  ;;  %v4051_v31 = vmax.f32 %v16385_v4, %v12352_v8  ;;  %v12388_v37 = vld [vmem:[%s15174_s2] ss:$0 sm:$0xff]  ;;  %v9230_v4 = vadd.low.f32.bf16 %v9224_v0, %v12109_v54 }
 0x210   : > { %16379 = vst [vmem:[#allocation346_spill] sm:$0xff] %v12352_v8  ;;  %16380 = vst [vmem:[#allocation347_spill] sm:$0xff] %v12355_v43  ;;  %v12383_v11 = vmul.f32 0.5, %v12363_v17  ;;  %v12392_v56 = vadd.f32 %v12388_v37, %v12124_v25  ;;  %v12394_v16 = vpop.permute.xlu1 %7955  ;;  %v12396_v51 = vpop.permute.xlu0 %7950  ;;  %v12399_v8 = vmax.f32 %v4050_v20, %v12345_v22  ;;  %v4049_v25 = vmax.f32 %v16391_v41, %v12380_v3 }
 0x211   : > { %16381 = vst [vmem:[#allocation348_spill] sm:$0xff] %v12359_v30  ;;  %16382 = vst [vmem:[#allocation349_spill] sm:$0xff] %v12363_v17  ;;  %v12402_v30 = vmax.f32 %v4048_v2, %v12355_v43  ;;  %v9229_v17 = vadd.high.f32.bf16 %v9223_v10, %v12109_v54  ;;  %v12406_v6 = vpop.f32.mrb[83].mxu0  ;;  %v12418_v20 = vadd.f32 %v12388_v37, %v12143_v33  ;;  %v12420_v2 = vpop.f32.mrb[84].mxu1 }
 0x212   : > { %16386 = vst [vmem:[#allocation350_spill] sm:$0xff] %v12380_v3  ;;  %16387 = vst [vmem:[#allocation351_spill] sm:$0xff] %v12383_v11  ;;  %v12411_v9 = vmax.f32 %v4051_v31, %v12383_v11  ;;  %v12414_v47 = vmul.f32 0.5, %v12392_v56  ;;  %v12428_v54 = vadd.f32 %v12388_v37, %v12167_v39  ;;  %v12432_v31 = vadd.f32 %v12388_v37, %v12169_v1  ;;  %v12444_v39 = vpop.f32.mrb[84].mxu0 }
 0x213   : > { %16388 = vst [vmem:[#allocation352_spill] sm:$0xff] %v12392_v56  ;;  %16389 = vst [vmem:[#allocation353_spill] sm:$0xff] %v12399_v8  ;;  %v9231_v0 = vadd.high.f32.bf16 %v9229_v17, %v12156_v15  ;;  %v9232_v33 = vadd.low.f32.bf16 %v9230_v4, %v12156_v15  ;;  %v9233_v41 = vadd.low.f32.bf16 %v9227_v55, %v12158_v42  ;;  %v12442_v17 = vpop.f32.mrb[85].mxu1  ;;  %v12459_v55 = vpop.f32.mrb[85].mxu0 }
 0x214   : > { %16390 = vst [vmem:[#allocation354_spill] sm:$0xff] %v12402_v30  ;;  %16392 = vst [vmem:[#allocation355_spill] sm:$0xff] %v12411_v9  ;;  %v12423_v10 = vmax.f32 %v4049_v25, %v12414_v47  ;;  %v2807_v56 = vpop.permute.xlu1 %2806  ;;  %v12434_v3 = vpop.permute.xlu0 %7960  ;;  %v9234_v25 = vadd.high.f32.bf16 %v9228_v53, %v12158_v42  ;;  %v12451_v11 = vmul.f32 0.5, %v12432_v31  ;;  %v12455_v15 = vadd.f32 %v12388_v37, %v12177_v45 }
 0x215   : > { %16393 = vst [vmem:[#allocation356_spill] sm:$0xff] %v12414_v47  ;;  %16394 = vst [vmem:[#allocation357_spill] sm:$0xff] %v12418_v20  ;;  %v12440_v47 = vmul.f32 0.5, %v12418_v20  ;;  %7432 = vmatprep.mubr.msk.bf16.mxu1 %vm1478_vm0, %v2807_v56  ;;  %v1215_v1 = vmul.f32 0.25, %v9231_v0  ;;  %v12457_v42 = vpop.f32.mrb[86].mxu1  ;;  %v1214_v53 = vmul.f32 0.25, %v9232_v33  ;;  %v12474_v9 = vadd.f32 %v12388_v37, %v12179_v19 }
 0x216   : > { %16395 = vst [vmem:[#allocation358_spill] sm:$0xff] %v12423_v10  ;;  %16396 = vst [vmem:[#allocation359_spill] sm:$0xff] %v12428_v54  ;;  %v12448_v10 = vmul.f32 0.5, %v12428_v54  ;;  %v1212_v4 = vmul.f32 0.25, %v9233_v41  ;;  %v1213_v20 = vmul.f32 0.25, %v9234_v25  ;;  %v12463_v0 = vpop.f32.mrb[87].mxu1  ;;  %v12491_v19 = vadd.f32 %v12388_v37, %v12190_v49 }
 0x217   : > { %16397 = vst [vmem:[#allocation360_spill] sm:$0xff] %v12432_v31  ;;  %16398 = vst [vmem:[#allocation361_spill] sm:$0xff] %v12440_v47  ;;  %v4054_v56 = vmax.f32 %v10943_v29, %v12440_v47  ;;  %v12465_v54 = vpop.f32.mrb[86].mxu0  ;;  %v3254_v31 = vmax.f32 %v1215_v1, 0.0  ;;  %v12470_v45 = vmul.f32 0.5, %v12455_v15  ;;  %v3253_v25 = vmax.f32 %v1214_v53, 0.0 }
 0x218   : > { %16399 = vst [vmem:[#allocation362_spill] sm:$0xff] %v12448_v10  ;;  %16400 = vst [vmem:[#allocation363_spill] sm:$0xff] %v12451_v11  ;;  %v4052_v43 = vmax.f32 %v10964_v27, %v12448_v10  ;;  %v2809_v41 = vpop.permute.xlu1 %2808  ;;  %v12476_v33 = vpop.permute.xlu0 %7965  ;;  %v3251_v47 = vmax.f32 %v1212_v4, 0.0  ;;  %v3252_v29 = vmax.f32 %v1213_v20, 0.0  ;;  %v12487_v27 = vmul.f32 0.5, %v12474_v9 }
 0x219   : > { %16401 = vst [vmem:[#allocation364_spill] sm:$0xff] %v12455_v15  ;;  %16402 = vst [vmem:[#allocation365_spill] sm:$0xff] %v12470_v45  ;;  %v12479_v30 = vmax.f32 %v4054_v56, %v12451_v11  ;;  %v12481_v1 = vpop.f32.mrb[87].mxu0  ;;  %7433 = vmatmul.mubr.msk.bf16.gmra.mrb[140].mxu1 %vm1478_vm0, %v2809_v41  ;;  %v16405_v15 = vld [vmem:[#allocation134_spill] sm:$0xff]  ;;  %v12495_v20 = vadd.f32 %v12388_v37, %v12192_v52  ;;  %v3296_v53 = vpack.c.bf16 %v3254_v31, %v3253_v25  ;;  %v12497_v56 = vpop.f32.mrb[88].mxu1 }
 0x21a   : > { %16403 = vst [vmem:[#allocation366_spill] sm:$0xff] %v12474_v9  ;;  %v4055_v10 = vmax.f32 %v16405_v15, %v12470_v45  ;;  %16406 = vst [vmem:[#allocation368_spill] sm:$0xff] %v12487_v27  ;;  %v3295_v4 = vpack.c.bf16 %v3252_v29, %v3251_v47  ;;  %v12500_v41 = vmax.f32 %v4052_v43, %v12487_v27  ;;  %v12503_v45 = vmul.f32 0.5, %v12491_v19  ;;  %v16412_v52 = vld [vmem:[#allocation50_spill] sm:$0xff]  ;;  %v16414_v29 = vld [vmem:[#allocation49_spill] sm:$0xff] }
 0x21b   : > { %16404 = vst [vmem:[#allocation367_spill] sm:$0xff] %v12479_v30  ;;  %16407 = vst [vmem:[#allocation369_spill] sm:$0xff] %v12491_v19  ;;  %v12506_v9 = vmul.f32 0.5, %v12495_v20  ;;  %v16413_v11 = vunpack.c.l.bf16 %v16412_v52  ;;  %v16415_v47 = vunpack.c.l.bf16 %v16414_v29  ;;  %v12520_v43 = vadd.f32 %v12388_v37, %v12214_v21  ;;  %v12523_v19 = vpop.f32.mrb[89].mxu1  ;;  %v16417_v27 = vld [vmem:[#allocation137_spill] sm:$0xff] }
 0x21c   : > { %16408 = vst [vmem:[#allocation370_spill] sm:$0xff] %v12495_v20  ;;  %16409 = vst [vmem:[#allocation371_spill] sm:$0xff] %v12500_v41  ;;  %v12508_v15 = vpop.permute.xlu1 %7975  ;;  %v12510_v49 = vpop.permute.xlu0 %7970  ;;  %7496 = vmatprep.mubr.msk.bf16.mxu0 %vm1478_vm0, %v3295_v4  ;;  %v4053_v41 = vmax.f32 %v16417_v27, %v12503_v45  ;;  %v16421_v4 = vld [vmem:[#allocation41_spill] sm:$0xff] }
 0x21d   : > { %16410 = vst [vmem:[#allocation372_spill] sm:$0xff] %v12503_v45  ;;  %16411 = vst [vmem:[#allocation373_spill] sm:$0xff] %v12506_v9  ;;  %v9235_v31 = vadd.high.f32.bf16 %v16413_v11, %v12203_v44  ;;  %v9236_v25 = vadd.low.f32.bf16 %v16415_v47, %v12203_v44  ;;  %v12525_v20 = vpop.f32.mrb[88].mxu0  ;;  %v12530_v52 = vmax.f32 %v4055_v10, %v12506_v9  ;;  %v16419_v11 = vld [vmem:[#allocation42_spill] sm:$0xff]  ;;  %7497 = vmatmul.mubr.msk.bf16.gmra.mrb[136].mxu0 %vm1478_vm0, %v3296_v53  ;;  %v12536_v21 = vpop.f32.mrb[90].mxu1 }
 0x21e   : > { %16416 = vst [vmem:[#allocation50_spill] sm:$0xff] %v12520_v43  ;;  %v16420_v29 = vunpack.c.l.bf16 %v16419_v11  ;;  %v12538_v47 = vpop.f32.mrb[89].mxu0  ;;  %v16422_v30 = vunpack.c.l.bf16 %v16421_v4  ;;  %v12544_v8 = vmul.f32 0.5, %v12520_v43  ;;  %v12548_v10 = vadd.f32 %v12388_v37, %v12227_v60  ;;  %v12550_v45 = vpop.f32.mrb[91].mxu1 }
 0x21f   : > { %16418 = vst [vmem:[#allocation49_spill] sm:$0xff] %v12530_v52  ;;  %v12552_v11 = vpop.f32.mrb[90].mxu0 }
 0x220   : > { %v9237_v44 = vadd.high.f32.bf16 %v16420_v29, %v12205_v61  ;;  %v9238_v22 = vadd.low.f32.bf16 %v16422_v30, %v12205_v61  ;;  %16423 = vst [vmem:[#allocation42_spill] sm:$0xff] %v12544_v8  ;;  %16424 = vst [vmem:[#allocation41_spill] sm:$0xff] %v12548_v10  ;;  %v12557_v29 = vadd.f32 %v12388_v37, %v12249_v57  ;;  %v12567_v60 = vpop.permute.xlu1 %7985  ;;  %v12569_v4 = vpop.permute.xlu0 %7980  ;;  %v12576_v57 = vmul.f32 0.5, %v12548_v10 }
 0x221   : > { %v12561_v61 = vadd.f32 %v12388_v37, %v12251_v35  ;;  %v12565_v30 = vadd.f32 %v12388_v37, %v12259_v23  ;;  %v12572_v43 = vmax.f32 %v4053_v41, %v12544_v8  ;;  %v12580_v35 = vadd.f32 %v12388_v37, %v12261_v32  ;;  %v12582_v27 = vpop.f32.mrb[91].mxu0 }
 0x222   : > { %v9239_v53 = vadd.high.f32.bf16 %v9237_v44, %v12236_v14  ;;  %16425 = vst [vmem:[#allocation374_spill] sm:$0xff] %v12557_v29  ;;  %v9240_v44 = vadd.low.f32.bf16 %v9238_v22, %v12236_v14  ;;  %16429 = vst [vmem:[#allocation378_spill] sm:$0xff] %v12576_v57  ;;  %v12585_v23 = vmul.f32 0.5, %v12557_v29  ;;  %v12595_v14 = vadd.f32 %v12388_v37, %v12269_v36  ;;  %v16435_v22 = vld [vmem:[#allocation141_spill] sm:$0xff] }
 0x223   : > { %16426 = vst [vmem:[#allocation375_spill] sm:$0xff] %v12561_v61  ;;  %16427 = vst [vmem:[#allocation376_spill] sm:$0xff] %v12565_v30  ;;  %v12588_v9 = vmul.f32 0.5, %v12561_v61  ;;  %v12591_v41 = vmul.f32 0.5, %v12565_v30  ;;  %v4058_v10 = vmax.f32 %v16435_v22, %v12576_v57  ;;  %v12600_v32 = vmul.f32 0.5, %v12580_v35  ;;  %v16438_v61 = vld [vmem:[#allocation146_spill] sm:$0xff] }
 0x224   : > { %16428 = vst [vmem:[#allocation377_spill] sm:$0xff] %v12572_v43  ;;  %16430 = vst [vmem:[#allocation379_spill] sm:$0xff] %v12580_v35  ;;  %v12604_v29 = vadd.f32 %v12388_v37, %v12271_v59  ;;  %v4056_v8 = vmax.f32 %v16438_v61, %v12585_v23  ;;  %v12611_v43 = vmul.f32 0.5, %v12595_v14  ;;  %v2811_v36 = vpop.permute.xlu1 %2810  ;;  %v12613_v52 = vpop.permute.xlu0 %7990  ;;  %v9241_v59 = vadd.high.f32.bf16 %v9235_v31, %v12279_v24  ;;  %v16594_v22 = vld [vmem:[#allocation96_spill] sm:$0xff] }
 0x225   : > { %16431 = vst [vmem:[#allocation380_spill] sm:$0xff] %v12585_v23  ;;  %16432 = vst [vmem:[#allocation381_spill] sm:$0xff] %v12588_v9  ;;  %v4059_v30 = vmax.f32 %v11053_v26, %v12591_v41  ;;  %v12616_v57 = vmax.f32 %v4058_v10, %v12588_v9  ;;  %v12624_v23 = vadd.f32 %v12388_v37, %v12294_v13  ;;  %7436 = vmatprep.mubr.msk.bf16.mxu1 %vm1478_vm0, %v2811_v36  ;;  %v12639_v31 = vpop.f32.mrb[92].mxu1 }
 0x226   : > { %16433 = vst [vmem:[#allocation382_spill] sm:$0xff] %v12591_v41  ;;  %16434 = vst [vmem:[#allocation383_spill] sm:$0xff] %v12595_v14  ;;  %v12619_v35 = vmul.f32 0.5, %v12604_v29  ;;  %v12628_v14 = vmax.f32 %v4056_v8, %v12600_v32  ;;  %v4057_v41 = vmax.f32 %v11056_v18, %v12611_v43  ;;  %v9242_v10 = vadd.low.f32.bf16 %v9236_v25, %v12279_v24 }
 0x227   : > { %16436 = vst [vmem:[#allocation384_spill] sm:$0xff] %v12600_v32  ;;  %16437 = vst [vmem:[#allocation385_spill] sm:$0xff] %v12604_v29  ;;  %v12637_v29 = vmul.f32 0.5, %v12624_v23  ;;  %v9243_v13 = vadd.high.f32.bf16 %v9241_v59, %v12331_v48  ;;  %v12644_v36 = vadd.f32 %v12388_v37, %v12319_v63  ;;  %v12648_v8 = vadd.f32 %v12388_v37, %v12347_v46  ;;  %v12661_v63 = vpop.f32.mrb[93].mxu1 }
 0x228   : > { %16439 = vst [vmem:[#allocation386_spill] sm:$0xff] %v12611_v43  ;;  %16440 = vst [vmem:[#allocation387_spill] sm:$0xff] %v12616_v57  ;;  %v12634_v26 = vmax.f32 %v4059_v30, %v12619_v35  ;;  %v2813_v43 = vpop.permute.xlu1 %2812  ;;  %v12650_v24 = vpop.permute.xlu0 %7995  ;;  %v9244_v30 = vadd.low.f32.bf16 %v9242_v10, %v12331_v48  ;;  %v12659_v59 = vadd.f32 %v12388_v37, %v12349_v38 }
 0x229   : > { %16441 = vst [vmem:[#allocation388_spill] sm:$0xff] %v12619_v35  ;;  %16442 = vst [vmem:[#allocation389_spill] sm:$0xff] %v12624_v23  ;;  %v12653_v25 = vmax.f32 %v4057_v41, %v12637_v29  ;;  %v9245_v23 = vadd.high.f32.bf16 %v9239_v53, %v12333_v62  ;;  %7437 = vmatmul.mubr.msk.bf16.gmra.mrb[144].mxu1 %vm1478_vm0, %v2813_v43  ;;  %v1219_v46 = vmul.f32 0.25, %v9243_v13  ;;  %v12666_v35 = vmul.f32 0.5, %v12644_v36  ;;  %v12671_v48 = vpop.f32.mrb[94].mxu1 }
 0x22a   : > { %16443 = vst [vmem:[#allocation390_spill] sm:$0xff] %v12628_v14  ;;  %16444 = vst [vmem:[#allocation391_spill] sm:$0xff] %v12634_v26  ;;  %v9246_v18 = vadd.low.f32.bf16 %v9240_v44, %v12333_v62  ;;  %v12669_v41 = vmul.f32 0.5, %v12648_v8  ;;  %v1218_v53 = vmul.f32 0.25, %v9244_v30  ;;  %v12674_v38 = vmul.f32 0.5, %v12659_v59  ;;  %v12680_v43 = vpop.f32.mrb[95].mxu1 }
 0x22b   : > { %16445 = vst [vmem:[#allocation392_spill] sm:$0xff] %v12637_v29  ;;  %16446 = vst [vmem:[#allocation393_spill] sm:$0xff] %v12644_v36  ;;  %v1217_v10 = vmul.f32 0.25, %v9245_v23  ;;  %v12678_v29 = vadd.f32 %v12388_v37, %v12365_v28  ;;  %v3258_v62 = vmax.f32 %v1219_v46, 0.0  ;;  %v4062_v13 = vmax.f32 %v11099_v50, %v12666_v35  ;;  %v16570_v14 = vld [vmem:[#allocation86_spill] sm:$0xff] }
 0x22c   : > { %16447 = vst [vmem:[#allocation394_spill] sm:$0xff] %v12648_v8  ;;  %16448 = vst [vmem:[#allocation395_spill] sm:$0xff] %v12653_v25  ;;  %v1216_v44 = vmul.f32 0.25, %v9246_v18  ;;  %v4060_v8 = vmax.f32 %v11102_v40, %v12669_v41  ;;  %v12686_v36 = vpop.permute.xlu1 %8005  ;;  %v3257_v23 = vmax.f32 %v1218_v53, 0.0  ;;  %v12693_v28 = vadd.f32 %v12388_v37, %v12367_v34  ;;  %v12695_v25 = vpop.permute.xlu0 %8000 }
 0x22d   : > { %16449 = vst [vmem:[#allocation396_spill] sm:$0xff] %v12659_v59  ;;  %16450 = vst [vmem:[#allocation397_spill] sm:$0xff] %v12666_v35  ;;  %v3256_v30 = vmax.f32 %v1217_v10, 0.0  ;;  %v12689_v59 = vmul.f32 0.5, %v12678_v29  ;;  %v12698_v46 = vmax.f32 %v4062_v13, %v12674_v38  ;;  %v12706_v53 = vadd.f32 %v12388_v37, %v12375_v5  ;;  %v12713_v40 = vpop.f32.mrb[92].mxu0  ;;  %v16467_v35 = vld [vmem:[#allocation60_spill] sm:$0xff] }
 0x22e   : > { %16451 = vst [vmem:[#allocation398_spill] sm:$0xff] %v12669_v41  ;;  %16452 = vst [vmem:[#allocation399_spill] sm:$0xff] %v12674_v38  ;;  %v3255_v18 = vmax.f32 %v1216_v44, 0.0  ;;  %v12702_v41 = vadd.f32 %v12388_v37, %v12373_v58  ;;  %v3298_v10 = vpack.c.bf16 %v3258_v62, %v3257_v23  ;;  %v12711_v34 = vmul.f32 0.5, %v12693_v28  ;;  %v12723_v5 = vpop.f32.mrb[93].mxu0  ;;  %v16463_v23 = vld [vmem:[#allocation61_spill] sm:$0xff] }
 0x22f   : > { %16453 = vst [vmem:[#allocation400_spill] sm:$0xff] %v12678_v29  ;;  %16454 = vst [vmem:[#allocation401_spill] sm:$0xff] %v12689_v59  ;;  %v4063_v29 = vmax.f32 %v11109_v12, %v12689_v59  ;;  %v12719_v58 = vmul.f32 0.5, %v12706_v53  ;;  %v16468_v50 = vunpack.c.l.bf16 %v16467_v35  ;;  %v12770_v35 = vadd.f32 %v12388_v37, %v12444_v39 }
 0x230   : > { %16455 = vst [vmem:[#allocation402_spill] sm:$0xff] %v12693_v28  ;;  %16456 = vst [vmem:[#allocation403_spill] sm:$0xff] %v12698_v46  ;;  %v3297_v44 = vpack.c.bf16 %v3256_v30, %v3255_v18  ;;  %v12716_v13 = vmul.f32 0.5, %v12702_v41  ;;  %v12721_v38 = vpop.permute.xlu1 %8015  ;;  %v12726_v62 = vmax.f32 %v4060_v8, %v12711_v34  ;;  %v16464_v28 = vunpack.c.l.bf16 %v16463_v23  ;;  %v12731_v12 = vpop.permute.xlu0 %8010  ;;  %v16465_v18 = vld [vmem:[#allocation161_spill] sm:$0xff] }
 0x231   : > { %16457 = vst [vmem:[#allocation404_spill] sm:$0xff] %v12702_v41  ;;  %16458 = vst [vmem:[#allocation405_spill] sm:$0xff] %v12706_v53  ;;  %v12733_v30 = vpop.f32.mrb[94].mxu0  ;;  %v12738_v53 = vmax.f32 %v4063_v29, %v12719_v58  ;;  %v9248_v46 = vadd.low.f32.bf16 %v16468_v50, %v12394_v16  ;;  %v12745_v8 = vadd.f32 %v12388_v37, %v12406_v6  ;;  %v16470_v23 = vld [vmem:[#allocation53_spill] sm:$0xff] }
 0x232   : > { %16459 = vst [vmem:[#allocation406_spill] sm:$0xff] %v12711_v34  ;;  %16460 = vst [vmem:[#allocation407_spill] sm:$0xff] %v12716_v13  ;;  %v9247_v59 = vadd.high.f32.bf16 %v16464_v28, %v12394_v16  ;;  %v4061_v41 = vmax.f32 %v16465_v18, %v12716_v13  ;;  %7500 = vmatprep.mubr.msk.bf16.mxu0 %vm1478_vm0, %v3297_v44  ;;  %v12748_v28 = vpop.f32.mrb[95].mxu0  ;;  %v16471_v34 = vunpack.c.l.bf16 %v16470_v23  ;;  %v16472_v13 = vld [vmem:[#allocation52_spill] sm:$0xff] }
 0x233   : > { %16461 = vst [vmem:[#allocation408_spill] sm:$0xff] %v12719_v58  ;;  %16462 = vst [vmem:[#allocation409_spill] sm:$0xff] %v12726_v62  ;;  %v16473_v29 = vunpack.c.l.bf16 %v16472_v13  ;;  %7501 = vmatmul.mubr.msk.bf16.gmra.mrb[140].mxu0 %vm1478_vm0, %v3298_v10  ;;  %v12758_v50 = vmul.f32 0.5, %v12745_v8  ;;  %v12762_v6 = vadd.f32 %v12388_v37, %v12420_v2  ;;  %v12766_v16 = vadd.f32 %v12388_v37, %v12442_v17  ;;  %v16488_v23 = vld [vmem:[#allocation32_spill] sm:$0xff]  ;;  %v16546_v58 = vld [vmem:[#allocation79_spill] sm:$0xff] }
 0x234   : > { %16466 = vst [vmem:[#allocation61_spill] sm:$0xff] %v12738_v53  ;;  %16469 = vst [vmem:[#allocation60_spill] sm:$0xff] %v12745_v8  ;;  %v9249_v62 = vadd.high.f32.bf16 %v16471_v34, %v12396_v51  ;;  %v2815_v34 = vpop.permute.xlu1 %2814  ;;  %v12776_v44 = vadd.f32 %v12388_v37, %v12457_v42  ;;  %v12780_v2 = vadd.f32 %v12388_v37, %v12459_v55  ;;  %v12782_v13 = vpop.permute.xlu0 %8020  ;;  %v12795_v42 = vmul.f32 0.5, %v12770_v35 }
 0x235   : > { %v9250_v18 = vadd.low.f32.bf16 %v16473_v29, %v12396_v51  ;;  %16474 = vst [vmem:[#allocation53_spill] sm:$0xff] %v12758_v50  ;;  %16475 = vst [vmem:[#allocation52_spill] sm:$0xff] %v12762_v6  ;;  %7440 = vmatprep.mubr.msk.bf16.mxu1 %vm1478_vm0, %v2815_v34  ;;  %v12786_v17 = vmax.f32 %v4061_v41, %v12758_v50  ;;  %v12789_v39 = vmul.f32 0.5, %v12762_v6  ;;  %v16489_v34 = vld [vmem:[#allocation35_spill] sm:$0xff] }
 0x236   : > { %16476 = vst [vmem:[#allocation410_spill] sm:$0xff] %v12766_v16  ;;  %16477 = vst [vmem:[#allocation411_spill] sm:$0xff] %v12770_v35  ;;  %v9252_v10 = vadd.high.f32.bf16 %v9249_v62, %v12434_v3  ;;  %v12798_v62 = vmul.f32 0.5, %v12776_v44  ;;  %v12801_v55 = vmul.f32 0.5, %v12780_v2  ;;  %v12809_v41 = vadd.f32 %v12388_v37, %v12465_v54 }
 0x237   : > { %v9251_v51 = vadd.low.f32.bf16 %v9250_v18, %v12434_v3  ;;  %16478 = vst [vmem:[#allocation412_spill] sm:$0xff] %v12776_v44  ;;  %16479 = vst [vmem:[#allocation413_spill] sm:$0xff] %v12780_v2  ;;  %v12792_v3 = vmul.f32 0.5, %v12766_v16  ;;  %v12805_v18 = vadd.f32 %v12388_v37, %v12463_v0  ;;  %v4066_v29 = vmax.f32 %v16488_v23, %v12789_v39  ;;  %v16490_v44 = vld [vmem:[#allocation34_spill] sm:$0xff] }
 0x238   : > { %16480 = vst [vmem:[#allocation414_spill] sm:$0xff] %v12786_v17  ;;  %16481 = vst [vmem:[#allocation415_spill] sm:$0xff] %v12789_v39  ;;  %v2817_v35 = vpop.permute.xlu1 %2816  ;;  %v4067_v6 = vmax.f32 %v16490_v44, %v12798_v62  ;;  %v12821_v0 = vmul.f32 0.5, %v12809_v41  ;;  %v12825_v54 = vadd.f32 %v12388_v37, %v12481_v1  ;;  %v12827_v8 = vpop.permute.xlu0 %8025  ;;  %v16496_v1 = vld [vmem:[#allocation168_spill] sm:$0xff]  ;;  %v16547_v17 = vunpack.c.l.bf16 %v16546_v58 }
 0x239   : > { %16482 = vst [vmem:[#allocation416_spill] sm:$0xff] %v12792_v3  ;;  %16483 = vst [vmem:[#allocation417_spill] sm:$0xff] %v12795_v42  ;;  %v4064_v16 = vmax.f32 %v16489_v34, %v12792_v3  ;;  %v12818_v2 = vmul.f32 0.5, %v12805_v18  ;;  %7441 = vmatmul.mubr.msk.bf16.gmra.mrb[148].mxu1 %vm1478_vm0, %v2817_v35  ;;  %v12830_v39 = vpop.f32.mrb[96].mxu0  ;;  %v12833_v3 = vmax.f32 %v4066_v29, %v12795_v42  ;;  %v12850_v29 = vpop.f32.mrb[96].mxu1 }
 0x23a   : > { %16484 = vst [vmem:[#allocation418_spill] sm:$0xff] %v12798_v62  ;;  %16485 = vst [vmem:[#allocation419_spill] sm:$0xff] %v12801_v55  ;;  %v12840_v44 = vpop.f32.mrb[97].mxu0  ;;  %v12845_v23 = vmax.f32 %v4067_v6, %v12821_v0  ;;  %v12848_v35 = vmul.f32 0.5, %v12825_v54  ;;  %v9272_v53 = vadd.low.f32.bf16 %v16547_v17, %v12721_v38  ;;  %v13061_v17 = vadd.f32 %v12388_v37, %v12733_v30 }
 0x23b   : > { %16486 = vst [vmem:[#allocation420_spill] sm:$0xff] %v12805_v18  ;;  %16487 = vst [vmem:[#allocation421_spill] sm:$0xff] %v12809_v41  ;;  %v12836_v62 = vmax.f32 %v4064_v16, %v12801_v55  ;;  %v9253_v18 = vadd.high.f32.bf16 %v9247_v59, %v12476_v33  ;;  %v9254_v41 = vadd.low.f32.bf16 %v9248_v46, %v12476_v33  ;;  %v12852_v42 = vpop.f32.mrb[98].mxu0  ;;  %v12860_v46 = vpop.f32.mrb[97].mxu1 }
 0x23c   : > { %16491 = vst [vmem:[#allocation422_spill] sm:$0xff] %v12818_v2  ;;  %16492 = vst [vmem:[#allocation423_spill] sm:$0xff] %v12821_v0  ;;  %v4065_v34 = vmax.f32 %v16496_v1, %v12818_v2  ;;  %v12856_v59 = vadd.f32 %v12388_v37, %v12497_v56  ;;  %v12858_v33 = vpop.permute.xlu1 %8035  ;;  %v12872_v2 = vadd.f32 %v12388_v37, %v12525_v20  ;;  %v12874_v1 = vpop.permute.xlu0 %8030 }
 0x23d   : > { %16493 = vst [vmem:[#allocation424_spill] sm:$0xff] %v12825_v54  ;;  %16494 = vst [vmem:[#allocation425_spill] sm:$0xff] %v12833_v3  ;;  %v9255_v6 = vadd.high.f32.bf16 %v9253_v18, %v12508_v15  ;;  %v12868_v54 = vadd.f32 %v12388_v37, %v12523_v19  ;;  %v12876_v56 = vpop.f32.mrb[99].mxu0  ;;  %v9256_v0 = vadd.low.f32.bf16 %v9254_v41, %v12508_v15  ;;  %v16507_v41 = vld [vmem:[#allocation51_spill] sm:$0xff] }
 0x23e   : > { %16495 = vst [vmem:[#allocation426_spill] sm:$0xff] %v12836_v62  ;;  %16497 = vst [vmem:[#allocation427_spill] sm:$0xff] %v12845_v23  ;;  %v12863_v16 = vmax.f32 %v4065_v34, %v12848_v35  ;;  %v9257_v23 = vadd.low.f32.bf16 %v9251_v51, %v12510_v49  ;;  %v9258_v34 = vadd.high.f32.bf16 %v9252_v10, %v12510_v49  ;;  %v12882_v18 = vmul.f32 0.5, %v12856_v59 }
 0x23f   : > { %16498 = vst [vmem:[#allocation428_spill] sm:$0xff] %v12848_v35  ;;  %16499 = vst [vmem:[#allocation429_spill] sm:$0xff] %v12856_v59  ;;  %v12884_v35 = vpop.f32.mrb[98].mxu1  ;;  %v1223_v19 = vmul.f32 0.25, %v9255_v6  ;;  %v12890_v20 = vmul.f32 0.5, %v12872_v2  ;;  %v12894_v55 = vadd.f32 %v12388_v37, %v12536_v21  ;;  %v1222_v51 = vmul.f32 0.25, %v9256_v0 }
 0x240   : > { %16500 = vst [vmem:[#allocation430_spill] sm:$0xff] %v12863_v16  ;;  %16501 = vst [vmem:[#allocation431_spill] sm:$0xff] %v12868_v54  ;;  %v12887_v16 = vmul.f32 0.5, %v12868_v54  ;;  %v12896_v15 = vpop.f32.mrb[99].mxu1  ;;  %v1220_v49 = vmul.f32 0.25, %v9257_v23  ;;  %v1221_v10 = vmul.f32 0.25, %v9258_v34  ;;  %v4070_v59 = vmax.f32 %v16507_v41, %v12882_v18  ;;  %v12900_v62 = vpop.permute.xlu1 %8045 }
 0x241   : > { %16502 = vst [vmem:[#allocation432_spill] sm:$0xff] %v12872_v2  ;;  %16503 = vst [vmem:[#allocation433_spill] sm:$0xff] %v12882_v18  ;;  %v3262_v6 = vmax.f32 %v1223_v19, 0.0  ;;  %v16508_v54 = vld [vmem:[#allocation179_spill] sm:$0xff]  ;;  %v12905_v2 = vmul.f32 0.5, %v12894_v55  ;;  %v12909_v21 = vadd.f32 %v12388_v37, %v12538_v47  ;;  %v12911_v50 = vpop.permute.xlu0 %8040  ;;  %v3261_v23 = vmax.f32 %v1222_v51, 0.0 }
 0x242   : > { %16504 = vst [vmem:[#allocation434_spill] sm:$0xff] %v12887_v16  ;;  %16505 = vst [vmem:[#allocation435_spill] sm:$0xff] %v12890_v20  ;;  %v4068_v3 = vmax.f32 %v16508_v54, %v12887_v16  ;;  %v3259_v0 = vmax.f32 %v1220_v49, 0.0  ;;  %v3260_v34 = vmax.f32 %v1221_v10, 0.0  ;;  %v12914_v18 = vmax.f32 %v4070_v59, %v12890_v20  ;;  %v16512_v19 = vld [vmem:[#allocation180_spill] sm:$0xff] }
 0x243   : > { %16506 = vst [vmem:[#allocation436_spill] sm:$0xff] %v12894_v55  ;;  %16509 = vst [vmem:[#allocation437_spill] sm:$0xff] %v12905_v2  ;;  %v4071_v41 = vmax.f32 %v16512_v19, %v12905_v2  ;;  %v12919_v16 = vmul.f32 0.5, %v12909_v21  ;;  %v12923_v55 = vadd.f32 %v12388_v37, %v12550_v45  ;;  %v12927_v47 = vadd.f32 %v12388_v37, %v12552_v11  ;;  %v16519_v45 = vld [vmem:[#allocation73_spill] sm:$0xff] }
 0x244   : > { %16510 = vst [vmem:[#allocation438_spill] sm:$0xff] %v12909_v21  ;;  %16511 = vst [vmem:[#allocation439_spill] sm:$0xff] %v12914_v18  ;;  %v3300_v51 = vpack.c.bf16 %v3262_v6, %v3261_v23  ;;  %v3299_v49 = vpack.c.bf16 %v3260_v34, %v3259_v0  ;;  %v2819_v10 = vpop.permute.xlu1 %2818  ;;  %v16520_v11 = vunpack.c.l.bf16 %v16519_v45  ;;  %v16521_v6 = vld [vmem:[#allocation72_spill] sm:$0xff]  ;;  %v16524_v34 = vld [vmem:[#allocation182_spill] sm:$0xff] }
 0x245   : > { %16513 = vst [vmem:[#allocation440_spill] sm:$0xff] %v12919_v16  ;;  %16514 = vst [vmem:[#allocation441_spill] sm:$0xff] %v12923_v55  ;;  %v12930_v59 = vmax.f32 %v4068_v3, %v12919_v16  ;;  %v12933_v54 = vmul.f32 0.5, %v12923_v55  ;;  %v12936_v21 = vmul.f32 0.5, %v12927_v47  ;;  %v12938_v2 = vpop.permute.xlu0 %8050  ;;  %7444 = vmatprep.mubr.msk.bf16.mxu1 %vm1478_vm0, %v2819_v10  ;;  %v16522_v23 = vunpack.c.l.bf16 %v16521_v6  ;;  %v16526_v10 = vld [vmem:[#allocation64_spill] sm:$0xff] }
 0x246   : > { %16515 = vst [vmem:[#allocation442_spill] sm:$0xff] %v12927_v47  ;;  %v9259_v19 = vadd.high.f32.bf16 %v16520_v11, %v12567_v60  ;;  %v12949_v3 = vadd.f32 %v12388_v37, %v12582_v27  ;;  %7504 = vmatprep.mubr.msk.bf16.mxu0 %vm1478_vm0, %v3299_v49  ;;  %v16527_v45 = vunpack.c.l.bf16 %v16526_v10  ;;  %v12974_v10 = vadd.f32 %v12388_v37, %v12661_v63 }
 0x247   : > { %16516 = vst [vmem:[#allocation443_spill] sm:$0xff] %v12930_v59  ;;  %16517 = vst [vmem:[#allocation444_spill] sm:$0xff] %v12933_v54  ;;  %v9260_v0 = vadd.low.f32.bf16 %v16522_v23, %v12567_v60  ;;  %v4069_v55 = vmax.f32 %v16524_v34, %v12933_v54  ;;  %v12955_v47 = vmax.f32 %v4071_v41, %v12936_v21  ;;  %7505 = vmatmul.mubr.msk.bf16.gmra.mrb[144].mxu0 %vm1478_vm0, %v3300_v51  ;;  %v16528_v60 = vld [vmem:[#allocation63_spill] sm:$0xff] }
 0x248   : > { %16518 = vst [vmem:[#allocation445_spill] sm:$0xff] %v12936_v21  ;;  %16523 = vst [vmem:[#allocation73_spill] sm:$0xff] %v12949_v3  ;;  %v9261_v11 = vadd.high.f32.bf16 %v16527_v45, %v12569_v4  ;;  %v16529_v6 = vunpack.c.l.bf16 %v16528_v60  ;;  %v12965_v27 = vmul.f32 0.5, %v12949_v3  ;;  %v2821_v49 = vpop.permute.xlu1 %2820  ;;  %v12970_v41 = vadd.f32 %v12388_v37, %v12639_v31  ;;  %v12988_v31 = vpop.f32.mrb[100].mxu0 }
 0x249   : > { %16525 = vst [vmem:[#allocation72_spill] sm:$0xff] %v12955_v47  ;;  %16532 = vst [vmem:[#allocation446_spill] sm:$0xff] %v12974_v10  ;;  %v12976_v45 = vpop.permute.xlu0 %8055  ;;  %7445 = vmatmul.mubr.msk.bf16.gmra.mrb[152].mxu1 %vm1478_vm0, %v2821_v49  ;;  %v9265_v60 = vadd.high.f32.bf16 %v9259_v19, %v12650_v24  ;;  %v9266_v63 = vadd.low.f32.bf16 %v9260_v0, %v12650_v24  ;;  %v12995_v49 = vmul.f32 0.5, %v12974_v10  ;;  %v13003_v19 = vpop.f32.mrb[101].mxu0  ;;  %v16539_v0 = vld [vmem:[#allocation44_spill] sm:$0xff]  ;;  %v16540_v10 = vld [vmem:[#allocation47_spill] sm:$0xff] }
 0x24a   : > { %v9262_v23 = vadd.low.f32.bf16 %v16529_v6, %v12569_v4  ;;  %16530 = vst [vmem:[#allocation64_spill] sm:$0xff] %v12965_v27  ;;  %v9263_v16 = vadd.high.f32.bf16 %v9261_v11, %v12613_v52  ;;  %16531 = vst [vmem:[#allocation63_spill] sm:$0xff] %v12970_v41  ;;  %v12980_v4 = vmax.f32 %v4069_v55, %v12965_v27  ;;  %v12992_v6 = vmul.f32 0.5, %v12970_v41  ;;  %v13021_v54 = vpop.f32.mrb[102].mxu0 }
 0x24b   : > { %v12986_v11 = vadd.f32 %v12388_v37, %v12671_v48  ;;  %16536 = vst [vmem:[#allocation450_spill] sm:$0xff] %v12995_v49  ;;  %v12999_v55 = vadd.f32 %v12388_v37, %v12680_v43  ;;  %v4072_v3 = vmax.f32 %v16540_v10, %v12995_v49  ;;  %v9268_v21 = vadd.high.f32.bf16 %v9265_v60, %v12686_v36 }
 0x24c   : > { %16533 = vst [vmem:[#allocation447_spill] sm:$0xff] %v12980_v4  ;;  %v9264_v51 = vadd.low.f32.bf16 %v9262_v23, %v12613_v52  ;;  %16535 = vst [vmem:[#allocation449_spill] sm:$0xff] %v12992_v6  ;;  %v13001_v52 = vpop.f32.mrb[100].mxu1  ;;  %v13008_v23 = vpop.permute.xlu1 %8065  ;;  %v4074_v41 = vmax.f32 %v16539_v0, %v12992_v6  ;;  %v9267_v4 = vadd.low.f32.bf16 %v9266_v63, %v12686_v36  ;;  %v16544_v36 = vld [vmem:[#allocation80_spill] sm:$0xff] }
 0x24d   : > { %16534 = vst [vmem:[#allocation448_spill] sm:$0xff] %v12986_v11  ;;  %16537 = vst [vmem:[#allocation451_spill] sm:$0xff] %v12999_v55  ;;  %v13006_v48 = vmul.f32 0.5, %v12986_v11  ;;  %v13010_v24 = vpop.f32.mrb[101].mxu1  ;;  %v13017_v43 = vmul.f32 0.5, %v12999_v55  ;;  %v13019_v27 = vpop.permute.xlu0 %8060  ;;  %v16542_v11 = vld [vmem:[#allocation46_spill] sm:$0xff]  ;;  %v9269_v47 = vadd.high.f32.bf16 %v9263_v16, %v12695_v25  ;;  %v16545_v60 = vunpack.c.l.bf16 %v16544_v36 }
 0x24e   : > { %v13028_v6 = vpop.f32.mrb[102].mxu1  ;;  %v13030_v0 = vpop.f32.mrb[103].mxu0  ;;  %v16543_v55 = vld [vmem:[#allocation190_spill] sm:$0xff]  ;;  %v9270_v10 = vadd.low.f32.bf16 %v9264_v51, %v12695_v25  ;;  %v1226_v20 = vmul.f32 0.25, %v9267_v4  ;;  %v1227_v18 = vmul.f32 0.25, %v9268_v21  ;;  %v16548_v25 = vld [vmem:[#allocation76_spill] sm:$0xff] }
 0x24f   : > { %16538 = vst [vmem:[#allocation452_spill] sm:$0xff] %v13006_v48  ;;  %16541 = vst [vmem:[#allocation453_spill] sm:$0xff] %v13017_v43  ;;  %v4075_v34 = vmax.f32 %v16542_v11, %v13006_v48  ;;  %v4073_v49 = vmax.f32 %v16543_v55, %v13017_v43  ;;  %v13035_v59 = vpop.f32.mrb[103].mxu1  ;;  %v1225_v48 = vmul.f32 0.25, %v9269_v47  ;;  %v9271_v16 = vadd.high.f32.bf16 %v16545_v60, %v12721_v38  ;;  %v16550_v47 = vld [vmem:[#allocation75_spill] sm:$0xff] }
 0x250   : > { %v2825_v11 = vpop.permute.xlu1 %2824  ;;  %v1224_v63 = vmul.f32 0.25, %v9270_v10  ;;  %v3265_v32 = vmax.f32 %v1226_v20, 0.0  ;;  %v3266_v43 = vmax.f32 %v1227_v18, 0.0  ;;  %v16549_v51 = vunpack.c.l.bf16 %v16548_v25  ;;  %16554 = vst [vmem:[#allocation76_spill] sm:$0xff] %v13061_v17 }
 0x251   : > { %v2823_v26 = vpop.permute.xlu0 %2822  ;;  %v3264_v55 = vmax.f32 %v1225_v48, 0.0  ;;  %v16551_v10 = vunpack.c.l.bf16 %v16550_v47  ;;  %v13052_v60 = vadd.f32 %v12388_v37, %v12713_v40  ;;  %v13056_v38 = vadd.f32 %v12388_v37, %v12723_v5 }
 0x252   : > { %v9273_v4 = vadd.high.f32.bf16 %v16549_v51, %v12731_v12  ;;  %7448 = vmatprep.mubr.msk.bf16.mxu1 %vm1478_vm0, %v2823_v26  ;;  %v3263_v21 = vmax.f32 %v1224_v63, 0.0  ;;  %v3302_v58 = vpack.c.bf16 %v3266_v43, %v3265_v32  ;;  %v13065_v26 = vadd.f32 %v12388_v37, %v12748_v28 }
 0x253   : > { %v9274_v36 = vadd.low.f32.bf16 %v16551_v10, %v12731_v12  ;;  %16552 = vst [vmem:[#allocation80_spill] sm:$0xff] %v13052_v60  ;;  %16553 = vst [vmem:[#allocation79_spill] sm:$0xff] %v13056_v38  ;;  %7449 = vmatmul.mubr.msk.bf16.gmra.mrb[156].mxu1 %vm1478_vm0, %v2825_v11  ;;  %v13068_v18 = vmul.f32 0.5, %v13052_v60  ;;  %v13071_v40 = vmul.f32 0.5, %v13056_v38  ;;  %v13074_v5 = vmul.f32 0.5, %v13061_v17 }
 0x254   : > { %16555 = vst [vmem:[#allocation75_spill] sm:$0xff] %v13065_v26  ;;  %v3301_v12 = vpack.c.bf16 %v3264_v55, %v3263_v21  ;;  %v13077_v32 = vmul.f32 0.5, %v13065_v26  ;;  %v9275_v30 = vadd.high.f32.bf16 %v9273_v4, %v12782_v13  ;;  %v9277_v43 = vadd.high.f32.bf16 %v9271_v16, %v12827_v8 }
 0x255   : > { %16556 = vst [vmem:[#allocation454_spill] sm:$0xff] %v13068_v18  ;;  %16557 = vst [vmem:[#allocation455_spill] sm:$0xff] %v13071_v40  ;;  %v13081_v20 = vmax.f32 %v4074_v41, %v13068_v18  ;;  %v13084_v28 = vmax.f32 %v4072_v3, %v13071_v40  ;;  %v9276_v11 = vadd.low.f32.bf16 %v9274_v36, %v12782_v13 }
 0x256   : > { %16558 = vst [vmem:[#allocation456_spill] sm:$0xff] %v13074_v5  ;;  %16559 = vst [vmem:[#allocation457_spill] sm:$0xff] %v13077_v32  ;;  %7508 = vmatprep.mubr.msk.bf16.mxu0 %vm1478_vm0, %v3301_v12  ;;  %v13089_v55 = vmax.f32 %v4075_v34, %v13074_v5  ;;  %v13092_v48 = vmax.f32 %v4073_v49, %v13077_v32  ;;  %v13098_v41 = vadd.f32 %v12388_v37, %v12830_v39 }
 0x257   : > { %16560 = vst [vmem:[#allocation458_spill] sm:$0xff] %v13081_v20  ;;  %16561 = vst [vmem:[#allocation459_spill] sm:$0xff] %v13084_v28  ;;  %7509 = vmatmul.mubr.msk.bf16.gmra.mrb[148].mxu0 %vm1478_vm0, %v3302_v58  ;;  %v9278_v3 = vadd.low.f32.bf16 %v9272_v53, %v12827_v8  ;;  %v13103_v13 = vadd.f32 %v12388_v37, %v12840_v44  ;;  %v13108_v49 = vadd.f32 %v12388_v37, %v12850_v29  ;;  %v13110_v63 = vpop.f32.mrb[104].mxu0  ;;  %v16568_v28 = vld [vmem:[#allocation97_spill] sm:$0xff] }
 0x258   : > { %16562 = vst [vmem:[#allocation460_spill] sm:$0xff] %v13089_v55  ;;  %16563 = vst [vmem:[#allocation461_spill] sm:$0xff] %v13092_v48  ;;  %v3950_v34 = vmul.f32 0.5, %v13098_v41  ;;  %v9280_v25 = vadd.high.f32.bf16 %v9277_v43, %v12858_v33  ;;  %v13119_v53 = vadd.f32 %v12388_v37, %v12852_v42  ;;  %v13121_v8 = vpop.f32.mrb[104].mxu1  ;;  %v13123_v44 = vpop.f32.mrb[105].mxu0  ;;  %v9281_v29 = vadd.low.f32.bf16 %v9276_v11, %v12874_v1  ;;  %v16564_v11 = vld [vmem:[#allocation62_spill] sm:$0xff] }
 0x259   : > { %v13113_v16 = vmul.f32 0.5, %v13103_v13  ;;  %v9279_v39 = vadd.low.f32.bf16 %v9278_v3, %v12858_v33  ;;  %v9282_v51 = vadd.high.f32.bf16 %v9275_v30, %v12874_v1  ;;  %v3886_v4 = vmul.f32 0.5, %v13108_v49  ;;  %v13132_v47 = vpop.f32.mrb[105].mxu1  ;;  %v13134_v33 = vpop.f32.mrb[106].mxu0  ;;  %v16567_v48 = vld [vmem:[#allocation77_spill] sm:$0xff] }
 0x25a   : > { %v13130_v21 = vadd.f32 %v12388_v37, %v12860_v46  ;;  %v1231_v10 = vmul.f32 0.25, %v9280_v25  ;;  %v13137_v36 = vmul.f32 0.5, %v13119_v53  ;;  %v13141_v58 = vadd.f32 %v12388_v37, %v12876_v56  ;;  %v13143_v1 = vpop.f32.mrb[106].mxu1  ;;  %v13145_v12 = vpop.f32.mrb[107].mxu0 }
 0x25b   : > { %v1230_v42 = vmul.f32 0.25, %v9279_v39  ;;  %v1228_v30 = vmul.f32 0.25, %v9281_v29  ;;  %v1229_v46 = vmul.f32 0.25, %v9282_v51  ;;  %v4142_v43 = vmax.f32 %v16564_v11, %v3886_v4  ;;  %v13149_v26 = vpop.f32.mrb[107].mxu1  ;;  %v16565_v29 = vld [vmem:[#allocation202_spill] sm:$0xff] }
 0x25c   : > { %v3884_v3 = vmul.f32 0.5, %v13130_v21  ;;  %v3270_v25 = vmax.f32 %v1231_v10, 0.0  ;;  %v13152_v17 = vmul.f32 0.5, %v13141_v58  ;;  %v13156_v56 = vadd.f32 %v12388_v37, %v12884_v35  ;;  %v16566_v10 = vld [vmem:[#allocation100_spill] sm:$0xff] }
 0x25d   : > { %v3269_v39 = vmax.f32 %v1230_v42, 0.0  ;;  %v3267_v38 = vmax.f32 %v1228_v30, 0.0  ;;  %v3268_v60 = vmax.f32 %v1229_v46, 0.0  ;;  %v4206_v32 = vmax.f32 %v4142_v43, %v3950_v34  ;;  %v16569_v43 = vld [vmem:[#allocation205_spill] sm:$0xff] }
 0x25e   : > { %v4140_v51 = vmax.f32 %v16565_v29, %v3884_v3  ;;  %v3887_v11 = vmul.f32 0.5, %v13156_v56  ;;  %v13162_v40 = vadd.f32 %v12388_v37, %v12896_v15  ;;  %v16571_v37 = vunpack.c.l.bf16 %v16570_v14 }
 0x25f   : > { %v3304_v5 = vpack.c.bf16 %v3270_v25, %v3269_v39  ;;  %v3303_v42 = vpack.c.bf16 %v3268_v60, %v3267_v38  ;;  %v4270_v18 = vsub.f32 %v16566_v10, %v4206_v32  ;;  %v4462_v55 = vsub.f32 %v16567_v48, %v4206_v32  ;;  %v16572_v48 = vld [vmem:[#allocation104_spill] sm:$0xff] }
 0x260   : > { %v4654_v35 = vsub.f32 %v16568_v28, %v4206_v32  ;;  %v4846_v20 = vsub.f32 %v3886_v4, %v4206_v32  ;;  %v5038_v30 = vsub.f32 %v3950_v34, %v4206_v32  ;;  %v4204_v46 = vmax.f32 %v4140_v51, %v13113_v16  ;;  %v16573_v4 = vld [vmem:[#allocation195_spill] sm:$0xff]  ;;  %v16574_v34 = vld [vmem:[#allocation196_spill] sm:$0xff] }
 0x261   : > { %v4143_v29 = vmax.f32 %v16569_v43, %v3887_v11  ;;  %v4336_v39 = vmul.f32 1.442695, %v4270_v18  ;;  %v4528_v25 = vmul.f32 1.442695, %v4462_v55  ;;  %v13172_v15 = vadd.high.f32.bf16 %v16571_v37, %v12900_v62  ;;  %7512 = vmatprep.mubr.msk.bf16.mxu0 %vm1478_vm0, %v3303_v42  ;;  %v16575_v43 = vld [vmem:[#allocation11_spill] sm:$0xff] }
 0x262   : > { %v4720_v61 = vmul.f32 1.442695, %v4654_v35  ;;  %v4912_v60 = vmul.f32 1.442695, %v4846_v20  ;;  %v5104_v38 = vmul.f32 1.442695, %v5038_v30  ;;  %v4268_v28 = vsub.f32 %v16572_v48, %v4204_v46  ;;  %7513 = vmatmul.mubr.msk.bf16.gmra.mrb[152].mxu0 %vm1478_vm0, %v3304_v5 }
 0x263   : > { %v4460_v32 = vsub.f32 %v16573_v4, %v4204_v46  ;;  %8071 = vpow2.f32 %v4336_v39  ;;  %v4652_v18 = vsub.f32 %v16574_v34, %v4204_v46  ;;  %v4844_v55 = vsub.f32 %v3884_v3, %v4204_v46  ;;  %v16576_v48 = vld [vmem:[#allocation198_spill] sm:$0xff]  ;;  %v16577_v39 = vld [vmem:[#allocation203_spill] sm:$0xff]  ;;  %v16578_v34 = vld [vmem:[#allocation57_spill] sm:$0xff] }
 0x264   : > { %v5036_v51 = vsub.f32 %v13113_v16, %v4204_v46  ;;  %8073 = vpow2.f32 %v4528_v25  ;;  %v4332_v14 = vmul.f32 1.442695, %v4268_v28  ;;  %v4207_v35 = vmax.f32 %v4143_v29, %v13137_v36 }
 0x265   : > { %v4524_v10 = vmul.f32 1.442695, %v4460_v32  ;;  %8075 = vpow2.f32 %v4720_v61  ;;  %v4716_v20 = vmul.f32 1.442695, %v4652_v18  ;;  %v4908_v42 = vmul.f32 1.442695, %v4844_v55 }
 0x266   : > { %v5100_v30 = vmul.f32 1.442695, %v5036_v51  ;;  %8077 = vpow2.f32 %v4912_v60  ;;  %v4271_v37 = vsub.f32 %v16575_v43, %v4207_v35  ;;  %v4463_v5 = vsub.f32 %v16576_v48, %v4207_v35  ;;  %v16586_v48 = vld [vmem:[#allocation83_spill] sm:$0xff] }
 0x267   : > { %v4655_v4 = vsub.f32 %v16577_v39, %v4207_v35  ;;  %8079 = vpow2.f32 %v5104_v38  ;;  %v4847_v3 = vsub.f32 %v3887_v11, %v4207_v35  ;;  %v5039_v16 = vsub.f32 %v13137_v36, %v4207_v35  ;;  %v13186_v25 = vpop.f32.mrb[108].mxu0  ;;  %v16588_v39 = vld [vmem:[#allocation82_spill] sm:$0xff] }
 0x268   : > { %v3885_v46 = vmul.f32 0.5, %v13162_v40  ;;  %8081 = vpow2.f32 %v4332_v14  ;;  %v4338_v61 = vmul.f32 1.442695, %v4271_v37  ;;  %v4530_v29 = vmul.f32 1.442695, %v4463_v5  ;;  %v13189_v55 = vpop.f32.mrb[108].mxu1 }
 0x269   : > { %v4722_v28 = vmul.f32 1.442695, %v4655_v4  ;;  %8083 = vpow2.f32 %v4524_v10  ;;  %v4914_v60 = vmul.f32 1.442695, %v4847_v3  ;;  %v5106_v32 = vmul.f32 1.442695, %v5039_v16 }
 0x26a   : > { %v4141_v18 = vmax.f32 %v16578_v34, %v3885_v46  ;;  %v13191_v51 = vpop.f32.mrb[109].mxu0  ;;  %8085 = vpow2.f32 %v4716_v20  ;;  %v13193_v11 = vpop.f32.mrb[109].mxu1  ;;  %v16584_v10 = vld [vmem:[#allocation85_spill] sm:$0xff]  ;;  %v16587_v20 = vunpack.c.l.bf16 %v16586_v48 }
 0x26b   : > { %16579 = vst [vmem:[#allocation62_spill] sm:$0xff] %v13191_v51  ;;  %16580 = vst [vmem:[#allocation202_spill] sm:$0xff] %v13193_v11  ;;  %v13195_v36 = vpop.f32.mrb[110].mxu0  ;;  %8087 = vpow2.f32 %v4908_v42  ;;  %v13198_v14 = vpop.f32.mrb[110].mxu1  ;;  %v16585_v43 = vunpack.c.l.bf16 %v16584_v10  ;;  %v16589_v42 = vunpack.c.l.bf16 %v16588_v39 }
 0x26c   : > { %16581 = vst [vmem:[#allocation100_spill] sm:$0xff] %v13195_v36  ;;  %v4205_v38 = vmax.f32 %v4141_v18, %v13152_v17  ;;  %16582 = vst [vmem:[#allocation77_spill] sm:$0xff] %v13198_v14  ;;  %v13200_v35 = vpop.f32.mrb[111].mxu0  ;;  %8089 = vpow2.f32 %v5100_v30  ;;  %v13210_v5 = vadd.high.f32.bf16 %v16587_v20, %v12911_v50  ;;  %v13217_v3 = vpop.f32.mrb[111].mxu1  ;;  %v16591_v30 = vld [vmem:[#allocation111_spill] sm:$0xff]  ;;  %v16596_v14 = vld [vmem:[#allocation192_spill] sm:$0xff] }
 0x26d   : > { %16583 = vst [vmem:[#allocation97_spill] sm:$0xff] %v13200_v35  ;;  %v13205_v37 = vadd.low.f32.bf16 %v16585_v43, %v12900_v62  ;;  %v13215_v4 = vadd.low.f32.bf16 %v16589_v42, %v12911_v50  ;;  %16590 = vst [vmem:[#allocation205_spill] sm:$0xff] %v13217_v3  ;;  %v8072_v16 = vpop.eup %8071  ;;  %8091 = vpow2.f32 %v4338_v61  ;;  %v16592_v18 = vld [vmem:[#allocation71_spill] sm:$0xff]  ;;  %v16593_v62 = vld [vmem:[#allocation204_spill] sm:$0xff] }
 0x26e   : > { %v4269_v34 = vsub.f32 %v16591_v30, %v4205_v38  ;;  %v4461_v10 = vsub.f32 %v16592_v18, %v4205_v38  ;;  %v4653_v43 = vsub.f32 %v16593_v62, %v4205_v38  ;;  %v8074_v9 = vpop.eup %8073  ;;  %v5230_v48 = vmul.f32 %v8072_v16, %v16594_v22  ;;  %v16595_v42 = vld [vmem:[#allocation191_spill] sm:$0xff] }
 0x26f   : > { %8093 = vpow2.f32 %v4530_v29  ;;  %v4845_v20 = vsub.f32 %v3885_v46, %v4205_v38  ;;  %v5037_v57 = vsub.f32 %v13152_v17, %v4205_v38  ;;  %v8076_v39 = vpop.eup %8075  ;;  %v5294_v50 = vadd.f32 %v8074_v9, %v8072_v16 }
 0x270   : > { %v5358_v35 = vmul.f32 %v8074_v9, %v16595_v42  ;;  %8095 = vpow2.f32 %v4722_v28  ;;  %v4334_v3 = vmul.f32 1.442695, %v4269_v34  ;;  %v8078_v61 = vpop.eup %8077  ;;  %v5550_v30 = vmul.f32 %v8076_v39, %v16596_v14  ;;  %v16597_v34 = vld [vmem:[#allocation98_spill] sm:$0xff] }
 0x271   : > { %8097 = vpow2.f32 %v4914_v60  ;;  %v4526_v18 = vmul.f32 1.442695, %v4461_v10  ;;  %v4718_v36 = vmul.f32 1.442695, %v4653_v43  ;;  %v8080_v62 = vpop.eup %8079  ;;  %v5486_v51 = vadd.f32 %v8076_v39, %v5294_v50  ;;  %v16598_v43 = vld [vmem:[#allocation193_spill] sm:$0xff] }
 0x272   : > { %v5422_v11 = vadd.f32 %v5358_v35, %v5230_v48  ;;  %v5742_v22 = vmul.f32 %v8078_v61, %v13108_v49  ;;  %8099 = vpow2.f32 %v5106_v32  ;;  %v8082_v46 = vpop.eup %8081  ;;  %v5934_v17 = vmul.f32 %v8080_v62, %v13098_v41 }
 0x273   : > { %8101 = vpow2.f32 %v4334_v3  ;;  %v4910_v29 = vmul.f32 1.442695, %v4845_v20  ;;  %v5102_v9 = vmul.f32 1.442695, %v5037_v57  ;;  %v8084_v28 = vpop.eup %8083  ;;  %v5678_v16 = vadd.f32 %v8078_v61, %v5486_v51  ;;  %v16599_v3 = vld [vmem:[#allocation194_spill] sm:$0xff] }
 0x274   : > { %v5614_v38 = vadd.f32 %v5550_v30, %v5422_v11  ;;  %v5228_v14 = vmul.f32 %v8082_v46, %v16597_v34  ;;  %8103 = vpow2.f32 %v4526_v18  ;;  %v8086_v60 = vpop.eup %8085  ;;  %v5292_v10 = vadd.f32 %v8084_v28, %v8082_v46  ;;  %v16602_v34 = vld [vmem:[#allocation199_spill] sm:$0xff] }
 0x275   : > { %v5356_v35 = vmul.f32 %v8084_v28, %v16598_v43  ;;  %8105 = vpow2.f32 %v4718_v36  ;;  %v9287_v49 = vadd.low.f32.bf16 %v13215_v4, %v12938_v2  ;;  %v8088_v32 = vpop.eup %8087  ;;  %v5870_v41 = vadd.f32 %v8080_v62, %v5678_v16  ;;  %v16606_v4 = vld [vmem:[#allocation99_spill] sm:$0xff] }
 0x276   : > { %v5806_v48 = vadd.f32 %v5742_v22, %v5614_v38  ;;  %v5548_v20 = vmul.f32 %v8086_v60, %v16599_v3  ;;  %8107 = vpow2.f32 %v4910_v29  ;;  %v8090_v57 = vpop.eup %8089  ;;  %v5484_v51 = vadd.f32 %v8086_v60, %v5292_v10  ;;  %v16600_v22 = vld [vmem:[#allocation102_spill] sm:$0xff]  ;;  %v16601_v38 = vld [vmem:[#allocation197_spill] sm:$0xff] }
 0x277   : > { %v5420_v11 = vadd.f32 %v5356_v35, %v5228_v14  ;;  %v5740_v39 = vmul.f32 %v8088_v32, %v13130_v21  ;;  %8109 = vpow2.f32 %v5102_v9  ;;  %v8092_v50 = vpop.eup %8091  ;;  %v5932_v36 = vmul.f32 %v8090_v57, %v13103_v13  ;;  %v13242_v21 = vld [vmem:[%s15174_s2] ss:$0 sm:$0xff] }
 0x278   : > { %v5998_v42 = vadd.f32 %v5934_v17, %v5806_v48  ;;  %8111 = vrcp.f32 %v5870_v41  ;;  %v9288_v61 = vadd.high.f32.bf16 %v13210_v5, %v12938_v2  ;;  %v5676_v62 = vadd.f32 %v8088_v32, %v5484_v51  ;;  %v13254_v41 = vpop.f32.mrb[112].mxu0 }
 0x279   : > { %v8094_v30 = vpop.eup %8093  ;;  %v5612_v18 = vadd.f32 %v5548_v20, %v5420_v11  ;;  %v5231_v46 = vmul.f32 %v8092_v50, %v16600_v22  ;;  %v13246_v13 = vadd.f32 %v13242_v21, %v12988_v31  ;;  %v9289_v60 = vadd.high.f32.bf16 %v13172_v15, %v12976_v45  ;;  %v13260_v11 = vpop.f32.mrb[112].mxu1 }
 0x27a   : > { %v8096_v29 = vpop.eup %8095  ;;  %v5295_v28 = vadd.f32 %v8094_v30, %v8092_v50  ;;  %v5359_v16 = vmul.f32 %v8094_v30, %v16601_v38  ;;  %v5868_v9 = vadd.f32 %v8090_v57, %v5676_v62  ;;  %v9290_v48 = vadd.low.f32.bf16 %v13205_v37, %v12976_v45  ;;  %v13262_v15 = vpop.f32.mrb[113].mxu0  ;;  %v16603_v50 = vld [vmem:[#allocation106_spill] sm:$0xff] }
 0x27b   : > { %v8098_v17 = vpop.eup %8097  ;;  %v5804_v5 = vadd.f32 %v5740_v39, %v5612_v18  ;;  %v5551_v14 = vmul.f32 %v8096_v29, %v16602_v34  ;;  %v13258_v57 = vmul.f32 0.5, %v13246_v13  ;;  %v13265_v45 = vpop.f32.mrb[113].mxu1  ;;  %v9291_v38 = vadd.high.f32.bf16 %v9289_v60, %v13008_v23 }
 0x27c   : > { %v8100_v10 = vpop.eup %8099  ;;  %v5423_v43 = vadd.f32 %v5359_v16, %v5231_v46  ;;  %v5487_v35 = vadd.f32 %v8096_v29, %v5295_v28  ;;  %v5743_v32 = vmul.f32 %v8098_v17, %v13156_v56  ;;  %8113 = vrcp.f32 %v5868_v9  ;;  %v16605_v29 = vld [vmem:[#allocation201_spill] sm:$0xff] }
 0x27d   : > { %v8102_v31 = vpop.eup %8101  ;;  %v5996_v3 = vadd.f32 %v5932_v36, %v5804_v5  ;;  %v5935_v20 = vmul.f32 %v8100_v10, %v13119_v53  ;;  %v16604_v36 = vld [vmem:[#allocation200_spill] sm:$0xff]  ;;  %v9292_v34 = vadd.low.f32.bf16 %v9290_v48, %v13008_v23  ;;  %v9293_v60 = vadd.high.f32.bf16 %v9288_v61, %v13019_v27 }
 0x27e   : > { %v8104_v51 = vpop.eup %8103  ;;  %v5615_v39 = vadd.f32 %v5551_v14, %v5423_v43  ;;  %v5679_v56 = vadd.f32 %v8098_v17, %v5487_v35  ;;  %v5229_v30 = vmul.f32 %v8102_v31, %v16603_v50  ;;  %v13276_v50 = vadd.f32 %v13242_v21, %v13001_v52  ;;  %v13289_v52 = vpop.f32.mrb[114].mxu1 }
 0x27f   : > { %v8106_v37 = vpop.eup %8105  ;;  %v5293_v18 = vadd.f32 %v8104_v51, %v8102_v31  ;;  %v5357_v62 = vmul.f32 %v8104_v51, %v16604_v36  ;;  %v1235_v31 = vmul.f32 0.25, %v9291_v38  ;;  %v13287_v61 = vadd.f32 %v13242_v21, %v13003_v19 }
 0x280   : > { %v8108_v22 = vpop.eup %8107  ;;  %v5807_v53 = vadd.f32 %v5743_v32, %v5615_v39  ;;  %v5871_v46 = vadd.f32 %v8100_v10, %v5679_v56  ;;  %v5549_v28 = vmul.f32 %v8106_v37, %v16605_v29  ;;  %v1234_v39 = vmul.f32 0.25, %v9292_v34 }
 0x281   : > { %v8110_v16 = vpop.eup %8109  ;;  %v5421_v5 = vadd.f32 %v5357_v62, %v5229_v30  ;;  %v5485_v9 = vadd.f32 %v8106_v37, %v5293_v18  ;;  %v5741_v17 = vmul.f32 %v8108_v22, %v13162_v40  ;;  %v3274_v56 = vmax.f32 %v1235_v31, 0.0 }
 0x282   : > { %v8112_v14 = vpop.eup %8111  ;;  %v5999_v43 = vadd.f32 %v5935_v20, %v5807_v53  ;;  %8115 = vrcp.f32 %v5871_v46  ;;  %v5933_v35 = vmul.f32 %v8110_v16, %v13141_v58  ;;  %v3273_v48 = vmax.f32 %v1234_v39, 0.0  ;;  %v13278_v20 = vpop.f32.mrb[114].mxu0 }
 0x283   : > { %v6126_v51 = vmul.f32 %v8112_v14, %v5998_v42  ;;  %v5613_v32 = vadd.f32 %v5549_v28, %v5421_v5  ;;  %v5677_v10 = vadd.f32 %v8108_v22, %v5485_v9  ;;  %v9294_v58 = vadd.low.f32.bf16 %v9287_v49, %v13019_v27  ;;  %v16607_v5 = vld [vmem:[#allocation218_spill] sm:$0xff] }
 0x284   : > { %v1233_v42 = vmul.f32 0.25, %v9293_v60  ;;  %v3890_v37 = vmul.f32 0.5, %v13276_v50  ;;  %v3306_v62 = vpack.c.bf16 %v3274_v56, %v3273_v48  ;;  %v13293_v22 = vadd.f32 %v13242_v21, %v13010_v24  ;;  %v16610_v56 = vld [vmem:[#allocation210_spill] sm:$0xff] }
 0x285   : > { %v6941_v40 = vmul.f32 -1.442695, %v6126_v51  ;;  %v5805_v30 = vadd.f32 %v5741_v17, %v5613_v32  ;;  %v5869_v23 = vadd.f32 %v8110_v16, %v5677_v10  ;;  %v1232_v2 = vmul.f32 0.25, %v9294_v58  ;;  %v16608_v51 = vld [vmem:[#allocation115_spill] sm:$0xff]  ;;  %v16609_v10 = vld [vmem:[#allocation208_spill] sm:$0xff] }
 0x286   : > { %v8114_v18 = vpop.eup %8113  ;;  %v3272_v27 = vmax.f32 %v1233_v42, 0.0  ;;  %v4146_v49 = vmax.f32 %v16606_v4, %v3890_v37  ;;  %v3952_v46 = vmul.f32 0.5, %v13287_v61  ;;  %v3888_v19 = vmul.f32 0.5, %v13293_v22 }
 0x287   : > { %8117 = vpow2.f32 %v6941_v40  ;;  %v5997_v36 = vadd.f32 %v5933_v35, %v5805_v30  ;;  %v6124_v53 = vmul.f32 %v8114_v18, %v5996_v3  ;;  %v13300_v29 = vadd.f32 %v13242_v21, %v13021_v54 }
 0x288   : > { %8119 = vrcp.f32 %v5869_v23  ;;  %v3271_v38 = vmax.f32 %v1232_v2, 0.0  ;;  %v13304_v24 = vadd.f32 %v13242_v21, %v13028_v6  ;;  %v13308_v3 = vadd.f32 %v13242_v21, %v13030_v0  ;;  %v13323_v0 = vpop.f32.mrb[115].mxu0  ;;  %v16611_v23 = vld [vmem:[#allocation101_spill] sm:$0xff] }
 0x289   : > { %v6939_v28 = vmul.f32 -1.442695, %v6124_v53  ;;  %v4210_v16 = vmax.f32 %v4146_v49, %v13258_v57  ;;  %v4144_v9 = vmax.f32 %v16607_v5, %v3888_v19  ;;  %v13313_v17 = vmul.f32 0.5, %v13300_v29  ;;  %v16613_v49 = vld [vmem:[#allocation209_spill] sm:$0xff] }
 0x28a   : > { %v13317_v54 = vadd.f32 %v13242_v21, %v13035_v59  ;;  %v3305_v14 = vpack.c.bf16 %v3272_v27, %v3271_v38  ;;  %v3891_v6 = vmul.f32 0.5, %v13304_v24  ;;  %v13321_v35 = vmul.f32 0.5, %v13308_v3  ;;  %v16614_v38 = vld [vmem:[#allocation212_spill] sm:$0xff] }
 0x28b   : > { %8121 = vpow2.f32 %v6939_v28  ;;  %v4274_v32 = vsub.f32 %v16608_v51, %v4210_v16  ;;  %v4466_v39 = vsub.f32 %v16609_v10, %v4210_v16  ;;  %v4658_v60 = vsub.f32 %v16610_v56, %v4210_v16 }
 0x28c   : > { %v8116_v34 = vpop.eup %8115  ;;  %v4850_v40 = vsub.f32 %v3890_v37, %v4210_v16  ;;  %v5042_v59 = vsub.f32 %v13258_v57, %v4210_v16  ;;  %v4208_v30 = vmax.f32 %v4144_v9, %v3952_v46  ;;  %v4147_v48 = vmax.f32 %v16611_v23, %v3891_v6  ;;  %7516 = vmatprep.mubr.msk.bf16.mxu0 %vm1478_vm0, %v3305_v14  ;;  %v16612_v37 = vld [vmem:[#allocation25_spill] sm:$0xff]  ;;  %v13339_v9 = vpop.f32.mrb[115].mxu1 }
 0x28d   : > { %v6127_v31 = vmul.f32 %v8116_v34, %v5999_v43  ;;  %v4344_v42 = vmul.f32 1.442695, %v4274_v32  ;;  %v4536_v18 = vmul.f32 1.442695, %v4466_v39  ;;  %7517 = vmatmul.mubr.msk.bf16.gmra.mrb[156].mxu0 %vm1478_vm0, %v3306_v62  ;;  %v13334_v43 = vadd.f32 %v13242_v21, %v13110_v63 }
 0x28e   : > { %v4728_v53 = vmul.f32 1.442695, %v4658_v60  ;;  %v4920_v2 = vmul.f32 1.442695, %v4850_v40  ;;  %v5112_v27 = vmul.f32 1.442695, %v5042_v59  ;;  %v4272_v4 = vsub.f32 %v16612_v37, %v4208_v30 }
 0x28f   : > { %v6942_v58 = vmul.f32 -1.442695, %v6127_v31  ;;  %v4464_v28 = vsub.f32 %v16613_v49, %v4208_v30  ;;  %v4656_v16 = vsub.f32 %v16614_v38, %v4208_v30  ;;  %v4848_v5 = vsub.f32 %v3888_v19, %v4208_v30 }
 0x290   : > { %v4340_v14 = vmul.f32 1.442695, %v4272_v4  ;;  %v5040_v63 = vsub.f32 %v3952_v46, %v4208_v30  ;;  %v4211_v56 = vmax.f32 %v4147_v48, %v13313_v17  ;;  %v3889_v19 = vmul.f32 0.5, %v13317_v54  ;;  %v16615_v46 = vld [vmem:[#allocation118_spill] sm:$0xff]  ;;  %v16616_v30 = vld [vmem:[#allocation211_spill] sm:$0xff] }
 0x291   : > { %v8118_v57 = vpop.eup %8117  ;;  %8123 = vpow2.f32 %v6942_v58  ;;  %v4532_v51 = vmul.f32 1.442695, %v4464_v28  ;;  %v4724_v32 = vmul.f32 1.442695, %v4656_v16  ;;  %v4916_v10 = vmul.f32 1.442695, %v4848_v5 }
 0x292   : > { %v8120_v34 = vpop.eup %8119  ;;  %v6382_v62 = vadd.f32 1.0, %v8118_v57  ;;  %8125 = vpow2.f32 %v4344_v42  ;;  %v5108_v39 = vmul.f32 1.442695, %v5040_v63  ;;  %v13344_v40 = vmul.f32 0.5, %v13334_v43  ;;  %v16617_v58 = vld [vmem:[#allocation216_spill] sm:$0xff] }
 0x293   : > { %v6125_v31 = vmul.f32 %v8120_v34, %v5997_v36  ;;  %8127 = vpow2.f32 %v4536_v18  ;;  %v4275_v36 = vsub.f32 %v16615_v46, %v4211_v56  ;;  %v4467_v23 = vsub.f32 %v16616_v30, %v4211_v56 }
 0x294   : > { %8129 = vrcp.f32 %v6382_v62  ;;  %v4659_v42 = vsub.f32 %v16617_v58, %v4211_v56  ;;  %v4851_v37 = vsub.f32 %v3891_v6, %v4211_v56  ;;  %v5043_v48 = vsub.f32 %v13313_v17, %v4211_v56  ;;  %v16620_v56 = vld [vmem:[#allocation119_spill] sm:$0xff] }
 0x295   : > { %v6940_v60 = vmul.f32 -1.442695, %v6125_v31  ;;  %8131 = vpow2.f32 %v4728_v53  ;;  %v8122_v59 = vpop.eup %8121  ;;  %v4346_v53 = vmul.f32 1.442695, %v4275_v36  ;;  %v4538_v4 = vmul.f32 1.442695, %v4467_v23 }
 0x296   : > { %8133 = vpow2.f32 %v4920_v2  ;;  %v6380_v18 = vadd.f32 1.0, %v8122_v59  ;;  %v4730_v57 = vmul.f32 1.442695, %v4659_v42  ;;  %v4922_v49 = vmul.f32 1.442695, %v4851_v37  ;;  %v16618_v2 = vld [vmem:[#allocation221_spill] sm:$0xff] }
 0x297   : > { %8135 = vpow2.f32 %v6940_v60  ;;  %v5114_v28 = vmul.f32 1.442695, %v5043_v48  ;;  %v4145_v38 = vmax.f32 %v16618_v2, %v3889_v19  ;;  %v13354_v16 = vadd.f32 %v13242_v21, %v13121_v8  ;;  %v16619_v31 = vld [vmem:[#allocation108_spill] sm:$0xff]  ;;  %v16621_v60 = vld [vmem:[#allocation215_spill] sm:$0xff] }
 0x298   : > { %8137 = vpow2.f32 %v5112_v27  ;;  %v13358_v6 = vadd.f32 %v13242_v21, %v13123_v44  ;;  %v13362_v17 = vadd.f32 %v13242_v21, %v13132_v47  ;;  %v13367_v34 = vadd.f32 %v13242_v21, %v13134_v33  ;;  %v16622_v36 = vld [vmem:[#allocation56_spill] sm:$0xff] }
 0x299   : > { %8139 = vrcp.f32 %v6380_v18  ;;  %v4209_v5 = vmax.f32 %v4145_v38, %v13321_v35  ;;  %v13371_v8 = vadd.f32 %v13242_v21, %v13143_v1  ;;  %v13374_v44 = vmul.f32 0.5, %v13354_v16  ;;  %v16624_v38 = vld [vmem:[#allocation58_spill] sm:$0xff] }
 0x29a   : > { %8141 = vpow2.f32 %v4340_v14  ;;  %v13377_v47 = vmul.f32 0.5, %v13358_v6 }
 0x29b   : > { %v8124_v27 = vpop.eup %8123  ;;  %8143 = vpow2.f32 %v4532_v51  ;;  %v4273_v33 = vsub.f32 %v16620_v56, %v4209_v5  ;;  %v4465_v59 = vsub.f32 %v16621_v60, %v4209_v5 }
 0x29c   : > { %v8126_v62 = vpop.eup %8125  ;;  %v6383_v14 = vadd.f32 1.0, %v8124_v27  ;;  %8145 = vpow2.f32 %v4724_v32  ;;  %v16623_v32 = vld [vmem:[#allocation219_spill] sm:$0xff] }
 0x29d   : > { %v8128_v63 = vpop.eup %8127  ;;  %v5234_v51 = vmul.f32 %v8126_v62, %v16619_v31  ;;  %8147 = vpow2.f32 %v4916_v10  ;;  %v4657_v23 = vsub.f32 %v16623_v32, %v4209_v5  ;;  %v4342_v42 = vmul.f32 1.442695, %v4273_v33  ;;  %v16626_v32 = vld [vmem:[#allocation43_spill] sm:$0xff] }
 0x29e   : > { %v8130_v46 = vpop.eup %8129  ;;  %8149 = vrcp.f32 %v6383_v14  ;;  %v5298_v1 = vadd.f32 %v8128_v63, %v8126_v62  ;;  %v5362_v30 = vmul.f32 %v8128_v63, %v16622_v36  ;;  %v4534_v18 = vmul.f32 1.442695, %v4465_v59 }
 0x29f   : > { %v8132_v58 = vpop.eup %8131  ;;  %6574 = vst [vmem:[%s13384_s30 + $0x10] sm:$0xff] %v8130_v46  ;;  %8151 = vpow2.f32 %v5108_v39  ;;  %v4849_v10 = vsub.f32 %v3889_v19, %v4209_v5  ;;  %v4726_v63 = vmul.f32 1.442695, %v4657_v23  ;;  %v13395_v36 = vmul.f32 0.5, %v13362_v17 }
 0x2a0   : > { %v8134_v37 = vpop.eup %8133  ;;  %v5426_v48 = vadd.f32 %v5362_v30, %v5234_v51  ;;  %v5490_v2 = vadd.f32 %v8132_v58, %v5298_v1  ;;  %v5554_v27 = vmul.f32 %v8132_v58, %v16624_v38  ;;  %8153 = vpow2.f32 %v4346_v53  ;;  %v16625_v53 = vld [vmem:[#allocation78_spill] sm:$0xff] }
 0x2a1   : > { %v8136_v62 = vpop.eup %8135  ;;  %v5746_v14 = vmul.f32 %v8134_v37, %v13276_v50  ;;  %8155 = vpow2.f32 %v4538_v4  ;;  %v4918_v31 = vmul.f32 1.442695, %v4849_v10  ;;  %v5041_v51 = vsub.f32 %v13321_v35, %v4209_v5  ;;  %v16627_v10 = vld [vmem:[#allocation55_spill] sm:$0xff] }
 0x2a2   : > { %v8138_v56 = vpop.eup %8137  ;;  %v6381_v60 = vadd.f32 1.0, %v8136_v62  ;;  %v5618_v46 = vadd.f32 %v5554_v27, %v5426_v48  ;;  %v5682_v39 = vadd.f32 %v8134_v37, %v5490_v2  ;;  %8157 = vpow2.f32 %v4730_v57  ;;  %v13402_v48 = vpop.f32.mrb[116].mxu1  ;;  %v16628_v27 = vld [vmem:[#allocation207_spill] sm:$0xff] }
 0x2a3   : > { %v8140_v33 = vpop.eup %8139  ;;  %v5938_v19 = vmul.f32 %v8138_v56, %v13246_v13  ;;  %8159 = vpow2.f32 %v4922_v49  ;;  %v4150_v59 = vmax.f32 %v16625_v53, %v13374_v44  ;;  %v5110_v23 = vmul.f32 1.442695, %v5041_v51  ;;  %v13399_v49 = vpop.f32.mrb[116].mxu0 }
 0x2a4   : > { %v8142_v1 = vpop.eup %8141  ;;  %6572 = vst [vmem:[%s13384_s30] sm:$0xff] %v8140_v33  ;;  %8161 = vrcp.f32 %v6381_v60  ;;  %v5810_v50 = vadd.f32 %v5746_v14, %v5618_v46  ;;  %v5874_v4 = vadd.f32 %v8138_v56, %v5682_v39  ;;  %v13404_v2 = vpop.f32.mrb[117].mxu0  ;;  %v16630_v56 = vld [vmem:[#allocation74_spill] sm:$0xff] }
 0x2a5   : > { %v8144_v30 = vpop.eup %8143  ;;  %v5232_v57 = vmul.f32 %v8142_v1, %v16626_v32  ;;  %8163 = vpow2.f32 %v5114_v28  ;;  %v4214_v13 = vmax.f32 %v4150_v59, %v13344_v40  ;;  %v16629_v28 = vld [vmem:[#allocation121_spill] sm:$0xff]  ;;  %v13409_v46 = vpop.f32.mrb[117].mxu1 }
 0x2a6   : > { %v8146_v35 = vpop.eup %8145  ;;  %v6002_v5 = vadd.f32 %v5938_v19, %v5810_v50  ;;  %8165 = vrcp.f32 %v5874_v4  ;;  %v5296_v58 = vadd.f32 %v8144_v30, %v8142_v1  ;;  %v5360_v37 = vmul.f32 %v8144_v30, %v16627_v10  ;;  %v16631_v50 = vld [vmem:[#allocation225_spill] sm:$0xff] }
 0x2a7   : > { %v8148_v38 = vpop.eup %8147  ;;  %v5552_v62 = vmul.f32 %v8146_v35, %v16628_v27  ;;  %8167 = vpow2.f32 %v4342_v42  ;;  %v4278_v14 = vsub.f32 %v16629_v28, %v4214_v13  ;;  %v4470_v60 = vsub.f32 %v16630_v56, %v4214_v13  ;;  %v13414_v42 = vpop.f32.mrb[118].mxu0  ;;  %v16633_v56 = vld [vmem:[#allocation206_spill] sm:$0xff] }
 0x2a8   : > { %v8150_v39 = vpop.eup %8149  ;;  %v5424_v33 = vadd.f32 %v5360_v37, %v5232_v57  ;;  %v5488_v19 = vadd.f32 %v8146_v35, %v5296_v58  ;;  %v5744_v51 = vmul.f32 %v8148_v38, %v13293_v22  ;;  %8169 = vpow2.f32 %v4534_v18  ;;  %v16632_v35 = vld [vmem:[#allocation54_spill] sm:$0xff] }
 0x2a9   : > { %v8152_v53 = vpop.eup %8151  ;;  %6575 = vst [vmem:[%s13384_s30 + $0x18] sm:$0xff] %v8150_v39  ;;  %8171 = vpow2.f32 %v4726_v63  ;;  %v4352_v59 = vmul.f32 1.442695, %v4278_v14  ;;  %v4544_v1 = vmul.f32 1.442695, %v4470_v60  ;;  %v4662_v4 = vsub.f32 %v16631_v50, %v4214_v13 }
 0x2aa   : > { %v8154_v30 = vpop.eup %8153  ;;  %v5616_v32 = vadd.f32 %v5552_v62, %v5424_v33  ;;  %v5680_v10 = vadd.f32 %v8148_v38, %v5488_v19  ;;  %v5936_v27 = vmul.f32 %v8152_v53, %v13287_v61  ;;  %8173 = vpow2.f32 %v4918_v31  ;;  %v16634_v62 = vld [vmem:[#allocation214_spill] sm:$0xff] }
 0x2ab   : > { %v8156_v57 = vpop.eup %8155  ;;  %v5235_v58 = vmul.f32 %v8154_v30, %v16632_v35  ;;  %8175 = vpow2.f32 %v5110_v23  ;;  %v4736_v22 = vmul.f32 1.442695, %v4662_v4  ;;  %v4854_v18 = vsub.f32 %v13374_v44, %v4214_v13  ;;  %v13422_v44 = vpop.f32.mrb[118].mxu1 }
 0x2ac   : > { %v8158_v63 = vpop.eup %8157  ;;  %v5808_v37 = vadd.f32 %v5744_v51, %v5616_v32  ;;  %v5872_v28 = vadd.f32 %v8152_v53, %v5680_v10  ;;  %v5299_v14 = vadd.f32 %v8156_v57, %v8154_v30  ;;  %v5363_v60 = vmul.f32 %v8156_v57, %v16633_v56 }
 0x2ad   : > { %v8160_v39 = vpop.eup %8159  ;;  %v5555_v38 = vmul.f32 %v8158_v63, %v16634_v62  ;;  %8177 = vpow2.f32 %v4352_v59  ;;  %v4928_v61 = vmul.f32 1.442695, %v4854_v18  ;;  %v5046_v31 = vsub.f32 %v13344_v40, %v4214_v13  ;;  %v16635_v18 = vld [vmem:[#allocation89_spill] sm:$0xff] }
 0x2ae   : > { %v8162_v33 = vpop.eup %8161  ;;  %v6000_v19 = vadd.f32 %v5936_v27, %v5808_v37  ;;  %8179 = vrcp.f32 %v5872_v28  ;;  %v5427_v23 = vadd.f32 %v5363_v60, %v5235_v58  ;;  %v5491_v50 = vadd.f32 %v8158_v63, %v5299_v14  ;;  %v16636_v14 = vld [vmem:[#allocation213_spill] sm:$0xff] }
 0x2af   : > { %v8164_v51 = vpop.eup %8163  ;;  %6573 = vst [vmem:[%s13384_s30 + $0x8] sm:$0xff] %v8162_v33  ;;  %v5747_v53 = vmul.f32 %v8160_v39, %v13304_v24  ;;  %8181 = vpow2.f32 %v4544_v1  ;;  %v5120_v4 = vmul.f32 1.442695, %v5046_v31  ;;  %v4148_v30 = vmax.f32 %v11561_v7, %v13395_v36 }
 0x2b0   : > { %v8166_v59 = vpop.eup %8165  ;;  %v5619_v32 = vadd.f32 %v5555_v38, %v5427_v23  ;;  %v5683_v10 = vadd.f32 %v8160_v39, %v5491_v50  ;;  %v5939_v40 = vmul.f32 %v8164_v51, %v13300_v29  ;;  %8183 = vpow2.f32 %v4736_v22  ;;  %v16637_v22 = vld [vmem:[#allocation122_spill] sm:$0xff]  ;;  %v16638_v39 = vld [vmem:[#allocation217_spill] sm:$0xff]  ;;  %v16639_v38 = vld [vmem:[#allocation224_spill] sm:$0xff] }
 0x2b1   : > { %v8168_v13 = vpop.eup %8167  ;;  %v6130_v27 = vmul.f32 %v8166_v59, %v6002_v5  ;;  %8185 = vpow2.f32 %v4928_v61  ;;  %v4212_v57 = vmax.f32 %v4148_v30, %v13377_v47  ;;  %v13431_v35 = vmul.f32 0.5, %v13367_v34  ;;  %v16640_v30 = vld [vmem:[#allocation229_spill] sm:$0xff] }
 0x2b2   : > { %v8170_v24 = vpop.eup %8169  ;;  %v5811_v1 = vadd.f32 %v5747_v53, %v5619_v32  ;;  %v5875_v58 = vadd.f32 %v8164_v51, %v5683_v10  ;;  %v5233_v63 = vmul.f32 %v8168_v13, %v16635_v18  ;;  %8187 = vpow2.f32 %v5120_v4  ;;  %v13441_v32 = vpop.f32.mrb[119].mxu0  ;;  %v16641_v18 = vld [vmem:[#allocation66_spill] sm:$0xff] }
 0x2b3   : > { %v8172_v7 = vpop.eup %8171  ;;  %v6945_v37 = vmul.f32 -1.442695, %v6130_v27  ;;  %v5297_v28 = vadd.f32 %v8170_v24, %v8168_v13  ;;  %v5361_v29 = vmul.f32 %v8170_v24, %v16636_v14  ;;  %v4276_v56 = vsub.f32 %v16637_v22, %v4212_v57 }
 0x2b4   : > { %v8174_v5 = vpop.eup %8173  ;;  %v6003_v60 = vadd.f32 %v5939_v40, %v5811_v1  ;;  %8189 = vrcp.f32 %v5875_v58  ;;  %v5553_v62 = vmul.f32 %v8172_v7, %v16638_v39  ;;  %v4468_v61 = vsub.f32 %v16639_v38, %v4212_v57  ;;  %v13445_v1 = vpop.f32.mrb[119].mxu1 }
 0x2b5   : > { %v8176_v31 = vpop.eup %8175  ;;  %8191 = vpow2.f32 %v6945_v37  ;;  %v5425_v33 = vadd.f32 %v5361_v29, %v5233_v63  ;;  %v5489_v23 = vadd.f32 %v8172_v7, %v5297_v28  ;;  %v5745_v50 = vmul.f32 %v8174_v5, %v13317_v54 }
 0x2b6   : > { %v5937_v51 = vmul.f32 %v8176_v31, %v13308_v3  ;;  %v4348_v53 = vmul.f32 1.442695, %v4276_v56  ;;  %v4540_v4 = vmul.f32 1.442695, %v4468_v61  ;;  %v4660_v59 = vsub.f32 %v16640_v30, %v4212_v57  ;;  %v16642_v56 = vld [vmem:[#allocation220_spill] sm:$0xff] }
 0x2b7   : > { %v8178_v10 = vpop.eup %8177  ;;  %v5617_v40 = vadd.f32 %v5553_v62, %v5425_v33  ;;  %v5681_v13 = vadd.f32 %v8174_v5, %v5489_v23  ;;  %v4852_v27 = vsub.f32 %v13395_v36, %v4212_v57  ;;  %v5044_v24 = vsub.f32 %v13377_v47, %v4212_v57  ;;  %v16643_v62 = vld [vmem:[#allocation223_spill] sm:$0xff] }
 0x2b8   : > { %v8180_v58 = vpop.eup %8179  ;;  %v5238_v54 = vmul.f32 %v8178_v10, %v16641_v18  ;;  %8193 = vpow2.f32 %v4348_v53  ;;  %v4732_v3 = vmul.f32 1.442695, %v4660_v59  ;;  %v3895_v63 = vmul.f32 0.5, %v13371_v8  ;;  %v16644_v53 = vld [vmem:[#allocation67_spill] sm:$0xff] }
 0x2b9   : > { %v8182_v7 = vpop.eup %8181  ;;  %v6128_v37 = vmul.f32 %v8180_v58, %v6000_v19  ;;  %v5809_v28 = vadd.f32 %v5745_v50, %v5617_v40  ;;  %v5873_v14 = vadd.f32 %v8176_v31, %v5681_v13  ;;  %8195 = vpow2.f32 %v4540_v4 }
 0x2ba   : > { %v8184_v29 = vpop.eup %8183  ;;  %v5302_v22 = vadd.f32 %v8182_v7, %v8178_v10  ;;  %v5366_v36 = vmul.f32 %v8182_v7, %v16642_v56  ;;  %8197 = vpow2.f32 %v4732_v3  ;;  %v4924_v47 = vmul.f32 1.442695, %v4852_v27  ;;  %v16645_v3 = vld [vmem:[#allocation14_spill] sm:$0xff] }
 0x2bb   : > { %v8186_v57 = vpop.eup %8185  ;;  %v6943_v5 = vmul.f32 -1.442695, %v6128_v37  ;;  %v6001_v39 = vadd.f32 %v5937_v51, %v5809_v28  ;;  %8199 = vrcp.f32 %v5873_v14  ;;  %v5558_v38 = vmul.f32 %v8184_v29, %v16643_v62  ;;  %v16647_v28 = vld [vmem:[#allocation233_spill] sm:$0xff] }
 0x2bc   : > { %v8188_v61 = vpop.eup %8187  ;;  %v5430_v33 = vadd.f32 %v5366_v36, %v5238_v54  ;;  %v5494_v23 = vadd.f32 %v8184_v29, %v5302_v22  ;;  %v5750_v19 = vmul.f32 %v8186_v57, %v13354_v16  ;;  %8201 = vpow2.f32 %v4924_v47  ;;  %v16648_v36 = vld [vmem:[#allocation92_spill] sm:$0xff] }
 0x2bd   : > { %8203 = vpow2.f32 %v6943_v5  ;;  %v5942_v31 = vmul.f32 %v8188_v61, %v13334_v43  ;;  %v5116_v50 = vmul.f32 1.442695, %v5044_v24  ;;  %v4151_v4 = vmax.f32 %v16644_v53, %v3895_v63 }
 0x2be   : > { %v8190_v30 = vpop.eup %8189  ;;  %v5622_v59 = vadd.f32 %v5558_v38, %v5430_v33  ;;  %v5686_v10 = vadd.f32 %v8186_v57, %v5494_v23  ;;  %v13456_v51 = vadd.f32 %v13242_v21, %v13145_v12  ;;  %v13460_v40 = vadd.f32 %v13242_v21, %v13149_v26  ;;  %v16646_v26 = vld [vmem:[#allocation227_spill] sm:$0xff] }
 0x2bf   : > { %v8192_v13 = vpop.eup %8191  ;;  %v6131_v16 = vmul.f32 %v8190_v30, %v6003_v60  ;;  %8205 = vpow2.f32 %v5116_v50  ;;  %v4215_v27 = vmax.f32 %v4151_v4, %v13431_v35  ;;  %v13465_v43 = vadd.f32 %v13242_v21, %v13186_v25  ;;  %v16650_v50 = vld [vmem:[#allocation228_spill] sm:$0xff] }
 0x2c0   : > { %v6386_v24 = vadd.f32 1.0, %v8192_v13  ;;  %v5814_v58 = vadd.f32 %v5750_v19, %v5622_v59  ;;  %v5878_v18 = vadd.f32 %v8188_v61, %v5686_v10  ;;  %v13468_v54 = vmul.f32 0.5, %v13456_v51  ;;  %v16649_v61 = vld [vmem:[#allocation222_spill] sm:$0xff] }
 0x2c1   : > { %v6946_v12 = vmul.f32 -1.442695, %v6131_v16  ;;  %v4279_v7 = vsub.f32 %v16645_v3, %v4215_v27  ;;  %v4471_v37 = vsub.f32 %v16646_v26, %v4215_v27  ;;  %v4663_v60 = vsub.f32 %v16647_v28, %v4215_v27 }
 0x2c2   : > { %v8194_v14 = vpop.eup %8193  ;;  %8207 = vrcp.f32 %v6386_v24  ;;  %v13473_v29 = vadd.f32 %v5942_v31, %v5814_v58  ;;  %v4855_v22 = vsub.f32 %v3895_v63, %v4215_v27  ;;  %v5047_v25 = vsub.f32 %v13431_v35, %v4215_v27 }
 0x2c3   : > { %v8196_v56 = vpop.eup %8195  ;;  %8209 = vpow2.f32 %v6946_v12  ;;  %v5236_v47 = vmul.f32 %v8194_v14, %v16648_v36  ;;  %v4354_v57 = vmul.f32 1.442695, %v4279_v7  ;;  %v4546_v5 = vmul.f32 1.442695, %v4471_v37  ;;  %v16651_v7 = vld [vmem:[#allocation237_spill] sm:$0xff]  ;;  %v16652_v37 = vld [vmem:[#allocation62_spill] sm:$0xff] }
 0x2c4   : > { %v8198_v62 = vpop.eup %8197  ;;  %8211 = vrcp.f32 %v5878_v18  ;;  %v5300_v38 = vadd.f32 %v8196_v56, %v8194_v14  ;;  %v5364_v33 = vmul.f32 %v8196_v56, %v16649_v61  ;;  %v4738_v23 = vmul.f32 1.442695, %v4663_v60  ;;  %v13503_v36 = vpop.f32.mrb[120].mxu1 }
 0x2c5   : > { %v8200_v19 = vpop.eup %8199  ;;  %v5556_v53 = vmul.f32 %v8198_v62, %v16650_v50  ;;  %8213 = vpow2.f32 %v4354_v57  ;;  %v4930_v31 = vmul.f32 1.442695, %v4855_v22  ;;  %v5122_v63 = vmul.f32 1.442695, %v5047_v25  ;;  %v13494_v22 = vpop.f32.mrb[120].mxu0 }
 0x2c6   : > { %v8202_v4 = vpop.eup %8201  ;;  %v6129_v35 = vmul.f32 %v8200_v19, %v6001_v39  ;;  %v5428_v30 = vadd.f32 %v5364_v33, %v5236_v47  ;;  %v5492_v59 = vadd.f32 %v8198_v62, %v5300_v38  ;;  %8215 = vpow2.f32 %v4546_v5  ;;  %v13505_v47 = vpop.f32.mrb[121].mxu0  ;;  %v16653_v62 = vld [vmem:[#allocation202_spill] sm:$0xff]  ;;  %v16654_v38 = vld [vmem:[#allocation100_spill] sm:$0xff] }
 0x2c7   : > { %v8204_v10 = vpop.eup %8203  ;;  %v5748_v13 = vmul.f32 %v8202_v4, %v13362_v17  ;;  %8217 = vpow2.f32 %v4738_v23  ;;  %v3893_v16 = vmul.f32 0.5, %v13460_v40  ;;  %v13482_v27 = vmul.f32 0.5, %v13465_v43  ;;  %v13515_v33 = vpop.f32.mrb[121].mxu1  ;;  %v16655_v19 = vld [vmem:[#allocation128_spill] sm:$0xff] }
 0x2c8   : > { %v6384_v24 = vadd.f32 1.0, %v8204_v10  ;;  %v6944_v58 = vmul.f32 -1.442695, %v6129_v35  ;;  %v5620_v18 = vadd.f32 %v5556_v53, %v5428_v30  ;;  %v5684_v12 = vadd.f32 %v8202_v4, %v5492_v59  ;;  %v16656_v53 = vld [vmem:[#allocation232_spill] sm:$0xff]  ;;  %v16657_v4 = vld [vmem:[#allocation70_spill] sm:$0xff] }
 0x2c9   : > { %v8206_v3 = vpop.eup %8205  ;;  %8219 = vpow2.f32 %v4930_v31  ;;  %v4149_v39 = vmax.f32 %v16651_v7, %v3893_v16  ;;  %v13487_v26 = vadd.f32 %v13242_v21, %v13189_v55  ;;  %v13491_v17 = vadd.f32 %v13242_v21, %v16652_v37  ;;  %v16659_v37 = vld [vmem:[#allocation94_spill] sm:$0xff] }
 0x2ca   : > { %8221 = vrcp.f32 %v6384_v24  ;;  %v5812_v28 = vadd.f32 %v5748_v13, %v5620_v18  ;;  %v5876_v60 = vadd.f32 %v8206_v3, %v5684_v12  ;;  %v5940_v14 = vmul.f32 %v8206_v3, %v13358_v6  ;;  %v16658_v24 = vld [vmem:[#allocation81_spill] sm:$0xff] }
 0x2cb   : > { %8223 = vpow2.f32 %v6944_v58  ;;  %v4213_v25 = vmax.f32 %v4149_v39, %v13468_v54  ;;  %v13498_v56 = vmul.f32 0.5, %v13487_v26  ;;  %v13501_v55 = vmul.f32 0.5, %v13491_v17 }
 0x2cc   : > { %v8208_v57 = vpop.eup %8207  ;;  %v6004_v5 = vadd.f32 %v5940_v14, %v5812_v28  ;;  %8225 = vrcp.f32 %v5876_v60  ;;  %v13509_v6 = vadd.f32 %v13242_v21, %v16653_v62  ;;  %v13513_v61 = vadd.f32 %v13242_v21, %v16654_v38  ;;  %v16660_v38 = vld [vmem:[#allocation226_spill] sm:$0xff] }
 0x2cd   : > { %v8210_v23 = vpop.eup %8209  ;;  %6578 = vst [vmem:[%s13384_s30 + $0x30] sm:$0xff] %v8208_v57  ;;  %8227 = vpow2.f32 %v5122_v63  ;;  %v4277_v50 = vsub.f32 %v16655_v19, %v4213_v25  ;;  %v4469_v31 = vsub.f32 %v16656_v53, %v4213_v25  ;;  %v4661_v35 = vsub.f32 %v16657_v4, %v4213_v25 }
 0x2ce   : > { %v8212_v30 = vpop.eup %8211  ;;  %v6387_v59 = vadd.f32 1.0, %v8210_v23  ;;  %v4853_v10 = vsub.f32 %v3893_v16, %v4213_v25  ;;  %v5045_v13 = vsub.f32 %v13468_v54, %v4213_v25  ;;  %v4154_v58 = vmax.f32 %v16658_v24, %v13498_v56  ;;  %v16661_v25 = vld [vmem:[#allocation231_spill] sm:$0xff]  ;;  %v16663_v24 = vld [vmem:[#allocation238_spill] sm:$0xff] }
 0x2cf   : > { %v8214_v18 = vpop.eup %8213  ;;  %v6134_v12 = vmul.f32 %v8212_v30, %v13473_v29  ;;  %v4350_v3 = vmul.f32 1.442695, %v4277_v50  ;;  %v4542_v7 = vmul.f32 1.442695, %v4469_v31  ;;  %v4734_v63 = vmul.f32 1.442695, %v4661_v35 }
 0x2d0   : > { %v8216_v39 = vpop.eup %8215  ;;  %8229 = vrcp.f32 %v6387_v59  ;;  %v5239_v28 = vmul.f32 %v8214_v18, %v16659_v37  ;;  %v4926_v60 = vmul.f32 1.442695, %v4853_v10  ;;  %v5118_v14 = vmul.f32 1.442695, %v5045_v13  ;;  %v13535_v35 = vpop.f32.mrb[122].mxu0  ;;  %v16662_v10 = vld [vmem:[#allocation135_spill] sm:$0xff] }
 0x2d1   : > { %v8218_v57 = vpop.eup %8217  ;;  %v6949_v62 = vmul.f32 -1.442695, %v6134_v12  ;;  %v5303_v16 = vadd.f32 %v8216_v39, %v8214_v18  ;;  %v5367_v54 = vmul.f32 %v8216_v39, %v16660_v38  ;;  %8231 = vpow2.f32 %v4350_v3  ;;  %v13540_v18 = vpop.f32.mrb[122].mxu1  ;;  %v16664_v39 = vld [vmem:[#allocation241_spill] sm:$0xff] }
 0x2d2   : > { %v5559_v23 = vmul.f32 %v8218_v57, %v16661_v25  ;;  %8233 = vpow2.f32 %v4542_v7  ;;  %v4218_v29 = vmax.f32 %v4154_v58, %v13482_v27  ;;  %v13530_v19 = vmul.f32 0.5, %v13509_v6 }
 0x2d3   : > { %v8220_v50 = vpop.eup %8219  ;;  %8235 = vpow2.f32 %v6949_v62  ;;  %v5431_v53 = vadd.f32 %v5367_v54, %v5239_v28  ;;  %v5495_v31 = vadd.f32 %v8218_v57, %v5303_v16  ;;  %v13533_v4 = vmul.f32 0.5, %v13513_v61 }
 0x2d4   : > { %v8222_v30 = vpop.eup %8221  ;;  %v5751_v59 = vmul.f32 %v8220_v50, %v13371_v8  ;;  %8237 = vpow2.f32 %v4734_v63  ;;  %v4282_v13 = vsub.f32 %v16662_v10, %v4218_v29  ;;  %v4474_v58 = vsub.f32 %v16663_v24, %v4218_v29 }
 0x2d5   : > { %v8224_v12 = vpop.eup %8223  ;;  %6576 = vst [vmem:[%s13384_s30 + $0x20] sm:$0xff] %v8222_v30  ;;  %v5623_v3 = vadd.f32 %v5559_v23, %v5431_v53  ;;  %v5687_v7 = vadd.f32 %v8220_v50, %v5495_v31  ;;  %8239 = vpow2.f32 %v4926_v60  ;;  %v4666_v37 = vsub.f32 %v16664_v39, %v4218_v29  ;;  %v16669_v39 = vld [vmem:[#allocation123_spill] sm:$0xff] }
 0x2d6   : > { %v8226_v28 = vpop.eup %8225  ;;  %v6385_v57 = vadd.f32 1.0, %v8224_v12  ;;  %8241 = vpow2.f32 %v5118_v14  ;;  %v4360_v62 = vmul.f32 1.442695, %v4282_v13  ;;  %v4552_v16 = vmul.f32 1.442695, %v4474_v58  ;;  %v16665_v14 = vld [vmem:[#allocation249_spill] sm:$0xff] }
 0x2d7   : > { %v8228_v8 = vpop.eup %8227  ;;  %v6132_v63 = vmul.f32 %v8226_v28, %v6004_v5  ;;  %v5815_v38 = vadd.f32 %v5751_v59, %v5623_v3  ;;  %v4744_v54 = vmul.f32 1.442695, %v4666_v37  ;;  %v4858_v25 = vsub.f32 %v13498_v56, %v4218_v29  ;;  %v16666_v59 = vld [vmem:[#allocation77_spill] sm:$0xff]  ;;  %v13563_v3 = vpop.f32.mrb[123].mxu0 }
 0x2d8   : > { %8243 = vrcp.f32 %v6385_v57  ;;  %v5879_v10 = vadd.f32 %v8228_v8, %v5687_v7  ;;  %v5943_v23 = vmul.f32 %v8228_v8, %v13367_v34  ;;  %v5050_v60 = vsub.f32 %v13482_v27, %v4218_v29  ;;  %v16667_v27 = vld [vmem:[#allocation97_spill] sm:$0xff] }
 0x2d9   : > { %v6947_v50 = vmul.f32 -1.442695, %v6132_v63  ;;  %8245 = vpow2.f32 %v4360_v62  ;;  %v4936_v53 = vmul.f32 1.442695, %v4858_v25  ;;  %v4152_v31 = vmax.f32 %v16665_v14, %v13530_v19  ;;  %v16668_v58 = vld [vmem:[#allocation205_spill] sm:$0xff]  ;;  %v13573_v62 = vpop.f32.mrb[123].mxu1 }
 0x2da   : > { %v8230_v30 = vpop.eup %8229  ;;  %v6007_v13 = vadd.f32 %v5943_v23, %v5815_v38  ;;  %8247 = vrcp.f32 %v5879_v10  ;;  %v5128_v5 = vmul.f32 1.442695, %v5050_v60  ;;  %v13551_v24 = vadd.f32 %v13242_v21, %v16666_v59  ;;  %v16670_v38 = vld [vmem:[#allocation230_spill] sm:$0xff] }
 0x2db   : > { %v8232_v56 = vpop.eup %8231  ;;  %6579 = vst [vmem:[%s13384_s30 + $0x38] sm:$0xff] %v8230_v30  ;;  %8249 = vpow2.f32 %v6947_v50  ;;  %v4216_v34 = vmax.f32 %v4152_v31, %v13501_v55  ;;  %v13557_v29 = vadd.f32 %v13242_v21, %v16667_v27  ;;  %v13561_v12 = vadd.f32 %v13242_v21, %v16668_v58  ;;  %v16671_v10 = vld [vmem:[#allocation138_spill] sm:$0xff]  ;;  %v16673_v31 = vld [vmem:[#allocation244_spill] sm:$0xff] }
 0x2dc   : > { %v8234_v7 = vpop.eup %8233  ;;  %v5237_v37 = vmul.f32 %v8232_v56, %v16669_v39  ;;  %8251 = vpow2.f32 %v4552_v16  ;;  %v13567_v28 = vmul.f32 0.5, %v13551_v24  ;;  %v13571_v57 = vadd.f32 %v13242_v21, %v13254_v41  ;;  %v16672_v16 = vld [vmem:[#allocation240_spill] sm:$0xff] }
 0x2dd   : > { %v8236_v8 = vpop.eup %8235  ;;  %v5301_v63 = vadd.f32 %v8234_v7, %v8232_v56  ;;  %v5365_v25 = vmul.f32 %v8234_v7, %v16670_v38  ;;  %8253 = vpow2.f32 %v4744_v54  ;;  %v4280_v23 = vsub.f32 %v16671_v10, %v4216_v34  ;;  %v16674_v41 = vld [vmem:[#allocation68_spill] sm:$0xff] }
 0x2de   : > { %v8238_v60 = vpop.eup %8237  ;;  %v6390_v50 = vadd.f32 1.0, %v8236_v8  ;;  %8255 = vpow2.f32 %v4936_v53  ;;  %v4472_v14 = vsub.f32 %v16672_v16, %v4216_v34  ;;  %v4664_v30 = vsub.f32 %v16673_v31, %v4216_v34 }
 0x2df   : > { %v8240_v59 = vpop.eup %8239  ;;  %v5429_v27 = vadd.f32 %v5365_v25, %v5237_v37  ;;  %v5493_v21 = vadd.f32 %v8238_v60, %v5301_v63  ;;  %v5557_v58 = vmul.f32 %v8238_v60, %v16674_v41  ;;  %8257 = vpow2.f32 %v5128_v5  ;;  %v16675_v5 = vld [vmem:[#allocation250_spill] sm:$0xff] }
 0x2e0   : > { %v8242_v56 = vpop.eup %8241  ;;  %8259 = vrcp.f32 %v6390_v50  ;;  %v5749_v54 = vmul.f32 %v8240_v59, %v13460_v40  ;;  %v4356_v7 = vmul.f32 1.442695, %v4280_v23  ;;  %v4548_v39 = vmul.f32 1.442695, %v4472_v14 }
 0x2e1   : > { %v5621_v38 = vadd.f32 %v5557_v58, %v5429_v27  ;;  %v5685_v8 = vadd.f32 %v8240_v59, %v5493_v21  ;;  %v5941_v53 = vmul.f32 %v8242_v56, %v13456_v51  ;;  %v4740_v10 = vmul.f32 1.442695, %v4664_v30  ;;  %v16676_v51 = vld [vmem:[#allocation129_spill] sm:$0xff] }
 0x2e2   : > { %v8244_v16 = vpop.eup %8243  ;;  %8261 = vpow2.f32 %v4356_v7  ;;  %v4856_v37 = vsub.f32 %v13530_v19, %v4216_v34  ;;  %v5048_v63 = vsub.f32 %v13501_v55, %v4216_v34  ;;  %v4155_v25 = vmax.f32 %v16675_v5, %v13567_v28 }
 0x2e3   : > { %v8246_v60 = vpop.eup %8245  ;;  %6577 = vst [vmem:[%s13384_s30 + $0x28] sm:$0xff] %v8244_v16  ;;  %v5813_v50 = vadd.f32 %v5749_v54, %v5621_v38  ;;  %v5877_v40 = vadd.f32 %v8242_v56, %v5685_v8  ;;  %8263 = vpow2.f32 %v4548_v39  ;;  %v13588_v23 = vmul.f32 0.5, %v13557_v29  ;;  %v16677_v38 = vld [vmem:[#allocation69_spill] sm:$0xff] }
 0x2e4   : > { %v8248_v14 = vpop.eup %8247  ;;  %v5242_v31 = vmul.f32 %v8246_v60, %v16676_v51  ;;  %8265 = vpow2.f32 %v4740_v10  ;;  %v4932_v30 = vmul.f32 1.442695, %v4856_v37  ;;  %v5124_v59 = vmul.f32 1.442695, %v5048_v63  ;;  %v16679_v16 = vld [vmem:[#allocation37_spill] sm:$0xff]  ;;  %v16680_v63 = vld [vmem:[#allocation242_spill] sm:$0xff] }
 0x2e5   : > { %v8250_v19 = vpop.eup %8249  ;;  %v6135_v27 = vmul.f32 %v8248_v14, %v6007_v13  ;;  %v6005_v55 = vadd.f32 %v5941_v53, %v5813_v50  ;;  %8267 = vrcp.f32 %v5877_v40  ;;  %v4219_v34 = vmax.f32 %v4155_v25, %v13533_v4  ;;  %v16678_v53 = vld [vmem:[#allocation235_spill] sm:$0xff] }
 0x2e6   : > { %v8252_v21 = vpop.eup %8251  ;;  %v6388_v41 = vadd.f32 1.0, %v8250_v19  ;;  %8269 = vpow2.f32 %v4932_v30  ;;  %v13593_v58 = vmul.f32 0.5, %v13561_v12  ;;  %v13596_v56 = vmul.f32 0.5, %v13571_v57  ;;  %v16681_v19 = vld [vmem:[#allocation247_spill] sm:$0xff] }
 0x2e7   : > { %v8254_v54 = vpop.eup %8253  ;;  %v6950_v7 = vmul.f32 -1.442695, %v6135_v27  ;;  %v5306_v39 = vadd.f32 %v8252_v21, %v8246_v60  ;;  %v5370_v8 = vmul.f32 %v8252_v21, %v16677_v38  ;;  %8271 = vpow2.f32 %v5124_v59 }
 0x2e8   : > { %v8256_v13 = vpop.eup %8255  ;;  %8273 = vrcp.f32 %v6388_v41  ;;  %v5562_v10 = vmul.f32 %v8254_v54, %v16678_v53  ;;  %v4283_v37 = vsub.f32 %v16679_v16, %v4219_v34  ;;  %v4475_v5 = vsub.f32 %v16680_v63, %v4219_v34 }
 0x2e9   : > { %v8258_v25 = vpop.eup %8257  ;;  %8275 = vpow2.f32 %v6950_v7  ;;  %v5434_v50 = vadd.f32 %v5370_v8, %v5242_v31  ;;  %v5498_v40 = vadd.f32 %v8254_v54, %v5306_v39  ;;  %v5754_v14 = vmul.f32 %v8256_v13, %v13487_v26  ;;  %v16682_v54 = vld [vmem:[#allocation84_spill] sm:$0xff] }
 0x2ea   : > { %v8260_v51 = vpop.eup %8259  ;;  %v5946_v60 = vmul.f32 %v8258_v25, %v13465_v43  ;;  %v4362_v30 = vmul.f32 1.442695, %v4283_v37  ;;  %v4554_v59 = vmul.f32 1.442695, %v4475_v5  ;;  %v4667_v27 = vsub.f32 %v16681_v19, %v4219_v34  ;;  %v13613_v43 = vld [vmem:[%s15174_s2] ss:$0 sm:$0xff] }
 0x2eb   : > { %6582 = vst [vmem:[%s13384_s30 + $0x50] sm:$0xff] %v8260_v51  ;;  %v5626_v21 = vadd.f32 %v5562_v10, %v5434_v50  ;;  %v5690_v41 = vadd.f32 %v8256_v13, %v5498_v40  ;;  %v4859_v38 = vsub.f32 %v13567_v28, %v4219_v34  ;;  %v5051_v53 = vsub.f32 %v13533_v4, %v4219_v34  ;;  %v16683_v13 = vld [vmem:[#allocation133_spill] sm:$0xff]  ;;  %v16684_v37 = vld [vmem:[#allocation234_spill] sm:$0xff]  ;;  %v16685_v51 = vld [vmem:[#allocation239_spill] sm:$0xff] }
 0x2ec   : > { %v8262_v16 = vpop.eup %8261  ;;  %8277 = vpow2.f32 %v4362_v30  ;;  %v4746_v31 = vmul.f32 1.442695, %v4667_v27  ;;  %v4153_v26 = vmax.f32 %v16682_v54, %v13593_v58  ;;  %v13617_v7 = vadd.f32 %v13613_v43, %v13260_v11 }
 0x2ed   : > { %v8264_v39 = vpop.eup %8263  ;;  %v5818_v8 = vadd.f32 %v5754_v14, %v5626_v21  ;;  %v5882_v28 = vadd.f32 %v8258_v25, %v5690_v41  ;;  %v5240_v4 = vmul.f32 %v8262_v16, %v16683_v13  ;;  %8279 = vpow2.f32 %v4554_v59 }
 0x2ee   : > { %v8266_v34 = vpop.eup %8265  ;;  %v5304_v10 = vadd.f32 %v8264_v39, %v8262_v16  ;;  %v5368_v63 = vmul.f32 %v8264_v39, %v16684_v37  ;;  %8281 = vpow2.f32 %v4746_v31  ;;  %v4938_v5 = vmul.f32 1.442695, %v4859_v38 }
 0x2ef   : > { %v8268_v50 = vpop.eup %8267  ;;  %v6010_v40 = vadd.f32 %v5946_v60, %v5818_v8  ;;  %8283 = vrcp.f32 %v5882_v28  ;;  %v5560_v30 = vmul.f32 %v8266_v34, %v16685_v51  ;;  %v5130_v19 = vmul.f32 1.442695, %v5051_v53  ;;  %v16687_v28 = vld [vmem:[#allocation246_spill] sm:$0xff] }
 0x2f0   : > { %v8270_v11 = vpop.eup %8269  ;;  %v6133_v27 = vmul.f32 %v8268_v50, %v6005_v55  ;;  %v5432_v14 = vadd.f32 %v5368_v63, %v5240_v4  ;;  %v5496_v25 = vadd.f32 %v8266_v34, %v5304_v10  ;;  %8285 = vpow2.f32 %v4938_v5  ;;  %v16686_v55 = vld [vmem:[#allocation17_spill] sm:$0xff]  ;;  %v16688_v4 = vld [vmem:[#allocation251_spill] sm:$0xff]  ;;  %v13633_v63 = vpop.f32.mrb[124].mxu0 }
 0x2f1   : > { %v8272_v21 = vpop.eup %8271  ;;  %v5752_v59 = vmul.f32 %v8270_v11, %v13509_v6  ;;  %8287 = vpow2.f32 %v5130_v19  ;;  %v4217_v41 = vmax.f32 %v4153_v26, %v13588_v23  ;;  %v13625_v38 = vmul.f32 0.5, %v13617_v7 }
 0x2f2   : > { %v8274_v60 = vpop.eup %8273  ;;  %v6948_v16 = vmul.f32 -1.442695, %v6133_v27  ;;  %v5624_v31 = vadd.f32 %v5560_v30, %v5432_v14  ;;  %v5688_v54 = vadd.f32 %v8270_v11, %v5496_v25  ;;  %v5944_v53 = vmul.f32 %v8272_v21, %v13491_v17  ;;  %v16689_v27 = vld [vmem:[#allocation261_spill] sm:$0xff]  ;;  %v13638_v25 = vpop.f32.mrb[124].mxu1 }
 0x2f3   : > { %v8276_v39 = vpop.eup %8275  ;;  %6580 = vst [vmem:[%s13384_s30 + $0x40] sm:$0xff] %v8274_v60  ;;  %v4281_v8 = vsub.f32 %v16686_v55, %v4217_v41  ;;  %v4473_v13 = vsub.f32 %v16687_v28, %v4217_v41  ;;  %v4665_v6 = vsub.f32 %v16688_v4, %v4217_v41  ;;  %v4857_v34 = vsub.f32 %v13593_v58, %v4217_v41  ;;  %v13640_v58 = vpop.f32.mrb[125].mxu0  ;;  %v16692_v28 = vld [vmem:[#allocation245_spill] sm:$0xff] }
 0x2f4   : > { %v6391_v26 = vadd.f32 1.0, %v8276_v39  ;;  %8289 = vpow2.f32 %v6948_v16  ;;  %v5816_v10 = vadd.f32 %v5752_v59, %v5624_v31  ;;  %v5880_v37 = vadd.f32 %v8272_v21, %v5688_v54  ;;  %v16690_v21 = vld [vmem:[#allocation136_spill] sm:$0xff] }
 0x2f5   : > { %v4358_v5 = vmul.f32 1.442695, %v4281_v8  ;;  %v4550_v50 = vmul.f32 1.442695, %v4473_v13  ;;  %v4742_v51 = vmul.f32 1.442695, %v4665_v6  ;;  %v5049_v17 = vsub.f32 %v13588_v23, %v4217_v41 }
 0x2f6   : > { %v8278_v30 = vpop.eup %8277  ;;  %8291 = vrcp.f32 %v6391_v26  ;;  %v6008_v19 = vadd.f32 %v5944_v53, %v5816_v10  ;;  %v4934_v11 = vmul.f32 1.442695, %v4857_v34  ;;  %v4158_v14 = vmax.f32 %v16689_v27, %v13625_v38  ;;  %v13647_v23 = vpop.f32.mrb[125].mxu1  ;;  %v16691_v53 = vld [vmem:[#allocation236_spill] sm:$0xff]  ;;  %v16694_v27 = vld [vmem:[#allocation255_spill] sm:$0xff] }
 0x2f7   : > { %v8280_v59 = vpop.eup %8279  ;;  %8293 = vrcp.f32 %v5880_v37  ;;  %v5243_v60 = vmul.f32 %v8278_v30, %v16690_v21  ;;  %v5126_v16 = vmul.f32 1.442695, %v5049_v17  ;;  %v13645_v31 = vadd.f32 %v13613_v43, %v13262_v15  ;;  %v16693_v17 = vld [vmem:[#allocation148_spill] sm:$0xff] }
 0x2f8   : > { %v8282_v41 = vpop.eup %8281  ;;  %v5307_v54 = vadd.f32 %v8280_v59, %v8278_v30  ;;  %v5371_v39 = vmul.f32 %v8280_v59, %v16691_v53  ;;  %8295 = vpow2.f32 %v4358_v5  ;;  %v4222_v55 = vmax.f32 %v4158_v14, %v13596_v56 }
 0x2f9   : > { %v8284_v8 = vpop.eup %8283  ;;  %v5563_v13 = vmul.f32 %v8282_v41, %v16692_v28  ;;  %8297 = vpow2.f32 %v4550_v50  ;;  %v13653_v4 = vmul.f32 0.5, %v13645_v31  ;;  %v13657_v15 = vadd.f32 %v13613_v43, %v13265_v45 }
 0x2fa   : > { %v8286_v6 = vpop.eup %8285  ;;  %v6138_v34 = vmul.f32 %v8284_v8, %v6010_v40  ;;  %v5435_v26 = vadd.f32 %v5371_v39, %v5243_v60  ;;  %v5499_v10 = vadd.f32 %v8282_v41, %v5307_v54  ;;  %8299 = vpow2.f32 %v4742_v51  ;;  %v16695_v40 = vld [vmem:[#allocation257_spill] sm:$0xff]  ;;  %v13664_v41 = vpop.f32.mrb[126].mxu0 }
 0x2fb   : > { %v8288_v37 = vpop.eup %8287  ;;  %v5755_v5 = vmul.f32 %v8286_v6, %v13551_v24  ;;  %8301 = vpow2.f32 %v4934_v11  ;;  %v4286_v30 = vsub.f32 %v16693_v17, %v4222_v55  ;;  %v4478_v50 = vsub.f32 %v16694_v27, %v4222_v55  ;;  %v13667_v39 = vpop.f32.mrb[126].mxu1 }
 0x2fc   : > { %v6953_v14 = vmul.f32 -1.442695, %v6138_v34  ;;  %v5627_v59 = vadd.f32 %v5563_v13, %v5435_v26  ;;  %v5691_v21 = vadd.f32 %v8286_v6, %v5499_v10  ;;  %v5947_v53 = vmul.f32 %v8288_v37, %v13513_v61  ;;  %16696 = vst [vmem:[#allocation86_spill] sm:$0xff] %v13667_v39 }
 0x2fd   : > { %8303 = vpow2.f32 %v5126_v16  ;;  %v4368_v45 = vmul.f32 1.442695, %v4286_v30  ;;  %v4560_v28 = vmul.f32 1.442695, %v4478_v50  ;;  %v4670_v60 = vsub.f32 %v16695_v40, %v4222_v55 }
 0x2fe   : > { %v8290_v51 = vpop.eup %8289  ;;  %8305 = vpow2.f32 %v6953_v14  ;;  %v5819_v24 = vadd.f32 %v5755_v5, %v5627_v59  ;;  %v5883_v11 = vadd.f32 %v8288_v37, %v5691_v21  ;;  %v4862_v54 = vsub.f32 %v13625_v38, %v4222_v55  ;;  %v16698_v14 = vld [vmem:[#allocation140_spill] sm:$0xff] }
 0x2ff   : > { %v6389_v8 = vadd.f32 1.0, %v8290_v51  ;;  %8307 = vpow2.f32 %v4368_v45  ;;  %v4752_v13 = vmul.f32 1.442695, %v4670_v60  ;;  %v5054_v61 = vsub.f32 %v13596_v56, %v4222_v55  ;;  %v16697_v55 = vld [vmem:[#allocation88_spill] sm:$0xff]  ;;  %v16699_v45 = vld [vmem:[#allocation243_spill] sm:$0xff] }
 0x300   : > { %v8292_v16 = vpop.eup %8291  ;;  %v6011_v6 = vadd.f32 %v5947_v53, %v5819_v24  ;;  %8309 = vrcp.f32 %v5883_v11  ;;  %v4944_v34 = vmul.f32 1.442695, %v4862_v54  ;;  %v3900_v26 = vmul.f32 0.5, %v13657_v15  ;;  %v16700_v60 = vld [vmem:[#allocation248_spill] sm:$0xff]  ;;  %v16701_v24 = vld [vmem:[#allocation21_spill] sm:$0xff]  ;;  %v13697_v54 = vpop.f32.mrb[127].mxu0 }
 0x301   : > { %v8294_v10 = vpop.eup %8293  ;;  %6583 = vst [vmem:[%s13384_s30 + $0x58] sm:$0xff] %v8292_v16  ;;  %8311 = vrcp.f32 %v6389_v8  ;;  %v5136_v5 = vmul.f32 1.442695, %v5054_v61  ;;  %v13674_v38 = vadd.f32 %v13613_v43, %v13278_v20  ;;  %v13678_v37 = vadd.f32 %v13613_v43, %v13289_v52  ;;  %16702 = vst [vmem:[#allocation104_spill] sm:$0xff] %v13697_v54  ;;  %v13700_v16 = vpop.f32.mrb[127].mxu1  ;;  %v16707_v54 = vld [vmem:[#allocation144_spill] sm:$0xff] }
 0x302   : > { %v8296_v17 = vpop.eup %8295  ;;  %v6136_v56 = vmul.f32 %v8294_v10, %v6008_v19  ;;  %8313 = vpow2.f32 %v4560_v28  ;;  %v4156_v30 = vmax.f32 %v16697_v55, %v3900_v26  ;;  %v13683_v27 = vadd.f32 %v13613_v43, %v13323_v0  ;;  %16703 = vst [vmem:[#allocation195_spill] sm:$0xff] %v13700_v16 }
 0x303   : > { %v8298_v50 = vpop.eup %8297  ;;  %v5241_v59 = vmul.f32 %v8296_v17, %v16698_v14  ;;  %8315 = vpow2.f32 %v4752_v13  ;;  %v13687_v20 = vmul.f32 0.5, %v13674_v38  ;;  %v13690_v21 = vmul.f32 0.5, %v13678_v37 }
 0x304   : > { %v8300_v52 = vpop.eup %8299  ;;  %v6951_v53 = vmul.f32 -1.442695, %v6136_v56  ;;  %v5305_v19 = vadd.f32 %v8298_v50, %v8296_v17  ;;  %v5369_v28 = vmul.f32 %v8298_v50, %v16699_v45  ;;  %8317 = vpow2.f32 %v4944_v34  ;;  %v16704_v34 = vld [vmem:[#allocation149_spill] sm:$0xff]  ;;  %v16705_v56 = vld [vmem:[#allocation256_spill] sm:$0xff] }
 0x305   : > { %v8302_v40 = vpop.eup %8301  ;;  %v5561_v0 = vmul.f32 %v8300_v52, %v16700_v60  ;;  %8319 = vpow2.f32 %v5136_v5  ;;  %v4220_v51 = vmax.f32 %v4156_v30, %v13653_v4  ;;  %v4159_v11 = vmax.f32 %v16701_v24, %v13690_v21  ;;  %v16706_v5 = vld [vmem:[#allocation264_spill] sm:$0xff] }
 0x306   : > { %8321 = vpow2.f32 %v6951_v53  ;;  %v5433_v8 = vadd.f32 %v5369_v28, %v5241_v59  ;;  %v5497_v13 = vadd.f32 %v8300_v52, %v5305_v19  ;;  %v5753_v61 = vmul.f32 %v8302_v40, %v13561_v12 }
 0x307   : > { %v8304_v10 = vpop.eup %8303  ;;  %v4284_v17 = vsub.f32 %v16704_v34, %v4220_v51  ;;  %v4476_v55 = vsub.f32 %v16705_v56, %v4220_v51  ;;  %v4668_v50 = vsub.f32 %v16706_v5, %v4220_v51  ;;  %v4860_v30 = vsub.f32 %v3900_v26, %v4220_v51 }
 0x308   : > { %v8306_v14 = vpop.eup %8305  ;;  %v5625_v45 = vadd.f32 %v5561_v0, %v5433_v8  ;;  %v5689_v60 = vadd.f32 %v8302_v40, %v5497_v13  ;;  %v5945_v24 = vmul.f32 %v8304_v10, %v13557_v29  ;;  %v5052_v59 = vsub.f32 %v13653_v4, %v4220_v51  ;;  %v16708_v51 = vld [vmem:[#allocation150_spill] sm:$0xff] }
 0x309   : > { %v8308_v52 = vpop.eup %8307  ;;  %v6394_v12 = vadd.f32 1.0, %v8306_v14  ;;  %v4364_v53 = vmul.f32 1.442695, %v4284_v17  ;;  %v4556_v19 = vmul.f32 1.442695, %v4476_v55  ;;  %v4223_v28 = vmax.f32 %v4159_v11, %v13687_v20  ;;  %v16709_v17 = vld [vmem:[#allocation259_spill] sm:$0xff] }
 0x30a   : > { %v8310_v34 = vpop.eup %8309  ;;  %v5817_v16 = vadd.f32 %v5753_v61, %v5625_v45  ;;  %v5881_v56 = vadd.f32 %v8304_v10, %v5689_v60  ;;  %v5246_v5 = vmul.f32 %v8308_v52, %v16707_v54  ;;  %v4748_v26 = vmul.f32 1.442695, %v4668_v50  ;;  %v16710_v10 = vld [vmem:[#allocation252_spill] sm:$0xff]  ;;  %v16711_v50 = vld [vmem:[#allocation254_spill] sm:$0xff] }
 0x30b   : > { %v8312_v39 = vpop.eup %8311  ;;  %8323 = vrcp.f32 %v6394_v12  ;;  %v6139_v40 = vmul.f32 %v8310_v34, %v6011_v6  ;;  %v4940_v0 = vmul.f32 1.442695, %v4860_v30  ;;  %v5132_v29 = vmul.f32 1.442695, %v5052_v59 }
 0x30c   : > { %v8314_v8 = vpop.eup %8313  ;;  %6581 = vst [vmem:[%s13384_s30 + $0x48] sm:$0xff] %v8312_v39  ;;  %v6009_v4 = vadd.f32 %v5945_v24, %v5817_v16  ;;  %8325 = vrcp.f32 %v5881_v56  ;;  %v4287_v13 = vsub.f32 %v16708_v51, %v4223_v28  ;;  %v4479_v55 = vsub.f32 %v16709_v17, %v4223_v28 }
 0x30d   : > { %v8316_v11 = vpop.eup %8315  ;;  %v6954_v14 = vmul.f32 -1.442695, %v6139_v40  ;;  %v5310_v61 = vadd.f32 %v8314_v8, %v8308_v52  ;;  %v5374_v45 = vmul.f32 %v8314_v8, %v16710_v10  ;;  %8327 = vpow2.f32 %v4364_v53  ;;  %v16712_v52 = vld [vmem:[#allocation266_spill] sm:$0xff] }
 0x30e   : > { %v8318_v54 = vpop.eup %8317  ;;  %v5566_v60 = vmul.f32 %v8316_v11, %v16711_v50  ;;  %8329 = vpow2.f32 %v4556_v19  ;;  %v4370_v6 = vmul.f32 1.442695, %v4287_v13  ;;  %v4562_v30 = vmul.f32 1.442695, %v4479_v55 }
 0x30f   : > { %v8320_v59 = vpop.eup %8319  ;;  %8331 = vpow2.f32 %v6954_v14  ;;  %v5438_v39 = vadd.f32 %v5374_v45, %v5246_v5  ;;  %v5502_v16 = vadd.f32 %v8316_v11, %v5310_v61  ;;  %v5758_v24 = vmul.f32 %v8318_v54, %v13617_v7 }
 0x310   : > { %v8322_v12 = vpop.eup %8321  ;;  %v5950_v34 = vmul.f32 %v8320_v59, %v13571_v57  ;;  %8333 = vpow2.f32 %v4748_v26  ;;  %v4671_v56 = vsub.f32 %v16712_v52, %v4223_v28  ;;  %v4863_v53 = vsub.f32 %v13690_v21, %v4223_v28 }
 0x311   : > { %v6392_v40 = vadd.f32 1.0, %v8322_v12  ;;  %v5630_v8 = vadd.f32 %v5566_v60, %v5438_v39  ;;  %v5694_v51 = vadd.f32 %v8318_v54, %v5502_v16  ;;  %8335 = vpow2.f32 %v4940_v0  ;;  %v16713_v54 = vld [vmem:[#allocation145_spill] sm:$0xff]  ;;  %v16714_v60 = vld [vmem:[#allocation270_spill] sm:$0xff] }
 0x312   : > { %8337 = vpow2.f32 %v5132_v29  ;;  %v4754_v19 = vmul.f32 1.442695, %v4671_v56  ;;  %v4946_v13 = vmul.f32 1.442695, %v4863_v53  ;;  %v5055_v5 = vsub.f32 %v13687_v20, %v4223_v28  ;;  %v16716_v56 = vld [vmem:[#allocation281_spill] sm:$0xff] }
 0x313   : > { %8339 = vrcp.f32 %v6392_v40  ;;  %v5822_v7 = vadd.f32 %v5758_v24, %v5630_v8  ;;  %v5886_v17 = vadd.f32 %v8320_v59, %v5694_v51  ;;  %v13720_v57 = vmul.f32 0.5, %v13683_v27  ;;  %v13759_v24 = vpop.f32.mrb[128].mxu0  ;;  %v16717_v40 = vld [vmem:[#allocation282_spill] sm:$0xff]  ;;  %v13766_v51 = vpop.f32.mrb[128].mxu1 }
 0x314   : > { %8341 = vpow2.f32 %v4370_v6  ;;  %v5138_v26 = vmul.f32 1.442695, %v5055_v5  ;;  %v13724_v21 = vadd.f32 %v13613_v43, %v13339_v9  ;;  %v13728_v0 = vadd.f32 %v13613_v43, %v13399_v49 }
 0x315   : > { %v8324_v29 = vpop.eup %8323  ;;  %v6014_v55 = vadd.f32 %v5950_v34, %v5822_v7  ;;  %8343 = vrcp.f32 %v5886_v17  ;;  %v13732_v20 = vadd.f32 %v13613_v43, %v13402_v48  ;;  %v13736_v28 = vadd.f32 %v13613_v43, %v13404_v2  ;;  %v16718_v7 = vld [vmem:[#allocation260_spill] sm:$0xff] }
 0x316   : > { %v8326_v11 = vpop.eup %8325  ;;  %6586 = vst [vmem:[%s13384_s30 + $0x70] sm:$0xff] %v8324_v29  ;;  %8345 = vpow2.f32 %v4562_v30  ;;  %v3901_v9 = vmul.f32 0.5, %v13724_v21  ;;  %v13741_v14 = vmul.f32 0.5, %v13728_v0  ;;  %v13745_v49 = vadd.f32 %v13613_v43, %v13409_v46 }
 0x317   : > { %v8328_v61 = vpop.eup %8327  ;;  %v6137_v10 = vmul.f32 %v8326_v11, %v6009_v4  ;;  %8347 = vpow2.f32 %v4754_v19  ;;  %v13748_v48 = vmul.f32 0.5, %v13732_v20  ;;  %v13751_v2 = vmul.f32 0.5, %v13736_v28  ;;  %v16715_v4 = vld [vmem:[#allocation253_spill] sm:$0xff]  ;;  %v16719_v11 = vld [vmem:[#allocation151_spill] sm:$0xff] }
 0x318   : > { %v8330_v45 = vpop.eup %8329  ;;  %v5244_v50 = vmul.f32 %v8328_v61, %v16713_v54  ;;  %8349 = vpow2.f32 %v4946_v13  ;;  %v4157_v6 = vmax.f32 %v16714_v60, %v3901_v9  ;;  %v13756_v30 = vmul.f32 0.5, %v13745_v49 }
 0x319   : > { %v8332_v46 = vpop.eup %8331  ;;  %v6952_v59 = vmul.f32 -1.442695, %v6137_v10  ;;  %v5308_v39 = vadd.f32 %v8330_v45, %v8328_v61  ;;  %v5372_v16 = vmul.f32 %v8330_v45, %v16715_v4  ;;  %8351 = vpow2.f32 %v5138_v26  ;;  %v16720_v10 = vld [vmem:[#allocation265_spill] sm:$0xff]  ;;  %v16721_v4 = vld [vmem:[#allocation20_spill] sm:$0xff] }
 0x31a   : > { %v8334_v12 = vpop.eup %8333  ;;  %v6395_v34 = vadd.f32 1.0, %v8332_v46  ;;  %v4221_v52 = vmax.f32 %v4157_v6, %v13720_v57  ;;  %v4162_v53 = vmax.f32 %v16716_v56, %v13748_v48 }
 0x31b   : > { %v8336_v19 = vpop.eup %8335  ;;  %8353 = vpow2.f32 %v6952_v59  ;;  %v5436_v13 = vadd.f32 %v5372_v16, %v5244_v50  ;;  %v5500_v5 = vadd.f32 %v8334_v12, %v5308_v39  ;;  %v5564_v17 = vmul.f32 %v8334_v12, %v16718_v7 }
 0x31c   : > { %v8338_v26 = vpop.eup %8337  ;;  %8355 = vrcp.f32 %v6395_v34  ;;  %v5756_v29 = vmul.f32 %v8336_v19, %v13657_v15  ;;  %v4285_v61 = vsub.f32 %v16719_v11, %v4221_v52  ;;  %v4477_v45 = vsub.f32 %v16720_v10, %v4221_v52  ;;  %v13776_v34 = vpop.f32.mrb[129].mxu0  ;;  %v16723_v10 = vld [vmem:[#allocation147_spill] sm:$0xff] }
 0x31d   : > { %v8340_v54 = vpop.eup %8339  ;;  %v5628_v60 = vadd.f32 %v5564_v17, %v5436_v13  ;;  %v5692_v6 = vadd.f32 %v8336_v19, %v5500_v5  ;;  %v5948_v46 = vmul.f32 %v8338_v26, %v13645_v31  ;;  %v4669_v56 = vsub.f32 %v16721_v4, %v4221_v52  ;;  %16722 = vst [vmem:[#allocation196_spill] sm:$0xff] %v13776_v34  ;;  %v13779_v19 = vpop.f32.mrb[129].mxu1 }
 0x31e   : > { %v8342_v59 = vpop.eup %8341  ;;  %6584 = vst [vmem:[%s13384_s30 + $0x60] sm:$0xff] %v8340_v54  ;;  %v4366_v50 = vmul.f32 1.442695, %v4285_v61  ;;  %v4558_v39 = vmul.f32 1.442695, %v4477_v45  ;;  %v4861_v16 = vsub.f32 %v3901_v9, %v4221_v52  ;;  %v5053_v12 = vsub.f32 %v13720_v57, %v4221_v52  ;;  %v16724_v57 = vld [vmem:[#allocation258_spill] sm:$0xff] }
 0x31f   : > { %v8344_v15 = vpop.eup %8343  ;;  %v5820_v7 = vadd.f32 %v5756_v29, %v5628_v60  ;;  %v5884_v11 = vadd.f32 %v8338_v26, %v5692_v6  ;;  %v5247_v8 = vmul.f32 %v8342_v59, %v16723_v10  ;;  %v4750_v13 = vmul.f32 1.442695, %v4669_v56  ;;  %v16725_v29 = vld [vmem:[#allocation263_spill] sm:$0xff] }
 0x320   : > { %v8346_v31 = vpop.eup %8345  ;;  %v6142_v5 = vmul.f32 %v8344_v15, %v6014_v55  ;;  %8357 = vpow2.f32 %v4366_v50  ;;  %v4942_v17 = vmul.f32 1.442695, %v4861_v16  ;;  %v5134_v54 = vmul.f32 1.442695, %v5053_v12  ;;  %v13785_v50 = vpop.f32.mrb[130].mxu0  ;;  %v16727_v12 = vld [vmem:[#allocation271_spill] sm:$0xff] }
 0x321   : > { %v8348_v61 = vpop.eup %8347  ;;  %v6012_v45 = vadd.f32 %v5948_v46, %v5820_v7  ;;  %8359 = vrcp.f32 %v5884_v11  ;;  %v5311_v9 = vadd.f32 %v8346_v31, %v8342_v59  ;;  %v5375_v52 = vmul.f32 %v8346_v31, %v16724_v57  ;;  %v16726_v59 = vld [vmem:[#allocation158_spill] sm:$0xff]  ;;  %v13790_v7 = vpop.f32.mrb[130].mxu1 }
 0x322   : > { %v8350_v4 = vpop.eup %8349  ;;  %v6957_v34 = vmul.f32 -1.442695, %v6142_v5  ;;  %v5567_v26 = vmul.f32 %v8348_v61, %v16725_v29  ;;  %8361 = vpow2.f32 %v4558_v39  ;;  %v4226_v60 = vmax.f32 %v4162_v53, %v13741_v14 }
 0x323   : > { %v8352_v6 = vpop.eup %8351  ;;  %v5439_v56 = vadd.f32 %v5375_v52, %v5247_v8  ;;  %v5503_v10 = vadd.f32 %v8348_v61, %v5311_v9  ;;  %v5759_v55 = vmul.f32 %v8350_v4, %v13678_v37  ;;  %8363 = vpow2.f32 %v4750_v13  ;;  %v16728_v8 = vld [vmem:[#allocation273_spill] sm:$0xff] }
 0x324   : > { %8365 = vpow2.f32 %v6957_v34  ;;  %v5951_v46 = vmul.f32 %v8352_v6, %v13674_v38  ;;  %v4290_v16 = vsub.f32 %v16726_v59, %v4226_v60  ;;  %v4482_v15 = vsub.f32 %v16727_v12, %v4226_v60  ;;  %v16732_v59 = vld [vmem:[#allocation18_spill] sm:$0xff] }
 0x325   : > { %v8354_v39 = vpop.eup %8353  ;;  %v5631_v53 = vadd.f32 %v5567_v26, %v5439_v56  ;;  %v5695_v11 = vadd.f32 %v8350_v4, %v5503_v10  ;;  %8367 = vpow2.f32 %v4942_v17  ;;  %v4674_v31 = vsub.f32 %v16728_v8, %v4226_v60  ;;  %v16731_v10 = vld [vmem:[#allocation272_spill] sm:$0xff] }
 0x326   : > { %v8356_v37 = vpop.eup %8355  ;;  %v6393_v13 = vadd.f32 1.0, %v8354_v39  ;;  %8369 = vpow2.f32 %v5134_v54  ;;  %v4376_v5 = vmul.f32 1.442695, %v4290_v16  ;;  %v4568_v61 = vmul.f32 1.442695, %v4482_v15 }
 0x327   : > { %6587 = vst [vmem:[%s13384_s30 + $0x78] sm:$0xff] %v8356_v37  ;;  %v5823_v34 = vadd.f32 %v5759_v55, %v5631_v53  ;;  %v5887_v38 = vadd.f32 %v8352_v6, %v5695_v11  ;;  %v4760_v9 = vmul.f32 1.442695, %v4674_v31  ;;  %v4866_v57 = vsub.f32 %v13748_v48, %v4226_v60  ;;  %v16734_v31 = vld [vmem:[#allocation262_spill] sm:$0xff] }
 0x328   : > { %8371 = vrcp.f32 %v6393_v13  ;;  %v5058_v52 = vsub.f32 %v13741_v14, %v4226_v60  ;;  %v16729_v17 = vmax.f32 %v16717_v40, %v13756_v30  ;;  %v13802_v29 = vadd.f32 %v13613_v43, %v13414_v42  ;;  %v16730_v14 = vld [vmem:[#allocation162_spill] sm:$0xff]  ;;  %v16733_v42 = vld [vmem:[#allocation275_spill] sm:$0xff] }
 0x329   : > { %v6015_v54 = vadd.f32 %v5951_v46, %v5823_v34  ;;  %8373 = vrcp.f32 %v5887_v38  ;;  %v4952_v26 = vmul.f32 1.442695, %v4866_v57  ;;  %v13806_v6 = vadd.f32 %v13613_v43, %v13422_v44  ;;  %v16735_v38 = vld [vmem:[#allocation87_spill] sm:$0xff] }
 0x32a   : > { %v4224_v4 = vmax.f32 %v16729_v17, %v13751_v2  ;;  %v8358_v48 = vpop.eup %8357  ;;  %8375 = vpow2.f32 %v4376_v5  ;;  %v5144_v56 = vmul.f32 1.442695, %v5058_v52 }
 0x32b   : > { %v8360_v40 = vpop.eup %8359  ;;  %v5245_v16 = vmul.f32 %v8358_v48, %v16732_v59  ;;  %8377 = vpow2.f32 %v4568_v61 }
 0x32c   : > { %v4288_v60 = vsub.f32 %v16730_v14, %v4224_v4  ;;  %v4480_v55 = vsub.f32 %v16731_v10, %v4224_v4  ;;  %v4672_v12 = vsub.f32 %v16733_v42, %v4224_v4  ;;  %v4864_v46 = vsub.f32 %v13756_v30, %v4224_v4  ;;  %v8362_v15 = vpop.eup %8361 }
 0x32d   : > { %v6140_v39 = vmul.f32 %v8360_v40, %v6012_v45  ;;  %8379 = vpow2.f32 %v4760_v9  ;;  %v8364_v11 = vpop.eup %8363  ;;  %v5309_v8 = vadd.f32 %v8362_v15, %v8358_v48  ;;  %v5373_v37 = vmul.f32 %v8362_v15, %v16734_v31  ;;  %v13823_v40 = vpop.f32.mrb[131].mxu1 }
 0x32e   : > { %v4372_v44 = vmul.f32 1.442695, %v4288_v60  ;;  %v4564_v53 = vmul.f32 1.442695, %v4480_v55  ;;  %8381 = vpow2.f32 %v4952_v26  ;;  %v4756_v13 = vmul.f32 1.442695, %v4672_v12  ;;  %v8366_v5 = vpop.eup %8365 }
 0x32f   : > { %v6955_v34 = vmul.f32 -1.442695, %v6140_v39  ;;  %v5565_v57 = vmul.f32 %v8364_v11, %v16735_v38  ;;  %8383 = vpow2.f32 %v5144_v56  ;;  %v4948_v61 = vmul.f32 1.442695, %v4864_v46  ;;  %v8368_v52 = vpop.eup %8367  ;;  %v13820_v60 = vpop.f32.mrb[131].mxu0  ;;  %v16736_v39 = vld [vmem:[#allocation283_spill] sm:$0xff] }
 0x330   : > { %v6398_v17 = vadd.f32 1.0, %v8366_v5  ;;  %v5437_v30 = vadd.f32 %v5373_v37, %v5245_v16  ;;  %v5501_v14 = vadd.f32 %v8364_v11, %v5309_v8  ;;  %8385 = vpow2.f32 %v4372_v44  ;;  %v8370_v45 = vpop.eup %8369  ;;  %v16737_v8 = vld [vmem:[#allocation154_spill] sm:$0xff] }
 0x331   : > { %8387 = vpow2.f32 %v6955_v34  ;;  %v5757_v9 = vmul.f32 %v8368_v52, %v13724_v21  ;;  %v5056_v48 = vsub.f32 %v13751_v2, %v4224_v4  ;;  %v13818_v26 = vmul.f32 0.5, %v13802_v29  ;;  %v16738_v34 = vld [vmem:[#allocation19_spill] sm:$0xff] }
 0x332   : > { %8389 = vrcp.f32 %v6398_v17  ;;  %v5629_v56 = vadd.f32 %v5565_v57, %v5437_v30  ;;  %v5693_v10 = vadd.f32 %v8368_v52, %v5501_v14  ;;  %v5949_v55 = vmul.f32 %v8370_v45, %v13683_v27  ;;  %v8372_v59 = vpop.eup %8371  ;;  %v16739_v57 = vld [vmem:[#allocation267_spill] sm:$0xff]  ;;  %v16740_v17 = vld [vmem:[#allocation286_spill] sm:$0xff] }
 0x333   : > { %8391 = vpow2.f32 %v4564_v53  ;;  %v5140_v16 = vmul.f32 1.442695, %v5056_v48  ;;  %v3907_v42 = vmul.f32 0.5, %v13806_v6  ;;  %v13828_v21 = vadd.f32 %v13613_v43, %v13441_v32  ;;  %v8374_v2 = vpop.eup %8373  ;;  %6585 = vst [vmem:[%s13384_s30 + $0x68] sm:$0xff] %v8372_v59  ;;  %v16741_v59 = vld [vmem:[#allocation166_spill] sm:$0xff] }
 0x334   : > { %v5821_v4 = vadd.f32 %v5757_v9, %v5629_v56  ;;  %v5885_v12 = vadd.f32 %v8370_v45, %v5693_v10  ;;  %8393 = vpow2.f32 %v4756_v13  ;;  %v13833_v46 = vadd.f32 %v13613_v43, %v13445_v1  ;;  %v8376_v27 = vpop.eup %8375 }
 0x335   : > { %v6143_v15 = vmul.f32 %v8374_v2, %v6015_v54  ;;  %8395 = vpow2.f32 %v4948_v61  ;;  %v4163_v44 = vmax.f32 %v16736_v39, %v3907_v42  ;;  %v13837_v53 = vmul.f32 0.5, %v13828_v21  ;;  %v8378_v11 = vpop.eup %8377  ;;  %v16742_v2 = vld [vmem:[#allocation274_spill] sm:$0xff] }
 0x336   : > { %v6013_v32 = vadd.f32 %v5949_v55, %v5821_v4  ;;  %8397 = vrcp.f32 %v5885_v12  ;;  %v5250_v31 = vmul.f32 %v8376_v27, %v16737_v8  ;;  %v13841_v37 = vmul.f32 0.5, %v13833_v46  ;;  %v16743_v12 = vld [vmem:[#allocation279_spill] sm:$0xff] }
 0x337   : > { %v8380_v13 = vpop.eup %8379  ;;  %v6958_v5 = vmul.f32 -1.442695, %v6143_v15  ;;  %v5314_v1 = vadd.f32 %v8378_v11, %v8376_v27  ;;  %v5378_v38 = vmul.f32 %v8378_v11, %v16738_v34  ;;  %8399 = vpow2.f32 %v5140_v16 }
 0x338   : > { %v8382_v54 = vpop.eup %8381  ;;  %v5570_v61 = vmul.f32 %v8380_v13, %v16739_v57  ;;  %v4227_v52 = vmax.f32 %v4163_v44, %v13818_v26  ;;  %v4161_v30 = vmax.f32 %v16740_v17, %v13841_v37  ;;  %v13850_v14 = vadd.f32 %v13613_v43, %v13494_v22  ;;  %v16744_v44 = vld [vmem:[#allocation156_spill] sm:$0xff] }
 0x339   : > { %v8384_v45 = vpop.eup %8383  ;;  %8401 = vpow2.f32 %v6958_v5  ;;  %v5442_v9 = vadd.f32 %v5378_v38, %v5250_v31  ;;  %v5506_v48 = vadd.f32 %v8380_v13, %v5314_v1  ;;  %v5762_v56 = vmul.f32 %v8382_v54, %v13732_v20 }
 0x33a   : > { %v8386_v10 = vpop.eup %8385  ;;  %v5954_v55 = vmul.f32 %v8384_v45, %v13728_v0  ;;  %v4291_v16 = vsub.f32 %v16741_v59, %v4227_v52  ;;  %v4483_v4 = vsub.f32 %v16742_v2, %v4227_v52  ;;  %v4675_v27 = vsub.f32 %v16743_v12, %v4227_v52  ;;  %v16746_v12 = vld [vmem:[#allocation269_spill] sm:$0xff] }
 0x33b   : > { %v8388_v15 = vpop.eup %8387  ;;  %v5634_v39 = vadd.f32 %v5570_v61, %v5442_v9  ;;  %v5698_v22 = vadd.f32 %v8382_v54, %v5506_v48  ;;  %v5248_v11 = vmul.f32 %v8386_v10, %v16744_v44  ;;  %v4867_v8 = vsub.f32 %v3907_v42, %v4227_v52  ;;  %v16745_v61 = vld [vmem:[#allocation16_spill] sm:$0xff] }
 0x33c   : > { %v8390_v31 = vpop.eup %8389  ;;  %v6396_v13 = vadd.f32 1.0, %v8388_v15  ;;  %v4378_v5 = vmul.f32 1.442695, %v4291_v16  ;;  %v4570_v20 = vmul.f32 1.442695, %v4483_v4  ;;  %v5059_v1 = vsub.f32 %v13818_v26, %v4227_v52 }
 0x33d   : > { %v8392_v34 = vpop.eup %8391  ;;  %6590 = vst [vmem:[%s13384_s30 + $0x90] sm:$0xff] %v8390_v31  ;;  %v5826_v0 = vadd.f32 %v5762_v56, %v5634_v39  ;;  %v5890_v38 = vadd.f32 %v8384_v45, %v5698_v22  ;;  %v4762_v57 = vmul.f32 1.442695, %v4675_v27  ;;  %v4954_v17 = vmul.f32 1.442695, %v4867_v8  ;;  %v16748_v22 = vld [vmem:[#allocation278_spill] sm:$0xff] }
 0x33e   : > { %v8394_v59 = vpop.eup %8393  ;;  %8403 = vrcp.f32 %v6396_v13  ;;  %v5312_v2 = vadd.f32 %v8392_v34, %v8386_v10  ;;  %v5376_v54 = vmul.f32 %v8392_v34, %v16745_v61  ;;  %v5146_v9 = vmul.f32 1.442695, %v5059_v1  ;;  %v16747_v10 = vld [vmem:[#allocation167_spill] sm:$0xff] }
 0x33f   : > { %v8396_v48 = vpop.eup %8395  ;;  %v6018_v42 = vadd.f32 %v5954_v55, %v5826_v0  ;;  %8405 = vrcp.f32 %v5890_v38  ;;  %v5568_v16 = vmul.f32 %v8394_v59, %v16746_v12  ;;  %v4225_v4 = vmax.f32 %v4161_v30, %v13837_v53 }
 0x340   : > { %v8398_v26 = vpop.eup %8397  ;;  %v5440_v52 = vadd.f32 %v5376_v54, %v5248_v11  ;;  %v5504_v15 = vadd.f32 %v8394_v59, %v5312_v2  ;;  %v5760_v45 = vmul.f32 %v8396_v48, %v13745_v49  ;;  %8407 = vpow2.f32 %v4378_v5 }
 0x341   : > { %v8400_v56 = vpop.eup %8399  ;;  %v6141_v27 = vmul.f32 %v8398_v26, %v6013_v32  ;;  %8409 = vpow2.f32 %v4570_v20  ;;  %v4289_v39 = vsub.f32 %v16747_v10, %v4225_v4  ;;  %v4481_v44 = vsub.f32 %v16748_v22, %v4225_v4  ;;  %v13867_v32 = vpop.f32.mrb[132].mxu0  ;;  %v16749_v20 = vld [vmem:[#allocation284_spill] sm:$0xff] }
 0x342   : > { %v5632_v8 = vadd.f32 %v5568_v16, %v5440_v52  ;;  %v5696_v55 = vadd.f32 %v8396_v48, %v5504_v15  ;;  %v5952_v31 = vmul.f32 %v8400_v56, %v13736_v28  ;;  %8411 = vpow2.f32 %v4762_v57  ;;  %v13872_v28 = vpop.f32.mrb[132].mxu1  ;;  %v13874_v57 = vpop.f32.mrb[133].mxu0 }
 0x343   : > { %v8402_v13 = vpop.eup %8401  ;;  %v6956_v30 = vmul.f32 -1.442695, %v6141_v27  ;;  %8413 = vpow2.f32 %v4954_v17  ;;  %v4374_v11 = vmul.f32 1.442695, %v4289_v39  ;;  %v4566_v1 = vmul.f32 1.442695, %v4481_v44 }
 0x344   : > { %v6399_v34 = vadd.f32 1.0, %v8402_v13  ;;  %v5824_v49 = vadd.f32 %v5760_v45, %v5632_v8  ;;  %v5888_v5 = vadd.f32 %v8400_v56, %v5696_v55  ;;  %8415 = vpow2.f32 %v5146_v9  ;;  %v13885_v54 = vpop.f32.mrb[133].mxu1  ;;  %v16751_v39 = vld [vmem:[#allocation159_spill] sm:$0xff]  ;;  %v13921_v55 = vpop.f32.mrb[134].mxu0  ;;  %v16753_v13 = vld [vmem:[#allocation277_spill] sm:$0xff] }
 0x345   : > { %8417 = vpow2.f32 %v6956_v30  ;;  %v4673_v0 = vsub.f32 %v16749_v20, %v4225_v4  ;;  %v4865_v38 = vsub.f32 %v13841_v37, %v4225_v4  ;;  %v5057_v59 = vsub.f32 %v13837_v53, %v4225_v4 }
 0x346   : > { %8419 = vrcp.f32 %v6399_v34  ;;  %v13876_v17 = vadd.f32 %v5952_v31, %v5824_v49  ;;  %v13879_v2 = vmul.f32 0.5, %v13850_v14  ;;  %v13883_v61 = vadd.f32 %v13613_v43, %v13503_v36 }
 0x347   : > { %8421 = vrcp.f32 %v5888_v5  ;;  %v4758_v37 = vmul.f32 1.442695, %v4673_v0  ;;  %v4950_v53 = vmul.f32 1.442695, %v4865_v38  ;;  %v5142_v9 = vmul.f32 1.442695, %v5057_v59 }
 0x348   : > { %v8404_v48 = vpop.eup %8403  ;;  %8423 = vpow2.f32 %v4374_v11  ;;  %v3910_v12 = vmul.f32 0.5, %v13883_v61  ;;  %v13890_v16 = vadd.f32 %v13613_v43, %v13505_v47  ;;  %v13894_v4 = vadd.f32 %v13613_v43, %v13515_v33  ;;  %v16750_v33 = vld [vmem:[#allocation295_spill] sm:$0xff]  ;;  %v13930_v5 = vpop.f32.mrb[134].mxu1 }
 0x349   : > { %v8406_v36 = vpop.eup %8405  ;;  %6588 = vst [vmem:[%s13384_s30 + $0x80] sm:$0xff] %v8404_v48  ;;  %8425 = vpow2.f32 %v4566_v1  ;;  %v13899_v26 = vadd.f32 %v13613_v43, %v13535_v35  ;;  %v13903_v52 = vadd.f32 %v13613_v43, %v13540_v18  ;;  %v13907_v15 = vadd.f32 %v13613_v43, %v13563_v3  ;;  %v16754_v1 = vld [vmem:[#allocation299_spill] sm:$0xff]  ;;  %16755 = vst [vmem:[#allocation11_spill] sm:$0xff] %v13930_v5 }
 0x34a   : > { %v8408_v47 = vpop.eup %8407  ;;  %v6146_v45 = vmul.f32 %v8406_v36, %v6018_v42  ;;  %8427 = vpow2.f32 %v4758_v37  ;;  %v4166_v56 = vmax.f32 %v16750_v33, %v3910_v12  ;;  %v13911_v27 = vmul.f32 0.5, %v13890_v16  ;;  %v16752_v42 = vld [vmem:[#allocation268_spill] sm:$0xff]  ;;  %v16757_v36 = vld [vmem:[#allocation289_spill] sm:$0xff] }
 0x34b   : > { %v8410_v10 = vpop.eup %8409  ;;  %v5251_v35 = vmul.f32 %v8408_v47, %v16751_v39  ;;  %8429 = vpow2.f32 %v4950_v53  ;;  %v13915_v22 = vmul.f32 0.5, %v13894_v4  ;;  %v13918_v18 = vmul.f32 0.5, %v13899_v26 }
 0x34c   : > { %v8412_v3 = vpop.eup %8411  ;;  %v6961_v43 = vmul.f32 -1.442695, %v6146_v45  ;;  %v5315_v44 = vadd.f32 %v8410_v10, %v8408_v47  ;;  %v5379_v8 = vmul.f32 %v8410_v10, %v16752_v42  ;;  %8431 = vpow2.f32 %v5142_v9  ;;  %v16756_v9 = vld [vmem:[#allocation170_spill] sm:$0xff]  ;;  %v16758_v45 = vld [vmem:[#allocation291_spill] sm:$0xff] }
 0x34d   : > { %v8414_v31 = vpop.eup %8413  ;;  %v5571_v30 = vmul.f32 %v8412_v3, %v16753_v13  ;;  %v4230_v11 = vmax.f32 %v4166_v56, %v13879_v2  ;;  %v4164_v34 = vmax.f32 %v16754_v1, %v13915_v22  ;;  %v13928_v49 = vmul.f32 0.5, %v13903_v52 }
 0x34e   : > { %v8416_v20 = vpop.eup %8415  ;;  %8433 = vpow2.f32 %v6961_v43  ;;  %v5443_v0 = vadd.f32 %v5379_v8, %v5251_v35  ;;  %v5507_v38 = vadd.f32 %v8412_v3, %v5315_v44  ;;  %v5763_v59 = vmul.f32 %v8414_v31, %v13806_v6 }
 0x34f   : > { %v8418_v37 = vpop.eup %8417  ;;  %v5955_v53 = vmul.f32 %v8416_v20, %v13802_v29  ;;  %v4294_v48 = vsub.f32 %v16756_v9, %v4230_v11  ;;  %v4486_v47 = vsub.f32 %v16757_v36, %v4230_v11  ;;  %v4678_v33 = vsub.f32 %v16758_v45, %v4230_v11  ;;  %v16759_v45 = vld [vmem:[#allocation160_spill] sm:$0xff] }
 0x350   : > { %v8420_v56 = vpop.eup %8419  ;;  %v6397_v10 = vadd.f32 1.0, %v8418_v37  ;;  %v5635_v39 = vadd.f32 %v5571_v30, %v5443_v0  ;;  %v5699_v42 = vadd.f32 %v8414_v31, %v5507_v38  ;;  %v4870_v13 = vsub.f32 %v3910_v12, %v4230_v11 }
 0x351   : > { %v8422_v1 = vpop.eup %8421  ;;  %6591 = vst [vmem:[%s13384_s30 + $0x98] sm:$0xff] %v8420_v56  ;;  %v4384_v35 = vmul.f32 1.442695, %v4294_v48  ;;  %v4576_v3 = vmul.f32 1.442695, %v4486_v47  ;;  %v5062_v6 = vsub.f32 %v13879_v2, %v4230_v11  ;;  %v16760_v47 = vld [vmem:[#allocation276_spill] sm:$0xff] }
 0x352   : > { %v4768_v43 = vmul.f32 1.442695, %v4678_v33  ;;  %v8424_v44 = vpop.eup %8423  ;;  %8435 = vrcp.f32 %v6397_v10  ;;  %v6144_v29 = vmul.f32 %v8422_v1, %v13876_v17  ;;  %v5827_v8 = vadd.f32 %v5763_v59, %v5635_v39  ;;  %v16761_v11 = vld [vmem:[#allocation280_spill] sm:$0xff]  ;;  %v16763_v1 = vld [vmem:[#allocation174_spill] sm:$0xff] }
 0x353   : > { %v5891_v9 = vadd.f32 %v8416_v20, %v5699_v42  ;;  %v8426_v36 = vpop.eup %8425  ;;  %v5249_v5 = vmul.f32 %v8424_v44, %v16759_v45  ;;  %8437 = vpow2.f32 %v4384_v35  ;;  %v4960_v30 = vmul.f32 1.442695, %v4870_v13  ;;  %v13944_v20 = vpop.f32.mrb[135].mxu0  ;;  %v16762_v39 = vld [vmem:[#allocation28_spill] sm:$0xff] }
 0x354   : > { %v5152_v31 = vmul.f32 1.442695, %v5062_v6  ;;  %v8428_v12 = vpop.eup %8427  ;;  %v6959_v0 = vmul.f32 -1.442695, %v6144_v29  ;;  %v6019_v38 = vadd.f32 %v5955_v53, %v5827_v8  ;;  %v5313_v37 = vadd.f32 %v8426_v36, %v8424_v44  ;;  %v16765_v29 = vld [vmem:[#allocation296_spill] sm:$0xff] }
 0x355   : > { %8439 = vrcp.f32 %v5891_v9  ;;  %v8430_v48 = vpop.eup %8429  ;;  %v5377_v2 = vmul.f32 %v8426_v36, %v16760_v47  ;;  %v5569_v33 = vmul.f32 %v8428_v12, %v16761_v11  ;;  %v4228_v17 = vmax.f32 %v4164_v34, %v13911_v27  ;;  %v16764_v34 = vld [vmem:[#allocation290_spill] sm:$0xff] }
 0x356   : > { %8441 = vpow2.f32 %v4576_v3  ;;  %v8432_v59 = vpop.eup %8431  ;;  %v5505_v56 = vadd.f32 %v8428_v12, %v5313_v37  ;;  %v5761_v10 = vmul.f32 %v8430_v48, %v13833_v46  ;;  %v4167_v53 = vmax.f32 %v16762_v39, %v13928_v49  ;;  %v13956_v37 = vpop.f32.mrb[135].mxu1 }
 0x357   : > { %8443 = vpow2.f32 %v6959_v0  ;;  %v5441_v42 = vadd.f32 %v5377_v2, %v5249_v5  ;;  %v5953_v13 = vmul.f32 %v8432_v59, %v13828_v21  ;;  %v4292_v35 = vsub.f32 %v16763_v1, %v4228_v17  ;;  %v13964_v2 = vld [vmem:[%s15174_s2] ss:$0 sm:$0xff] }
 0x358   : > { %8445 = vpow2.f32 %v4768_v43  ;;  %v8434_v6 = vpop.eup %8433  ;;  %v5697_v3 = vadd.f32 %v8430_v48, %v5505_v56  ;;  %v4484_v44 = vsub.f32 %v16764_v34, %v4228_v17  ;;  %v4676_v8 = vsub.f32 %v16765_v29, %v4228_v17  ;;  %v16769_v1 = vld [vmem:[#allocation301_spill] sm:$0xff] }
 0x359   : > { %8447 = vpow2.f32 %v4960_v30  ;;  %v6402_v9 = vadd.f32 1.0, %v8434_v6  ;;  %v5633_v36 = vadd.f32 %v5569_v33, %v5441_v42  ;;  %v4380_v46 = vmul.f32 1.442695, %v4292_v35  ;;  %v16770_v29 = vld [vmem:[#allocation285_spill] sm:$0xff] }
 0x35a   : > { %8449 = vpow2.f32 %v5152_v31  ;;  %v5889_v45 = vadd.f32 %v8432_v59, %v5697_v3  ;;  %v4572_v12 = vmul.f32 1.442695, %v4484_v44  ;;  %v4764_v5 = vmul.f32 1.442695, %v4676_v8 }
 0x35b   : > { %v4868_v21 = vsub.f32 %v13915_v22, %v4228_v17  ;;  %8451 = vrcp.f32 %v6402_v9  ;;  %v5825_v43 = vadd.f32 %v5761_v10, %v5633_v36  ;;  %v5060_v0 = vsub.f32 %v13911_v27, %v4228_v17  ;;  %v16766_v17 = vld [vmem:[#allocation177_spill] sm:$0xff] }
 0x35c   : > { %v4231_v30 = vmax.f32 %v4167_v53, %v13918_v18  ;;  %v8436_v48 = vpop.eup %8435  ;;  %8453 = vrcp.f32 %v5889_v45  ;;  %v13959_v31 = vmul.f32 0.5, %v13907_v15  ;;  %v13968_v22 = vadd.f32 %v13964_v2, %v13573_v62  ;;  %v16767_v10 = vld [vmem:[#allocation33_spill] sm:$0xff] }
 0x35d   : > { %v4956_v47 = vmul.f32 1.442695, %v4868_v21  ;;  %v8438_v27 = vpop.eup %8437  ;;  %6589 = vst [vmem:[%s13384_s30 + $0x88] sm:$0xff] %v8436_v48  ;;  %v6017_v11 = vadd.f32 %v5953_v13, %v5825_v43  ;;  %8455 = vpow2.f32 %v4380_v46  ;;  %v5148_v33 = vmul.f32 1.442695, %v5060_v0  ;;  %v16768_v53 = vld [vmem:[#allocation293_spill] sm:$0xff] }
 0x35e   : > { %v4295_v59 = vsub.f32 %v16766_v17, %v4231_v30  ;;  %v5254_v39 = vmul.f32 %v8438_v27, %v16767_v10  ;;  %8457 = vpow2.f32 %v4572_v12  ;;  %v4487_v42 = vsub.f32 %v16768_v53, %v4231_v30  ;;  %v16771_v48 = vld [vmem:[#allocation288_spill] sm:$0xff] }
 0x35f   : > { %v8440_v56 = vpop.eup %8439  ;;  %v4679_v35 = vsub.f32 %v16769_v1, %v4231_v30  ;;  %8459 = vpow2.f32 %v4764_v5  ;;  %v4871_v34 = vsub.f32 %v13928_v49, %v4231_v30  ;;  %v13984_v53 = vadd.f32 %v13964_v2, %v13633_v63 }
 0x360   : > { %v8442_v6 = vpop.eup %8441  ;;  %v6147_v3 = vmul.f32 %v8440_v56, %v6019_v38  ;;  %v4386_v62 = vmul.f32 1.442695, %v4295_v59  ;;  %8461 = vpow2.f32 %v4956_v47  ;;  %v4578_v9 = vmul.f32 1.442695, %v4487_v42 }
 0x361   : > { %v8444_v44 = vpop.eup %8443  ;;  %v5318_v13 = vadd.f32 %v8442_v6, %v8438_v27  ;;  %v5382_v8 = vmul.f32 %v8442_v6, %v16770_v29  ;;  %8463 = vpow2.f32 %v5148_v33  ;;  %v4770_v12 = vmul.f32 1.442695, %v4679_v35  ;;  %v16772_v35 = vld [vmem:[#allocation305_spill] sm:$0xff] }
 0x362   : > { %v8446_v36 = vpop.eup %8445  ;;  %v6400_v46 = vadd.f32 1.0, %v8444_v44  ;;  %v6962_v45 = vmul.f32 -1.442695, %v6147_v3  ;;  %8465 = vpow2.f32 %v4386_v62  ;;  %v4962_v27 = vmul.f32 1.442695, %v4871_v34  ;;  %v16773_v34 = vld [vmem:[#allocation169_spill] sm:$0xff] }
 0x363   : > { %v8448_v21 = vpop.eup %8447  ;;  %v5446_v43 = vadd.f32 %v5382_v8, %v5254_v39  ;;  %v5510_v0 = vadd.f32 %v8446_v36, %v5318_v13  ;;  %v5574_v38 = vmul.f32 %v8446_v36, %v16771_v48  ;;  %v5063_v47 = vsub.f32 %v13918_v18, %v4231_v30 }
 0x364   : > { %v8450_v5 = vpop.eup %8449  ;;  %8467 = vrcp.f32 %v6400_v46  ;;  %v5766_v49 = vmul.f32 %v8448_v21, %v13883_v61  ;;  %v3909_v39 = vmul.f32 0.5, %v13968_v22  ;;  %v13989_v18 = vadd.f32 %v13964_v2, %v13638_v25  ;;  %v16775_v46 = vld [vmem:[#allocation294_spill] sm:$0xff] }
 0x365   : > { %8469 = vpow2.f32 %v6962_v45  ;;  %v5638_v17 = vadd.f32 %v5574_v38, %v5446_v43  ;;  %v5702_v59 = vadd.f32 %v8448_v21, %v5510_v0  ;;  %v5958_v33 = vmul.f32 %v8450_v5, %v13850_v14  ;;  %v8452_v56 = vpop.eup %8451  ;;  %v16776_v21 = vld [vmem:[#allocation315_spill] sm:$0xff] }
 0x366   : > { %8471 = vpow2.f32 %v4578_v9  ;;  %v5154_v10 = vmul.f32 1.442695, %v5063_v47  ;;  %v8454_v42 = vpop.eup %8453  ;;  %6594 = vst [vmem:[%s13384_s30 + $0xb0] sm:$0xff] %v8452_v56  ;;  %v4165_v6 = vmax.f32 %v16772_v35, %v3909_v39  ;;  %v13993_v3 = vmul.f32 0.5, %v13984_v53  ;;  %v16774_v9 = vld [vmem:[#allocation287_spill] sm:$0xff] }
 0x367   : > { %v5830_v61 = vadd.f32 %v5766_v49, %v5638_v17  ;;  %v5894_v1 = vadd.f32 %v8450_v5, %v5702_v59  ;;  %8473 = vpow2.f32 %v4770_v12  ;;  %v8456_v30 = vpop.eup %8455  ;;  %v6145_v14 = vmul.f32 %v8454_v42, %v6017_v11  ;;  %v16777_v17 = vld [vmem:[#allocation178_spill] sm:$0xff] }
 0x368   : > { %8475 = vpow2.f32 %v4962_v27  ;;  %v8458_v62 = vpop.eup %8457  ;;  %v5252_v44 = vmul.f32 %v8456_v30, %v16773_v34  ;;  %v13997_v13 = vmul.f32 0.5, %v13989_v18  ;;  %v4229_v12 = vmax.f32 %v4165_v6, %v13959_v31 }
 0x369   : > { %v6022_v63 = vadd.f32 %v5958_v33, %v5830_v61  ;;  %8477 = vrcp.f32 %v5894_v1  ;;  %v8460_v29 = vpop.eup %8459  ;;  %v6960_v8 = vmul.f32 -1.442695, %v6145_v14  ;;  %v5316_v25 = vadd.f32 %v8458_v62, %v8456_v30  ;;  %v16778_v33 = vld [vmem:[#allocation300_spill] sm:$0xff] }
 0x36a   : > { %v5380_v36 = vmul.f32 %v8458_v62, %v16774_v9  ;;  %8479 = vpow2.f32 %v5154_v10  ;;  %v8462_v11 = vpop.eup %8461  ;;  %v5572_v45 = vmul.f32 %v8460_v29, %v16775_v46  ;;  %v4170_v43 = vmax.f32 %v16776_v21, %v13997_v13  ;;  %v16779_v10 = vld [vmem:[#allocation26_spill] sm:$0xff]  ;;  %v16780_v30 = vld [vmem:[#allocation172_spill] sm:$0xff]  ;;  %v14018_v46 = vpop.f32.mrb[136].mxu1 }
 0x36b   : > { %v14006_v0 = vadd.f32 %v13964_v2, %v13640_v58  ;;  %v8464_v48 = vpop.eup %8463  ;;  %8481 = vpow2.f32 %v6960_v8  ;;  %v5508_v5 = vadd.f32 %v8460_v29, %v5316_v25  ;;  %v5764_v49 = vmul.f32 %v8462_v11, %v13894_v4  ;;  %v16781_v21 = vld [vmem:[#allocation292_spill] sm:$0xff] }
 0x36c   : > { %v5444_v38 = vadd.f32 %v5380_v36, %v5252_v44  ;;  %v8466_v27 = vpop.eup %8465  ;;  %v5956_v47 = vmul.f32 %v8464_v48, %v13890_v16  ;;  %v4293_v59 = vsub.f32 %v16777_v17, %v4229_v12  ;;  %v4485_v56 = vsub.f32 %v16778_v33, %v4229_v12  ;;  %v14016_v36 = vpop.f32.mrb[136].mxu0 }
 0x36d   : > { %v4677_v42 = vsub.f32 %v16779_v10, %v4229_v12  ;;  %v5700_v58 = vadd.f32 %v8462_v11, %v5508_v5  ;;  %v5255_v14 = vmul.f32 %v8466_v27, %v16780_v30  ;;  %v4869_v35 = vsub.f32 %v3909_v39, %v4229_v12  ;;  %v14021_v5 = vpop.f32.mrb[137].mxu0  ;;  %v14023_v17 = vpop.f32.mrb[137].mxu1  ;;  %v16785_v30 = vld [vmem:[#allocation306_spill] sm:$0xff] }
 0x36e   : > { %v8468_v61 = vpop.eup %8467  ;;  %v5636_v1 = vadd.f32 %v5572_v45, %v5444_v38  ;;  %v4382_v62 = vmul.f32 1.442695, %v4293_v59  ;;  %v4574_v34 = vmul.f32 1.442695, %v4485_v56  ;;  %v5061_v44 = vsub.f32 %v13959_v31, %v4229_v12  ;;  %16782 = vst [vmem:[#allocation198_spill] sm:$0xff] %v14023_v17 }
 0x36f   : > { %v8470_v6 = vpop.eup %8469  ;;  %6592 = vst [vmem:[%s13384_s30 + $0xa0] sm:$0xff] %v8468_v61  ;;  %v4766_v4 = vmul.f32 1.442695, %v4677_v42  ;;  %v5892_v25 = vadd.f32 %v8464_v48, %v5700_v58  ;;  %v4958_v9 = vmul.f32 1.442695, %v4869_v35  ;;  %v4234_v59 = vmax.f32 %v4170_v43, %v13993_v3 }
 0x370   : > { %v8472_v16 = vpop.eup %8471  ;;  %v6403_v29 = vadd.f32 1.0, %v8470_v6  ;;  %v5828_v8 = vadd.f32 %v5764_v49, %v5636_v1  ;;  %8483 = vpow2.f32 %v4382_v62  ;;  %v5150_v38 = vmul.f32 1.442695, %v5061_v44  ;;  %v16783_v49 = vld [vmem:[#allocation298_spill] sm:$0xff]  ;;  %v16784_v1 = vld [vmem:[#allocation183_spill] sm:$0xff] }
 0x371   : > { %v8474_v11 = vpop.eup %8473  ;;  %v5319_v45 = vadd.f32 %v8472_v16, %v8466_v27  ;;  %v5383_v39 = vmul.f32 %v8472_v16, %v16781_v21  ;;  %v4298_v58 = vsub.f32 %v16784_v1, %v4234_v59  ;;  %v4490_v35 = vsub.f32 %v16785_v30, %v4234_v59 }
 0x372   : > { %v8476_v31 = vpop.eup %8475  ;;  %8485 = vrcp.f32 %v6403_v29  ;;  %v6020_v12 = vadd.f32 %v5956_v47, %v5828_v8  ;;  %v5575_v48 = vmul.f32 %v8474_v11, %v16783_v49  ;;  %v14045_v21 = vadd.f32 %v13964_v2, %v13647_v23  ;;  %v16790_v23 = vld [vmem:[#allocation173_spill] sm:$0xff] }
 0x373   : > { %v8478_v33 = vpop.eup %8477  ;;  %8487 = vrcp.f32 %v5892_v25  ;;  %v5447_v56 = vadd.f32 %v5383_v39, %v5255_v14  ;;  %v5511_v10 = vadd.f32 %v8474_v11, %v5319_v45  ;;  %v5767_v27 = vmul.f32 %v8476_v31, %v13903_v52  ;;  %v16788_v25 = vld [vmem:[#allocation309_spill] sm:$0xff] }
 0x374   : > { %v8480_v42 = vpop.eup %8479  ;;  %v6150_v61 = vmul.f32 %v8478_v33, %v6022_v63  ;;  %8489 = vpow2.f32 %v4574_v34  ;;  %v4392_v16 = vmul.f32 1.442695, %v4298_v58  ;;  %v4584_v14 = vmul.f32 1.442695, %v4490_v35  ;;  %v14031_v63 = vpop.f32.mrb[138].mxu0 }
 0x375   : > { %v5639_v6 = vadd.f32 %v5575_v48, %v5447_v56  ;;  %v5703_v62 = vadd.f32 %v8476_v31, %v5511_v10  ;;  %v5959_v47 = vmul.f32 %v8480_v42, %v13899_v26  ;;  %8491 = vpow2.f32 %v4766_v4  ;;  %v8482_v44 = vpop.eup %8481  ;;  %16786 = vst [vmem:[#allocation203_spill] sm:$0xff] %v14031_v63  ;;  %v14033_v34 = vpop.f32.mrb[138].mxu1  ;;  %v16789_v48 = vld [vmem:[#allocation86_spill] sm:$0xff]  ;;  %v16791_v10 = vld [vmem:[#allocation104_spill] sm:$0xff] }
 0x376   : > { %v6965_v43 = vmul.f32 -1.442695, %v6150_v61  ;;  %8493 = vpow2.f32 %v4958_v9  ;;  %v6401_v29 = vadd.f32 1.0, %v8482_v44  ;;  %16787 = vst [vmem:[#allocation57_spill] sm:$0xff] %v14033_v34  ;;  %v4682_v11 = vsub.f32 %v16788_v25, %v4234_v59 }
 0x377   : > { %v5831_v8 = vadd.f32 %v5767_v27, %v5639_v6  ;;  %v5895_v52 = vadd.f32 %v8480_v42, %v5703_v62  ;;  %8495 = vpow2.f32 %v5150_v38  ;;  %v4874_v45 = vsub.f32 %v13997_v13, %v4234_v59  ;;  %v16792_v42 = vld [vmem:[#allocation195_spill] sm:$0xff]  ;;  %v14073_v6 = vpop.f32.mrb[139].mxu0 }
 0x378   : > { %8497 = vpow2.f32 %v6965_v43  ;;  %v5066_v26 = vsub.f32 %v13993_v3, %v4234_v59  ;;  %v14041_v9 = vmul.f32 0.5, %v14006_v0  ;;  %v4776_v39 = vmul.f32 1.442695, %v4682_v11  ;;  %16794 = vst [vmem:[#allocation85_spill] sm:$0xff] %v14073_v6 }
 0x379   : > { %8499 = vrcp.f32 %v6401_v29  ;;  %v14038_v4 = vadd.f32 %v5959_v47, %v5831_v8  ;;  %v4968_v38 = vmul.f32 1.442695, %v4874_v45  ;;  %v3912_v13 = vmul.f32 0.5, %v14045_v21  ;;  %v16796_v8 = vld [vmem:[#allocation297_spill] sm:$0xff] }
 0x37a   : > { %8501 = vrcp.f32 %v5895_v52  ;;  %v5160_v31 = vmul.f32 1.442695, %v5066_v26  ;;  %v8484_v49 = vpop.eup %8483  ;;  %v14050_v3 = vadd.f32 %v13964_v2, %v13664_v41  ;;  %v14054_v59 = vadd.f32 %v13964_v2, %v16789_v48  ;;  %v16793_v41 = vld [vmem:[#allocation318_spill] sm:$0xff]  ;;  %v16797_v26 = vld [vmem:[#allocation29_spill] sm:$0xff]  ;;  %v16799_v48 = vld [vmem:[#allocation323_spill] sm:$0xff] }
 0x37b   : > { %8503 = vpow2.f32 %v4392_v16  ;;  %v5253_v56 = vmul.f32 %v8484_v49, %v16790_v23  ;;  %v14059_v27 = vadd.f32 %v13964_v2, %v16791_v10  ;;  %v14063_v61 = vadd.f32 %v13964_v2, %v16792_v42  ;;  %v14081_v16 = vpop.f32.mrb[139].mxu1 }
 0x37c   : > { %v8486_v33 = vpop.eup %8485  ;;  %8505 = vpow2.f32 %v4584_v14  ;;  %v4168_v58 = vmax.f32 %v16793_v41, %v3912_v13  ;;  %v14068_v30 = vmul.f32 0.5, %v14050_v3  ;;  %v14071_v35 = vmul.f32 0.5, %v14054_v59  ;;  %16795 = vst [vmem:[#allocation83_spill] sm:$0xff] %v14081_v16 }
 0x37d   : > { %v8488_v1 = vpop.eup %8487  ;;  %6595 = vst [vmem:[%s13384_s30 + $0xb8] sm:$0xff] %v8486_v33  ;;  %8507 = vpow2.f32 %v4776_v39  ;;  %v14076_v44 = vmul.f32 0.5, %v14059_v27  ;;  %v14079_v43 = vmul.f32 0.5, %v14063_v61  ;;  %v16798_v39 = vld [vmem:[#allocation319_spill] sm:$0xff] }
 0x37e   : > { %v8490_v62 = vpop.eup %8489  ;;  %v6148_v47 = vmul.f32 %v8488_v1, %v6020_v12  ;;  %8509 = vpow2.f32 %v4968_v38  ;;  %v4232_v25 = vmax.f32 %v4168_v58, %v14041_v9  ;;  %v4171_v38 = vmax.f32 %v16798_v39, %v14071_v35  ;;  %v16800_v1 = vld [vmem:[#allocation187_spill] sm:$0xff] }
 0x37f   : > { %v8492_v14 = vpop.eup %8491  ;;  %v5317_v29 = vadd.f32 %v8490_v62, %v8484_v49  ;;  %v5381_v52 = vmul.f32 %v8490_v62, %v16796_v8  ;;  %8511 = vpow2.f32 %v5160_v31  ;;  %v4169_v33 = vmax.f32 %v16799_v48, %v14079_v43  ;;  %v16801_v62 = vld [vmem:[#allocation308_spill] sm:$0xff] }
 0x380   : > { %v8494_v11 = vpop.eup %8493  ;;  %v6963_v45 = vmul.f32 -1.442695, %v6148_v47  ;;  %v5573_v12 = vmul.f32 %v8492_v14, %v16797_v26  ;;  %v4296_v31 = vsub.f32 %v16800_v1, %v4232_v25  ;;  %v4488_v47 = vsub.f32 %v16801_v62, %v4232_v25  ;;  %v16802_v8 = vld [vmem:[#allocation312_spill] sm:$0xff] }
 0x381   : > { %v8496_v23 = vpop.eup %8495  ;;  %v5445_v10 = vadd.f32 %v5381_v52, %v5253_v56  ;;  %v5509_v42 = vadd.f32 %v8492_v14, %v5317_v29  ;;  %v5765_v49 = vmul.f32 %v8494_v11, %v13968_v22  ;;  %v4680_v26 = vsub.f32 %v16802_v8, %v4232_v25  ;;  %v16803_v8 = vld [vmem:[#allocation12_spill] sm:$0xff] }
 0x382   : > { %v8498_v41 = vpop.eup %8497  ;;  %8513 = vpow2.f32 %v6963_v45  ;;  %v5957_v58 = vmul.f32 %v8496_v23, %v13907_v15  ;;  %v4388_v34 = vmul.f32 1.442695, %v4296_v31  ;;  %v4580_v56 = vmul.f32 1.442695, %v4488_v47  ;;  %v16804_v47 = vld [vmem:[#allocation24_spill] sm:$0xff] }
 0x383   : > { %v8500_v39 = vpop.eup %8499  ;;  %v6406_v16 = vadd.f32 1.0, %v8498_v41  ;;  %v5637_v6 = vadd.f32 %v5573_v12, %v5445_v10  ;;  %v5701_v48 = vadd.f32 %v8494_v11, %v5509_v42  ;;  %v4772_v14 = vmul.f32 1.442695, %v4680_v26  ;;  %v16806_v26 = vld [vmem:[#allocation188_spill] sm:$0xff] }
 0x384   : > { %v8502_v63 = vpop.eup %8501  ;;  %6593 = vst [vmem:[%s13384_s30 + $0xa8] sm:$0xff] %v8500_v39  ;;  %v4872_v22 = vsub.f32 %v3912_v13, %v4232_v25  ;;  %v5064_v29 = vsub.f32 %v14041_v9, %v4232_v25  ;;  %v16805_v25 = vld [vmem:[#allocation303_spill] sm:$0xff] }
 0x385   : > { %v8504_v52 = vpop.eup %8503  ;;  %8515 = vrcp.f32 %v6406_v16  ;;  %v6151_v15 = vmul.f32 %v8502_v63, %v14038_v4  ;;  %v5829_v45 = vadd.f32 %v5765_v49, %v5637_v6  ;;  %v5893_v1 = vadd.f32 %v8496_v23, %v5701_v48 }
 0x386   : > { %v8506_v62 = vpop.eup %8505  ;;  %v5258_v17 = vmul.f32 %v8504_v52, %v16803_v8  ;;  %8517 = vpow2.f32 %v4388_v34  ;;  %v4964_v12 = vmul.f32 1.442695, %v4872_v22  ;;  %v5156_v11 = vmul.f32 1.442695, %v5064_v29  ;;  %v16807_v22 = vld [vmem:[#allocation310_spill] sm:$0xff] }
 0x387   : > { %v8508_v10 = vpop.eup %8507  ;;  %v6966_v42 = vmul.f32 -1.442695, %v6151_v15  ;;  %v6021_v31 = vadd.f32 %v5957_v58, %v5829_v45  ;;  %8519 = vrcp.f32 %v5893_v1  ;;  %v5322_v41 = vadd.f32 %v8506_v62, %v8504_v52 }
 0x388   : > { %v8510_v13 = vpop.eup %8509  ;;  %v5386_v9 = vmul.f32 %v8506_v62, %v16804_v47  ;;  %v5578_v16 = vmul.f32 %v8508_v10, %v16805_v25  ;;  %8521 = vpow2.f32 %v4580_v56  ;;  %v4235_v63 = vmax.f32 %v4171_v38, %v14068_v30  ;;  %v16808_v56 = vld [vmem:[#allocation316_spill] sm:$0xff] }
 0x389   : > { %v8512_v4 = vpop.eup %8511  ;;  %8523 = vpow2.f32 %v6966_v42  ;;  %v5514_v6 = vadd.f32 %v8508_v10, %v5322_v41  ;;  %v5770_v34 = vmul.f32 %v8510_v13, %v13989_v18  ;;  %v4233_v23 = vmax.f32 %v4169_v33, %v14076_v44  ;;  %v16809_v10 = vld [vmem:[#allocation189_spill] sm:$0xff]  ;;  %v16810_v41 = vld [vmem:[#allocation314_spill] sm:$0xff] }
 0x38a   : > { %v5450_v49 = vadd.f32 %v5386_v9, %v5258_v17  ;;  %v5962_v58 = vmul.f32 %v8512_v4, %v13984_v53  ;;  %8525 = vpow2.f32 %v4772_v14  ;;  %v4299_v39 = vsub.f32 %v16806_v26, %v4235_v63 }
 0x38b   : > { %v5706_v48 = vadd.f32 %v8510_v13, %v5514_v6  ;;  %8527 = vpow2.f32 %v4964_v12  ;;  %v4491_v29 = vsub.f32 %v16807_v22, %v4235_v63  ;;  %v4683_v52 = vsub.f32 %v16808_v56, %v4235_v63  ;;  %v16812_v6 = vld [vmem:[#allocation125_spill] sm:$0xff]  ;;  %v16813_v56 = vld [vmem:[#allocation302_spill] sm:$0xff] }
 0x38c   : > { %v8514_v38 = vpop.eup %8513  ;;  %v5642_v15 = vadd.f32 %v5578_v16, %v5450_v49  ;;  %8529 = vpow2.f32 %v5156_v11  ;;  %v4394_v45 = vmul.f32 1.442695, %v4299_v39  ;;  %v4875_v18 = vsub.f32 %v14071_v35, %v4235_v63  ;;  %v16811_v11 = vld [vmem:[#allocation320_spill] sm:$0xff] }
 0x38d   : > { %v6404_v33 = vadd.f32 1.0, %v8514_v38  ;;  %v5898_v17 = vadd.f32 %v8512_v4, %v5706_v48  ;;  %v4586_v1 = vmul.f32 1.442695, %v4491_v29  ;;  %v4778_v53 = vmul.f32 1.442695, %v4683_v52 }
 0x38e   : > { %v5834_v14 = vadd.f32 %v5770_v34, %v5642_v15  ;;  %8531 = vpow2.f32 %v4394_v45  ;;  %v4970_v62 = vmul.f32 1.442695, %v4875_v18  ;;  %v5067_v8 = vsub.f32 %v14068_v30, %v4235_v63 }
 0x38f   : > { %v8516_v12 = vpop.eup %8515  ;;  %8533 = vrcp.f32 %v6404_v33  ;;  %v4297_v42 = vsub.f32 %v16809_v10, %v4233_v23  ;;  %v4489_v13 = vsub.f32 %v16810_v41, %v4233_v23  ;;  %v4681_v47 = vsub.f32 %v16811_v11, %v4233_v23  ;;  %v14130_v10 = vpop.f32.mrb[140].mxu1 }
 0x390   : > { %v8518_v9 = vpop.eup %8517  ;;  %6598 = vst [vmem:[%s13384_s30 + $0xd0] sm:$0xff] %v8516_v12  ;;  %v6026_v35 = vadd.f32 %v5962_v58, %v5834_v14  ;;  %8535 = vrcp.f32 %v5898_v17  ;;  %v5162_v25 = vmul.f32 1.442695, %v5067_v8  ;;  %v4873_v16 = vsub.f32 %v14079_v43, %v4233_v23  ;;  %v16814_v17 = vld [vmem:[#allocation307_spill] sm:$0xff] }
 0x391   : > { %v8520_v4 = vpop.eup %8519  ;;  %v5256_v34 = vmul.f32 %v8518_v9, %v16812_v6  ;;  %8537 = vpow2.f32 %v4586_v1  ;;  %v4390_v30 = vmul.f32 1.442695, %v4297_v42  ;;  %v4582_v63 = vmul.f32 1.442695, %v4489_v13  ;;  %v16815_v13 = vld [vmem:[#allocation196_spill] sm:$0xff] }
 0x392   : > { %v8522_v49 = vpop.eup %8521  ;;  %v6149_v26 = vmul.f32 %v8520_v4, %v6021_v31  ;;  %8539 = vpow2.f32 %v4778_v53  ;;  %v4774_v39 = vmul.f32 1.442695, %v4681_v47  ;;  %v4966_v48 = vmul.f32 1.442695, %v4873_v16  ;;  %v16816_v4 = vld [vmem:[#allocation181_spill] sm:$0xff] }
 0x393   : > { %v8524_v22 = vpop.eup %8523  ;;  %v5320_v29 = vadd.f32 %v8522_v49, %v8518_v9  ;;  %v5384_v52 = vmul.f32 %v8522_v49, %v16813_v56  ;;  %8541 = vpow2.f32 %v4970_v62  ;;  %v5065_v58 = vsub.f32 %v14076_v44, %v4233_v23  ;;  %v14127_v23 = vpop.f32.mrb[140].mxu0  ;;  %v16817_v56 = vld [vmem:[#allocation304_spill] sm:$0xff] }
 0x394   : > { %v8526_v38 = vpop.eup %8525  ;;  %v6407_v43 = vadd.f32 1.0, %v8524_v22  ;;  %v6964_v15 = vmul.f32 -1.442695, %v6149_v26  ;;  %8543 = vpow2.f32 %v5162_v25  ;;  %v14120_v45 = vadd.f32 %v13964_v2, %v13759_v24  ;;  %v14132_v42 = vpop.f32.mrb[141].mxu0 }
 0x395   : > { %v8528_v18 = vpop.eup %8527  ;;  %v5448_v31 = vadd.f32 %v5384_v52, %v5256_v34  ;;  %v5512_v33 = vadd.f32 %v8526_v38, %v5320_v29  ;;  %v5576_v1 = vmul.f32 %v8526_v38, %v16814_v17  ;;  %8545 = vpow2.f32 %v4390_v30  ;;  %v14146_v9 = vpop.f32.mrb[141].mxu1  ;;  %v16818_v52 = vld [vmem:[#allocation331_spill] sm:$0xff] }
 0x396   : > { %v8530_v53 = vpop.eup %8529  ;;  %8547 = vrcp.f32 %v6407_v43  ;;  %v5768_v14 = vmul.f32 %v8528_v18, %v14045_v21  ;;  %v5158_v62 = vmul.f32 1.442695, %v5065_v58  ;;  %v14125_v44 = vmul.f32 0.5, %v14120_v45  ;;  %v14169_v17 = vpop.f32.mrb[142].mxu0 }
 0x397   : > { %8549 = vpow2.f32 %v6964_v15  ;;  %v5640_v8 = vadd.f32 %v5576_v1, %v5448_v31  ;;  %v5704_v24 = vadd.f32 %v8528_v18, %v5512_v33  ;;  %v5960_v12 = vmul.f32 %v8530_v53, %v14006_v0  ;;  %v16819_v15 = vld [vmem:[#allocation313_spill] sm:$0xff] }
 0x398   : > { %v8532_v41 = vpop.eup %8531  ;;  %8551 = vpow2.f32 %v4582_v63  ;;  %v14136_v21 = vadd.f32 %v13964_v2, %v13766_v51  ;;  %v14140_v11 = vadd.f32 %v13964_v2, %v16815_v13  ;;  %v14144_v47 = vadd.f32 %v13964_v2, %v13779_v19  ;;  %v16820_v31 = vld [vmem:[#allocation337_spill] sm:$0xff] }
 0x399   : > { %v8534_v0 = vpop.eup %8533  ;;  %v5832_v25 = vadd.f32 %v5768_v14, %v5640_v8  ;;  %v5896_v16 = vadd.f32 %v8530_v53, %v5704_v24  ;;  %v5259_v6 = vmul.f32 %v8532_v41, %v16816_v4  ;;  %8553 = vpow2.f32 %v4774_v39  ;;  %v14173_v8 = vpop.f32.mrb[142].mxu1  ;;  %v16821_v4 = vld [vmem:[#allocation186_spill] sm:$0xff] }
 0x39a   : > { %v8536_v34 = vpop.eup %8535  ;;  %6596 = vst [vmem:[%s13384_s30 + $0xc0] sm:$0xff] %v8534_v0  ;;  %8555 = vpow2.f32 %v4966_v48  ;;  %v3918_v51 = vmul.f32 0.5, %v14136_v21  ;;  %v14152_v30 = vmul.f32 0.5, %v14140_v11  ;;  %v14155_v63 = vmul.f32 0.5, %v14144_v47 }
 0x39b   : > { %v8538_v19 = vpop.eup %8537  ;;  %v6154_v49 = vmul.f32 %v8536_v34, %v6026_v35  ;;  %v6024_v26 = vadd.f32 %v5960_v12, %v5832_v25  ;;  %8557 = vrcp.f32 %v5896_v16  ;;  %v14159_v22 = vadd.f32 %v13964_v2, %v13785_v50 }
 0x39c   : > { %v8540_v39 = vpop.eup %8539  ;;  %v5323_v29 = vadd.f32 %v8538_v19, %v8532_v41  ;;  %v5387_v48 = vmul.f32 %v8538_v19, %v16817_v56  ;;  %8559 = vpow2.f32 %v5158_v62  ;;  %v4174_v58 = vmax.f32 %v16818_v52, %v3918_v51 }
 0x39d   : > { %v8542_v38 = vpop.eup %8541  ;;  %v6969_v43 = vmul.f32 -1.442695, %v6154_v49  ;;  %v5579_v18 = vmul.f32 %v8540_v39, %v16819_v15  ;;  %v4172_v35 = vmax.f32 %v16820_v31, %v14155_v63  ;;  %v14167_v33 = vmul.f32 0.5, %v14159_v22  ;;  %v16823_v49 = vld [vmem:[#allocation325_spill] sm:$0xff]  ;;  %v16825_v31 = vld [vmem:[#allocation311_spill] sm:$0xff] }
 0x39e   : > { %v8544_v50 = vpop.eup %8543  ;;  %v5451_v1 = vadd.f32 %v5387_v48, %v5259_v6  ;;  %v5515_v53 = vadd.f32 %v8540_v39, %v5323_v29  ;;  %v5771_v14 = vmul.f32 %v8542_v38, %v14054_v59  ;;  %v4238_v62 = vmax.f32 %v4174_v58, %v14125_v44  ;;  %v16822_v6 = vld [vmem:[#allocation110_spill] sm:$0xff]  ;;  %v16824_v29 = vld [vmem:[#allocation327_spill] sm:$0xff] }
 0x39f   : > { %v8546_v24 = vpop.eup %8545  ;;  %8561 = vpow2.f32 %v6969_v43  ;;  %v5963_v12 = vmul.f32 %v8544_v50, %v14050_v3  ;;  %v14177_v41 = vmax.f32 %v4172_v35, %v14152_v30  ;;  %v14181_v13 = vadd.f32 %v13964_v2, %v13790_v7 }
 0x3a0   : > { %v8548_v0 = vpop.eup %8547  ;;  %v5643_v25 = vadd.f32 %v5579_v18, %v5451_v1  ;;  %v5707_v16 = vadd.f32 %v8542_v38, %v5515_v53  ;;  %v5257_v59 = vmul.f32 %v8546_v24, %v16821_v4  ;;  %v4302_v34 = vsub.f32 %v16822_v6, %v4238_v62  ;;  %v16826_v6 = vld [vmem:[#allocation317_spill] sm:$0xff] }
 0x3a1   : > { %v8550_v19 = vpop.eup %8549  ;;  %6599 = vst [vmem:[%s13384_s30 + $0xd8] sm:$0xff] %v8548_v0  ;;  %v4494_v39 = vsub.f32 %v16823_v49, %v4238_v62  ;;  %v4686_v3 = vsub.f32 %v16824_v29, %v4238_v62  ;;  %v4878_v56 = vsub.f32 %v3918_v51, %v4238_v62  ;;  %v5070_v48 = vsub.f32 %v14125_v44, %v4238_v62 }
 0x3a2   : > { %v8552_v52 = vpop.eup %8551  ;;  %v6405_v58 = vadd.f32 1.0, %v8550_v19  ;;  %v5835_v7 = vadd.f32 %v5771_v14, %v5643_v25  ;;  %v5899_v43 = vadd.f32 %v8544_v50, %v5707_v16  ;;  %v4400_v15 = vmul.f32 1.442695, %v4302_v34  ;;  %v16827_v16 = vld [vmem:[#allocation112_spill] sm:$0xff] }
 0x3a3   : > { %v8554_v18 = vpop.eup %8553  ;;  %v5321_v38 = vadd.f32 %v8552_v52, %v8546_v24  ;;  %v5385_v35 = vmul.f32 %v8552_v52, %v16825_v31  ;;  %v4592_v1 = vmul.f32 1.442695, %v4494_v39  ;;  %v4784_v53 = vmul.f32 1.442695, %v4686_v3  ;;  %v14195_v3 = vpop.f32.mrb[143].mxu0  ;;  %v16828_v52 = vld [vmem:[#allocation326_spill] sm:$0xff] }
 0x3a4   : > { %v8556_v4 = vpop.eup %8555  ;;  %8563 = vrcp.f32 %v6405_v58  ;;  %v6027_v0 = vadd.f32 %v5963_v12, %v5835_v7  ;;  %v5577_v49 = vmul.f32 %v8554_v18, %v16826_v6  ;;  %v4976_v29 = vmul.f32 1.442695, %v4878_v56  ;;  %v14199_v58 = vpop.f32.mrb[143].mxu1 }
 0x3a5   : > { %v8558_v51 = vpop.eup %8557  ;;  %8565 = vrcp.f32 %v5899_v43  ;;  %v5449_v44 = vadd.f32 %v5385_v35, %v5257_v59  ;;  %v5513_v62 = vadd.f32 %v8554_v18, %v5321_v38  ;;  %v5769_v14 = vmul.f32 %v8556_v4, %v14063_v61  ;;  %v16829_v43 = vld [vmem:[#allocation334_spill] sm:$0xff] }
 0x3a6   : > { %v8560_v50 = vpop.eup %8559  ;;  %v6152_v25 = vmul.f32 %v8558_v51, %v6024_v26  ;;  %8567 = vpow2.f32 %v4400_v15  ;;  %v5168_v24 = vmul.f32 1.442695, %v5070_v48  ;;  %v4300_v34 = vsub.f32 %v16827_v16, %v14177_v41 }
 0x3a7   : > { %v5641_v19 = vadd.f32 %v5577_v49, %v5449_v44  ;;  %v5705_v39 = vadd.f32 %v8556_v4, %v5513_v62  ;;  %v5961_v12 = vmul.f32 %v8560_v50, %v14059_v27  ;;  %8569 = vpow2.f32 %v4592_v1 }
 0x3a8   : > { %v6967_v56 = vmul.f32 -1.442695, %v6152_v25  ;;  %8571 = vpow2.f32 %v4784_v53  ;;  %v4396_v59 = vmul.f32 1.442695, %v4300_v34  ;;  %v4492_v61 = vsub.f32 %v16828_v52, %v14177_v41  ;;  %v16831_v34 = vld [vmem:[#allocation103_spill] sm:$0xff] }
 0x3a9   : > { %v8562_v26 = vpop.eup %8561  ;;  %v5833_v48 = vadd.f32 %v5769_v14, %v5641_v19  ;;  %v5897_v7 = vadd.f32 %v8560_v50, %v5705_v39  ;;  %8573 = vpow2.f32 %v4976_v29  ;;  %v4684_v15 = vsub.f32 %v16829_v43, %v14177_v41  ;;  %v16832_v39 = vld [vmem:[#allocation342_spill] sm:$0xff]  ;;  %v16835_v43 = vld [vmem:[#allocation113_spill] sm:$0xff] }
 0x3aa   : > { %v6410_v18 = vadd.f32 1.0, %v8562_v26  ;;  %8575 = vpow2.f32 %v6967_v56  ;;  %v4588_v27 = vmul.f32 1.442695, %v4492_v61  ;;  %v4876_v38 = vsub.f32 %v14155_v63, %v14177_v41 }
 0x3ab   : > { %v6025_v31 = vadd.f32 %v5961_v12, %v5833_v48  ;;  %8577 = vrcp.f32 %v5897_v7  ;;  %v4780_v35 = vmul.f32 1.442695, %v4684_v15  ;;  %v5068_v1 = vsub.f32 %v14152_v30, %v14177_v41  ;;  %v16830_v30 = vld [vmem:[#allocation39_spill] sm:$0xff]  ;;  %v16834_v48 = vld [vmem:[#allocation324_spill] sm:$0xff] }
 0x3ac   : > { %8579 = vrcp.f32 %v6410_v18  ;;  %v4972_v53 = vmul.f32 1.442695, %v4876_v38  ;;  %v3919_v4 = vmul.f32 0.5, %v14181_v13  ;;  %v14210_v6 = vadd.f32 %v13964_v2, %v13820_v60  ;;  %v16836_v18 = vld [vmem:[#allocation329_spill] sm:$0xff]  ;;  %v16837_v38 = vld [vmem:[#allocation336_spill] sm:$0xff] }
 0x3ad   : > { %8581 = vpow2.f32 %v5168_v24  ;;  %v5164_v49 = vmul.f32 1.442695, %v5068_v1  ;;  %v14214_v63 = vadd.f32 %v13964_v2, %v13823_v40  ;;  %v14218_v29 = vadd.f32 %v13964_v2, %v13867_v32 }
 0x3ae   : > { %v8564_v51 = vpop.eup %8563  ;;  %8583 = vpow2.f32 %v4396_v59  ;;  %v4175_v41 = vmax.f32 %v16830_v30, %v3919_v4  ;;  %v14222_v44 = vmul.f32 0.5, %v14210_v6  ;;  %v14226_v60 = vadd.f32 %v13964_v2, %v13872_v28 }
 0x3af   : > { %v8566_v62 = vpop.eup %8565  ;;  %6597 = vst [vmem:[%s13384_s30 + $0xc8] sm:$0xff] %v8564_v51  ;;  %8585 = vpow2.f32 %v4588_v27  ;;  %v14230_v40 = vmul.f32 0.5, %v14214_v63  ;;  %v14233_v32 = vmul.f32 0.5, %v14218_v29  ;;  %v14237_v14 = vadd.f32 %v13964_v2, %v13874_v57 }
 0x3b0   : > { %v8568_v50 = vpop.eup %8567  ;;  %v6155_v25 = vmul.f32 %v8566_v62, %v6027_v0  ;;  %8587 = vpow2.f32 %v4780_v35  ;;  %v4239_v24 = vmax.f32 %v4175_v41, %v14167_v33  ;;  %v14241_v28 = vmul.f32 0.5, %v14226_v60  ;;  %v16833_v0 = vld [vmem:[#allocation321_spill] sm:$0xff] }
 0x3b1   : > { %v8570_v16 = vpop.eup %8569  ;;  %v5262_v19 = vmul.f32 %v8568_v50, %v16831_v34  ;;  %8589 = vpow2.f32 %v4972_v53  ;;  %v4173_v12 = vmax.f32 %v16832_v39, %v14230_v40  ;;  %v14247_v56 = vmul.f32 0.5, %v14237_v14 }
 0x3b2   : > { %v8572_v57 = vpop.eup %8571  ;;  %v6970_v59 = vmul.f32 -1.442695, %v6155_v25  ;;  %v5326_v52 = vadd.f32 %v8570_v16, %v8568_v50  ;;  %v5390_v61 = vmul.f32 %v8570_v16, %v16833_v0  ;;  %8591 = vpow2.f32 %v5164_v49 }
 0x3b3   : > { %v8574_v26 = vpop.eup %8573  ;;  %v5582_v7 = vmul.f32 %v8572_v57, %v16834_v48  ;;  %v4303_v15 = vsub.f32 %v16835_v43, %v4239_v24  ;;  %v4495_v27 = vsub.f32 %v16836_v18, %v4239_v24  ;;  %v4687_v35 = vsub.f32 %v16837_v38, %v4239_v24 }
 0x3b4   : > { %v8576_v1 = vpop.eup %8575  ;;  %8593 = vpow2.f32 %v6970_v59  ;;  %v5454_v53 = vadd.f32 %v5390_v61, %v5262_v19  ;;  %v5518_v51 = vadd.f32 %v8572_v57, %v5326_v52  ;;  %v5774_v30 = vmul.f32 %v8574_v26, %v14136_v21 }
 0x3b5   : > { %v8578_v41 = vpop.eup %8577  ;;  %v6408_v62 = vadd.f32 1.0, %v8576_v1  ;;  %v4402_v50 = vmul.f32 1.442695, %v4303_v15  ;;  %v4594_v49 = vmul.f32 1.442695, %v4495_v27  ;;  %v4879_v25 = vsub.f32 %v3919_v4, %v4239_v24  ;;  %v16838_v27 = vld [vmem:[#allocation105_spill] sm:$0xff] }
 0x3b6   : > { %v8580_v16 = vpop.eup %8579  ;;  %v6153_v34 = vmul.f32 %v8578_v41, %v6025_v31  ;;  %v5646_v39 = vadd.f32 %v5582_v7, %v5454_v53  ;;  %v5710_v0 = vadd.f32 %v8574_v26, %v5518_v51  ;;  %v4786_v48 = vmul.f32 1.442695, %v4687_v35  ;;  %v16839_v7 = vld [vmem:[#allocation114_spill] sm:$0xff] }
 0x3b7   : > { %v8582_v43 = vpop.eup %8581  ;;  %6602 = vst [vmem:[%s13384_s30 + $0xf0] sm:$0xff] %v8580_v16  ;;  %8595 = vrcp.f32 %v6408_v62  ;;  %v4978_v18 = vmul.f32 1.442695, %v4879_v25  ;;  %v5071_v59 = vsub.f32 %v14167_v33, %v4239_v24  ;;  %v4237_v19 = vmax.f32 %v4173_v12, %v14222_v44  ;;  %v16840_v33 = vld [vmem:[#allocation322_spill] sm:$0xff]  ;;  %v16842_v62 = vld [vmem:[#allocation335_spill] sm:$0xff]  ;;  %v14264_v25 = vpop.f32.mrb[144].mxu0 }
 0x3b8   : > { %v8584_v57 = vpop.eup %8583  ;;  %v6968_v21 = vmul.f32 -1.442695, %v6153_v34  ;;  %v5838_v52 = vadd.f32 %v5774_v30, %v5646_v39  ;;  %v5902_v61 = vadd.f32 %v8582_v43, %v5710_v0  ;;  %v5966_v15 = vmul.f32 %v8582_v43, %v14120_v45  ;;  %v16841_v51 = vld [vmem:[#allocation330_spill] sm:$0xff]  ;;  %v14267_v0 = vpop.f32.mrb[144].mxu1 }
 0x3b9   : > { %v8586_v4 = vpop.eup %8585  ;;  %v5260_v31 = vmul.f32 %v8584_v57, %v16838_v27  ;;  %8597 = vpow2.f32 %v4402_v50  ;;  %v5170_v26 = vmul.f32 1.442695, %v5071_v59  ;;  %v4301_v38 = vsub.f32 %v16839_v7, %v4237_v19  ;;  %v14269_v43 = vpop.f32.mrb[145].mxu0 }
 0x3ba   : > { %v8588_v35 = vpop.eup %8587  ;;  %8599 = vpow2.f32 %v6968_v21  ;;  %v6030_v1 = vadd.f32 %v5966_v15, %v5838_v52  ;;  %v5324_v53 = vadd.f32 %v8586_v4, %v8584_v57  ;;  %v5388_v24 = vmul.f32 %v8586_v4, %v16840_v33  ;;  %v16843_v21 = vld [vmem:[#allocation31_spill] sm:$0xff]  ;;  %v16844_v33 = vld [vmem:[#allocation353_spill] sm:$0xff] }
 0x3bb   : > { %v8590_v12 = vpop.eup %8589  ;;  %8601 = vrcp.f32 %v5902_v61  ;;  %v5580_v30 = vmul.f32 %v8588_v35, %v16841_v51  ;;  %v4398_v41 = vmul.f32 1.442695, %v4301_v38  ;;  %v4493_v45 = vsub.f32 %v16842_v62, %v4237_v19  ;;  %v14273_v61 = vpop.f32.mrb[145].mxu1  ;;  %v16846_v62 = vld [vmem:[#allocation107_spill] sm:$0xff] }
 0x3bc   : > { %v8592_v16 = vpop.eup %8591  ;;  %v5452_v50 = vadd.f32 %v5388_v24, %v5260_v31  ;;  %v5516_v34 = vadd.f32 %v8588_v35, %v5324_v53  ;;  %v5772_v39 = vmul.f32 %v8590_v12, %v14144_v47  ;;  %8603 = vpow2.f32 %v4594_v49 }
 0x3bd   : > { %v5964_v59 = vmul.f32 %v8592_v16, %v14140_v11  ;;  %8605 = vpow2.f32 %v4786_v48  ;;  %v4590_v57 = vmul.f32 1.442695, %v4493_v45  ;;  %v4685_v52 = vsub.f32 %v16843_v21, %v4237_v19 }
 0x3be   : > { %v8594_v15 = vpop.eup %8593  ;;  %v5644_v4 = vadd.f32 %v5580_v30, %v5452_v50  ;;  %v5708_v27 = vadd.f32 %v8590_v12, %v5516_v34  ;;  %8607 = vpow2.f32 %v4978_v18  ;;  %v4877_v47 = vsub.f32 %v14230_v40, %v4237_v19 }
 0x3bf   : > { %v6411_v49 = vadd.f32 1.0, %v8594_v15  ;;  %8609 = vpow2.f32 %v5170_v26  ;;  %v4782_v31 = vmul.f32 1.442695, %v4685_v52  ;;  %v5069_v7 = vsub.f32 %v14222_v44, %v4237_v19  ;;  %v14287_v44 = vld [vmem:[%s15174_s2] ss:$0 sm:$0xff]  ;;  %v16845_v26 = vld [vmem:[#allocation11_spill] sm:$0xff] }
 0x3c0   : > { %v5836_v38 = vadd.f32 %v5772_v39, %v5644_v4  ;;  %v5900_v11 = vadd.f32 %v8592_v16, %v5708_v27  ;;  %8611 = vpow2.f32 %v4398_v41  ;;  %v4974_v48 = vmul.f32 1.442695, %v4877_v47  ;;  %v16847_v39 = vld [vmem:[#allocation117_spill] sm:$0xff] }
 0x3c1   : > { %v8596_v35 = vpop.eup %8595  ;;  %8613 = vrcp.f32 %v6411_v49  ;;  %v5166_v53 = vmul.f32 1.442695, %v5069_v7  ;;  %v4178_v24 = vmax.f32 %v16844_v33, %v14241_v28  ;;  %v14281_v18 = vadd.f32 %v13964_v2, %v13885_v54  ;;  %v16849_v15 = vld [vmem:[#allocation345_spill] sm:$0xff] }
 0x3c2   : > { %6600 = vst [vmem:[%s13384_s30 + $0xe0] sm:$0xff] %v8596_v35  ;;  %v6028_v40 = vadd.f32 %v5964_v59, %v5836_v38  ;;  %8615 = vrcp.f32 %v5900_v11  ;;  %v14291_v19 = vadd.f32 %v14287_v44, %v13921_v55  ;;  %v14295_v12 = vadd.f32 %v14287_v44, %v16845_v26  ;;  %v14317_v11 = vpop.f32.mrb[146].mxu0  ;;  %v16851_v33 = vld [vmem:[#allocation333_spill] sm:$0xff] }
 0x3c3   : > { %v8598_v51 = vpop.eup %8597  ;;  %8617 = vpow2.f32 %v4590_v57  ;;  %v4242_v54 = vmax.f32 %v4178_v24, %v14233_v32  ;;  %v14299_v2 = vmul.f32 0.5, %v14281_v18  ;;  %v14303_v30 = vadd.f32 %v14287_v44, %v13944_v20  ;;  %v16848_v57 = vld [vmem:[#allocation343_spill] sm:$0xff] }
 0x3c4   : > { %v8600_v41 = vpop.eup %8599  ;;  %v5263_v45 = vmul.f32 %v8598_v51, %v16846_v62  ;;  %8619 = vpow2.f32 %v4782_v31  ;;  %v14307_v55 = vmul.f32 0.5, %v14291_v19  ;;  %v14310_v16 = vmul.f32 0.5, %v14295_v12  ;;  %v16850_v31 = vld [vmem:[#allocation328_spill] sm:$0xff] }
 0x3c5   : > { %v8602_v50 = vpop.eup %8601  ;;  %v6409_v34 = vadd.f32 1.0, %v8600_v41  ;;  %8621 = vpow2.f32 %v4974_v48  ;;  %v4306_v59 = vsub.f32 %v16847_v39, %v4242_v54  ;;  %v4498_v21 = vsub.f32 %v16848_v57, %v4242_v54 }
 0x3c6   : > { %v8604_v52 = vpop.eup %8603  ;;  %v6158_v20 = vmul.f32 %v8602_v50, %v6030_v1  ;;  %8623 = vpow2.f32 %v5166_v53  ;;  %v4690_v4 = vsub.f32 %v16849_v15, %v4242_v54  ;;  %v4882_v27 = vsub.f32 %v14241_v28, %v4242_v54  ;;  %v14321_v50 = vpop.f32.mrb[146].mxu1 }
 0x3c7   : > { %v8606_v47 = vpop.eup %8605  ;;  %8625 = vrcp.f32 %v6409_v34  ;;  %v5327_v49 = vadd.f32 %v8604_v52, %v8598_v51  ;;  %v5391_v7 = vmul.f32 %v8604_v52, %v16850_v31  ;;  %v4408_v38 = vmul.f32 1.442695, %v4306_v59 }
 0x3c8   : > { %v8608_v48 = vpop.eup %8607  ;;  %v6973_v35 = vmul.f32 -1.442695, %v6158_v20  ;;  %v5583_v24 = vmul.f32 %v8606_v47, %v16851_v33  ;;  %v4600_v26 = vmul.f32 1.442695, %v4498_v21  ;;  %v4792_v41 = vmul.f32 1.442695, %v4690_v4 }
 0x3c9   : > { %v8610_v1 = vpop.eup %8609  ;;  %v5455_v53 = vadd.f32 %v5391_v7, %v5263_v45  ;;  %v5519_v62 = vadd.f32 %v8606_v47, %v5327_v49  ;;  %v5775_v28 = vmul.f32 %v8608_v48, %v14181_v13  ;;  %8627 = vpow2.f32 %v4408_v38  ;;  %v16852_v20 = vld [vmem:[#allocation109_spill] sm:$0xff]  ;;  %v16853_v4 = vld [vmem:[#allocation354_spill] sm:$0xff]  ;;  %v16854_v49 = vld [vmem:[#allocation355_spill] sm:$0xff] }
 0x3ca   : > { %v8612_v51 = vpop.eup %8611  ;;  %8629 = vpow2.f32 %v6973_v35  ;;  %v5967_v34 = vmul.f32 %v8610_v1, %v14159_v22  ;;  %v4984_v39 = vmul.f32 1.442695, %v4882_v27  ;;  %v5074_v59 = vsub.f32 %v14233_v32, %v4242_v54 }
 0x3cb   : > { %v8614_v57 = vpop.eup %8613  ;;  %v5647_v52 = vadd.f32 %v5583_v24, %v5455_v53  ;;  %v5711_v21 = vadd.f32 %v8608_v48, %v5519_v62  ;;  %v5261_v15 = vmul.f32 %v8612_v51, %v16852_v20  ;;  %8631 = vpow2.f32 %v4600_v26  ;;  %v16855_v48 = vld [vmem:[#allocation332_spill] sm:$0xff]  ;;  %v16856_v53 = vld [vmem:[#allocation38_spill] sm:$0xff] }
 0x3cc   : > { %v8616_v45 = vpop.eup %8615  ;;  %6603 = vst [vmem:[%s13384_s30 + $0xf8] sm:$0xff] %v8614_v57  ;;  %8633 = vpow2.f32 %v4792_v41  ;;  %v5176_v13 = vmul.f32 1.442695, %v5074_v59  ;;  %v4176_v47 = vmax.f32 %v16853_v4, %v14299_v2  ;;  %v4179_v31 = vmax.f32 %v16854_v49, %v14310_v16  ;;  %v14334_v59 = vpop.f32.mrb[147].mxu0 }
 0x3cd   : > { %v8618_v22 = vpop.eup %8617  ;;  %v6156_v27 = vmul.f32 %v8616_v45, %v6028_v40  ;;  %v5839_v7 = vadd.f32 %v5775_v28, %v5647_v52  ;;  %v5903_v32 = vadd.f32 %v8610_v1, %v5711_v21  ;;  %8635 = vpow2.f32 %v4984_v39  ;;  %v14338_v52 = vpop.f32.mrb[147].mxu1  ;;  %v16858_v45 = vld [vmem:[#allocation344_spill] sm:$0xff] }
 0x3ce   : > { %v8620_v54 = vpop.eup %8619  ;;  %v5325_v38 = vadd.f32 %v8618_v22, %v8612_v51  ;;  %v5389_v35 = vmul.f32 %v8618_v22, %v16855_v48  ;;  %8637 = vpow2.f32 %v5176_v13  ;;  %v4240_v33 = vmax.f32 %v4176_v47, %v14247_v56  ;;  %v16857_v51 = vld [vmem:[#allocation93_spill] sm:$0xff]  ;;  %v16859_v13 = vld [vmem:[#allocation347_spill] sm:$0xff] }
 0x3cf   : > { %v8622_v24 = vpop.eup %8621  ;;  %v6971_v26 = vmul.f32 -1.442695, %v6156_v27  ;;  %v6031_v41 = vadd.f32 %v5967_v34, %v5839_v7  ;;  %8639 = vrcp.f32 %v5903_v32  ;;  %v5581_v62 = vmul.f32 %v8620_v54, %v16856_v53 }
 0x3d0   : > { %v8624_v40 = vpop.eup %8623  ;;  %v5453_v28 = vadd.f32 %v5389_v35, %v5261_v15  ;;  %v5517_v1 = vadd.f32 %v8620_v54, %v5325_v38  ;;  %v5773_v39 = vmul.f32 %v8622_v24, %v14214_v63  ;;  %v4304_v57 = vsub.f32 %v16857_v51, %v4240_v33  ;;  %v16860_v35 = vld [vmem:[#allocation90_spill] sm:$0xff] }
 0x3d1   : > { %v8626_v21 = vpop.eup %8625  ;;  %8641 = vpow2.f32 %v6971_v26  ;;  %v5965_v20 = vmul.f32 %v8624_v40, %v14210_v6  ;;  %v4496_v34 = vsub.f32 %v16858_v45, %v4240_v33  ;;  %v4688_v4 = vsub.f32 %v16859_v13, %v4240_v33  ;;  %v16864_v45 = vld [vmem:[#allocation346_spill] sm:$0xff] }
 0x3d2   : > { %6601 = vst [vmem:[%s13384_s30 + $0xe8] sm:$0xff] %v8626_v21  ;;  %v5645_v47 = vadd.f32 %v5581_v62, %v5453_v28  ;;  %v5709_v49 = vadd.f32 %v8622_v24, %v5517_v1  ;;  %v4404_v22 = vmul.f32 1.442695, %v4304_v57  ;;  %v4880_v15 = vsub.f32 %v14299_v2, %v4240_v33  ;;  %v16861_v57 = vld [vmem:[#allocation30_spill] sm:$0xff] }
 0x3d3   : > { %v8628_v27 = vpop.eup %8627  ;;  %v4596_v63 = vmul.f32 1.442695, %v4496_v34  ;;  %v4788_v7 = vmul.f32 1.442695, %v4688_v4  ;;  %v5072_v32 = vsub.f32 %v14247_v56, %v4240_v33  ;;  %v4243_v54 = vmax.f32 %v4179_v31, %v14307_v55  ;;  %v16862_v31 = vld [vmem:[#allocation339_spill] sm:$0xff] }
 0x3d4   : > { %v8630_v38 = vpop.eup %8629  ;;  %v5837_v48 = vadd.f32 %v5773_v39, %v5645_v47  ;;  %v5901_v6 = vadd.f32 %v8624_v40, %v5709_v49  ;;  %v5266_v26 = vmul.f32 %v8628_v27, %v16860_v35  ;;  %8643 = vpow2.f32 %v4404_v22  ;;  %v16863_v39 = vld [vmem:[#allocation120_spill] sm:$0xff] }
 0x3d5   : > { %v8632_v53 = vpop.eup %8631  ;;  %v6414_v51 = vadd.f32 1.0, %v8630_v38  ;;  %8645 = vpow2.f32 %v4596_v63  ;;  %v4980_v24 = vmul.f32 1.442695, %v4880_v15  ;;  %v5172_v62 = vmul.f32 1.442695, %v5072_v32 }
 0x3d6   : > { %v8634_v28 = vpop.eup %8633  ;;  %v6029_v2 = vadd.f32 %v5965_v20, %v5837_v48  ;;  %8647 = vrcp.f32 %v5901_v6  ;;  %v5330_v1 = vadd.f32 %v8632_v53, %v8628_v27  ;;  %v5394_v21 = vmul.f32 %v8632_v53, %v16861_v57  ;;  %v16865_v6 = vld [vmem:[#allocation351_spill] sm:$0xff] }
 0x3d7   : > { %v8636_v56 = vpop.eup %8635  ;;  %8649 = vrcp.f32 %v6414_v51  ;;  %v5586_v33 = vmul.f32 %v8634_v28, %v16862_v31  ;;  %v4307_v40 = vsub.f32 %v16863_v39, %v4243_v54  ;;  %v4499_v34 = vsub.f32 %v16864_v45, %v4243_v54 }
 0x3d8   : > { %v8638_v13 = vpop.eup %8637  ;;  %v5458_v4 = vadd.f32 %v5394_v21, %v5266_v26  ;;  %v5522_v47 = vadd.f32 %v8634_v28, %v5330_v1  ;;  %v5778_v49 = vmul.f32 %v8636_v56, %v14226_v60  ;;  %8651 = vpow2.f32 %v4788_v7 }
 0x3d9   : > { %v8640_v22 = vpop.eup %8639  ;;  %v5970_v20 = vmul.f32 %v8638_v13, %v14218_v29  ;;  %8653 = vpow2.f32 %v4980_v24  ;;  %v4410_v15 = vmul.f32 1.442695, %v4307_v40  ;;  %v4602_v27 = vmul.f32 1.442695, %v4499_v34  ;;  %v16867_v40 = vld [vmem:[#allocation338_spill] sm:$0xff] }
 0x3da   : > { %v6159_v63 = vmul.f32 %v8640_v22, %v6031_v41  ;;  %v5650_v32 = vadd.f32 %v5586_v33, %v5458_v4  ;;  %v5714_v38 = vadd.f32 %v8636_v56, %v5522_v47  ;;  %8655 = vpow2.f32 %v5172_v62  ;;  %v14383_v47 = vpop.f32.mrb[148].mxu0  ;;  %v16868_v22 = vld [vmem:[#allocation358_spill] sm:$0xff] }
 0x3db   : > { %v8642_v48 = vpop.eup %8641  ;;  %8657 = vpow2.f32 %v4410_v15  ;;  %v4691_v35 = vsub.f32 %v16865_v6, %v4243_v54  ;;  %v4883_v26 = vsub.f32 %v14310_v16, %v4243_v54  ;;  %v5075_v53 = vsub.f32 %v14307_v55, %v4243_v54  ;;  %v16866_v54 = vld [vmem:[#allocation116_spill] sm:$0xff]  ;;  %v14394_v6 = vpop.f32.mrb[149].mxu0 }
 0x3dc   : > { %v6412_v60 = vadd.f32 1.0, %v8642_v48  ;;  %v6974_v7 = vmul.f32 -1.442695, %v6159_v63  ;;  %v5842_v51 = vadd.f32 %v5778_v49, %v5650_v32  ;;  %v5906_v28 = vadd.f32 %v8638_v13, %v5714_v38  ;;  %v16869_v38 = vld [vmem:[#allocation341_spill] sm:$0xff] }
 0x3dd   : > { %8659 = vpow2.f32 %v4602_v27  ;;  %v4794_v29 = vmul.f32 1.442695, %v4691_v35  ;;  %v4986_v24 = vmul.f32 1.442695, %v4883_v26  ;;  %v5178_v1 = vmul.f32 1.442695, %v5075_v53 }
 0x3de   : > { %v8644_v41 = vpop.eup %8643  ;;  %8661 = vrcp.f32 %v6412_v60  ;;  %v14357_v57 = vadd.f32 %v5970_v20, %v5842_v51  ;;  %v14360_v62 = vmul.f32 0.5, %v14303_v30  ;;  %v14364_v16 = vadd.f32 %v14287_v44, %v13956_v37  ;;  %v16870_v60 = vld [vmem:[#allocation367_spill] sm:$0xff] }
 0x3df   : > { %v8646_v55 = vpop.eup %8645  ;;  %8663 = vpow2.f32 %v6974_v7  ;;  %v5264_v21 = vmul.f32 %v8644_v41, %v16866_v54  ;;  %v14369_v56 = vadd.f32 %v14287_v44, %v14016_v36  ;;  %v14373_v31 = vadd.f32 %v14287_v44, %v14018_v46 }
 0x3e0   : > { %v8648_v33 = vpop.eup %8647  ;;  %8665 = vrcp.f32 %v5906_v28  ;;  %v5328_v39 = vadd.f32 %v8646_v55, %v8644_v41  ;;  %v5392_v45 = vmul.f32 %v8646_v55, %v16867_v40  ;;  %v3921_v37 = vmul.f32 0.5, %v14364_v16  ;;  %v16871_v41 = vld [vmem:[#allocation91_spill] sm:$0xff] }
 0x3e1   : > { %v8650_v34 = vpop.eup %8649  ;;  %v6157_v13 = vmul.f32 %v8648_v33, %v6029_v2  ;;  %8667 = vpow2.f32 %v4794_v29  ;;  %v14378_v4 = vmul.f32 0.5, %v14369_v56  ;;  %v14381_v36 = vmul.f32 0.5, %v14373_v31  ;;  %v14391_v2 = vpop.f32.mrb[148].mxu1 }
 0x3e2   : > { %v8652_v46 = vpop.eup %8651  ;;  %6606 = vst [vmem:[%s13384_s30 + $0x110] sm:$0xff] %v8650_v34  ;;  %v5456_v49 = vadd.f32 %v5392_v45, %v5264_v21  ;;  %8669 = vpow2.f32 %v4986_v24  ;;  %v4177_v20 = vmax.f32 %v16868_v22, %v3921_v37  ;;  %v14389_v15 = vadd.f32 %v14287_v44, %v14021_v5  ;;  %v14403_v51 = vpop.f32.mrb[149].mxu1  ;;  %v16873_v21 = vld [vmem:[#allocation350_spill] sm:$0xff] }
 0x3e3   : > { %v8654_v27 = vpop.eup %8653  ;;  %v6972_v63 = vmul.f32 -1.442695, %v6157_v13  ;;  %v5520_v32 = vadd.f32 %v8652_v46, %v5328_v39  ;;  %v5584_v48 = vmul.f32 %v8652_v46, %v16869_v38  ;;  %8671 = vpow2.f32 %v5178_v1  ;;  %v16874_v39 = vld [vmem:[#allocation356_spill] sm:$0xff] }
 0x3e4   : > { %v8656_v35 = vpop.eup %8655  ;;  %v5776_v26 = vmul.f32 %v8654_v27, %v14281_v18  ;;  %v4241_v53 = vmax.f32 %v4177_v20, %v14360_v62  ;;  %v4182_v7 = vmax.f32 %v16870_v60, %v14381_v36  ;;  %v14401_v5 = vmul.f32 0.5, %v14389_v15  ;;  %v16872_v18 = vld [vmem:[#allocation13_spill] sm:$0xff] }
 0x3e5   : > { %v8658_v28 = vpop.eup %8657  ;;  %8673 = vpow2.f32 %v6972_v63  ;;  %v5648_v29 = vadd.f32 %v5584_v48, %v5456_v49  ;;  %v5712_v24 = vadd.f32 %v8654_v27, %v5520_v32  ;;  %v5968_v1 = vmul.f32 %v8656_v35, %v14237_v14  ;;  %v16875_v27 = vld [vmem:[#allocation340_spill] sm:$0xff] }
 0x3e6   : > { %v5267_v55 = vmul.f32 %v8658_v28, %v16871_v41  ;;  %v4305_v54 = vsub.f32 %v16872_v18, %v4241_v53  ;;  %v4497_v33 = vsub.f32 %v16873_v21, %v4241_v53  ;;  %v4689_v40 = vsub.f32 %v16874_v39, %v4241_v53 }
 0x3e7   : > { %v8660_v45 = vpop.eup %8659  ;;  %v5840_v34 = vadd.f32 %v5776_v26, %v5648_v29  ;;  %v5904_v13 = vadd.f32 %v8656_v35, %v5712_v24  ;;  %v4881_v46 = vsub.f32 %v3921_v37, %v4241_v53  ;;  %v5073_v22 = vsub.f32 %v14360_v62, %v4241_v53  ;;  %v16876_v53 = vld [vmem:[#allocation198_spill] sm:$0xff] }
 0x3e8   : > { %v8662_v20 = vpop.eup %8661  ;;  %v5331_v49 = vadd.f32 %v8660_v45, %v8658_v28  ;;  %v5395_v63 = vmul.f32 %v8660_v45, %v16875_v27  ;;  %v4406_v14 = vmul.f32 1.442695, %v4305_v54  ;;  %v4598_v32 = vmul.f32 1.442695, %v4497_v33  ;;  %v16878_v33 = vld [vmem:[#allocation203_spill] sm:$0xff]  ;;  %v16880_v27 = vld [vmem:[#allocation361_spill] sm:$0xff] }
 0x3e9   : > { %v8664_v38 = vpop.eup %8663  ;;  %6604 = vst [vmem:[%s13384_s30 + $0x100] sm:$0xff] %v8662_v20  ;;  %v6032_v48 = vadd.f32 %v5968_v1, %v5840_v34  ;;  %8675 = vrcp.f32 %v5904_v13  ;;  %v4790_v60 = vmul.f32 1.442695, %v4689_v40  ;;  %v4982_v41 = vmul.f32 1.442695, %v4881_v46  ;;  %v16877_v1 = vld [vmem:[#allocation349_spill] sm:$0xff] }
 0x3ea   : > { %v8666_v18 = vpop.eup %8665  ;;  %v6415_v21 = vadd.f32 1.0, %v8664_v38  ;;  %v5459_v39 = vadd.f32 %v5395_v63, %v5267_v55  ;;  %8677 = vpow2.f32 %v4406_v14  ;;  %v5174_v35 = vmul.f32 1.442695, %v5073_v22  ;;  %v16879_v34 = vld [vmem:[#allocation130_spill] sm:$0xff]  ;;  %v16881_v14 = vld [vmem:[#allocation363_spill] sm:$0xff]  ;;  %v14429_v38 = vpop.f32.mrb[150].mxu0 }
 0x3eb   : > { %v8668_v37 = vpop.eup %8667  ;;  %v6162_v62 = vmul.f32 %v8666_v18, %v14357_v57  ;;  %8679 = vpow2.f32 %v4598_v32  ;;  %v4246_v26 = vmax.f32 %v4182_v7, %v14378_v4  ;;  %v14417_v28 = vadd.f32 %v14287_v44, %v16876_v53 }
 0x3ec   : > { %v8670_v29 = vpop.eup %8669  ;;  %8681 = vrcp.f32 %v6415_v21  ;;  %v5523_v24 = vadd.f32 %v8668_v37, %v5331_v49  ;;  %v5587_v54 = vmul.f32 %v8668_v37, %v16877_v1  ;;  %v14422_v55 = vadd.f32 %v14287_v44, %v16878_v33 }
 0x3ed   : > { %v8672_v40 = vpop.eup %8671  ;;  %v6977_v45 = vmul.f32 -1.442695, %v6162_v62  ;;  %v5779_v57 = vmul.f32 %v8670_v29, %v14295_v12  ;;  %8683 = vpow2.f32 %v4790_v60  ;;  %v4310_v7 = vsub.f32 %v16879_v34, %v4246_v26  ;;  %v14431_v60 = vpop.f32.mrb[150].mxu1 }
 0x3ee   : > { %v5651_v13 = vadd.f32 %v5587_v54, %v5459_v39  ;;  %v5715_v46 = vadd.f32 %v8670_v29, %v5523_v24  ;;  %v5971_v22 = vmul.f32 %v8672_v40, %v14291_v19  ;;  %8685 = vpow2.f32 %v4982_v41  ;;  %16882 = vst [vmem:[#allocation82_spill] sm:$0xff] %v14431_v60 }
 0x3ef   : > { %v8674_v20 = vpop.eup %8673  ;;  %8687 = vpow2.f32 %v6977_v45  ;;  %v4416_v49 = vmul.f32 1.442695, %v4310_v7  ;;  %v4502_v63 = vsub.f32 %v16880_v27, %v4246_v26  ;;  %v4694_v32 = vsub.f32 %v16881_v14, %v4246_v26  ;;  %v16884_v45 = vld [vmem:[#allocation371_spill] sm:$0xff]  ;;  %v16887_v27 = vld [vmem:[#allocation348_spill] sm:$0xff] }
 0x3f0   : > { %v6413_v18 = vadd.f32 1.0, %v8674_v20  ;;  %v5843_v21 = vadd.f32 %v5779_v57, %v5651_v13  ;;  %v5907_v12 = vadd.f32 %v8672_v40, %v5715_v46  ;;  %8689 = vpow2.f32 %v5174_v35  ;;  %v16883_v35 = vld [vmem:[#allocation57_spill] sm:$0xff] }
 0x3f1   : > { %8691 = vpow2.f32 %v4416_v49  ;;  %v4608_v39 = vmul.f32 1.442695, %v4502_v63  ;;  %v4800_v37 = vmul.f32 1.442695, %v4694_v32  ;;  %v4886_v19 = vsub.f32 %v14381_v36, %v4246_v26  ;;  %v16886_v13 = vld [vmem:[#allocation85_spill] sm:$0xff] }
 0x3f2   : > { %8693 = vrcp.f32 %v6413_v18  ;;  %v14434_v41 = vadd.f32 %v5971_v22, %v5843_v21  ;;  %v5078_v62 = vsub.f32 %v14378_v4, %v4246_v26  ;;  %v3924_v53 = vmul.f32 0.5, %v14417_v28  ;;  %v16885_v26 = vld [vmem:[#allocation27_spill] sm:$0xff]  ;;  %v16888_v32 = vld [vmem:[#allocation49_spill] sm:$0xff] }
 0x3f3   : > { %v8676_v29 = vpop.eup %8675  ;;  %8695 = vrcp.f32 %v5907_v12  ;;  %v4992_v24 = vmul.f32 1.442695, %v4886_v19  ;;  %v14439_v1 = vmul.f32 0.5, %v14422_v55  ;;  %v14443_v54 = vadd.f32 %v14287_v44, %v16883_v35  ;;  %v14462_v12 = vpop.f32.mrb[151].mxu0 }
 0x3f4   : > { %v8678_v33 = vpop.eup %8677  ;;  %v6160_v36 = vmul.f32 %v8676_v29, %v6032_v48  ;;  %8697 = vpow2.f32 %v4608_v39  ;;  %v5184_v40 = vmul.f32 1.442695, %v5078_v62  ;;  %v4180_v57 = vmax.f32 %v16884_v45, %v3924_v53  ;;  %16889 = vst [vmem:[#allocation111_spill] sm:$0xff] %v14462_v12  ;;  %v16890_v62 = vld [vmem:[#allocation352_spill] sm:$0xff]  ;;  %v16893_v45 = vld [vmem:[#allocation362_spill] sm:$0xff]  ;;  %v16895_v12 = vld [vmem:[#allocation15_spill] sm:$0xff] }
 0x3f5   : > { %v8680_v4 = vpop.eup %8679  ;;  %v5265_v34 = vmul.f32 %v8678_v33, %v16885_v26  ;;  %8699 = vpow2.f32 %v4800_v37  ;;  %v14448_v7 = vmul.f32 0.5, %v14443_v54  ;;  %v14452_v46 = vadd.f32 %v14287_v44, %v16886_v13 }
 0x3f6   : > { %v8682_v22 = vpop.eup %8681  ;;  %v6975_v20 = vmul.f32 -1.442695, %v6160_v36  ;;  %v5329_v49 = vadd.f32 %v8680_v4, %v8678_v33  ;;  %v5393_v48 = vmul.f32 %v8680_v4, %v16887_v27  ;;  %8701 = vpow2.f32 %v4992_v24  ;;  %v14465_v24 = vpop.f32.mrb[151].mxu1  ;;  %v16892_v36 = vld [vmem:[#allocation36_spill] sm:$0xff] }
 0x3f7   : > { %v8684_v63 = vpop.eup %8683  ;;  %6607 = vst [vmem:[%s13384_s30 + $0x118] sm:$0xff] %v8682_v22  ;;  %8703 = vpow2.f32 %v5184_v40  ;;  %v4244_v14 = vmax.f32 %v4180_v57, %v14401_v5  ;;  %v4183_v18 = vmax.f32 %v16888_v32, %v14448_v7  ;;  %v14460_v21 = vmul.f32 0.5, %v14452_v46  ;;  %16891 = vst [vmem:[#allocation71_spill] sm:$0xff] %v14465_v24  ;;  %v16894_v4 = vld [vmem:[#allocation368_spill] sm:$0xff] }
 0x3f8   : > { %v8686_v39 = vpop.eup %8685  ;;  %8705 = vpow2.f32 %v6975_v20  ;;  %v5457_v37 = vadd.f32 %v5393_v48, %v5265_v34  ;;  %v5521_v19 = vadd.f32 %v8684_v63, %v5329_v49  ;;  %v5585_v29 = vmul.f32 %v8684_v63, %v16890_v62 }
 0x3f9   : > { %v8688_v35 = vpop.eup %8687  ;;  %v5777_v33 = vmul.f32 %v8686_v39, %v14364_v16  ;;  %v4308_v40 = vsub.f32 %v16892_v36, %v4244_v14  ;;  %v4500_v57 = vsub.f32 %v16893_v45, %v4244_v14  ;;  %v4692_v26 = vsub.f32 %v16894_v4, %v4244_v14 }
 0x3fa   : > { %v8690_v13 = vpop.eup %8689  ;;  %v6418_v22 = vadd.f32 1.0, %v8688_v35  ;;  %v5649_v27 = vadd.f32 %v5585_v29, %v5457_v37  ;;  %v5713_v20 = vadd.f32 %v8686_v39, %v5521_v19  ;;  %v4884_v34 = vsub.f32 %v3924_v53, %v4244_v14  ;;  %v16896_v29 = vld [vmem:[#allocation83_spill] sm:$0xff] }
 0x3fb   : > { %v8692_v49 = vpop.eup %8691  ;;  %v5969_v48 = vmul.f32 %v8690_v13, %v14303_v30  ;;  %v4412_v63 = vmul.f32 1.442695, %v4308_v40  ;;  %v4604_v32 = vmul.f32 1.442695, %v4500_v57  ;;  %v4796_v62 = vmul.f32 1.442695, %v4692_v26 }
 0x3fc   : > { %v8694_v24 = vpop.eup %8693  ;;  %8707 = vrcp.f32 %v6418_v22  ;;  %v5841_v16 = vadd.f32 %v5777_v33, %v5649_v27  ;;  %v5905_v36 = vadd.f32 %v8690_v13, %v5713_v20  ;;  %v5270_v45 = vmul.f32 %v8692_v49, %v16895_v12  ;;  %v16897_v12 = vld [vmem:[#allocation357_spill] sm:$0xff] }
 0x3fd   : > { %v8696_v60 = vpop.eup %8695  ;;  %6605 = vst [vmem:[%s13384_s30 + $0x108] sm:$0xff] %v8694_v24  ;;  %8709 = vpow2.f32 %v4412_v63  ;;  %v4988_v4 = vmul.f32 1.442695, %v4884_v34  ;;  %v5076_v37 = vsub.f32 %v14401_v5, %v4244_v14  ;;  %v4247_v53 = vmax.f32 %v4183_v18, %v14439_v1  ;;  %v16898_v5 = vld [vmem:[#allocation360_spill] sm:$0xff]  ;;  %v16899_v18 = vld [vmem:[#allocation134_spill] sm:$0xff]  ;;  %v16900_v63 = vld [vmem:[#allocation365_spill] sm:$0xff] }
 0x3fe   : > { %v8698_v39 = vpop.eup %8697  ;;  %v6163_v30 = vmul.f32 %v8696_v60, %v14434_v41  ;;  %v6033_v19 = vadd.f32 %v5969_v48, %v5841_v16  ;;  %8711 = vrcp.f32 %v5905_v36  ;;  %v14479_v35 = vadd.f32 %v14287_v44, %v16896_v29 }
 0x3ff   : > { %v8700_v33 = vpop.eup %8699  ;;  %v5334_v40 = vadd.f32 %v8698_v39, %v8692_v49  ;;  %v5398_v57 = vmul.f32 %v8698_v39, %v16897_v12  ;;  %8713 = vpow2.f32 %v4604_v32  ;;  %v5180_v24 = vmul.f32 1.442695, %v5076_v37  ;;  %v16901_v39 = vld [vmem:[#allocation373_spill] sm:$0xff] }
 0x400   : > { %v8702_v26 = vpop.eup %8701  ;;  %v6978_v13 = vmul.f32 -1.442695, %v6163_v30  ;;  %v5590_v14 = vmul.f32 %v8700_v33, %v16898_v5  ;;  %8715 = vpow2.f32 %v4796_v62  ;;  %v4311_v22 = vsub.f32 %v16899_v18, %v4247_v53  ;;  %v16902_v5 = vld [vmem:[#allocation126_spill] sm:$0xff] }
 0x401   : > { %v8704_v60 = vpop.eup %8703  ;;  %v5462_v41 = vadd.f32 %v5398_v57, %v5270_v45  ;;  %v5526_v27 = vadd.f32 %v8700_v33, %v5334_v40  ;;  %v5782_v20 = vmul.f32 %v8702_v26, %v14373_v31  ;;  %8717 = vpow2.f32 %v4988_v4 }
 0x402   : > { %v8706_v34 = vpop.eup %8705  ;;  %8719 = vpow2.f32 %v6978_v13  ;;  %v5974_v49 = vmul.f32 %v8704_v60, %v14369_v56  ;;  %v4418_v48 = vmul.f32 1.442695, %v4311_v22  ;;  %v4503_v32 = vsub.f32 %v16900_v63, %v4247_v53 }
 0x403   : > { %v6416_v16 = vadd.f32 1.0, %v8706_v34  ;;  %v5654_v36 = vadd.f32 %v5590_v14, %v5462_v41  ;;  %v5718_v37 = vadd.f32 %v8702_v26, %v5526_v27  ;;  %8721 = vpow2.f32 %v5180_v24  ;;  %v16904_v34 = vld [vmem:[#allocation359_spill] sm:$0xff] }
 0x404   : > { %8723 = vpow2.f32 %v4418_v48  ;;  %v4610_v62 = vmul.f32 1.442695, %v4503_v32  ;;  %v4695_v45 = vsub.f32 %v16901_v39, %v4247_v53  ;;  %v4887_v30 = vsub.f32 %v14448_v7, %v4247_v53  ;;  %v16905_v32 = vld [vmem:[#allocation366_spill] sm:$0xff] }
 0x405   : > { %8725 = vrcp.f32 %v6416_v16  ;;  %v5846_v31 = vadd.f32 %v5782_v20, %v5654_v36  ;;  %v5910_v4 = vadd.f32 %v8704_v60, %v5718_v37  ;;  %v5079_v29 = vsub.f32 %v14439_v1, %v4247_v53  ;;  %v16903_v1 = vld [vmem:[#allocation377_spill] sm:$0xff] }
 0x406   : > { %v8708_v56 = vpop.eup %8707  ;;  %8727 = vpow2.f32 %v4610_v62  ;;  %v4802_v33 = vmul.f32 1.442695, %v4695_v45  ;;  %v4994_v40 = vmul.f32 1.442695, %v4887_v30  ;;  %v14491_v12 = vmul.f32 0.5, %v14479_v35  ;;  %v16906_v45 = vld [vmem:[#allocation137_spill] sm:$0xff] }
 0x407   : > { %v8710_v57 = vpop.eup %8709  ;;  %6610 = vst [vmem:[%s13384_s30 + $0x130] sm:$0xff] %v8708_v56  ;;  %v6038_v24 = vadd.f32 %v5974_v49, %v5846_v31  ;;  %8729 = vrcp.f32 %v5910_v4  ;;  %v5186_v26 = vmul.f32 1.442695, %v5079_v29  ;;  %v14496_v7 = vadd.f32 %v14287_v44, %v14127_v23  ;;  %v16907_v29 = vld [vmem:[#allocation372_spill] sm:$0xff] }
 0x408   : > { %v8712_v13 = vpop.eup %8711  ;;  %v5268_v14 = vmul.f32 %v8710_v57, %v16902_v5  ;;  %8731 = vpow2.f32 %v4802_v33  ;;  %v4181_v53 = vmax.f32 %v16903_v1, %v14491_v12  ;;  %v14503_v18 = vadd.f32 %v14287_v44, %v14130_v10  ;;  %v16908_v33 = vld [vmem:[#allocation42_spill] sm:$0xff] }
 0x409   : > { %v8714_v22 = vpop.eup %8713  ;;  %v6161_v60 = vmul.f32 %v8712_v13, %v6033_v19  ;;  %8733 = vpow2.f32 %v4994_v40  ;;  %v14506_v41 = vmul.f32 0.5, %v14496_v7  ;;  %v14510_v23 = vadd.f32 %v14287_v44, %v14132_v42 }
 0x40a   : > { %v8716_v27 = vpop.eup %8715  ;;  %v5332_v20 = vadd.f32 %v8714_v22, %v8710_v57  ;;  %v5396_v49 = vmul.f32 %v8714_v22, %v16904_v34  ;;  %8735 = vpow2.f32 %v5186_v26  ;;  %v4245_v48 = vmax.f32 %v4181_v53, %v14460_v21  ;;  %v14525_v57 = vpop.f32.mrb[152].mxu0 }
 0x40b   : > { %v8718_v63 = vpop.eup %8717  ;;  %v6976_v10 = vmul.f32 -1.442695, %v6161_v60  ;;  %v5588_v16 = vmul.f32 %v8716_v27, %v16905_v32  ;;  %v14516_v19 = vmul.f32 0.5, %v14503_v18  ;;  %v14519_v36 = vmul.f32 0.5, %v14510_v23  ;;  %v14528_v53 = vpop.f32.mrb[152].mxu1  ;;  %v16909_v60 = vld [vmem:[#allocation127_spill] sm:$0xff] }
 0x40c   : > { %v8720_v37 = vpop.eup %8719  ;;  %v5460_v42 = vadd.f32 %v5396_v49, %v5268_v14  ;;  %v5524_v62 = vadd.f32 %v8716_v27, %v5332_v20  ;;  %v5780_v39 = vmul.f32 %v8718_v63, %v14417_v28  ;;  %v4309_v30 = vsub.f32 %v16906_v45, %v4245_v48  ;;  %v14530_v28 = vpop.f32.mrb[153].mxu0 }
 0x40d   : > { %v8722_v31 = vpop.eup %8721  ;;  %v6419_v4 = vadd.f32 1.0, %v8720_v37  ;;  %8737 = vpow2.f32 %v6976_v10  ;;  %v4501_v56 = vsub.f32 %v16907_v29, %v4245_v48  ;;  %v4693_v40 = vsub.f32 %v16908_v33, %v4245_v48  ;;  %v14533_v49 = vpop.f32.mrb[153].mxu1 }
 0x40e   : > { %v8724_v26 = vpop.eup %8723  ;;  %v5652_v13 = vadd.f32 %v5588_v16, %v5460_v42  ;;  %v5716_v5 = vadd.f32 %v8718_v63, %v5524_v62  ;;  %v5972_v14 = vmul.f32 %v8722_v31, %v14389_v15  ;;  %v4414_v1 = vmul.f32 1.442695, %v4309_v30  ;;  %v16910_v42 = vld [vmem:[#allocation364_spill] sm:$0xff] }
 0x40f   : > { %v8726_v22 = vpop.eup %8725  ;;  %8739 = vrcp.f32 %v6419_v4  ;;  %v5271_v27 = vmul.f32 %v8724_v26, %v16909_v60  ;;  %v4606_v20 = vmul.f32 1.442695, %v4501_v56  ;;  %v4798_v34 = vmul.f32 1.442695, %v4693_v40 }
 0x410   : > { %v8728_v10 = vpop.eup %8727  ;;  %6608 = vst [vmem:[%s13384_s30 + $0x120] sm:$0xff] %v8726_v22  ;;  %v5844_v32 = vadd.f32 %v5780_v39, %v5652_v13  ;;  %v5908_v16 = vadd.f32 %v8722_v31, %v5716_v5  ;;  %8741 = vpow2.f32 %v4414_v1  ;;  %v4885_v15 = vsub.f32 %v14491_v12, %v4245_v48  ;;  %v16911_v39 = vld [vmem:[#allocation370_spill] sm:$0xff] }
 0x411   : > { %v8730_v63 = vpop.eup %8729  ;;  %v5335_v37 = vadd.f32 %v8728_v10, %v8724_v26  ;;  %v5399_v62 = vmul.f32 %v8728_v10, %v16910_v42  ;;  %8743 = vpow2.f32 %v4606_v20  ;;  %v5077_v45 = vsub.f32 %v14460_v21, %v4245_v48  ;;  %v14556_v20 = vpop.f32.mrb[154].mxu0  ;;  %v16913_v42 = vld [vmem:[#allocation141_spill] sm:$0xff] }
 0x412   : > { %v8732_v30 = vpop.eup %8731  ;;  %v6166_v4 = vmul.f32 %v8730_v63, %v6038_v24  ;;  %v6036_v29 = vadd.f32 %v5972_v14, %v5844_v32  ;;  %8745 = vrcp.f32 %v5908_v16  ;;  %v4990_v56 = vmul.f32 1.442695, %v4885_v15  ;;  %v16912_v24 = vld [vmem:[#allocation387_spill] sm:$0xff]  ;;  %v14559_v16 = vpop.f32.mrb[154].mxu1 }
 0x413   : > { %v8734_v33 = vpop.eup %8733  ;;  %v5463_v40 = vadd.f32 %v5399_v62, %v5271_v27  ;;  %v5527_v22 = vadd.f32 %v8732_v30, %v5335_v37  ;;  %v5591_v31 = vmul.f32 %v8732_v30, %v16911_v39  ;;  %8747 = vpow2.f32 %v4798_v34 }
 0x414   : > { %v8736_v13 = vpop.eup %8735  ;;  %v6981_v12 = vmul.f32 -1.442695, %v6166_v4  ;;  %v5783_v26 = vmul.f32 %v8734_v33, %v14443_v54  ;;  %8749 = vpow2.f32 %v4990_v56  ;;  %v5182_v5 = vmul.f32 1.442695, %v5077_v45  ;;  %v16914_v45 = vld [vmem:[#allocation378_spill] sm:$0xff]  ;;  %v16915_v56 = vld [vmem:[#allocation381_spill] sm:$0xff] }
 0x415   : > { %v5655_v1 = vadd.f32 %v5591_v31, %v5463_v40  ;;  %v5719_v60 = vadd.f32 %v8734_v33, %v5527_v22  ;;  %v5975_v21 = vmul.f32 %v8736_v13, %v14422_v55  ;;  %v4186_v48 = vmax.f32 %v16912_v24, %v14516_v19  ;;  %v16916_v31 = vld [vmem:[#allocation131_spill] sm:$0xff]  ;;  %v16918_v24 = vld [vmem:[#allocation369_spill] sm:$0xff] }
 0x416   : > { %8751 = vpow2.f32 %v6981_v12  ;;  %v14546_v14 = vadd.f32 %v14287_v44, %v14146_v9  ;;  %v14550_v27 = vadd.f32 %v14287_v44, %v14169_v17  ;;  %v14554_v54 = vadd.f32 %v14287_v44, %v14173_v8 }
 0x417   : > { %v8738_v34 = vpop.eup %8737  ;;  %v5847_v55 = vadd.f32 %v5783_v26, %v5655_v1  ;;  %v5911_v10 = vadd.f32 %v8736_v13, %v5719_v60  ;;  %8753 = vpow2.f32 %v5182_v5  ;;  %v4250_v32 = vmax.f32 %v4186_v48, %v14506_v41  ;;  %v16917_v5 = vld [vmem:[#allocation390_spill] sm:$0xff] }
 0x418   : > { %v6417_v9 = vadd.f32 1.0, %v8738_v34  ;;  %v14562_v15 = vmul.f32 0.5, %v14546_v14  ;;  %v14565_v17 = vmul.f32 0.5, %v14550_v27  ;;  %v14568_v8 = vmul.f32 0.5, %v14554_v54 }
 0x419   : > { %v8740_v63 = vpop.eup %8739  ;;  %v6039_v37 = vadd.f32 %v5975_v21, %v5847_v55  ;;  %8755 = vrcp.f32 %v5911_v10  ;;  %v4314_v62 = vsub.f32 %v16913_v42, %v4250_v32  ;;  %v4506_v30 = vsub.f32 %v16914_v45, %v4250_v32 }
 0x41a   : > { %v8742_v4 = vpop.eup %8741  ;;  %6611 = vst [vmem:[%s13384_s30 + $0x138] sm:$0xff] %v8740_v63  ;;  %8757 = vrcp.f32 %v6417_v9  ;;  %v4698_v33 = vsub.f32 %v16915_v56, %v4250_v32  ;;  %v4890_v40 = vsub.f32 %v14516_v19, %v4250_v32  ;;  %v5082_v22 = vsub.f32 %v14506_v41, %v4250_v32 }
 0x41b   : > { %v8744_v39 = vpop.eup %8743  ;;  %v5269_v13 = vmul.f32 %v8742_v4, %v16916_v31  ;;  %v4424_v12 = vmul.f32 1.442695, %v4314_v62  ;;  %v4616_v26 = vmul.f32 1.442695, %v4506_v30  ;;  %v4184_v1 = vmax.f32 %v16917_v5, %v14562_v15  ;;  %v16919_v62 = vld [vmem:[#allocation50_spill] sm:$0xff]  ;;  %v14582_v30 = vpop.f32.mrb[155].mxu0 }
 0x41c   : > { %v8746_v60 = vpop.eup %8745  ;;  %v5333_v21 = vadd.f32 %v8744_v39, %v8742_v4  ;;  %v5397_v48 = vmul.f32 %v8744_v39, %v16918_v24  ;;  %v4808_v34 = vmul.f32 1.442695, %v4698_v33  ;;  %v5000_v55 = vmul.f32 1.442695, %v4890_v40  ;;  %v16920_v33 = vld [vmem:[#allocation146_spill] sm:$0xff] }
 0x41d   : > { %v8748_v10 = vpop.eup %8747  ;;  %v6164_v9 = vmul.f32 %v8746_v60, %v6036_v29  ;;  %8759 = vpow2.f32 %v4424_v12  ;;  %v5192_v19 = vmul.f32 1.442695, %v5082_v22  ;;  %v4248_v41 = vmax.f32 %v4184_v1, %v14519_v36  ;;  %v16921_v22 = vld [vmem:[#allocation380_spill] sm:$0xff] }
 0x41e   : > { %v8750_v32 = vpop.eup %8749  ;;  %v5461_v63 = vadd.f32 %v5397_v48, %v5269_v13  ;;  %v5525_v42 = vadd.f32 %v8748_v10, %v5333_v21  ;;  %v5589_v45 = vmul.f32 %v8748_v10, %v16919_v62  ;;  %8761 = vpow2.f32 %v4616_v26  ;;  %v16922_v60 = vld [vmem:[#allocation384_spill] sm:$0xff] }
 0x41f   : > { %v6979_v56 = vmul.f32 -1.442695, %v6164_v9  ;;  %v5781_v4 = vmul.f32 %v8750_v32, %v14479_v35  ;;  %8763 = vpow2.f32 %v4808_v34  ;;  %v4312_v40 = vsub.f32 %v16920_v33, %v4248_v41  ;;  %v14590_v9 = vpop.f32.mrb[155].mxu1 }
 0x420   : > { %v8752_v39 = vpop.eup %8751  ;;  %v5653_v29 = vadd.f32 %v5589_v45, %v5461_v63  ;;  %v5717_v31 = vadd.f32 %v8750_v32, %v5525_v42  ;;  %8765 = vpow2.f32 %v5000_v55  ;;  %v4504_v12 = vsub.f32 %v16921_v22, %v4248_v41 }
 0x421   : > { %v8754_v5 = vpop.eup %8753  ;;  %v6422_v13 = vadd.f32 1.0, %v8752_v39  ;;  %8767 = vpow2.f32 %v6979_v56  ;;  %v4420_v1 = vmul.f32 1.442695, %v4312_v40  ;;  %v4696_v26 = vsub.f32 %v16922_v60, %v4248_v41  ;;  %v16924_v39 = vld [vmem:[#allocation132_spill] sm:$0xff] }
 0x422   : > { %v5845_v21 = vadd.f32 %v5781_v4, %v5653_v29  ;;  %v5909_v24 = vadd.f32 %v8754_v5, %v5717_v31  ;;  %v5973_v35 = vmul.f32 %v8754_v5, %v14452_v46  ;;  %8769 = vpow2.f32 %v5192_v19  ;;  %v16923_v46 = vld [vmem:[#allocation391_spill] sm:$0xff]  ;;  %v16925_v5 = vld [vmem:[#allocation41_spill] sm:$0xff] }
 0x423   : > { %v8756_v48 = vpop.eup %8755  ;;  %8771 = vrcp.f32 %v6422_v13  ;;  %v4612_v34 = vmul.f32 1.442695, %v4504_v12  ;;  %v4804_v10 = vmul.f32 1.442695, %v4696_v26  ;;  %v4888_v55 = vsub.f32 %v14562_v15, %v4248_v41  ;;  %v16927_v26 = vld [vmem:[#allocation375_spill] sm:$0xff] }
 0x424   : > { %v8758_v32 = vpop.eup %8757  ;;  %v6167_v63 = vmul.f32 %v8756_v48, %v6039_v37  ;;  %v6037_v42 = vadd.f32 %v5973_v35, %v5845_v21  ;;  %8773 = vrcp.f32 %v5909_v24  ;;  %v5080_v62 = vsub.f32 %v14519_v36, %v4248_v41  ;;  %v14603_v37 = vld [vmem:[%s15174_s2] ss:$0 sm:$0xff]  ;;  %v16928_v24 = vld [vmem:[#allocation382_spill] sm:$0xff]  ;;  %v16929_v48 = vld [vmem:[#allocation388_spill] sm:$0xff] }
 0x425   : > { %6609 = vst [vmem:[%s13384_s30 + $0x128] sm:$0xff] %v8758_v32  ;;  %8775 = vpow2.f32 %v4420_v1  ;;  %v4996_v45 = vmul.f32 1.442695, %v4888_v55  ;;  %v4187_v19 = vmax.f32 %v16923_v46, %v14568_v8  ;;  %v14598_v56 = vadd.f32 %v14287_v44, %v14195_v3  ;;  %v16926_v1 = vld [vmem:[#allocation23_spill] sm:$0xff] }
 0x426   : > { %v6982_v4 = vmul.f32 -1.442695, %v6167_v63  ;;  %8777 = vpow2.f32 %v4612_v34  ;;  %v5188_v15 = vmul.f32 1.442695, %v5080_v62  ;;  %v14607_v36 = vadd.f32 %v14603_v37, %v14199_v58 }
 0x427   : > { %v8760_v41 = vpop.eup %8759  ;;  %8779 = vpow2.f32 %v4804_v10  ;;  %v4251_v33 = vmax.f32 %v4187_v19, %v14565_v17  ;;  %v14611_v40 = vmul.f32 0.5, %v14598_v56  ;;  %v14615_v3 = vadd.f32 %v14603_v37, %v14264_v25 }
 0x428   : > { %v8762_v44 = vpop.eup %8761  ;;  %8781 = vpow2.f32 %v6982_v4  ;;  %v5274_v29 = vmul.f32 %v8760_v41, %v16924_v39  ;;  %v14619_v31 = vmul.f32 0.5, %v14607_v36  ;;  %v14623_v58 = vadd.f32 %v14603_v37, %v14267_v0 }
 0x429   : > { %v8764_v22 = vpop.eup %8763  ;;  %v5338_v12 = vadd.f32 %v8762_v44, %v8760_v41  ;;  %v5402_v13 = vmul.f32 %v8762_v44, %v16925_v5  ;;  %8783 = vpow2.f32 %v4996_v45  ;;  %v4315_v60 = vsub.f32 %v16926_v1, %v4251_v33 }
 0x42a   : > { %v8766_v25 = vpop.eup %8765  ;;  %v5594_v21 = vmul.f32 %v8764_v22, %v16927_v26  ;;  %8785 = vpow2.f32 %v5188_v15  ;;  %v4507_v35 = vsub.f32 %v16928_v24, %v4251_v33  ;;  %v4699_v34 = vsub.f32 %v16929_v48, %v4251_v33 }
 0x42b   : > { %v8768_v10 = vpop.eup %8767  ;;  %v5466_v55 = vadd.f32 %v5402_v13, %v5274_v29  ;;  %v5530_v0 = vadd.f32 %v8764_v22, %v5338_v12  ;;  %v5786_v32 = vmul.f32 %v8766_v25, %v14503_v18  ;;  %v4426_v63 = vmul.f32 1.442695, %v4315_v60  ;;  %v16930_v18 = vld [vmem:[#allocation395_spill] sm:$0xff] }
 0x42c   : > { %v8770_v62 = vpop.eup %8769  ;;  %v6420_v46 = vadd.f32 1.0, %v8768_v10  ;;  %v4618_v45 = vmul.f32 1.442695, %v4507_v35  ;;  %v4810_v19 = vmul.f32 1.442695, %v4699_v34  ;;  %v4891_v4 = vsub.f32 %v14568_v8, %v4251_v33 }
 0x42d   : > { %v8772_v41 = vpop.eup %8771  ;;  %v5658_v44 = vadd.f32 %v5594_v21, %v5466_v55  ;;  %v5722_v15 = vadd.f32 %v8766_v25, %v5530_v0  ;;  %v5978_v39 = vmul.f32 %v8770_v62, %v14496_v7  ;;  %8787 = vpow2.f32 %v4426_v63  ;;  %v16931_v21 = vld [vmem:[#allocation139_spill] sm:$0xff]  ;;  %v16932_v55 = vld [vmem:[#allocation374_spill] sm:$0xff] }
 0x42e   : > { %v8774_v5 = vpop.eup %8773  ;;  %6614 = vst [vmem:[%s13384_s30 + $0x150] sm:$0xff] %v8772_v41  ;;  %8789 = vrcp.f32 %v6420_v46  ;;  %v5002_v29 = vmul.f32 1.442695, %v4891_v4  ;;  %v5083_v22 = vsub.f32 %v14565_v17, %v4251_v33  ;;  %v4185_v12 = vmax.f32 %v16930_v18, %v14619_v31  ;;  %v14639_v33 = vpop.f32.mrb[156].mxu1  ;;  %v16933_v0 = vld [vmem:[#allocation379_spill] sm:$0xff]  ;;  %v16934_v63 = vld [vmem:[#allocation22_spill] sm:$0xff] }
 0x42f   : > { %v8776_v13 = vpop.eup %8775  ;;  %v6165_v1 = vmul.f32 %v8774_v5, %v6037_v42  ;;  %v5850_v60 = vadd.f32 %v5786_v32, %v5658_v44  ;;  %v5914_v26 = vadd.f32 %v8770_v62, %v5722_v15  ;;  %8791 = vpow2.f32 %v4618_v45  ;;  %v14644_v46 = vpop.f32.mrb[157].mxu1  ;;  %v16935_v41 = vld [vmem:[#allocation386_spill] sm:$0xff] }
 0x430   : > { %v8778_v8 = vpop.eup %8777  ;;  %v5272_v25 = vmul.f32 %v8776_v13, %v16931_v21  ;;  %8793 = vpow2.f32 %v4810_v19  ;;  %v5194_v7 = vmul.f32 1.442695, %v5083_v22  ;;  %v4249_v24 = vmax.f32 %v4185_v12, %v14611_v40  ;;  %v14647_v15 = vpop.f32.mrb[158].mxu1 }
 0x431   : > { %v8780_v35 = vpop.eup %8779  ;;  %v6980_v48 = vmul.f32 -1.442695, %v6165_v1  ;;  %v6042_v34 = vadd.f32 %v5978_v39, %v5850_v60  ;;  %8795 = vrcp.f32 %v5914_v26  ;;  %v5336_v17 = vadd.f32 %v8778_v8, %v8776_v13  ;;  %v14650_v12 = vpop.f32.mrb[159].mxu1  ;;  %v16936_v26 = vld [vmem:[#allocation392_spill] sm:$0xff] }
 0x432   : > { %v8782_v10 = vpop.eup %8781  ;;  %v5400_v42 = vmul.f32 %v8778_v8, %v16932_v55  ;;  %v5592_v32 = vmul.f32 %v8780_v35, %v16933_v0  ;;  %8797 = vpow2.f32 %v5002_v29  ;;  %v4313_v62 = vsub.f32 %v16934_v63, %v4249_v24 }
 0x433   : > { %v8784_v45 = vpop.eup %8783  ;;  %v6423_v19 = vadd.f32 1.0, %v8782_v10  ;;  %8799 = vpow2.f32 %v6980_v48  ;;  %v5528_v4 = vadd.f32 %v8780_v35, %v5336_v17  ;;  %v4505_v44 = vsub.f32 %v16935_v41, %v4249_v24  ;;  %v14659_v48 = vpop.f32.mrb[156].mxu0  ;;  %v16937_v10 = vld [vmem:[#allocation142_spill] sm:$0xff] }
 0x434   : > { %v8786_v39 = vpop.eup %8785  ;;  %v5464_v5 = vadd.f32 %v5400_v42, %v5272_v25  ;;  %v5784_v22 = vmul.f32 %v8784_v45, %v14546_v14  ;;  %8801 = vpow2.f32 %v5194_v7  ;;  %v4422_v18 = vmul.f32 1.442695, %v4313_v62 }
 0x435   : > { %8803 = vrcp.f32 %v6423_v19  ;;  %v5720_v29 = vadd.f32 %v8784_v45, %v5528_v4  ;;  %v5976_v13 = vmul.f32 %v8786_v39, %v14510_v23  ;;  %v4614_v1 = vmul.f32 1.442695, %v4505_v44  ;;  %v16938_v19 = vld [vmem:[#allocation376_spill] sm:$0xff]  ;;  %v16939_v44 = vld [vmem:[#allocation385_spill] sm:$0xff] }
 0x436   : > { %v5656_v60 = vadd.f32 %v5592_v32, %v5464_v5  ;;  %8805 = vpow2.f32 %v4422_v18  ;;  %v4697_v8 = vsub.f32 %v16936_v26, %v4249_v24  ;;  %v4889_v21 = vsub.f32 %v14619_v31, %v4249_v24  ;;  %v16940_v5 = vld [vmem:[#allocation403_spill] sm:$0xff]  ;;  %v14674_v26 = vpop.f32.mrb[157].mxu0 }
 0x437   : > { %v8788_v35 = vpop.eup %8787  ;;  %v5912_v25 = vadd.f32 %v8786_v39, %v5720_v29  ;;  %8807 = vpow2.f32 %v4614_v1  ;;  %v5081_v14 = vsub.f32 %v14611_v40, %v4249_v24  ;;  %v14657_v7 = vmul.f32 0.5, %v14615_v3 }
 0x438   : > { %v8790_v17 = vpop.eup %8789  ;;  %v5848_v23 = vadd.f32 %v5784_v22, %v5656_v60  ;;  %v5275_v55 = vmul.f32 %v8788_v35, %v16937_v10  ;;  %v4806_v42 = vmul.f32 1.442695, %v4697_v8  ;;  %v4998_v0 = vmul.f32 1.442695, %v4889_v21 }
 0x439   : > { %v8792_v32 = vpop.eup %8791  ;;  %6612 = vst [vmem:[%s13384_s30 + $0x140] sm:$0xff] %v8790_v17  ;;  %8809 = vrcp.f32 %v5912_v25  ;;  %v5190_v31 = vmul.f32 1.442695, %v5081_v14  ;;  %v3934_v63 = vmul.f32 0.5, %v14623_v58  ;;  %v14666_v40 = vadd.f32 %v14603_v37, %v14269_v43 }
 0x43a   : > { %v8794_v24 = vpop.eup %8793  ;;  %v6040_v62 = vadd.f32 %v5976_v13, %v5848_v23  ;;  %v5339_v45 = vadd.f32 %v8792_v32, %v8788_v35  ;;  %v5403_v4 = vmul.f32 %v8792_v32, %v16938_v19  ;;  %8811 = vpow2.f32 %v4806_v42  ;;  %v16942_v32 = vld [vmem:[#allocation397_spill] sm:$0xff] }
 0x43b   : > { %v8796_v41 = vpop.eup %8795  ;;  %v5595_v39 = vmul.f32 %v8794_v24, %v16939_v44  ;;  %8813 = vpow2.f32 %v4998_v0  ;;  %v4190_v22 = vmax.f32 %v16940_v5, %v3934_v63  ;;  %v14672_v18 = vmul.f32 0.5, %v14666_v40  ;;  %v16941_v0 = vld [vmem:[#allocation40_spill] sm:$0xff]  ;;  %v16944_v44 = vld [vmem:[#allocation143_spill] sm:$0xff] }
 0x43c   : > { %v8798_v29 = vpop.eup %8797  ;;  %v6170_v1 = vmul.f32 %v8796_v41, %v6042_v34  ;;  %v5467_v60 = vadd.f32 %v5403_v4, %v5275_v55  ;;  %v5531_v43 = vadd.f32 %v8794_v24, %v5339_v45  ;;  %8815 = vpow2.f32 %v5190_v31  ;;  %v16943_v24 = vld [vmem:[#allocation399_spill] sm:$0xff] }
 0x43d   : > { %v8800_v13 = vpop.eup %8799  ;;  %v5787_v8 = vmul.f32 %v8798_v29, %v14554_v54  ;;  %v4254_v21 = vmax.f32 %v4190_v22, %v14657_v7  ;;  %v14680_v35 = vadd.f32 %v14603_v37, %v14273_v61  ;;  %v14684_v25 = vadd.f32 %v14603_v37, %v14317_v11 }
 0x43e   : > { %v8802_v34 = vpop.eup %8801  ;;  %v6421_v14 = vadd.f32 1.0, %v8800_v13  ;;  %v6985_v17 = vmul.f32 -1.442695, %v6170_v1  ;;  %v5659_v23 = vadd.f32 %v5595_v39, %v5467_v60  ;;  %v5723_v10 = vadd.f32 %v8798_v29, %v5531_v43  ;;  %v16945_v1 = vld [vmem:[#allocation383_spill] sm:$0xff] }
 0x43f   : > { %v8804_v55 = vpop.eup %8803  ;;  %v5979_v42 = vmul.f32 %v8802_v34, %v14550_v27  ;;  %v4318_v54 = vsub.f32 %v16941_v0, %v4254_v21  ;;  %v4510_v31 = vsub.f32 %v16942_v32, %v4254_v21  ;;  %v4702_v45 = vsub.f32 %v16943_v24, %v4254_v21 }
 0x440   : > { %v8806_v61 = vpop.eup %8805  ;;  %6615 = vst [vmem:[%s13384_s30 + $0x158] sm:$0xff] %v8804_v55  ;;  %8817 = vrcp.f32 %v6421_v14  ;;  %v5851_v19 = vadd.f32 %v5787_v8, %v5659_v23  ;;  %v5915_v11 = vadd.f32 %v8802_v34, %v5723_v10  ;;  %v4894_v4 = vsub.f32 %v3934_v63, %v4254_v21  ;;  %v14694_v8 = vpop.f32.mrb[158].mxu0 }
 0x441   : > { %v8808_v41 = vpop.eup %8807  ;;  %8819 = vpow2.f32 %v6985_v17  ;;  %v5273_v39 = vmul.f32 %v8806_v61, %v16944_v44  ;;  %v4432_v5 = vmul.f32 1.442695, %v4318_v54  ;;  %v4624_v22 = vmul.f32 1.442695, %v4510_v31 }
 0x442   : > { %v6043_v29 = vadd.f32 %v5979_v42, %v5851_v19  ;;  %8821 = vrcp.f32 %v5915_v11  ;;  %v5337_v27 = vadd.f32 %v8808_v41, %v8806_v61  ;;  %v5401_v60 = vmul.f32 %v8808_v41, %v16945_v1  ;;  %v16946_v42 = vld [vmem:[#allocation389_spill] sm:$0xff] }
 0x443   : > { %v8810_v43 = vpop.eup %8809  ;;  %8823 = vpow2.f32 %v4432_v5  ;;  %v4816_v13 = vmul.f32 1.442695, %v4702_v45  ;;  %v5008_v0 = vmul.f32 1.442695, %v4894_v4  ;;  %v5086_v14 = vsub.f32 %v14657_v7, %v4254_v21  ;;  %v16947_v7 = vld [vmem:[#allocation409_spill] sm:$0xff]  ;;  %v14717_v5 = vpop.f32.mrb[159].mxu0 }
 0x444   : > { %v8812_v63 = vpop.eup %8811  ;;  %v6168_v34 = vmul.f32 %v8810_v43, %v6040_v62  ;;  %v5465_v17 = vadd.f32 %v5401_v60, %v5273_v39  ;;  %8825 = vpow2.f32 %v4624_v22  ;;  %v3932_v23 = vmul.f32 0.5, %v14680_v35  ;;  %v16949_v60 = vld [vmem:[#allocation398_spill] sm:$0xff] }
 0x445   : > { %v8814_v10 = vpop.eup %8813  ;;  %v5529_v55 = vadd.f32 %v8812_v63, %v5337_v27  ;;  %v5593_v54 = vmul.f32 %v8812_v63, %v16946_v42  ;;  %8827 = vpow2.f32 %v4816_v13  ;;  %v5200_v32 = vmul.f32 1.442695, %v5086_v14  ;;  %v16948_v27 = vld [vmem:[#allocation155_spill] sm:$0xff]  ;;  %v16950_v13 = vld [vmem:[#allocation406_spill] sm:$0xff] }
 0x446   : > { %v8816_v31 = vpop.eup %8815  ;;  %v6983_v24 = vmul.f32 -1.442695, %v6168_v34  ;;  %v5785_v45 = vmul.f32 %v8814_v10, %v14607_v36  ;;  %8829 = vpow2.f32 %v5008_v0  ;;  %v4188_v21 = vmax.f32 %v16947_v7, %v3932_v23  ;;  %v16951_v7 = vld [vmem:[#allocation65_spill] sm:$0xff] }
 0x447   : > { %v5657_v61 = vadd.f32 %v5593_v54, %v5465_v17  ;;  %v5721_v19 = vadd.f32 %v8814_v10, %v5529_v55  ;;  %v5977_v62 = vmul.f32 %v8816_v31, %v14598_v56  ;;  %8831 = vpow2.f32 %v5200_v32 }
 0x448   : > { %8833 = vpow2.f32 %v6983_v24  ;;  %v4252_v11 = vmax.f32 %v4188_v21, %v14672_v18  ;;  %v14703_v4 = vmul.f32 0.5, %v14684_v25  ;;  %v14707_v41 = vadd.f32 %v14603_v37, %v14321_v50 }
 0x449   : > { %v5849_v36 = vadd.f32 %v5785_v45, %v5657_v61  ;;  %v5913_v44 = vadd.f32 %v8816_v31, %v5721_v19  ;;  %v14711_v39 = vadd.f32 %v14603_v37, %v14334_v59  ;;  %v14715_v56 = vadd.f32 %v14603_v37, %v14338_v52  ;;  %v16952_v61 = vld [vmem:[#allocation61_spill] sm:$0xff] }
 0x44a   : > { %v8818_v22 = vpop.eup %8817  ;;  %v4316_v1 = vsub.f32 %v16948_v27, %v4252_v11  ;;  %v4508_v43 = vsub.f32 %v16949_v60, %v4252_v11  ;;  %v4700_v50 = vsub.f32 %v16950_v13, %v4252_v11  ;;  %v4892_v0 = vsub.f32 %v3932_v23, %v4252_v11 }
 0x44b   : > { %v8820_v14 = vpop.eup %8819  ;;  %6613 = vst [vmem:[%s13384_s30 + $0x148] sm:$0xff] %v8818_v22  ;;  %v6041_v63 = vadd.f32 %v5977_v62, %v5849_v36  ;;  %8835 = vrcp.f32 %v5913_v44  ;;  %v5084_v59 = vsub.f32 %v14672_v18, %v4252_v11  ;;  %v3935_v34 = vmul.f32 0.5, %v14707_v41  ;;  %v16953_v44 = vld [vmem:[#allocation393_spill] sm:$0xff] }
 0x44c   : > { %v8822_v52 = vpop.eup %8821  ;;  %v6426_v17 = vadd.f32 1.0, %v8820_v14  ;;  %v4428_v10 = vmul.f32 1.442695, %v4316_v1  ;;  %v4620_v55 = vmul.f32 1.442695, %v4508_v43  ;;  %v14726_v42 = vmul.f32 0.5, %v14711_v39 }
 0x44d   : > { %v8824_v54 = vpop.eup %8823  ;;  %v6171_v32 = vmul.f32 %v8822_v52, %v6043_v29  ;;  %v4812_v31 = vmul.f32 1.442695, %v4700_v50  ;;  %v5004_v24 = vmul.f32 1.442695, %v4892_v0  ;;  %v5196_v23 = vmul.f32 1.442695, %v5084_v59 }
 0x44e   : > { %v8826_v45 = vpop.eup %8825  ;;  %8837 = vrcp.f32 %v6426_v17  ;;  %v5278_v21 = vmul.f32 %v8824_v54, %v16951_v7  ;;  %v4191_v18 = vmax.f32 %v16952_v61, %v3935_v34  ;;  %v14731_v19 = vmul.f32 0.5, %v14715_v56  ;;  %v16954_v29 = vld [vmem:[#allocation396_spill] sm:$0xff]  ;;  %v16955_v43 = vld [vmem:[#allocation414_spill] sm:$0xff] }
 0x44f   : > { %v8828_v62 = vpop.eup %8827  ;;  %v6986_v11 = vmul.f32 -1.442695, %v6171_v32  ;;  %v5342_v36 = vadd.f32 %v8826_v45, %v8824_v54  ;;  %v5406_v22 = vmul.f32 %v8826_v45, %v16953_v44  ;;  %8839 = vpow2.f32 %v4428_v10  ;;  %v16956_v10 = vld [vmem:[#allocation157_spill] sm:$0xff] }
 0x450   : > { %v8830_v27 = vpop.eup %8829  ;;  %v5598_v1 = vmul.f32 %v8828_v62, %v16954_v29  ;;  %8841 = vpow2.f32 %v4620_v55  ;;  %v4255_v60 = vmax.f32 %v4191_v18, %v14703_v4  ;;  %v4189_v13 = vmax.f32 %v16955_v43, %v14731_v19  ;;  %v16957_v32 = vld [vmem:[#allocation401_spill] sm:$0xff] }
 0x451   : > { %v8832_v50 = vpop.eup %8831  ;;  %8843 = vpow2.f32 %v6986_v11  ;;  %v5470_v0 = vadd.f32 %v5406_v22, %v5278_v21  ;;  %v5534_v14 = vadd.f32 %v8828_v62, %v5342_v36  ;;  %v5790_v59 = vmul.f32 %v8830_v27, %v14623_v58  ;;  %v16958_v11 = vld [vmem:[#allocation408_spill] sm:$0xff] }
 0x452   : > { %v8834_v52 = vpop.eup %8833  ;;  %v5982_v17 = vmul.f32 %v8832_v50, %v14615_v3  ;;  %8845 = vpow2.f32 %v4812_v31  ;;  %v4319_v54 = vsub.f32 %v16956_v10, %v4255_v60  ;;  %v4511_v45 = vsub.f32 %v16957_v32, %v4255_v60 }
 0x453   : > { %v6424_v55 = vadd.f32 1.0, %v8834_v52  ;;  %v5662_v7 = vadd.f32 %v5598_v1, %v5470_v0  ;;  %v5726_v61 = vadd.f32 %v8830_v27, %v5534_v14  ;;  %8847 = vpow2.f32 %v5004_v24 }
 0x454   : > { %8849 = vpow2.f32 %v5196_v23  ;;  %v4434_v18 = vmul.f32 1.442695, %v4319_v54  ;;  %v4626_v44 = vmul.f32 1.442695, %v4511_v45  ;;  %v4703_v21 = vsub.f32 %v16958_v11, %v4255_v60 }
 0x455   : > { %v8836_v62 = vpop.eup %8835  ;;  %8851 = vrcp.f32 %v6424_v55  ;;  %v5854_v58 = vadd.f32 %v5790_v59, %v5662_v7  ;;  %v5918_v36 = vadd.f32 %v8832_v50, %v5726_v61  ;;  %v4895_v3 = vsub.f32 %v3935_v34, %v4255_v60  ;;  %v16960_v59 = vld [vmem:[#allocation407_spill] sm:$0xff]  ;;  %v16963_v55 = vld [vmem:[#allocation394_spill] sm:$0xff] }
 0x456   : > { %v6169_v31 = vmul.f32 %v8836_v62, %v6041_v63  ;;  %8853 = vpow2.f32 %v4434_v18  ;;  %v4818_v22 = vmul.f32 1.442695, %v4703_v21  ;;  %v5087_v29 = vsub.f32 %v14703_v4, %v4255_v60  ;;  %v16959_v63 = vld [vmem:[#allocation161_spill] sm:$0xff] }
 0x457   : > { %v6046_v43 = vadd.f32 %v5982_v17, %v5854_v58  ;;  %8855 = vrcp.f32 %v5918_v36  ;;  %v5010_v27 = vmul.f32 1.442695, %v4895_v3  ;;  %v4253_v24 = vmax.f32 %v4189_v13, %v14726_v42  ;;  %v16961_v60 = vld [vmem:[#allocation53_spill] sm:$0xff]  ;;  %v16962_v13 = vld [vmem:[#allocation95_spill] sm:$0xff]  ;;  %v16964_v3 = vld [vmem:[#allocation402_spill] sm:$0xff] }
 0x458   : > { %v8838_v23 = vpop.eup %8837  ;;  %v6984_v1 = vmul.f32 -1.442695, %v6169_v31  ;;  %8857 = vpow2.f32 %v4626_v44  ;;  %v5202_v0 = vmul.f32 1.442695, %v5087_v29  ;;  %v14747_v14 = vadd.f32 %v14603_v37, %v14383_v47 }
 0x459   : > { %v8840_v50 = vpop.eup %8839  ;;  %6618 = vst [vmem:[%s13384_s30 + $0x170] sm:$0xff] %v8838_v23  ;;  %8859 = vpow2.f32 %v4818_v22  ;;  %v4317_v34 = vsub.f32 %v16959_v63, %v4253_v24  ;;  %v4509_v4 = vsub.f32 %v16960_v59, %v4253_v24  ;;  %v4701_v52 = vsub.f32 %v16961_v60, %v4253_v24  ;;  %v16965_v60 = vld [vmem:[#allocation152_spill] sm:$0xff] }
 0x45a   : > { %v8842_v17 = vpop.eup %8841  ;;  %8861 = vpow2.f32 %v6984_v1  ;;  %v5276_v10 = vmul.f32 %v8840_v50, %v16962_v13  ;;  %v4893_v54 = vsub.f32 %v14731_v19, %v4253_v24  ;;  %v5085_v32 = vsub.f32 %v14726_v42, %v4253_v24 }
 0x45b   : > { %v8844_v45 = vpop.eup %8843  ;;  %v5340_v47 = vadd.f32 %v8842_v17, %v8840_v50  ;;  %v5404_v7 = vmul.f32 %v8842_v17, %v16963_v55  ;;  %8863 = vpow2.f32 %v5010_v27  ;;  %v4430_v61 = vmul.f32 1.442695, %v4317_v34 }
 0x45c   : > { %v8846_v18 = vpop.eup %8845  ;;  %v6427_v44 = vadd.f32 1.0, %v8844_v45  ;;  %8865 = vpow2.f32 %v5202_v0  ;;  %v4622_v11 = vmul.f32 1.442695, %v4509_v4  ;;  %v4814_v21 = vmul.f32 1.442695, %v4701_v52 }
 0x45d   : > { %v8848_v62 = vpop.eup %8847  ;;  %v5468_v58 = vadd.f32 %v5404_v7, %v5276_v10  ;;  %v5532_v36 = vadd.f32 %v8846_v18, %v5340_v47  ;;  %v5596_v31 = vmul.f32 %v8846_v18, %v16964_v3  ;;  %8867 = vpow2.f32 %v4430_v61  ;;  %v16967_v7 = vld [vmem:[#allocation405_spill] sm:$0xff] }
 0x45e   : > { %v8850_v19 = vpop.eup %8849  ;;  %8869 = vrcp.f32 %v6427_v44  ;;  %v5788_v42 = vmul.f32 %v8848_v62, %v14680_v35  ;;  %v5006_v22 = vmul.f32 1.442695, %v4893_v54  ;;  %v5198_v29 = vmul.f32 1.442695, %v5085_v32  ;;  %v16968_v18 = vld [vmem:[#allocation425_spill] sm:$0xff] }
 0x45f   : > { %v8852_v27 = vpop.eup %8851  ;;  %v5660_v24 = vadd.f32 %v5596_v31, %v5468_v58  ;;  %v5724_v23 = vadd.f32 %v8848_v62, %v5532_v36  ;;  %v5980_v1 = vmul.f32 %v8850_v19, %v14666_v40  ;;  %8871 = vpow2.f32 %v4622_v11 }
 0x460   : > { %v8854_v0 = vpop.eup %8853  ;;  %6616 = vst [vmem:[%s13384_s30 + $0x160] sm:$0xff] %v8852_v27  ;;  %8873 = vpow2.f32 %v4814_v21  ;;  %v14762_v50 = vmul.f32 0.5, %v14747_v14  ;;  %v14766_v63 = vadd.f32 %v14603_v37, %v14391_v2  ;;  %v14770_v35 = vadd.f32 %v14603_v37, %v14394_v6  ;;  %v16966_v6 = vld [vmem:[#allocation400_spill] sm:$0xff] }
 0x461   : > { %v8856_v34 = vpop.eup %8855  ;;  %v5852_v59 = vadd.f32 %v5788_v42, %v5660_v24  ;;  %v5916_v4 = vadd.f32 %v8850_v19, %v5724_v23  ;;  %v5279_v40 = vmul.f32 %v8854_v0, %v16965_v60  ;;  %8875 = vpow2.f32 %v5006_v22  ;;  %v16969_v23 = vld [vmem:[#allocation153_spill] sm:$0xff] }
 0x462   : > { %v8858_v52 = vpop.eup %8857  ;;  %v6174_v17 = vmul.f32 %v8856_v34, %v6046_v43  ;;  %8877 = vpow2.f32 %v5198_v29  ;;  %v3938_v13 = vmul.f32 0.5, %v14766_v63  ;;  %v14775_v10 = vmul.f32 0.5, %v14770_v35  ;;  %v16971_v34 = vld [vmem:[#allocation415_spill] sm:$0xff] }
 0x463   : > { %v8860_v2 = vpop.eup %8859  ;;  %v6044_v54 = vadd.f32 %v5980_v1, %v5852_v59  ;;  %8879 = vrcp.f32 %v5916_v4  ;;  %v5343_v32 = vadd.f32 %v8858_v52, %v8854_v0  ;;  %v5407_v45 = vmul.f32 %v8858_v52, %v16966_v6  ;;  %v16970_v1 = vld [vmem:[#allocation32_spill] sm:$0xff]  ;;  %v16972_v4 = vld [vmem:[#allocation417_spill] sm:$0xff] }
 0x464   : > { %v8862_v47 = vpop.eup %8861  ;;  %v6989_v55 = vmul.f32 -1.442695, %v6174_v17  ;;  %v5599_v61 = vmul.f32 %v8860_v2, %v16967_v7  ;;  %v4194_v44 = vmax.f32 %v16968_v18, %v3938_v13  ;;  %v14782_v43 = vadd.f32 %v14603_v37, %v14403_v51  ;;  %v16974_v18 = vld [vmem:[#allocation60_spill] sm:$0xff] }
 0x465   : > { %v8864_v11 = vpop.eup %8863  ;;  %v6425_v21 = vadd.f32 1.0, %v8862_v47  ;;  %v5471_v62 = vadd.f32 %v5407_v45, %v5279_v40  ;;  %v5535_v58 = vadd.f32 %v8860_v2, %v5343_v32  ;;  %v14786_v36 = vadd.f32 %v14603_v37, %v14429_v38  ;;  %v16973_v45 = vld [vmem:[#allocation404_spill] sm:$0xff] }
 0x466   : > { %v8866_v3 = vpop.eup %8865  ;;  %8881 = vpow2.f32 %v6989_v55  ;;  %v5791_v31 = vmul.f32 %v8864_v11, %v14707_v41  ;;  %v4258_v19 = vmax.f32 %v4194_v44, %v14762_v50  ;;  %v14791_v42 = vmul.f32 0.5, %v14782_v43 }
 0x467   : > { %v8868_v51 = vpop.eup %8867  ;;  %8883 = vrcp.f32 %v6425_v21  ;;  %v5663_v22 = vadd.f32 %v5599_v61, %v5471_v62  ;;  %v5727_v29 = vadd.f32 %v8864_v11, %v5535_v58  ;;  %v5983_v27 = vmul.f32 %v8866_v3, %v14684_v25 }
 0x468   : > { %v8870_v24 = vpop.eup %8869  ;;  %v5277_v38 = vmul.f32 %v8868_v51, %v16969_v23  ;;  %v4322_v0 = vsub.f32 %v16970_v1, %v4258_v19  ;;  %v4514_v59 = vsub.f32 %v16971_v34, %v4258_v19  ;;  %v4706_v41 = vsub.f32 %v16972_v4, %v4258_v19 }
 0x469   : > { %v8872_v60 = vpop.eup %8871  ;;  %6619 = vst [vmem:[%s13384_s30 + $0x178] sm:$0xff] %v8870_v24  ;;  %v5855_v40 = vadd.f32 %v5791_v31, %v5663_v22  ;;  %v5919_v52 = vadd.f32 %v8866_v3, %v5727_v29  ;;  %v4898_v17 = vsub.f32 %v3938_v13, %v4258_v19  ;;  %v5090_v2 = vsub.f32 %v14762_v50, %v4258_v19 }
 0x46a   : > { %v8874_v32 = vpop.eup %8873  ;;  %v5341_v6 = vadd.f32 %v8872_v60, %v8868_v51  ;;  %v5405_v25 = vmul.f32 %v8872_v60, %v16973_v45  ;;  %v4440_v47 = vmul.f32 1.442695, %v4322_v0  ;;  %v4632_v55 = vmul.f32 1.442695, %v4514_v59  ;;  %v16977_v60 = vld [vmem:[#allocation111_spill] sm:$0xff] }
 0x46b   : > { %v8876_v7 = vpop.eup %8875  ;;  %v6047_v61 = vadd.f32 %v5983_v27, %v5855_v40  ;;  %8885 = vrcp.f32 %v5919_v52  ;;  %v5597_v44 = vmul.f32 %v8874_v32, %v16974_v18  ;;  %v4824_v11 = vmul.f32 1.442695, %v4706_v41  ;;  %v16975_v27 = vld [vmem:[#allocation426_spill] sm:$0xff] }
 0x46c   : > { %v8878_v21 = vpop.eup %8877  ;;  %v5469_v62 = vadd.f32 %v5405_v25, %v5277_v38  ;;  %v5533_v58 = vadd.f32 %v8874_v32, %v5341_v6  ;;  %v5789_v3 = vmul.f32 %v8876_v7, %v14715_v56  ;;  %8887 = vpow2.f32 %v4440_v47  ;;  %v16976_v56 = vld [vmem:[#allocation82_spill] sm:$0xff]  ;;  %v16979_v6 = vld [vmem:[#allocation35_spill] sm:$0xff]  ;;  %v16980_v25 = vld [vmem:[#allocation416_spill] sm:$0xff] }
 0x46d   : > { %v8880_v13 = vpop.eup %8879  ;;  %v5981_v50 = vmul.f32 %v8878_v21, %v14711_v39  ;;  %8889 = vpow2.f32 %v4632_v55  ;;  %v5016_v31 = vmul.f32 1.442695, %v4898_v17  ;;  %v5208_v19 = vmul.f32 1.442695, %v5090_v2  ;;  %v16978_v17 = vld [vmem:[#allocation71_spill] sm:$0xff] }
 0x46e   : > { %v6172_v51 = vmul.f32 %v8880_v13, %v6044_v54  ;;  %v5661_v22 = vadd.f32 %v5597_v44, %v5469_v62  ;;  %v5725_v29 = vadd.f32 %v8876_v7, %v5533_v58  ;;  %8891 = vpow2.f32 %v4824_v11  ;;  %v16981_v55 = vld [vmem:[#allocation419_spill] sm:$0xff] }
 0x46f   : > { %8893 = vpow2.f32 %v5016_v31  ;;  %v4192_v24 = vmax.f32 %v16975_v27, %v14791_v42  ;;  %v14807_v23 = vmul.f32 0.5, %v14786_v36  ;;  %v14811_v38 = vadd.f32 %v14603_v37, %v16976_v56  ;;  %v16982_v11 = vld [vmem:[#allocation427_spill] sm:$0xff] }
 0x470   : > { %v8882_v39 = vpop.eup %8881  ;;  %v6987_v1 = vmul.f32 -1.442695, %v6172_v51  ;;  %v5853_v0 = vadd.f32 %v5789_v3, %v5661_v22  ;;  %v5917_v34 = vadd.f32 %v8878_v21, %v5725_v29  ;;  %8895 = vpow2.f32 %v5208_v19  ;;  %v16983_v29 = vld [vmem:[#allocation48_spill] sm:$0xff] }
 0x471   : > { %v8884_v54 = vpop.eup %8883  ;;  %v6430_v59 = vadd.f32 1.0, %v8882_v39  ;;  %v4256_v4 = vmax.f32 %v4192_v24, %v14775_v10  ;;  %v14815_v41 = vmul.f32 0.5, %v14811_v38  ;;  %v14819_v40 = vadd.f32 %v14603_v37, %v16977_v60  ;;  %v16987_v60 = vld [vmem:[#allocation418_spill] sm:$0xff] }
 0x472   : > { %6617 = vst [vmem:[%s13384_s30 + $0x168] sm:$0xff] %v8884_v54  ;;  %8897 = vpow2.f32 %v6987_v1  ;;  %v6045_v52 = vadd.f32 %v5981_v50, %v5853_v0  ;;  %v14824_v2 = vadd.f32 %v14603_v37, %v16978_v17  ;;  %v14828_v32 = vadd.f32 %v14603_v37, %v14525_v57  ;;  %v16984_v1 = vld [vmem:[#allocation52_spill] sm:$0xff] }
 0x473   : > { %8899 = vrcp.f32 %v6430_v59  ;;  %v4320_v45 = vsub.f32 %v16979_v6, %v4256_v4  ;;  %v4512_v47 = vsub.f32 %v16980_v25, %v4256_v4  ;;  %v4704_v7 = vsub.f32 %v16981_v55, %v4256_v4  ;;  %v16986_v59 = vld [vmem:[#allocation34_spill] sm:$0xff] }
 0x474   : > { %8901 = vrcp.f32 %v5917_v34  ;;  %v4896_v18 = vsub.f32 %v14791_v42, %v4256_v4  ;;  %v5088_v44 = vsub.f32 %v14775_v10, %v4256_v4  ;;  %v4195_v21 = vmax.f32 %v16982_v11, %v14815_v41  ;;  %v16985_v34 = vld [vmem:[#allocation411_spill] sm:$0xff] }
 0x475   : > { %v8886_v62 = vpop.eup %8885  ;;  %v4436_v58 = vmul.f32 1.442695, %v4320_v45  ;;  %v4628_v3 = vmul.f32 1.442695, %v4512_v47  ;;  %v4820_v57 = vmul.f32 1.442695, %v4704_v7  ;;  %v14839_v13 = vadd.f32 %v14603_v37, %v14528_v53 }
 0x476   : > { %v8888_v50 = vpop.eup %8887  ;;  %v6175_v31 = vmul.f32 %v8886_v62, %v6047_v61  ;;  %v5012_v19 = vmul.f32 1.442695, %v4896_v18  ;;  %v5204_v51 = vmul.f32 1.442695, %v5088_v44  ;;  %v4259_v22 = vmax.f32 %v4195_v21, %v14807_v23  ;;  %v16988_v62 = vld [vmem:[#allocation423_spill] sm:$0xff] }
 0x477   : > { %v8890_v42 = vpop.eup %8889  ;;  %v5282_v10 = vmul.f32 %v8888_v50, %v16983_v29  ;;  %8903 = vpow2.f32 %v4436_v58  ;;  %v14844_v27 = vmul.f32 0.5, %v14819_v40  ;;  %v14847_v24 = vmul.f32 0.5, %v14824_v2 }
 0x478   : > { %v8892_v56 = vpop.eup %8891  ;;  %v6990_v39 = vmul.f32 -1.442695, %v6175_v31  ;;  %v5346_v53 = vadd.f32 %v8890_v42, %v8888_v50  ;;  %v5410_v0 = vmul.f32 %v8890_v42, %v16984_v1  ;;  %8905 = vpow2.f32 %v4628_v3 }
 0x479   : > { %v8894_v61 = vpop.eup %8893  ;;  %v5602_v54 = vmul.f32 %v8892_v56, %v16985_v34  ;;  %8907 = vpow2.f32 %v4820_v57  ;;  %v4323_v4 = vsub.f32 %v16986_v59, %v4259_v22  ;;  %v4515_v17 = vsub.f32 %v16987_v60, %v4259_v22 }
 0x47a   : > { %v8896_v6 = vpop.eup %8895  ;;  %8909 = vpow2.f32 %v6990_v39  ;;  %v5474_v45 = vadd.f32 %v5410_v0, %v5282_v10  ;;  %v5538_v25 = vadd.f32 %v8892_v56, %v5346_v53  ;;  %v5794_v47 = vmul.f32 %v8894_v61, %v14766_v63  ;;  %v16989_v39 = vld [vmem:[#allocation430_spill] sm:$0xff] }
 0x47b   : > { %v5986_v55 = vmul.f32 %v8896_v6, %v14747_v14  ;;  %8911 = vpow2.f32 %v5012_v19  ;;  %v4442_v7 = vmul.f32 1.442695, %v4323_v4  ;;  %v4634_v18 = vmul.f32 1.442695, %v4515_v17  ;;  %v16991_v17 = vld [vmem:[#allocation410_spill] sm:$0xff] }
 0x47c   : > { %v8898_v44 = vpop.eup %8897  ;;  %v5666_v11 = vadd.f32 %v5602_v54, %v5474_v45  ;;  %v5730_v21 = vadd.f32 %v8894_v61, %v5538_v25  ;;  %8913 = vpow2.f32 %v5204_v51  ;;  %v4707_v58 = vsub.f32 %v16988_v62, %v4259_v22  ;;  %v16990_v61 = vld [vmem:[#allocation163_spill] sm:$0xff] }
 0x47d   : > { %v8900_v3 = vpop.eup %8899  ;;  %v6428_v57 = vadd.f32 1.0, %v8898_v44  ;;  %8915 = vpow2.f32 %v4442_v7  ;;  %v4899_v50 = vsub.f32 %v14815_v41, %v4259_v22  ;;  %v5091_v31 = vsub.f32 %v14807_v23, %v4259_v22  ;;  %v16992_v45 = vld [vmem:[#allocation439_spill] sm:$0xff]  ;;  %v16994_v7 = vld [vmem:[#allocation168_spill] sm:$0xff]  ;;  %v16995_v44 = vld [vmem:[#allocation422_spill] sm:$0xff] }
 0x47e   : > { %v8902_v63 = vpop.eup %8901  ;;  %6622 = vst [vmem:[%s13384_s30 + $0x190] sm:$0xff] %v8900_v3  ;;  %v5858_v42 = vadd.f32 %v5794_v47, %v5666_v11  ;;  %v5922_v14 = vadd.f32 %v8896_v6, %v5730_v21  ;;  %8917 = vpow2.f32 %v4634_v18  ;;  %v4826_v19 = vmul.f32 1.442695, %v4707_v58  ;;  %v16993_v47 = vld [vmem:[#allocation413_spill] sm:$0xff]  ;;  %v16996_v58 = vld [vmem:[#allocation428_spill] sm:$0xff] }
 0x47f   : > { %8919 = vrcp.f32 %v6428_v57  ;;  %v6173_v29 = vmul.f32 %v8902_v63, %v6045_v52  ;;  %v5018_v10 = vmul.f32 1.442695, %v4899_v50  ;;  %v5210_v56 = vmul.f32 1.442695, %v5091_v31 }
 0x480   : > { %v6050_v51 = vadd.f32 %v5986_v55, %v5858_v42  ;;  %8921 = vrcp.f32 %v5922_v14  ;;  %v4193_v53 = vmax.f32 %v16989_v39, %v14847_v24  ;;  %v14862_v1 = vmul.f32 0.5, %v14828_v32  ;;  %v16997_v39 = vld [vmem:[#allocation164_spill] sm:$0xff] }
 0x481   : > { %v8904_v41 = vpop.eup %8903  ;;  %v6988_v23 = vmul.f32 -1.442695, %v6173_v29  ;;  %8923 = vpow2.f32 %v4826_v19  ;;  %v14865_v22 = vmul.f32 0.5, %v14839_v13  ;;  %v14869_v0 = vadd.f32 %v14603_v37, %v14530_v28 }
 0x482   : > { %v8906_v52 = vpop.eup %8905  ;;  %v5280_v34 = vmul.f32 %v8904_v41, %v16990_v61  ;;  %8925 = vpow2.f32 %v5018_v10  ;;  %v4257_v54 = vmax.f32 %v4193_v53, %v14844_v27  ;;  %v14875_v59 = vadd.f32 %v14603_v37, %v14533_v49 }
 0x483   : > { %v8908_v4 = vpop.eup %8907  ;;  %8927 = vpow2.f32 %v6988_v23  ;;  %v5344_v60 = vadd.f32 %v8906_v52, %v8904_v41  ;;  %v5408_v6 = vmul.f32 %v8906_v52, %v16991_v17  ;;  %v4198_v25 = vmax.f32 %v16992_v45, %v14865_v22 }
 0x484   : > { %v8910_v28 = vpop.eup %8909  ;;  %v5600_v55 = vmul.f32 %v8908_v4, %v16993_v47  ;;  %8929 = vpow2.f32 %v5210_v56  ;;  %v4321_v18 = vsub.f32 %v16994_v7, %v4257_v54  ;;  %v4513_v11 = vsub.f32 %v16995_v44, %v4257_v54  ;;  %v16999_v44 = vld [vmem:[#allocation421_spill] sm:$0xff] }
 0x485   : > { %v8912_v21 = vpop.eup %8911  ;;  %v6431_v62 = vadd.f32 1.0, %v8910_v28  ;;  %v5472_v49 = vadd.f32 %v5408_v6, %v5280_v34  ;;  %v5536_v37 = vadd.f32 %v8908_v4, %v5344_v60  ;;  %v4705_v3 = vsub.f32 %v16996_v58, %v4257_v54  ;;  %v16998_v4 = vld [vmem:[#allocation412_spill] sm:$0xff] }
 0x486   : > { %v8914_v57 = vpop.eup %8913  ;;  %v5792_v50 = vmul.f32 %v8912_v21, %v14782_v43  ;;  %v4438_v31 = vmul.f32 1.442695, %v4321_v18  ;;  %v4630_v63 = vmul.f32 1.442695, %v4513_v11  ;;  %v4897_v42 = vsub.f32 %v14847_v24, %v4257_v54 }
 0x487   : > { %v8916_v14 = vpop.eup %8915  ;;  %8931 = vrcp.f32 %v6431_v62  ;;  %v5664_v19 = vadd.f32 %v5600_v55, %v5472_v49  ;;  %v5728_v29 = vadd.f32 %v8912_v21, %v5536_v37  ;;  %v5984_v10 = vmul.f32 %v8914_v57, %v14770_v35 }
 0x488   : > { %v8918_v56 = vpop.eup %8917  ;;  %v5283_v53 = vmul.f32 %v8916_v14, %v16997_v39  ;;  %8933 = vpow2.f32 %v4438_v31  ;;  %v4822_v41 = vmul.f32 1.442695, %v4705_v3  ;;  %v5014_v23 = vmul.f32 1.442695, %v4897_v42  ;;  %v17001_v31 = vld [vmem:[#allocation433_spill] sm:$0xff] }
 0x489   : > { %v8920_v52 = vpop.eup %8919  ;;  %v5856_v61 = vadd.f32 %v5792_v50, %v5664_v19  ;;  %v5920_v43 = vadd.f32 %v8914_v57, %v5728_v29  ;;  %v5347_v34 = vadd.f32 %v8918_v56, %v8916_v14  ;;  %v5411_v60 = vmul.f32 %v8918_v56, %v16998_v4  ;;  %v17002_v19 = vld [vmem:[#allocation435_spill] sm:$0xff] }
 0x48a   : > { %v8922_v24 = vpop.eup %8921  ;;  %6620 = vst [vmem:[%s13384_s30 + $0x180] sm:$0xff] %v8920_v52  ;;  %8935 = vpow2.f32 %v4630_v63  ;;  %v5089_v17 = vsub.f32 %v14844_v27, %v4257_v54  ;;  %v4262_v6 = vmax.f32 %v4198_v25, %v14862_v1  ;;  %v14893_v35 = vmul.f32 0.5, %v14869_v0  ;;  %v17000_v54 = vld [vmem:[#allocation51_spill] sm:$0xff]  ;;  %v17003_v52 = vld [vmem:[#allocation165_spill] sm:$0xff] }
 0x48b   : > { %v8924_v45 = vpop.eup %8923  ;;  %v6178_v28 = vmul.f32 %v8922_v24, %v6050_v51  ;;  %v6048_v47 = vadd.f32 %v5984_v10, %v5856_v61  ;;  %8937 = vrcp.f32 %v5920_v43  ;;  %v5475_v55 = vadd.f32 %v5411_v60, %v5283_v53  ;;  %v17004_v60 = vld [vmem:[#allocation443_spill] sm:$0xff] }
 0x48c   : > { %v8926_v7 = vpop.eup %8925  ;;  %v5539_v18 = vadd.f32 %v8924_v45, %v5347_v34  ;;  %v5603_v11 = vmul.f32 %v8924_v45, %v16999_v44  ;;  %8939 = vpow2.f32 %v4822_v41  ;;  %v5206_v21 = vmul.f32 1.442695, %v5089_v17 }
 0x48d   : > { %v8928_v62 = vpop.eup %8927  ;;  %v6993_v49 = vmul.f32 -1.442695, %v6178_v28  ;;  %v5795_v27 = vmul.f32 %v8926_v7, %v14811_v38  ;;  %8941 = vpow2.f32 %v5014_v23  ;;  %v4326_v25 = vsub.f32 %v17000_v54, %v4262_v6  ;;  %v17005_v28 = vld [vmem:[#allocation420_spill] sm:$0xff] }
 0x48e   : > { %v8930_v37 = vpop.eup %8929  ;;  %v6429_v58 = vadd.f32 1.0, %v8928_v62  ;;  %v5667_v3 = vadd.f32 %v5603_v11, %v5475_v55  ;;  %v5731_v51 = vadd.f32 %v8926_v7, %v5539_v18  ;;  %8943 = vpow2.f32 %v5206_v21 }
 0x48f   : > { %8945 = vpow2.f32 %v6993_v49  ;;  %v5987_v57 = vmul.f32 %v8930_v37, %v14786_v36  ;;  %v4448_v50 = vmul.f32 1.442695, %v4326_v25  ;;  %v4518_v63 = vsub.f32 %v17001_v31, %v4262_v6  ;;  %v17006_v49 = vld [vmem:[#allocation424_spill] sm:$0xff] }
 0x490   : > { %8947 = vrcp.f32 %v6429_v58  ;;  %v5859_v42 = vadd.f32 %v5795_v27, %v5667_v3  ;;  %v5923_v14 = vadd.f32 %v8930_v37, %v5731_v51  ;;  %v4710_v38 = vsub.f32 %v17002_v19, %v4262_v6  ;;  %v17008_v3 = vld [vmem:[#allocation434_spill] sm:$0xff] }
 0x491   : > { %v8932_v29 = vpop.eup %8931  ;;  %8949 = vpow2.f32 %v4448_v50  ;;  %v4640_v10 = vmul.f32 1.442695, %v4518_v63  ;;  %v4902_v56 = vsub.f32 %v14865_v22, %v4262_v6  ;;  %v5094_v39 = vsub.f32 %v14862_v1, %v4262_v6  ;;  %v14910_v1 = vld [vmem:[%s15174_s2] ss:$0 sm:$0xff] }
 0x492   : > { %v8934_v53 = vpop.eup %8933  ;;  %6623 = vst [vmem:[%s13384_s30 + $0x198] sm:$0xff] %v8932_v29  ;;  %v6051_v41 = vadd.f32 %v5987_v57, %v5859_v42  ;;  %8951 = vrcp.f32 %v5923_v14  ;;  %v4832_v36 = vmul.f32 1.442695, %v4710_v38  ;;  %v3940_v23 = vmul.f32 0.5, %v14875_v59  ;;  %v17009_v42 = vld [vmem:[#allocation440_spill] sm:$0xff] }
 0x493   : > { %v5281_v61 = vmul.f32 %v8934_v53, %v17003_v52  ;;  %8953 = vpow2.f32 %v4640_v10  ;;  %v5024_v43 = vmul.f32 1.442695, %v4902_v56  ;;  %v5216_v34 = vmul.f32 1.442695, %v5094_v39 }
 0x494   : > { %v8936_v4 = vpop.eup %8935  ;;  %8955 = vpow2.f32 %v4832_v36  ;;  %v4196_v24 = vmax.f32 %v17004_v60, %v3940_v23  ;;  %v14914_v22 = vadd.f32 %v14910_v1, %v14556_v20  ;;  %v14918_v17 = vadd.f32 %v14910_v1, %v14559_v16 }
 0x495   : > { %v8938_v6 = vpop.eup %8937  ;;  %v5345_v45 = vadd.f32 %v8936_v4, %v8934_v53  ;;  %v5409_v55 = vmul.f32 %v8936_v4, %v17005_v28  ;;  %8957 = vpow2.f32 %v5024_v43  ;;  %v14923_v7 = vadd.f32 %v14910_v1, %v14582_v30 }
 0x496   : > { %v8940_v18 = vpop.eup %8939  ;;  %v6176_v44 = vmul.f32 %v8938_v6, %v6048_v47  ;;  %8959 = vpow2.f32 %v5216_v34  ;;  %v4260_v11 = vmax.f32 %v4196_v24, %v14893_v35  ;;  %v14927_v20 = vmul.f32 0.5, %v14914_v22  ;;  %v17007_v47 = vld [vmem:[#allocation179_spill] sm:$0xff] }
 0x497   : > { %v8942_v21 = vpop.eup %8941  ;;  %v5473_v16 = vadd.f32 %v5409_v55, %v5281_v61  ;;  %v5537_v62 = vadd.f32 %v8940_v18, %v5345_v45  ;;  %v5601_v27 = vmul.f32 %v8940_v18, %v17006_v49  ;;  %v14931_v54 = vmul.f32 0.5, %v14918_v17  ;;  %v17010_v61 = vld [vmem:[#allocation171_spill] sm:$0xff]  ;;  %v17012_v18 = vld [vmem:[#allocation429_spill] sm:$0xff] }
 0x498   : > { %v8944_v25 = vpop.eup %8943  ;;  %v6991_v30 = vmul.f32 -1.442695, %v6176_v44  ;;  %v5793_v37 = vmul.f32 %v8942_v21, %v14824_v2  ;;  %v4324_v58 = vsub.f32 %v17007_v47, %v4260_v11  ;;  %v4516_v51 = vsub.f32 %v17008_v3, %v4260_v11 }
 0x499   : > { %v8946_v57 = vpop.eup %8945  ;;  %v5665_v50 = vadd.f32 %v5601_v27, %v5473_v16  ;;  %v5729_v31 = vadd.f32 %v8942_v21, %v5537_v62  ;;  %v5985_v63 = vmul.f32 %v8944_v25, %v14819_v40  ;;  %v4708_v14 = vsub.f32 %v17009_v42, %v4260_v11  ;;  %v17011_v40 = vld [vmem:[#allocation72_spill] sm:$0xff] }
 0x49a   : > { %v8948_v19 = vpop.eup %8947  ;;  %v6434_v38 = vadd.f32 1.0, %v8946_v57  ;;  %8961 = vpow2.f32 %v6991_v30  ;;  %v4444_v29 = vmul.f32 1.442695, %v4324_v58  ;;  %v4636_v10 = vmul.f32 1.442695, %v4516_v51  ;;  %v17013_v62 = vld [vmem:[#allocation432_spill] sm:$0xff] }
 0x49b   : > { %v8950_v56 = vpop.eup %8949  ;;  %6621 = vst [vmem:[%s13384_s30 + $0x188] sm:$0xff] %v8948_v19  ;;  %v5857_v39 = vadd.f32 %v5793_v37, %v5665_v50  ;;  %v5921_v2 = vadd.f32 %v8944_v25, %v5729_v31  ;;  %v4828_v53 = vmul.f32 1.442695, %v4708_v14  ;;  %v4900_v36 = vsub.f32 %v3940_v23, %v4260_v11  ;;  %v17014_v37 = vld [vmem:[#allocation180_spill] sm:$0xff]  ;;  %v17015_v58 = vld [vmem:[#allocation437_spill] sm:$0xff] }
 0x49c   : > { %v8952_v52 = vpop.eup %8951  ;;  %8963 = vrcp.f32 %v6434_v38  ;;  %v5286_v43 = vmul.f32 %v8950_v56, %v17010_v61  ;;  %v5092_v34 = vsub.f32 %v14893_v35, %v4260_v11  ;;  %v4199_v4 = vmax.f32 %v17011_v40, %v14931_v54  ;;  %v17016_v50 = vld [vmem:[#allocation445_spill] sm:$0xff] }
 0x49d   : > { %v8954_v60 = vpop.eup %8953  ;;  %v6179_v24 = vmul.f32 %v8952_v52, %v6051_v41  ;;  %v6049_v6 = vadd.f32 %v5985_v63, %v5857_v39  ;;  %8965 = vrcp.f32 %v5921_v2  ;;  %v5020_v45 = vmul.f32 1.442695, %v4900_v36 }
 0x49e   : > { %v8956_v28 = vpop.eup %8955  ;;  %v5350_v55 = vadd.f32 %v8954_v60, %v8950_v56  ;;  %v5414_v44 = vmul.f32 %v8954_v60, %v17012_v18  ;;  %8967 = vpow2.f32 %v4444_v29  ;;  %v5212_v23 = vmul.f32 1.442695, %v5092_v34 }
 0x49f   : > { %v8958_v21 = vpop.eup %8957  ;;  %v6994_v16 = vmul.f32 -1.442695, %v6179_v24  ;;  %v5606_v49 = vmul.f32 %v8956_v28, %v17013_v62  ;;  %8969 = vpow2.f32 %v4636_v10  ;;  %v4263_v35 = vmax.f32 %v4199_v4, %v14927_v20  ;;  %v17021_v62 = vld [vmem:[#allocation458_spill] sm:$0xff] }
 0x4a0   : > { %v8960_v11 = vpop.eup %8959  ;;  %v5478_v27 = vadd.f32 %v5414_v44, %v5286_v43  ;;  %v5542_v25 = vadd.f32 %v8956_v28, %v5350_v55  ;;  %v5798_v41 = vmul.f32 %v8958_v21, %v14839_v13  ;;  %8971 = vpow2.f32 %v4828_v53  ;;  %v17018_v55 = vld [vmem:[#allocation431_spill] sm:$0xff] }
 0x4a1   : > { %8973 = vpow2.f32 %v6994_v16  ;;  %v5990_v30 = vmul.f32 %v8960_v11, %v14828_v32  ;;  %v4327_v47 = vsub.f32 %v17014_v37, %v4263_v35  ;;  %v4519_v3 = vsub.f32 %v17015_v58, %v4263_v35 }
 0x4a2   : > { %v5670_v51 = vadd.f32 %v5606_v49, %v5478_v27  ;;  %v5734_v57 = vadd.f32 %v8958_v21, %v5542_v25  ;;  %8975 = vpow2.f32 %v5020_v45  ;;  %v4711_v31 = vsub.f32 %v17016_v50, %v4263_v35  ;;  %v17020_v21 = vld [vmem:[#allocation447_spill] sm:$0xff] }
 0x4a3   : > { %8977 = vpow2.f32 %v5212_v23  ;;  %v4450_v63 = vmul.f32 1.442695, %v4327_v47  ;;  %v4642_v42 = vmul.f32 1.442695, %v4519_v3  ;;  %v4903_v14 = vsub.f32 %v14931_v54, %v4263_v35  ;;  %v17019_v23 = vld [vmem:[#allocation438_spill] sm:$0xff]  ;;  %v17022_v47 = vld [vmem:[#allocation459_spill] sm:$0xff] }
 0x4a4   : > { %v8962_v13 = vpop.eup %8961  ;;  %v5862_v19 = vadd.f32 %v5798_v41, %v5670_v51  ;;  %v5926_v38 = vadd.f32 %v8960_v11, %v5734_v57  ;;  %v4834_v29 = vmul.f32 1.442695, %v4711_v31  ;;  %v5095_v32 = vsub.f32 %v14927_v20, %v4263_v35 }
 0x4a5   : > { %v6432_v10 = vadd.f32 1.0, %v8962_v13  ;;  %8979 = vpow2.f32 %v4450_v63  ;;  %v5026_v56 = vmul.f32 1.442695, %v4903_v14  ;;  %v14954_v39 = vmul.f32 0.5, %v14923_v7  ;;  %v17023_v63 = vld [vmem:[#allocation182_spill] sm:$0xff]  ;;  %v17024_v14 = vld [vmem:[#allocation444_spill] sm:$0xff] }
 0x4a6   : > { %v8964_v2 = vpop.eup %8963  ;;  %v6054_v53 = vadd.f32 %v5990_v30, %v5862_v19  ;;  %8981 = vrcp.f32 %v5926_v38  ;;  %v5218_v36 = vmul.f32 1.442695, %v5095_v32  ;;  %v14958_v54 = vadd.f32 %v14910_v1, %v14590_v9 }
 0x4a7   : > { %v8966_v52 = vpop.eup %8965  ;;  %6626 = vst [vmem:[%s13384_s30 + $0x1b0] sm:$0xff] %v8964_v2  ;;  %8983 = vrcp.f32 %v6432_v10  ;;  %v14963_v20 = vadd.f32 %v14910_v1, %v14639_v33  ;;  %v14967_v61 = vadd.f32 %v14910_v1, %v14644_v46  ;;  %v14971_v43 = vadd.f32 %v14910_v1, %v14647_v15  ;;  %v17017_v33 = vld [vmem:[#allocation175_spill] sm:$0xff] }
 0x4a8   : > { %v8968_v34 = vpop.eup %8967  ;;  %v6177_v40 = vmul.f32 %v8966_v52, %v6049_v6  ;;  %8985 = vpow2.f32 %v4642_v42  ;;  %v3941_v9 = vmul.f32 0.5, %v14958_v54  ;;  %v14976_v4 = vadd.f32 %v14910_v1, %v14650_v12 }
 0x4a9   : > { %v8970_v60 = vpop.eup %8969  ;;  %v5284_v24 = vmul.f32 %v8968_v34, %v17017_v33  ;;  %8987 = vpow2.f32 %v4834_v29  ;;  %v14980_v46 = vmul.f32 0.5, %v14963_v20  ;;  %v14983_v45 = vmul.f32 0.5, %v14967_v61 }
 0x4aa   : > { %v8972_v15 = vpop.eup %8971  ;;  %v6992_v28 = vmul.f32 -1.442695, %v6177_v40  ;;  %v5348_v6 = vadd.f32 %v8970_v60, %v8968_v34  ;;  %v5412_v18 = vmul.f32 %v8970_v60, %v17018_v55  ;;  %8989 = vpow2.f32 %v5026_v56  ;;  %v17026_v56 = vld [vmem:[#allocation124_spill] sm:$0xff] }
 0x4ab   : > { %v8974_v44 = vpop.eup %8973  ;;  %v5604_v12 = vmul.f32 %v8972_v15, %v17019_v23  ;;  %8991 = vpow2.f32 %v5218_v36  ;;  %v4197_v16 = vmax.f32 %v17020_v21, %v3941_v9  ;;  %v4202_v49 = vmax.f32 %v17021_v62, %v14980_v46 }
 0x4ac   : > { %v8976_v35 = vpop.eup %8975  ;;  %v6435_v11 = vadd.f32 1.0, %v8974_v44  ;;  %8993 = vpow2.f32 %v6992_v28  ;;  %v5476_v27 = vadd.f32 %v5412_v18, %v5284_v24  ;;  %v5540_v25 = vadd.f32 %v8972_v15, %v5348_v6  ;;  %v17027_v18 = vld [vmem:[#allocation436_spill] sm:$0xff] }
 0x4ad   : > { %v8978_v41 = vpop.eup %8977  ;;  %v5796_v30 = vmul.f32 %v8976_v35, %v14875_v59  ;;  %v4261_v37 = vmax.f32 %v4197_v16, %v14954_v39  ;;  %v4200_v58 = vmax.f32 %v17022_v47, %v14983_v45  ;;  %v14995_v3 = vmul.f32 0.5, %v14971_v43  ;;  %v17025_v59 = vld [vmem:[#allocation64_spill] sm:$0xff] }
 0x4ae   : > { %8995 = vrcp.f32 %v6435_v11  ;;  %v5668_v51 = vadd.f32 %v5604_v12, %v5476_v27  ;;  %v5732_v57 = vadd.f32 %v8976_v35, %v5540_v25  ;;  %v5988_v50 = vmul.f32 %v8978_v41, %v14869_v0  ;;  %v17028_v12 = vld [vmem:[#allocation442_spill] sm:$0xff] }
 0x4af   : > { %v8980_v31 = vpop.eup %8979  ;;  %v4325_v42 = vsub.f32 %v17023_v63, %v4261_v37  ;;  %v4517_v13 = vsub.f32 %v17024_v14, %v4261_v37  ;;  %v4709_v19 = vsub.f32 %v17025_v59, %v4261_v37  ;;  %v4901_v38 = vsub.f32 %v3941_v9, %v4261_v37 }
 0x4b0   : > { %v8982_v29 = vpop.eup %8981  ;;  %v5860_v32 = vadd.f32 %v5796_v30, %v5668_v51  ;;  %v5924_v10 = vadd.f32 %v8978_v41, %v5732_v57  ;;  %v5287_v2 = vmul.f32 %v8980_v31, %v17026_v56  ;;  %v5093_v36 = vsub.f32 %v14954_v39, %v4261_v37  ;;  %v17030_v37 = vld [vmem:[#allocation461_spill] sm:$0xff] }
 0x4b1   : > { %v8984_v52 = vpop.eup %8983  ;;  %v6182_v34 = vmul.f32 %v8982_v29, %v6054_v53  ;;  %v4446_v40 = vmul.f32 1.442695, %v4325_v42  ;;  %v4638_v0 = vmul.f32 1.442695, %v4517_v13  ;;  %v4830_v60 = vmul.f32 1.442695, %v4709_v19 }
 0x4b2   : > { %v8986_v33 = vpop.eup %8985  ;;  %6624 = vst [vmem:[%s13384_s30 + $0x1a0] sm:$0xff] %v8984_v52  ;;  %v6052_v24 = vadd.f32 %v5988_v50, %v5860_v32  ;;  %8997 = vrcp.f32 %v5924_v10  ;;  %v5022_v15 = vmul.f32 1.442695, %v4901_v38  ;;  %v5214_v28 = vmul.f32 1.442695, %v5093_v36  ;;  %v17029_v53 = vld [vmem:[#allocation460_spill] sm:$0xff] }
 0x4b3   : > { %v8988_v6 = vpop.eup %8987  ;;  %v6997_v9 = vmul.f32 -1.442695, %v6182_v34  ;;  %v5351_v55 = vadd.f32 %v8986_v33, %v8980_v31  ;;  %v5415_v44 = vmul.f32 %v8986_v33, %v17027_v18  ;;  %8999 = vpow2.f32 %v4446_v40  ;;  %v17031_v32 = vld [vmem:[#allocation44_spill] sm:$0xff]  ;;  %v17032_v56 = vld [vmem:[#allocation449_spill] sm:$0xff]  ;;  %v17033_v36 = vld [vmem:[#allocation454_spill] sm:$0xff] }
 0x4b4   : > { %v8990_v23 = vpop.eup %8989  ;;  %v5607_v39 = vmul.f32 %v8988_v6, %v17028_v12  ;;  %9001 = vpow2.f32 %v4638_v0  ;;  %v4203_v21 = vmax.f32 %v17029_v53, %v14995_v3  ;;  %v15009_v16 = vmul.f32 0.5, %v14976_v4  ;;  %v17035_v18 = vld [vmem:[#allocation441_spill] sm:$0xff] }
 0x4b5   : > { %v8992_v35 = vpop.eup %8991  ;;  %9003 = vpow2.f32 %v6997_v9  ;;  %v5479_v11 = vadd.f32 %v5415_v44, %v5287_v2  ;;  %v5543_v27 = vadd.f32 %v8988_v6, %v5351_v55  ;;  %v5799_v25 = vmul.f32 %v8990_v23, %v14918_v17 }
 0x4b6   : > { %v8994_v41 = vpop.eup %8993  ;;  %v5991_v30 = vmul.f32 %v8992_v35, %v14914_v22  ;;  %9005 = vpow2.f32 %v4830_v60  ;;  %v4201_v51 = vmax.f32 %v17030_v37, %v15009_v16  ;;  %v15017_v57 = vadd.f32 %v14910_v1, %v14659_v48  ;;  %v17034_v60 = vld [vmem:[#allocation176_spill] sm:$0xff]  ;;  %v17046_v37 = vld [vmem:[#allocation457_spill] sm:$0xff] }
 0x4b7   : > { %v6433_v50 = vadd.f32 1.0, %v8994_v41  ;;  %v5671_v31 = vadd.f32 %v5607_v39, %v5479_v11  ;;  %v5735_v63 = vadd.f32 %v8990_v23, %v5543_v27  ;;  %9007 = vpow2.f32 %v5022_v15  ;;  %v17037_v11 = vld [vmem:[#allocation73_spill] sm:$0xff] }
 0x4b8   : > { %v8996_v42 = vpop.eup %8995  ;;  %9009 = vpow2.f32 %v5214_v28  ;;  %v4010_v14 = vmul.f32 0.5, %v15017_v57  ;;  %v15022_v17 = vadd.f32 %v14910_v1, %v14674_v26  ;;  %v15026_v22 = vadd.f32 %v14910_v1, %v14694_v8 }
 0x4b9   : > { %6627 = vst [vmem:[%s13384_s30 + $0x1b8] sm:$0xff] %v8996_v42  ;;  %9011 = vrcp.f32 %v6433_v50  ;;  %v5863_v48 = vadd.f32 %v5799_v25, %v5671_v31  ;;  %v5927_v13 = vadd.f32 %v8992_v35, %v5735_v63  ;;  %v15040_v8 = vadd.f32 %v14910_v1, %v14717_v5  ;;  %v17038_v50 = vld [vmem:[#allocation450_spill] sm:$0xff] }
 0x4ba   : > { %v4266_v59 = vmax.f32 %v4202_v49, %v4010_v14  ;;  %v15033_v19 = vmul.f32 0.5, %v15022_v17  ;;  %v15036_v38 = vmul.f32 0.5, %v15026_v22 }
 0x4bb   : > { %v6055_v26 = vadd.f32 %v5991_v30, %v5863_v48  ;;  %9013 = vrcp.f32 %v5927_v13 }
 0x4bc   : > { %v8998_v29 = vpop.eup %8997  ;;  %v4330_v10 = vsub.f32 %v17031_v32, %v4266_v59  ;;  %v4522_v2 = vsub.f32 %v17032_v56, %v4266_v59  ;;  %v4714_v62 = vsub.f32 %v17033_v36, %v4266_v59  ;;  %v4906_v49 = vsub.f32 %v14980_v46, %v4266_v59 }
 0x4bd   : > { %v9000_v52 = vpop.eup %8999  ;;  %v6180_v34 = vmul.f32 %v8998_v29, %v6052_v24  ;;  %v5098_v40 = vsub.f32 %v4010_v14, %v4266_v59  ;;  %v4264_v0 = vmax.f32 %v4200_v58, %v15033_v19  ;;  %v15051_v5 = vmax.f32 %v4203_v21, %v15036_v38  ;;  %v17036_v58 = vld [vmem:[#allocation47_spill] sm:$0xff] }
 0x4be   : > { %v9002_v1 = vpop.eup %9001  ;;  %v5285_v33 = vmul.f32 %v9000_v52, %v17034_v60  ;;  %v4456_v15 = vmul.f32 1.442695, %v4330_v10  ;;  %v4648_v28 = vmul.f32 1.442695, %v4522_v2  ;;  %v4840_v6 = vmul.f32 1.442695, %v4714_v62 }
 0x4bf   : > { %v9004_v9 = vpop.eup %9003  ;;  %v6995_v55 = vmul.f32 -1.442695, %v6180_v34  ;;  %v5349_v46 = vadd.f32 %v9002_v1, %v9000_v52  ;;  %v5413_v24 = vmul.f32 %v9002_v1, %v17035_v18  ;;  %v5032_v44 = vmul.f32 1.442695, %v4906_v49  ;;  %v17039_v59 = vld [vmem:[#allocation455_spill] sm:$0xff]  ;;  %v17040_v34 = vld [vmem:[#allocation46_spill] sm:$0xff] }
 0x4c0   : > { %v9006_v23 = vpop.eup %9005  ;;  %v6438_v12 = vadd.f32 1.0, %v9004_v9  ;;  %9015 = vpow2.f32 %v4456_v15  ;;  %v5224_v47 = vmul.f32 1.442695, %v5098_v40  ;;  %v4328_v39 = vsub.f32 %v17036_v58, %v4264_v0 }
 0x4c1   : > { %v9008_v53 = vpop.eup %9007  ;;  %9017 = vpow2.f32 %v6995_v55  ;;  %v5477_v21 = vadd.f32 %v5413_v24, %v5285_v33  ;;  %v5541_v35 = vadd.f32 %v9006_v23, %v5349_v46  ;;  %v5605_v27 = vmul.f32 %v9006_v23, %v17037_v11  ;;  %v17042_v33 = vld [vmem:[#allocation456_spill] sm:$0xff]  ;;  %v17043_v46 = vld [vmem:[#allocation59_spill] sm:$0xff] }
 0x4c2   : > { %v9010_v25 = vpop.eup %9009  ;;  %9019 = vrcp.f32 %v6438_v12  ;;  %v5797_v41 = vmul.f32 %v9008_v53, %v14958_v54  ;;  %v4452_v30 = vmul.f32 1.442695, %v4328_v39  ;;  %v4520_v31 = vsub.f32 %v17038_v50, %v4264_v0  ;;  %v17045_v12 = vld [vmem:[#allocation453_spill] sm:$0xff]  ;;  %v17047_v11 = vld [vmem:[#allocation63_spill] sm:$0xff] }
 0x4c3   : > { %v9012_v63 = vpop.eup %9011  ;;  %v5669_v42 = vadd.f32 %v5605_v27, %v5477_v21  ;;  %v5733_v14 = vadd.f32 %v9008_v53, %v5541_v35  ;;  %v5989_v48 = vmul.f32 %v9010_v25, %v14923_v7  ;;  %9021 = vpow2.f32 %v4648_v28 }
 0x4c4   : > { %6625 = vst [vmem:[%s13384_s30 + $0x1a8] sm:$0xff] %v9012_v63  ;;  %9023 = vpow2.f32 %v4840_v6  ;;  %v4644_v13 = vmul.f32 1.442695, %v4520_v31  ;;  %v4712_v29 = vsub.f32 %v17039_v59, %v4264_v0  ;;  %v4904_v32 = vsub.f32 %v14983_v45, %v4264_v0  ;;  %v17041_v45 = vld [vmem:[#allocation452_spill] sm:$0xff] }
 0x4c5   : > { %v9014_v10 = vpop.eup %9013  ;;  %v5861_v56 = vadd.f32 %v5797_v41, %v5669_v42  ;;  %v5925_v2 = vadd.f32 %v9010_v25, %v5733_v14  ;;  %9025 = vpow2.f32 %v5032_v44  ;;  %v5096_v54 = vsub.f32 %v15033_v19, %v4264_v0 }
 0x4c6   : > { %v6183_v36 = vmul.f32 %v9014_v10, %v6055_v26  ;;  %9027 = vpow2.f32 %v5224_v47  ;;  %v4836_v62 = vmul.f32 1.442695, %v4712_v29  ;;  %v15065_v49 = vmul.f32 0.5, %v15040_v8 }
 0x4c7   : > { %v6053_v7 = vadd.f32 %v5989_v48, %v5861_v56  ;;  %9029 = vrcp.f32 %v5925_v2  ;;  %v5028_v52 = vmul.f32 1.442695, %v4904_v32  ;;  %v4331_v40 = vsub.f32 %v17040_v34, %v15051_v5 }
 0x4c8   : > { %v6998_v1 = vmul.f32 -1.442695, %v6183_v36  ;;  %9031 = vpow2.f32 %v4452_v30  ;;  %v4523_v60 = vsub.f32 %v17041_v45, %v15051_v5  ;;  %v4715_v19 = vsub.f32 %v17042_v33, %v15051_v5  ;;  %v17048_v30 = vld [vmem:[#allocation80_spill] sm:$0xff] }
 0x4c9   : > { %9033 = vpow2.f32 %v4644_v13  ;;  %v5220_v26 = vmul.f32 1.442695, %v5096_v54  ;;  %v4907_v0 = vsub.f32 %v14995_v3, %v15051_v5  ;;  %v5099_v15 = vsub.f32 %v15036_v38, %v15051_v5  ;;  %v17044_v38 = vld [vmem:[#allocation190_spill] sm:$0xff]  ;;  %v17049_v54 = vld [vmem:[#allocation184_spill] sm:$0xff] }
 0x4ca   : > { %v9016_v28 = vpop.eup %9015  ;;  %9035 = vpow2.f32 %v6998_v1  ;;  %v4458_v6 = vmul.f32 1.442695, %v4331_v40  ;;  %v15081_v9 = vmax.f32 %v4201_v51, %v15065_v49  ;;  %v4650_v24 = vmul.f32 1.442695, %v4523_v60 }
 0x4cb   : > { %v9018_v55 = vpop.eup %9017  ;;  %v5290_v18 = vmul.f32 %v9016_v28, %v17043_v46  ;;  %9037 = vpow2.f32 %v4836_v62  ;;  %v4842_v44 = vmul.f32 1.442695, %v4715_v19  ;;  %v5034_v25 = vmul.f32 1.442695, %v4907_v0  ;;  %v17051_v0 = vld [vmem:[#allocation79_spill] sm:$0xff] }
 0x4cc   : > { %v9020_v3 = vpop.eup %9019  ;;  %v6436_v23 = vadd.f32 1.0, %v9018_v55  ;;  %9039 = vpow2.f32 %v5028_v52  ;;  %v4329_v5 = vsub.f32 %v17044_v38, %v15081_v9  ;;  %v4521_v47 = vsub.f32 %v17045_v12, %v15081_v9 }
 0x4cd   : > { %v9022_v58 = vpop.eup %9021  ;;  %6630 = vst [vmem:[%s13384_s30 + $0x1d0] sm:$0xff] %v9020_v3  ;;  %9041 = vpow2.f32 %v5220_v26  ;;  %v4713_v51 = vsub.f32 %v17046_v37, %v15081_v9  ;;  %v4905_v39 = vsub.f32 %v15009_v16, %v15081_v9  ;;  %v5097_v53 = vsub.f32 %v15065_v49, %v15081_v9 }
 0x4ce   : > { %v9024_v21 = vpop.eup %9023  ;;  %9043 = vrcp.f32 %v6436_v23  ;;  %v5354_v35 = vadd.f32 %v9022_v58, %v9016_v28  ;;  %v5418_v27 = vmul.f32 %v9022_v58, %v17047_v11  ;;  %v5226_v31 = vmul.f32 1.442695, %v5099_v15 }
 0x4cf   : > { %v9026_v41 = vpop.eup %9025  ;;  %v5610_v50 = vmul.f32 %v9024_v21, %v17048_v30  ;;  %9045 = vpow2.f32 %v4458_v6  ;;  %v4454_v59 = vmul.f32 1.442695, %v4329_v5  ;;  %v4646_v62 = vmul.f32 1.442695, %v4521_v47  ;;  %v17052_v5 = vld [vmem:[#allocation185_spill] sm:$0xff] }
 0x4d0   : > { %v9028_v63 = vpop.eup %9027  ;;  %v5482_v42 = vadd.f32 %v5418_v27, %v5290_v18  ;;  %v5546_v14 = vadd.f32 %v9024_v21, %v5354_v35  ;;  %v5802_v48 = vmul.f32 %v9026_v41, %v14963_v20  ;;  %9047 = vpow2.f32 %v4650_v24  ;;  %v17054_v35 = vld [vmem:[#allocation76_spill] sm:$0xff] }
 0x4d1   : > { %v9030_v16 = vpop.eup %9029  ;;  %v5994_v13 = vmul.f32 %v9028_v63, %v15017_v57  ;;  %9049 = vpow2.f32 %v4842_v44  ;;  %v17050_v57 = vld [vmem:[#allocation446_spill] sm:$0xff]  ;;  %v4838_v33 = vmul.f32 1.442695, %v4713_v51  ;;  %v5030_v55 = vmul.f32 1.442695, %v4905_v39 }
 0x4d2   : > { %v9032_v29 = vpop.eup %9031  ;;  %v6181_v32 = vmul.f32 %v9030_v16, %v6053_v7  ;;  %v5674_v10 = vadd.f32 %v5610_v50, %v5482_v42  ;;  %v5738_v56 = vadd.f32 %v9026_v41, %v5546_v14  ;;  %9051 = vpow2.f32 %v5034_v25  ;;  %v17055_v14 = vld [vmem:[#allocation45_spill] sm:$0xff] }
 0x4d3   : > { %v9034_v2 = vpop.eup %9033  ;;  %v5288_v36 = vmul.f32 %v9032_v29, %v17049_v54  ;;  %9053 = vpow2.f32 %v5226_v31  ;;  %v5222_v47 = vmul.f32 1.442695, %v5097_v53  ;;  %v17056_v54 = vld [vmem:[#allocation451_spill] sm:$0xff] }
 0x4d4   : > { %v9036_v49 = vpop.eup %9035  ;;  %v6996_v52 = vmul.f32 -1.442695, %v6181_v32  ;;  %v5866_v34 = vadd.f32 %v5802_v48, %v5674_v10  ;;  %v5930_v20 = vadd.f32 %v9028_v63, %v5738_v56  ;;  %v5352_v40 = vadd.f32 %v9034_v2, %v9032_v29 }
 0x4d5   : > { %v9038_v1 = vpop.eup %9037  ;;  %v6439_v45 = vadd.f32 1.0, %v9036_v49  ;;  %v5416_v60 = vmul.f32 %v9034_v2, %v17050_v57  ;;  %9055 = vpow2.f32 %v4454_v59 }
 0x4d6   : > { %v9040_v7 = vpop.eup %9039  ;;  %9057 = vpow2.f32 %v6996_v52  ;;  %v6058_v19 = vadd.f32 %v5994_v13, %v5866_v34  ;;  %v5544_v26 = vadd.f32 %v9038_v1, %v5352_v40  ;;  %v5608_v15 = vmul.f32 %v9038_v1, %v17051_v0  ;;  %v17057_v52 = vld [vmem:[#allocation75_spill] sm:$0xff] }
 0x4d7   : > { %v9042_v28 = vpop.eup %9041  ;;  %9059 = vrcp.f32 %v6439_v45  ;;  %v5480_v6 = vadd.f32 %v5416_v60, %v5288_v36  ;;  %v5800_v9 = vmul.f32 %v9040_v7, %v14967_v61  ;;  %v17053_v61 = vld [vmem:[#allocation448_spill] sm:$0xff] }
 0x4d8   : > { %v9044_v46 = vpop.eup %9043  ;;  %9061 = vrcp.f32 %v5930_v20  ;;  %v5736_v18 = vadd.f32 %v9040_v7, %v5544_v26  ;;  %v5992_v24 = vmul.f32 %v9042_v28, %v15022_v17 }
 0x4d9   : > { %v9046_v44 = vpop.eup %9045  ;;  %6628 = vst [vmem:[%s13384_s30 + $0x1c0] sm:$0xff] %v9044_v46  ;;  %v5672_v3 = vadd.f32 %v5608_v15, %v5480_v6  ;;  %9063 = vpow2.f32 %v4646_v62 }
 0x4da   : > { %v9048_v23 = vpop.eup %9047  ;;  %v5928_v38 = vadd.f32 %v9042_v28, %v5736_v18  ;;  %v5291_v12 = vmul.f32 %v9046_v44, %v17052_v5  ;;  %9065 = vpow2.f32 %v4838_v33 }
 0x4db   : > { %v9050_v58 = vpop.eup %9049  ;;  %v5864_v37 = vadd.f32 %v5800_v9, %v5672_v3  ;;  %v5355_v51 = vadd.f32 %v9048_v23, %v9046_v44  ;;  %v5419_v39 = vmul.f32 %v9048_v23, %v17053_v61  ;;  %9067 = vpow2.f32 %v5030_v55 }
 0x4dc   : > { %v9052_v21 = vpop.eup %9051  ;;  %9069 = vrcp.f32 %v5928_v38  ;;  %v5611_v17 = vmul.f32 %v9050_v58, %v17054_v35 }
 0x4dd   : > { %v9054_v11 = vpop.eup %9053  ;;  %v6056_v27 = vadd.f32 %v5992_v24, %v5864_v37  ;;  %v5483_v25 = vadd.f32 %v5419_v39, %v5291_v12  ;;  %v5547_v41 = vadd.f32 %v9050_v58, %v5355_v51  ;;  %v5803_v30 = vmul.f32 %v9052_v21, %v14971_v43 }
 0x4de   : > { %v5995_v50 = vmul.f32 %v9054_v11, %v15026_v22  ;;  %9071 = vpow2.f32 %v5222_v47 }
 0x4df   : > { %v9056_v53 = vpop.eup %9055  ;;  %v5675_v31 = vadd.f32 %v5611_v17, %v5483_v25  ;;  %v5739_v63 = vadd.f32 %v9052_v21, %v5547_v41 }
 0x4e0   : > { %v9058_v42 = vpop.eup %9057  ;;  %v5289_v48 = vmul.f32 %v9056_v53, %v17055_v14 }
 0x4e1   : > { %v9060_v16 = vpop.eup %9059  ;;  %v6437_v13 = vadd.f32 1.0, %v9058_v42  ;;  %v5867_v59 = vadd.f32 %v5803_v30, %v5675_v31  ;;  %v5931_v29 = vadd.f32 %v9054_v11, %v5739_v63 }
 0x4e2   : > { %v9062_v32 = vpop.eup %9061  ;;  %6631 = vst [vmem:[%s13384_s30 + $0x1d8] sm:$0xff] %v9060_v16 }
 0x4e3   : > { %v9064_v10 = vpop.eup %9063  ;;  %9073 = vrcp.f32 %v6437_v13  ;;  %v6186_v56 = vmul.f32 %v9062_v32, %v6058_v19  ;;  %v6059_v2 = vadd.f32 %v5995_v50, %v5867_v59 }
 0x4e4   : > { %v9066_v43 = vpop.eup %9065  ;;  %9075 = vrcp.f32 %v5931_v29  ;;  %v5353_v22 = vadd.f32 %v9064_v10, %v9056_v53  ;;  %v5417_v36 = vmul.f32 %v9064_v10, %v17056_v54 }
 0x4e5   : > { %v9068_v62 = vpop.eup %9067  ;;  %v7001_v49 = vmul.f32 -1.442695, %v6186_v56  ;;  %v5609_v34 = vmul.f32 %v9066_v43, %v17057_v52 }
 0x4e6   : > { %v9070_v20 = vpop.eup %9069  ;;  %v5481_v40 = vadd.f32 %v5417_v36, %v5289_v48  ;;  %v5545_v1 = vadd.f32 %v9066_v43, %v5353_v22  ;;  %v5801_v45 = vmul.f32 %v9068_v62, %v14976_v4 }
 0x4e7   : > { %9077 = vpow2.f32 %v7001_v49  ;;  %v6184_v57 = vmul.f32 %v9070_v20, %v6056_v27 }
 0x4e8   : > { %v9072_v60 = vpop.eup %9071  ;;  %v5673_v33 = vadd.f32 %v5609_v34, %v5481_v40  ;;  %v5737_v7 = vadd.f32 %v9068_v62, %v5545_v1 }
 0x4e9   : > { %v6999_v19 = vmul.f32 -1.442695, %v6184_v57  ;;  %v5993_v26 = vmul.f32 %v9072_v60, %v15040_v8 }
 0x4ea   : > { %v5865_v0 = vadd.f32 %v5801_v45, %v5673_v33  ;;  %v5929_v15 = vadd.f32 %v9072_v60, %v5737_v7 }
 0x4eb   : > { %9079 = vpow2.f32 %v6999_v19 }
 0x4ec   : > { %v6057_v28 = vadd.f32 %v5993_v26, %v5865_v0  ;;  %9081 = vrcp.f32 %v5929_v15 }
 0x4ed   : > { %v9074_v6 = vpop.eup %9073 }
 0x4ee   : > { %v9076_v9 = vpop.eup %9075  ;;  %6629 = vst [vmem:[%s13384_s30 + $0x1c8] sm:$0xff] %v9074_v6 }
 0x4ef   : > { %v6187_v55 = vmul.f32 %v9076_v9, %v6059_v2 }
 0x4f1   : > { %v9078_v46 = vpop.eup %9077  ;;  %v7002_v4 = vmul.f32 -1.442695, %v6187_v55 }
 0x4f2   : > { %v6442_v18 = vadd.f32 1.0, %v9078_v46 }
 0x4f3   : > { %9083 = vpow2.f32 %v7002_v4 }
 0x4f4   : > { %9085 = vrcp.f32 %v6442_v18 }
 0x4f5   : > { %v9080_v24 = vpop.eup %9079 }
 0x4f6   : > { %v9082_v44 = vpop.eup %9081  ;;  %v6440_v3 = vadd.f32 1.0, %v9080_v24 }
 0x4f7   : > { %v6185_v8 = vmul.f32 %v9082_v44, %v6057_v28 }
 0x4f8   : > { %9087 = vrcp.f32 %v6440_v3 }
 0x4f9   : > { %v7000_v23 = vmul.f32 -1.442695, %v6185_v8 }
 0x4fb   : > { %9089 = vpow2.f32 %v7000_v23 }
 0x4fd   : > { %v9084_v38 = vpop.eup %9083 }
 0x4fe   : > { %v9086_v5 = vpop.eup %9085  ;;  %v6443_v12 = vadd.f32 1.0, %v9084_v38 }
 0x4ff   : > { %6634 = vst [vmem:[%s13384_s30 + $0x1f0] sm:$0xff] %v9086_v5 }
 0x500   : > { %9091 = vrcp.f32 %v6443_v12 }
 0x502   : > { %v9088_v47 = vpop.eup %9087 }
 0x503   : > { %6632 = vst [vmem:[%s13384_s30 + $0x1e0] sm:$0xff] %v9088_v47 }
 0x505   : > { %v9090_v58 = vpop.eup %9089 }
 0x506   : > { %v6441_v37 = vadd.f32 1.0, %v9090_v58 }
 0x508   : > { %9093 = vrcp.f32 %v6441_v37 }
 0x50a   : > { %v9092_v51 = vpop.eup %9091 }
 0x50b   : > { %6635 = vst [vmem:[%s13384_s30 + $0x1f8] sm:$0xff] %v9092_v51 }
 0x512   : > { %v9094_v61 = vpop.eup %9093 }
 0x513   : > { %6633 = vst [vmem:[%s13384_s30 + $0x1e8] sm:$0xff] %v9094_v61 }
 0x514   : > { %9366 = shalt.err (!%p9363_p7)
}
 0x515   : > { %s9367_s30 = scalar_lea.hbm %s15125_s23, 8192  ;;  %s9371_s20 = scalar_lea.hbm %s15175_s3, 16384 }
 0x516   : > { %p9368_p9 = scmp.ne.s32.totalorder %s15125_s23, %s9367_s30  ;;  %p9372_p5 = scmp.lt.u32.totalorder %s15125_s23, %s15175_s3 }
 0x517   : > { %p9373_p11 = scmp.lt.u32.totalorder %s9371_s20, %s9367_s30  ;;  %p9375_p4 = scmp.lt.u32.totalorder %s9367_s30, %s15125_s23 }
 0x518   : > { %p9369_p1 = pnand %p9368_p9, %p9550_p12 }
 0x519   : > { %p9374_p2 = por %p9373_p11, %p9372_p5 }
 0x51a   : > { %p9370_p0 = pneg %p9369_p1 }
 0x51b   : > { %p9376_p6 = por %p9375_p4, %p9374_p2 }
 0x51d   : > { %p9377_p8 = pnand %p9376_p6, %p9370_p0 }
 0x51f   : > { %9380 = shalt.err (!%p9377_p8)
}
 0x520   : > { %s9434_s4 = smov 128   ;;  %s9435_s25 = smov 8  }
 0x521   : > { %7530 = dma.vmem_to_hbm [thread:$0]  (%p9550_p12), %s15127_s5, 8192, %s15125_s23, %s6637_s29, %s9434_s4, %s9434_s4, %s9435_s25  }
 0x522 PF: > { %s6665_s26 = sand.u32 1, %s9411_s12   ;;  %p17058_p10 = scmp.ne.s32.totalorder %s15750_s19, 0 }
 0x523   : > { %p17059_p13 = scmp.ge.s32.totalorder %s9423_s15, 2  ;;  %s6666_s27 = scalar_lea.sflag [#allocation4], %s6665_s26 }
 0x525   : > { %p7541_p3 = pnand %p17059_p13, %p17058_p10 }
 0x527   : > { %9406 = dma.done.wait (!%p7541_p3), %s6666_s27, 8192  }
 0x528   : > { %9408 = vsyncadd (!%p7541_p3), %s6666_s27, 4294959104  ;;  %p17_p7 = scmp.ge.s32.totalorder %s9512_s24, 4   ;;  %s17060_s12 = smov %s9415_s13 }
 0x529   : > { %s17061_s13 = smov %s9419_s14  ;;  %s17062_s14 = smov %s9546_s17 }
 0x52a   : > { %s17063_s15 = smov %s9512_s24  ;;  %19 = sbr.rel (!%p17_p7) target bundleno = 6 (0x6), region = 81 }
 0x531   :  { %6671 = vsyncpa [#allocation3], 1 }
 0x532   :  { %6673 = vsyncpa [#allocation3 + $0x1], 1 }
 0x533   :  { %6674 = vsyncpa [#allocation6], 1 }
 0x534   :  { %6675 = vsyncpa [#allocation4], 1 }
 0x535   :  { %6677 = vsyncpa [#allocation4 + $0x1], 1 }

</bundles_post_ra>
